<compile_context>
chip_gen: v7x
topology: tpu7x:2x2x1
jax: 0.10.0
libtpu: 0.0.40
codegen_flags: <defaults>
</compile_context>

<pallas_src>
from functools import partial

import jax
import jax.numpy as jnp
from jax.experimental import pallas as pl
from jax.experimental.pallas import tpu as pltpu

LANE = 128                     # TPU lane width: pad every channel dim to a multiple
MXU_DTYPE = jnp.bfloat16       # matmul input dtype (f32 accumulation / epilogue)

_CP = getattr(pltpu, "CompilerParams", None) or getattr(pltpu, "TPUCompilerParams", None)


def _mosaic_params():
    if _CP is None:
        return None
    try:
        return _CP(dimension_semantics=("parallel",),
                   vmem_limit_bytes=32 * 1024 * 1024)
    except TypeError:                                   # older param signature
        return _CP(dimension_semantics=("parallel",))


def _pad_up(n, m=LANE):
    return ((n + m - 1) // m) * m


def _const_spec(shape):
    nd = len(shape)
    return pl.BlockSpec(shape, lambda g, _nd=nd: (0,) * _nd)


def _choose_batch_tile(batch, rows_per_item):
    """Pick how many batch items to fold into one grid step (M = Bt*rows)."""
    target = max(1, -(-256 // max(rows_per_item, 1)))   # aim M ~ 256 (v6e/v7x MXU)
    bt = min(batch, target)
    if batch >= 2:                                      # keep >=2 grid points for v7x megacore
        bt = min(bt, max(1, batch // 2))
    while batch % bt:
        bt -= 1
    return bt


# --------------------------------------------------------------------------
# Fused whole-network Pallas kernel (value-land; full-block ref reads only)
# --------------------------------------------------------------------------

def _bottleneck_unit(x, refs, stride, has_proj):
    """One Bottleneck1D unit on a (Bt, L, Cin_p) f32 activation. Returns f32."""
    if has_proj:
        w1_ref, b1_ref, w2_ref, b2_ref, w3_ref, b3_ref, wp_ref, bp_ref = refs
    else:
        w1_ref, b1_ref, w2_ref, b2_ref, w3_ref, b3_ref = refs
        assert stride == 1, "identity shortcut requires stride 1"

    bt, seq_len, cin = x.shape
    hidden = w1_ref.shape[1]
    cout = w3_ref.shape[1]
    if stride != 1:
        assert seq_len % stride == 0, "stride-2 unit needs an even length"
    out_len = seq_len // stride
    m = bt * out_len

    x16 = x.astype(MXU_DTYPE)                           # matmul inputs in bf16
    xf16 = x16.reshape(bt * seq_len, cin)

    # conv1 (1x1) + bn1 + relu  --  batch folded into the matmul M dimension
    h1 = jnp.dot(xf16, w1_ref[...], preferred_element_type=jnp.float32) + b1_ref[...]
    h1 = jnp.maximum(h1, 0.0).astype(MXU_DTYPE).reshape(bt, seq_len, hidden)

    # conv2 (k=3, pad=1, stride) + bn2 + relu -- taps built by per-batch shifts
    # (zero rows at batch-item edges), no VMEM scratch round-trip.
    zrow = jnp.zeros((bt, 1, hidden), MXU_DTYPE)
    if stride == 1:
        t_prev = jnp.concatenate([zrow, h1[:, :-1, :]], axis=1)   # in[l-1]
        t_mid = h1                                                # in[l]
        t_next = jnp.concatenate([h1[:, 1:, :], zrow], axis=1)    # in[l+1]
    else:
        rr = h1.reshape(bt, out_len, 2, hidden)
        t_mid = rr[:, :, 0, :]                                    # in[2l]
        t_next = rr[:, :, 1, :]                                   # in[2l+1]
        t_prev = jnp.concatenate([zrow, t_next[:, :-1, :]], axis=1)  # in[2l-1]

    w2 = w2_ref[...]
    acc = jnp.dot(t_prev.reshape(m, hidden), w2[0],
                  preferred_element_type=jnp.float32)
    acc = acc + jnp.dot(t_mid.reshape(m, hidden), w2[1],
                        preferred_element_type=jnp.float32)
    acc = acc + jnp.dot(t_next.reshape(m, hidden), w2[2],
                        preferred_element_type=jnp.float32)
    h2 = jnp.maximum(acc + b2_ref[...], 0.0).astype(MXU_DTYPE)

    # conv3 (1x1) + bn3 (no relu before the residual add)
    y = jnp.dot(h2, w3_ref[...], preferred_element_type=jnp.float32) + b3_ref[...]

    # residual branch
    if has_proj:
        if stride == 1:
            xr = xf16
        else:
            xr = x16.reshape(bt, out_len, 2, cin)[:, :, 0, :].reshape(m, cin)
        identity = (jnp.dot(xr, wp_ref[...], preferred_element_type=jnp.float32)
                    + bp_ref[...])
    else:
        identity = x.reshape(m, cin)                    # exact f32 identity

    return jnp.maximum(y + identity, 0.0).reshape(bt, out_len, cout)


def _resnet_kernel(*refs, unit_cfgs):
    """Whole ResNet1D forward for one batch group.

    refs: x_packed (Bt, conv_len, Kp) bf16, stem_w (Kp, C0p) bf16,
          stem_b (1, C0p) f32, then per unit [w1,b1,w2,b2,w3,b3(,wp,bp)],
          finally out_ref (Bt, L_out, Coutp) f32.
    """
    x_ref, sw_ref, sb_ref = refs[0], refs[1], refs[2]
    pos = 3
    per_unit = []
    for (_stride, has_proj) in unit_cfgs:
        n = 8 if has_proj else 6
        per_unit.append(refs[pos:pos + n])
        pos += n
    out_ref = refs[pos]

    bt, conv_len, kp = x_ref.shape
    c_stem = sw_ref.shape[1]

    # ---- stem: packed conv7/s2 (single matmul) + BN + ReLU ----
    xs = x_ref[...].reshape(bt * conv_len, kp)
    h = jnp.dot(xs, sw_ref[...], preferred_element_type=jnp.float32) + sb_ref[...]
    h = jnp.maximum(h, 0.0).reshape(bt, conv_len, c_stem)

    # ---- maxpool(k=3, s=2, p=1): post-ReLU, so 0 is a valid -inf substitute ----
    pool_len = conv_len // 2
    r = h.reshape(bt, pool_len, 2, c_stem)
    even = r[:, :, 0, :]                                # h[2j]
    odd = r[:, :, 1, :]                                 # h[2j+1]
    prev = jnp.concatenate(
        [jnp.zeros((bt, 1, c_stem), jnp.float32), odd[:, :-1, :]], axis=1)  # h[2j-1]
    x = jnp.maximum(jnp.maximum(prev, even), odd)       # f32, VMEM-resident

    # ---- all Bottleneck1D units, fully fused (no HBM round-trips) ----
    for (stride, has_proj), urefs in zip(unit_cfgs, per_unit):
        x = _bottleneck_unit(x, urefs, stride, has_proj)

    out_ref[...] = x.astype(out_ref.dtype)


# --------------------------------------------------------------------------
# Deterministic parameter init (shapes taken from the PyTorch __init__)
# --------------------------------------------------------------------------

def _conv_w(key, cout, cin, k):
    std = (2.0 / (cin * k)) ** 0.5
    return std * jax.random.normal(key, (cout, cin, k), jnp.float32)


def _bn_params(key, c):
    k1, k2 = jax.random.split(key)
    gamma = 1.0 + 0.1 * jax.random.normal(k1, (c,), jnp.float32)
    beta = 0.1 * jax.random.normal(k2, (c,), jnp.float32)
    mean = jnp.zeros((c,), jnp.float32)
    var = jnp.ones((c,), jnp.float32)
    return gamma, beta, mean, var


def init_resnet1d(key, in_channels, units_per_block, channels_per_block):
    k_stem_w, k_stem_bn, k_blocks = jax.random.split(key, 3)
    params = {
        "conv1_w": _conv_w(k_stem_w, 64, in_channels, 7),
        "bn1": _bn_params(k_stem_bn, 64),
        "blocks": [],
    }
    in_ch = 64
    kcur = k_blocks
    for b, (units, feats) in enumerate(zip(units_per_block, channels_per_block)):
        block_stride = 1 if b == 0 else 2
        block = []
        for u in range(units):
            s = block_stride if u == 0 else 1
            out_ch = feats * 4
            kcur, *uk = jax.random.split(kcur, 9)
            unit = {
                "stride": s,
                "conv1_w": _conv_w(uk[0], feats, in_ch, 1),
                "bn1": _bn_params(uk[1], feats),
                "conv2_w": _conv_w(uk[2], feats, feats, 3),
                "bn2": _bn_params(uk[3], feats),
                "conv3_w": _conv_w(uk[4], out_ch, feats, 1),
                "bn3": _bn_params(uk[5], out_ch),
            }
            if in_ch != out_ch:
                unit["proj_w"] = _conv_w(uk[6], out_ch, in_ch, 1)
                unit["proj_bn"] = _bn_params(uk[7], out_ch)
            in_ch = out_ch
            block.append(unit)
        params["blocks"].append(block)
    return params


# --------------------------------------------------------------------------
# Parameter preparation: fold BN, pad channels to 128, cast weights to bf16
# --------------------------------------------------------------------------

def _fold_bn(bn):
    gamma, beta, mean, var = bn
    scale = gamma / jnp.sqrt(var + 1e-5)
    bias = beta - mean * scale
    return scale, bias


def _prep_pointwise(w_oik, bn):
    """(Cout, Cin, 1) conv + BN -> (Cin_p, Cout_p) bf16 weight, (1, Cout_p) f32 bias."""
    scale, bias = _fold_bn(bn)
    cout, cin, _ = w_oik.shape
    w = jnp.transpose(w_oik[:, :, 0], (1, 0)) * scale[None, :]
    w = jnp.pad(w, ((0, _pad_up(cin) - cin), (0, _pad_up(cout) - cout)))
    b = jnp.pad(bias, (0, _pad_up(cout) - cout)).reshape(1, -1)
    return w.astype(MXU_DTYPE), b.astype(jnp.float32)


def _prep_k3(w_oik, bn):
    """(Cout, Cin, 3) conv + BN -> (3, Cin_p, Cout_p) bf16 weight, (1, Cout_p) f32 bias."""
    scale, bias = _fold_bn(bn)
    cout, cin, _ = w_oik.shape
    w = jnp.transpose(w_oik, (2, 1, 0)) * scale[None, None, :]
    w = jnp.pad(w, ((0, 0), (0, _pad_up(cin) - cin), (0, _pad_up(cout) - cout)))
    b = jnp.pad(bias, (0, _pad_up(cout) - cout)).reshape(1, -1)
    return w.astype(MXU_DTYPE), b.astype(jnp.float32)


def _prep_stem(w_oik, bn):
    """(Cout, Cin, 7) conv + BN -> tap-packed (pad(7*Cin), Cout_p) bf16 weight."""
    scale, bias = _fold_bn(bn)
    cout, cin, k = w_oik.shape
    w = jnp.transpose(w_oik, (2, 1, 0)) * scale[None, None, :]   # (k, cin, cout)
    w = w.reshape(k * cin, cout)                                 # row = tap*cin + ch
    w = jnp.pad(w, ((0, _pad_up(k * cin) - k * cin), (0, _pad_up(cout) - cout)))
    b = jnp.pad(bias, (0, _pad_up(cout) - cout)).reshape(1, -1)
    return w.astype(MXU_DTYPE), b.astype(jnp.float32)


def prepare_params(params):
    stem_w, stem_b = _prep_stem(params["conv1_w"], params["bn1"])
    units = []
    for block in params["blocks"]:
        for u in block:
            w1, b1 = _prep_pointwise(u["conv1_w"], u["bn1"])
            w2, b2 = _prep_k3(u["conv2_w"], u["bn2"])
            w3, b3 = _prep_pointwise(u["conv3_w"], u["bn3"])
            pu = {"stride": u["stride"],
                  "w1": w1, "b1": b1, "w2": w2, "b2": b2, "w3": w3, "b3": b3}
            if "proj_w" in u:
                wp, bp = _prep_pointwise(u["proj_w"], u["proj_bn"])
                pu["wp"] = wp
                pu["bp"] = bp
            units.append(pu)
    out_ch = int(params["blocks"][-1][-1]["conv3_w"].shape[0])
    return {"stem_w": stem_w, "stem_b": stem_b, "units": units,
            "out_channels": out_ch}


# --------------------------------------------------------------------------
# Forward pass (single fused pallas_call)
# --------------------------------------------------------------------------

def resnet1d_forward(prep, x_ncl, batch_tile=None):
    """x_ncl: (N, C, L) PyTorch layout -> (N, C_out, L_out)."""
    batch, cin, seq = x_ncl.shape
    conv_len = (seq - 1) // 2 + 1                        # conv7/s2/p3 output length
    assert conv_len % 2 == 0, "TODO(synk): generalise stem maxpool to odd conv lengths"
    pool_len = conv_len // 2

    # Layout plumbing (no conv math): channels-last, spatial halo of 3, then the
    # 7 stride-2 taps interleaved into one lane-dense 128-wide contraction, bf16.
    x = jnp.transpose(x_ncl, (0, 2, 1))                  # (B, L, Cin)
    x = jnp.pad(x, ((0, 0), (3, 3), (0, 0)))             # (B, L+6, Cin)
    taps = [jax.lax.slice_in_dim(x, k, k + 2 * (conv_len - 1) + 1, stride=2, axis=1)
            for k in range(7)]
    xp = jnp.concatenate(taps, axis=-1)                  # (B, conv_len, 7*Cin)
    k_packed = prep["stem_w"].shape[0]
    xp = jnp.pad(xp, ((0, 0), (0, 0), (0, k_packed - 7 * cin))).astype(MXU_DTYPE)

    if batch_tile is None:
        batch_tile = _choose_batch_tile(batch, pool_len)
    grid = (batch // batch_tile,)

    args = [xp, prep["stem_w"], prep["stem_b"]]
    in_specs = [pl.BlockSpec((batch_tile, conv_len, k_packed), lambda g: (g, 0, 0)),
                _const_spec(prep["stem_w"].shape),
                _const_spec(prep["stem_b"].shape)]

    unit_cfgs = []
    cur_len = pool_len
    for u in prep["units"]:
        has_proj = "wp" in u
        names = ("w1", "b1", "w2", "b2", "w3", "b3") + (("wp", "bp") if has_proj else ())
        for name in names:
            args.append(u[name])
            in_specs.append(_const_spec(u[name].shape))
        unit_cfgs.append((u["stride"], has_proj))
        assert cur_len % u["stride"] == 0, "TODO(synk): odd length before stride-2 unit"
        cur_len //= u["stride"]
    cout_p = prep["units"][-1]["w3"].shape[1]

    out = pl.pallas_call(
        partial(_resnet_kernel, unit_cfgs=tuple(unit_cfgs)),
        out_shape=jax.ShapeDtypeStruct((batch, cur_len, cout_p), jnp.float32),
        grid=grid,
        in_specs=in_specs,
        out_specs=pl.BlockSpec((batch_tile, cur_len, cout_p), lambda g: (g, 0, 0)),
        compiler_params=_mosaic_params(),
    )(*args)

    out = out[:, :, :prep["out_channels"]]               # drop channel padding
    return jnp.transpose(out, (0, 2, 1))                 # back to (N, C, L)


# --------------------------------------------------------------------------
# Pure-JAX reference (NCL, mirrors the PyTorch forward) for validation
# --------------------------------------------------------------------------

def _ref_conv1d(x_ncl, w, stride, pad):
    return jax.lax.conv_general_dilated(
        x_ncl, w, window_strides=(stride,), padding=[(pad, pad)],
        dimension_numbers=("NCH", "OIH", "NCH"))


def _ref_bn(x_ncl, bn):
    gamma, beta, mean, var = bn
    scale = gamma / jnp.sqrt(var + 1e-5)
    bias = beta - mean * scale
    return x_ncl * scale[None, :, None] + bias[None, :, None]


def _ref_maxpool(x_ncl):
    return jax.lax.reduce_window(
        x_ncl, -jnp.inf, jax.lax.max,
        window_dimensions=(1, 1, 3), window_strides=(1, 1, 2),
        padding=((0, 0), (0, 0), (1, 1)))


def _ref_bottleneck(x, unit):
    s = unit["stride"]
    out = jnp.maximum(_ref_bn(_ref_conv1d(x, unit["conv1_w"], 1, 0), unit["bn1"]), 0.0)
    out = jnp.maximum(_ref_bn(_ref_conv1d(out, unit["conv2_w"], s, 1), unit["bn2"]), 0.0)
    out = _ref_bn(_ref_conv1d(out, unit["conv3_w"], 1, 0), unit["bn3"])
    if "proj_w" in unit:
        identity = _ref_bn(_ref_conv1d(x, unit["proj_w"], s, 0), unit["proj_bn"])
    else:
        identity = x
    return jnp.maximum(out + identity, 0.0)


def resnet1d_reference(params, x_ncl):
    out = jnp.maximum(_ref_bn(_ref_conv1d(x_ncl, params["conv1_w"], 2, 3),
                              params["bn1"]), 0.0)
    out = _ref_maxpool(out)
    for block in params["blocks"]:
        for unit in block:
            out = _ref_bottleneck(out, unit)
    return out


# --------------------------------------------------------------------------

if __name__ == "__main__":
    key = jax.random.PRNGKey(0)
    kx, kp = jax.random.split(key)

    B, C_in, L = 2, 4, 64                       # x: (N, C, L), PyTorch NCL layout
    x = jax.random.normal(kx, (B, C_in, L), jnp.float32)

    params = init_resnet1d(
        kp, C_in,
        units_per_block=(2, 2, 2, 2),
        channels_per_block=(8, 16, 32, 64),     # small ResNet; x4 bottleneck expansion
    )
    prep = prepare_params(params)

    fwd = jax.jit(partial(resnet1d_forward, prep))
    out = jax.block_until_ready(fwd(x))

    ref = resnet1d_reference(params, x)
    assert out.shape == ref.shape, (out.shape, ref.shape)
    err = float(jnp.max(jnp.abs(out - ref)))
    # bf16 MXU inputs vs. f32 reference -> relative tolerance
    tol = 2e-2 + 4e-2 * float(jnp.max(jnp.abs(ref)))
    assert err < tol, f"max abs err {err} > tol {tol}"

    print("KERNEL_OK")
</pallas_src>

<mosaic_0001>
module attributes {stable_mosaic.version = 11 : i64} {
  func.func @_resnet_kernel(%arg0: i32, %arg1: memref<1x32x128xbf16, #tpu.memory_space<vmem>>, %arg2: memref<128x128xbf16, #tpu.memory_space<vmem>>, %arg3: memref<1x128xf32, #tpu.memory_space<vmem>>, %arg4: memref<128x128xbf16, #tpu.memory_space<vmem>>, %arg5: memref<1x128xf32, #tpu.memory_space<vmem>>, %arg6: memref<3x128x128xbf16, #tpu.memory_space<vmem>>, %arg7: memref<1x128xf32, #tpu.memory_space<vmem>>, %arg8: memref<128x128xbf16, #tpu.memory_space<vmem>>, %arg9: memref<1x128xf32, #tpu.memory_space<vmem>>, %arg10: memref<128x128xbf16, #tpu.memory_space<vmem>>, %arg11: memref<1x128xf32, #tpu.memory_space<vmem>>, %arg12: memref<128x128xbf16, #tpu.memory_space<vmem>>, %arg13: memref<1x128xf32, #tpu.memory_space<vmem>>, %arg14: memref<3x128x128xbf16, #tpu.memory_space<vmem>>, %arg15: memref<1x128xf32, #tpu.memory_space<vmem>>, %arg16: memref<128x128xbf16, #tpu.memory_space<vmem>>, %arg17: memref<1x128xf32, #tpu.memory_space<vmem>>, %arg18: memref<128x128xbf16, #tpu.memory_space<vmem>>, %arg19: memref<1x128xf32, #tpu.memory_space<vmem>>, %arg20: memref<3x128x128xbf16, #tpu.memory_space<vmem>>, %arg21: memref<1x128xf32, #tpu.memory_space<vmem>>, %arg22: memref<128x128xbf16, #tpu.memory_space<vmem>>, %arg23: memref<1x128xf32, #tpu.memory_space<vmem>>, %arg24: memref<128x128xbf16, #tpu.memory_space<vmem>>, %arg25: memref<1x128xf32, #tpu.memory_space<vmem>>, %arg26: memref<128x128xbf16, #tpu.memory_space<vmem>>, %arg27: memref<1x128xf32, #tpu.memory_space<vmem>>, %arg28: memref<3x128x128xbf16, #tpu.memory_space<vmem>>, %arg29: memref<1x128xf32, #tpu.memory_space<vmem>>, %arg30: memref<128x128xbf16, #tpu.memory_space<vmem>>, %arg31: memref<1x128xf32, #tpu.memory_space<vmem>>, %arg32: memref<128x128xbf16, #tpu.memory_space<vmem>>, %arg33: memref<1x128xf32, #tpu.memory_space<vmem>>, %arg34: memref<3x128x128xbf16, #tpu.memory_space<vmem>>, %arg35: memref<1x128xf32, #tpu.memory_space<vmem>>, %arg36: memref<128x128xbf16, #tpu.memory_space<vmem>>, %arg37: memref<1x128xf32, #tpu.memory_space<vmem>>, %arg38: memref<128x128xbf16, #tpu.memory_space<vmem>>, %arg39: memref<1x128xf32, #tpu.memory_space<vmem>>, %arg40: memref<128x128xbf16, #tpu.memory_space<vmem>>, %arg41: memref<1x128xf32, #tpu.memory_space<vmem>>, %arg42: memref<3x128x128xbf16, #tpu.memory_space<vmem>>, %arg43: memref<1x128xf32, #tpu.memory_space<vmem>>, %arg44: memref<128x128xbf16, #tpu.memory_space<vmem>>, %arg45: memref<1x128xf32, #tpu.memory_space<vmem>>, %arg46: memref<128x128xbf16, #tpu.memory_space<vmem>>, %arg47: memref<1x128xf32, #tpu.memory_space<vmem>>, %arg48: memref<3x128x128xbf16, #tpu.memory_space<vmem>>, %arg49: memref<1x128xf32, #tpu.memory_space<vmem>>, %arg50: memref<128x256xbf16, #tpu.memory_space<vmem>>, %arg51: memref<1x256xf32, #tpu.memory_space<vmem>>, %arg52: memref<128x256xbf16, #tpu.memory_space<vmem>>, %arg53: memref<1x256xf32, #tpu.memory_space<vmem>>, %arg54: memref<256x128xbf16, #tpu.memory_space<vmem>>, %arg55: memref<1x128xf32, #tpu.memory_space<vmem>>, %arg56: memref<3x128x128xbf16, #tpu.memory_space<vmem>>, %arg57: memref<1x128xf32, #tpu.memory_space<vmem>>, %arg58: memref<128x256xbf16, #tpu.memory_space<vmem>>, %arg59: memref<1x256xf32, #tpu.memory_space<vmem>>, %arg60: memref<1x2x256xf32, #tpu.memory_space<vmem>>) attributes {dimension_semantics = [#tpu.dimension_semantics<parallel>], iteration_bounds = array<i64: 2>, scalar_prefetch = 0 : i64, scratch_operands = 0 : i64, tpu.core_type = #tpu.core_type<tc>, window_params = [{transform_indices = @transform_0, window_bounds = array<i64: 1, 32, 128>}, {pipeline_mode = #tpu.pipeline_mode<synchronous>, transform_indices = @transform_1, window_bounds = array<i64: 128, 128>}, {pipeline_mode = #tpu.pipeline_mode<synchronous>, transform_indices = @transform_2, window_bounds = array<i64: 1, 128>}, {pipeline_mode = #tpu.pipeline_mode<synchronous>, transform_indices = @transform_3, window_bounds = array<i64: 128, 128>}, {pipeline_mode = #tpu.pipeline_mode<synchronous>, transform_indices = @transform_4, window_bounds = array<i64: 1, 128>}, {pipeline_mode = #tpu.pipeline_mode<synchronous>, transform_indices = @transform_5, window_bounds = array<i64: 3, 128, 128>}, {pipeline_mode = #tpu.pipeline_mode<synchronous>, transform_indices = @transform_6, window_bounds = array<i64: 1, 128>}, {pipeline_mode = #tpu.pipeline_mode<synchronous>, transform_indices = @transform_7, window_bounds = array<i64: 128, 128>}, {pipeline_mode = #tpu.pipeline_mode<synchronous>, transform_indices = @transform_8, window_bounds = array<i64: 1, 128>}, {pipeline_mode = #tpu.pipeline_mode<synchronous>, transform_indices = @transform_9, window_bounds = array<i64: 128, 128>}, {pipeline_mode = #tpu.pipeline_mode<synchronous>, transform_indices = @transform_10, window_bounds = array<i64: 1, 128>}, {pipeline_mode = #tpu.pipeline_mode<synchronous>, transform_indices = @transform_11, window_bounds = array<i64: 128, 128>}, {pipeline_mode = #tpu.pipeline_mode<synchronous>, transform_indices = @transform_12, window_bounds = array<i64: 1, 128>}, {pipeline_mode = #tpu.pipeline_mode<synchronous>, transform_indices = @transform_13, window_bounds = array<i64: 3, 128, 128>}, {pipeline_mode = #tpu.pipeline_mode<synchronous>, transform_indices = @transform_14, window_bounds = array<i64: 1, 128>}, {pipeline_mode = #tpu.pipeline_mode<synchronous>, transform_indices = @transform_15, window_bounds = array<i64: 128, 128>}, {pipeline_mode = #tpu.pipeline_mode<synchronous>, transform_indices = @transform_16, window_bounds = array<i64: 1, 128>}, {pipeline_mode = #tpu.pipeline_mode<synchronous>, transform_indices = @transform_17, window_bounds = array<i64: 128, 128>}, {pipeline_mode = #tpu.pipeline_mode<synchronous>, transform_indices = @transform_18, window_bounds = array<i64: 1, 128>}, {pipeline_mode = #tpu.pipeline_mode<synchronous>, transform_indices = @transform_19, window_bounds = array<i64: 3, 128, 128>}, {pipeline_mode = #tpu.pipeline_mode<synchronous>, transform_indices = @transform_20, window_bounds = array<i64: 1, 128>}, {pipeline_mode = #tpu.pipeline_mode<synchronous>, transform_indices = @transform_21, window_bounds = array<i64: 128, 128>}, {pipeline_mode = #tpu.pipeline_mode<synchronous>, transform_indices = @transform_22, window_bounds = array<i64: 1, 128>}, {pipeline_mode = #tpu.pipeline_mode<synchronous>, transform_indices = @transform_23, window_bounds = array<i64: 128, 128>}, {pipeline_mode = #tpu.pipeline_mode<synchronous>, transform_indices = @transform_24, window_bounds = array<i64: 1, 128>}, {pipeline_mode = #tpu.pipeline_mode<synchronous>, transform_indices = @transform_25, window_bounds = array<i64: 128, 128>}, {pipeline_mode = #tpu.pipeline_mode<synchronous>, transform_indices = @transform_26, window_bounds = array<i64: 1, 128>}, {pipeline_mode = #tpu.pipeline_mode<synchronous>, transform_indices = @transform_27, window_bounds = array<i64: 3, 128, 128>}, {pipeline_mode = #tpu.pipeline_mode<synchronous>, transform_indices = @transform_28, window_bounds = array<i64: 1, 128>}, {pipeline_mode = #tpu.pipeline_mode<synchronous>, transform_indices = @transform_29, window_bounds = array<i64: 128, 128>}, {pipeline_mode = #tpu.pipeline_mode<synchronous>, transform_indices = @transform_30, window_bounds = array<i64: 1, 128>}, {pipeline_mode = #tpu.pipeline_mode<synchronous>, transform_indices = @transform_31, window_bounds = array<i64: 128, 128>}, {pipeline_mode = #tpu.pipeline_mode<synchronous>, transform_indices = @transform_32, window_bounds = array<i64: 1, 128>}, {pipeline_mode = #tpu.pipeline_mode<synchronous>, transform_indices = @transform_33, window_bounds = array<i64: 3, 128, 128>}, {pipeline_mode = #tpu.pipeline_mode<synchronous>, transform_indices = @transform_34, window_bounds = array<i64: 1, 128>}, {pipeline_mode = #tpu.pipeline_mode<synchronous>, transform_indices = @transform_35, window_bounds = array<i64: 128, 128>}, {pipeline_mode = #tpu.pipeline_mode<synchronous>, transform_indices = @transform_36, window_bounds = array<i64: 1, 128>}, {pipeline_mode = #tpu.pipeline_mode<synchronous>, transform_indices = @transform_37, window_bounds = array<i64: 128, 128>}, {pipeline_mode = #tpu.pipeline_mode<synchronous>, transform_indices = @transform_38, window_bounds = array<i64: 1, 128>}, {pipeline_mode = #tpu.pipeline_mode<synchronous>, transform_indices = @transform_39, window_bounds = array<i64: 128, 128>}, {pipeline_mode = #tpu.pipeline_mode<synchronous>, transform_indices = @transform_40, window_bounds = array<i64: 1, 128>}, {pipeline_mode = #tpu.pipeline_mode<synchronous>, transform_indices = @transform_41, window_bounds = array<i64: 3, 128, 128>}, {pipeline_mode = #tpu.pipeline_mode<synchronous>, transform_indices = @transform_42, window_bounds = array<i64: 1, 128>}, {pipeline_mode = #tpu.pipeline_mode<synchronous>, transform_indices = @transform_43, window_bounds = array<i64: 128, 128>}, {pipeline_mode = #tpu.pipeline_mode<synchronous>, transform_indices = @transform_44, window_bounds = array<i64: 1, 128>}, {pipeline_mode = #tpu.pipeline_mode<synchronous>, transform_indices = @transform_45, window_bounds = array<i64: 128, 128>}, {pipeline_mode = #tpu.pipeline_mode<synchronous>, transform_indices = @transform_46, window_bounds = array<i64: 1, 128>}, {pipeline_mode = #tpu.pipeline_mode<synchronous>, transform_indices = @transform_47, window_bounds = array<i64: 3, 128, 128>}, {pipeline_mode = #tpu.pipeline_mode<synchronous>, transform_indices = @transform_48, window_bounds = array<i64: 1, 128>}, {pipeline_mode = #tpu.pipeline_mode<synchronous>, transform_indices = @transform_49, window_bounds = array<i64: 128, 256>}, {pipeline_mode = #tpu.pipeline_mode<synchronous>, transform_indices = @transform_50, window_bounds = array<i64: 1, 256>}, {pipeline_mode = #tpu.pipeline_mode<synchronous>, transform_indices = @transform_51, window_bounds = array<i64: 128, 256>}, {pipeline_mode = #tpu.pipeline_mode<synchronous>, transform_indices = @transform_52, window_bounds = array<i64: 1, 256>}, {pipeline_mode = #tpu.pipeline_mode<synchronous>, transform_indices = @transform_53, window_bounds = array<i64: 256, 128>}, {pipeline_mode = #tpu.pipeline_mode<synchronous>, transform_indices = @transform_54, window_bounds = array<i64: 1, 128>}, {pipeline_mode = #tpu.pipeline_mode<synchronous>, transform_indices = @transform_55, window_bounds = array<i64: 3, 128, 128>}, {pipeline_mode = #tpu.pipeline_mode<synchronous>, transform_indices = @transform_56, window_bounds = array<i64: 1, 128>}, {pipeline_mode = #tpu.pipeline_mode<synchronous>, transform_indices = @transform_57, window_bounds = array<i64: 128, 256>}, {pipeline_mode = #tpu.pipeline_mode<synchronous>, transform_indices = @transform_58, window_bounds = array<i64: 1, 256>}, {transform_indices = @transform_59, window_bounds = array<i64: 1, 2, 256>}]} {
    %c0 = arith.constant 0 : index
    %c0_0 = arith.constant 0 : index
    %c0_1 = arith.constant 0 : index
    %0 = vector.load %arg1[%c0, %c0_0, %c0_1] : memref<1x32x128xbf16, #tpu.memory_space<vmem>>, vector<1x32x128xbf16>
    %1 = vector.shape_cast %0 : vector<1x32x128xbf16> to vector<32x128xbf16>
    %c0_2 = arith.constant 0 : index
    %c0_3 = arith.constant 0 : index
    %2 = vector.load %arg2[%c0_2, %c0_3] : memref<128x128xbf16, #tpu.memory_space<vmem>>, vector<128x128xbf16>
    %cst = arith.constant dense<0.000000e+00> : vector<32x128xf32>
    %3 = tpu.matmul %1, %2, %cst {dimension_numbers = #tpu.dot_dimension_numbers<[1], [0], [0], [1], [0, 0, 1, 1], [], []>} : vector<32x128xbf16>, vector<128x128xbf16>, vector<32x128xf32> -> vector<32x128xf32>
    %c0_4 = arith.constant 0 : index
    %c0_5 = arith.constant 0 : index
    %4 = vector.load %arg3[%c0_4, %c0_5] : memref<1x128xf32, #tpu.memory_space<vmem>>, vector<1x128xf32>
    %5 = vector.broadcast %4 : vector<1x128xf32> to vector<32x128xf32>
    %6 = arith.addf %3, %5 : vector<32x128xf32>
    %cst_6 = arith.constant 0.000000e+00 : f32
    %7 = vector.broadcast %cst_6 : f32 to vector<32x128xf32>
    %8 = arith.maximumf %6, %7 : vector<32x128xf32>
    %9 = vector.shape_cast %8 : vector<32x128xf32> to vector<1x32x128xf32>
    %10 = vector.shape_cast %9 : vector<1x32x128xf32> to vector<1x16x2x128xf32>
    %11 = vector.extract_strided_slice %10 {offsets = [0, 0, 0, 0], sizes = [1, 16, 1, 128], strides = [1, 1, 1, 1]} : vector<1x16x2x128xf32> to vector<1x16x1x128xf32>
    %12 = vector.shape_cast %11 : vector<1x16x1x128xf32> to vector<1x16x128xf32>
    %13 = vector.extract_strided_slice %10 {offsets = [0, 0, 1, 0], sizes = [1, 16, 1, 128], strides = [1, 1, 1, 1]} : vector<1x16x2x128xf32> to vector<1x16x1x128xf32>
    %14 = vector.shape_cast %13 : vector<1x16x1x128xf32> to vector<1x16x128xf32>
    %cst_7 = arith.constant 0.000000e+00 : f32
    %15 = vector.broadcast %cst_7 : f32 to vector<1x1x128xf32>
    %16 = vector.extract_strided_slice %14 {offsets = [0, 0, 0], sizes = [1, 15, 128], strides = [1, 1, 1]} : vector<1x16x128xf32> to vector<1x15x128xf32>
    %17 = tpu.concatenate %15, %16 in 1 : vector<1x1x128xf32>, vector<1x15x128xf32> -> vector<1x16x128xf32>
    %18 = arith.maximumf %17, %12 : vector<1x16x128xf32>
    %19 = arith.maximumf %18, %14 : vector<1x16x128xf32>
    %20 = arith.truncf %19 : vector<1x16x128xf32> to vector<1x16x128xbf16>
    %21 = vector.shape_cast %20 : vector<1x16x128xbf16> to vector<16x128xbf16>
    %c0_8 = arith.constant 0 : index
    %c0_9 = arith.constant 0 : index
    %22 = vector.load %arg4[%c0_8, %c0_9] : memref<128x128xbf16, #tpu.memory_space<vmem>>, vector<128x128xbf16>
    %cst_10 = arith.constant dense<0.000000e+00> : vector<16x128xf32>
    %23 = tpu.matmul %21, %22, %cst_10 {dimension_numbers = #tpu.dot_dimension_numbers<[1], [0], [0], [1], [0, 0, 1, 1], [], []>} : vector<16x128xbf16>, vector<128x128xbf16>, vector<16x128xf32> -> vector<16x128xf32>
    %c0_11 = arith.constant 0 : index
    %c0_12 = arith.constant 0 : index
    %24 = vector.load %arg5[%c0_11, %c0_12] : memref<1x128xf32, #tpu.memory_space<vmem>>, vector<1x128xf32>
    %25 = vector.broadcast %24 : vector<1x128xf32> to vector<16x128xf32>
    %26 = arith.addf %23, %25 : vector<16x128xf32>
    %cst_13 = arith.constant 0.000000e+00 : f32
    %27 = vector.broadcast %cst_13 : f32 to vector<16x128xf32>
    %28 = arith.maximumf %26, %27 : vector<16x128xf32>
    %29 = arith.truncf %28 : vector<16x128xf32> to vector<16x128xbf16>
    %30 = vector.shape_cast %29 : vector<16x128xbf16> to vector<1x16x128xbf16>
    %cst_14 = arith.constant 0.000000e+00 : bf16
    %31 = vector.broadcast %cst_14 : bf16 to vector<1x1x128xbf16>
    %32 = vector.extract_strided_slice %30 {offsets = [0, 0, 0], sizes = [1, 15, 128], strides = [1, 1, 1]} : vector<1x16x128xbf16> to vector<1x15x128xbf16>
    %33 = tpu.concatenate %31, %32 in 1 : vector<1x1x128xbf16>, vector<1x15x128xbf16> -> vector<1x16x128xbf16>
    %34 = vector.extract_strided_slice %30 {offsets = [0, 1, 0], sizes = [1, 15, 128], strides = [1, 1, 1]} : vector<1x16x128xbf16> to vector<1x15x128xbf16>
    %35 = tpu.concatenate %34, %31 in 1 : vector<1x15x128xbf16>, vector<1x1x128xbf16> -> vector<1x16x128xbf16>
    %c0_15 = arith.constant 0 : index
    %c0_16 = arith.constant 0 : index
    %c0_17 = arith.constant 0 : index
    %36 = vector.load %arg6[%c0_15, %c0_16, %c0_17] : memref<3x128x128xbf16, #tpu.memory_space<vmem>>, vector<3x128x128xbf16>
    %37 = vector.shape_cast %33 : vector<1x16x128xbf16> to vector<16x128xbf16>
    %38 = vector.extract_strided_slice %36 {offsets = [0, 0, 0], sizes = [1, 128, 128], strides = [1, 1, 1]} : vector<3x128x128xbf16> to vector<1x128x128xbf16>
    %39 = vector.shape_cast %38 : vector<1x128x128xbf16> to vector<128x128xbf16>
    %cst_18 = arith.constant dense<0.000000e+00> : vector<16x128xf32>
    %40 = tpu.matmul %37, %39, %cst_18 {dimension_numbers = #tpu.dot_dimension_numbers<[1], [0], [0], [1], [0, 0, 1, 1], [], []>} : vector<16x128xbf16>, vector<128x128xbf16>, vector<16x128xf32> -> vector<16x128xf32>
    %41 = vector.shape_cast %30 : vector<1x16x128xbf16> to vector<16x128xbf16>
    %42 = vector.extract_strided_slice %36 {offsets = [1, 0, 0], sizes = [1, 128, 128], strides = [1, 1, 1]} : vector<3x128x128xbf16> to vector<1x128x128xbf16>
    %43 = vector.shape_cast %42 : vector<1x128x128xbf16> to vector<128x128xbf16>
    %cst_19 = arith.constant dense<0.000000e+00> : vector<16x128xf32>
    %44 = tpu.matmul %41, %43, %cst_19 {dimension_numbers = #tpu.dot_dimension_numbers<[1], [0], [0], [1], [0, 0, 1, 1], [], []>} : vector<16x128xbf16>, vector<128x128xbf16>, vector<16x128xf32> -> vector<16x128xf32>
    %45 = arith.addf %40, %44 : vector<16x128xf32>
    %46 = vector.shape_cast %35 : vector<1x16x128xbf16> to vector<16x128xbf16>
    %47 = vector.extract_strided_slice %36 {offsets = [2, 0, 0], sizes = [1, 128, 128], strides = [1, 1, 1]} : vector<3x128x128xbf16> to vector<1x128x128xbf16>
    %48 = vector.shape_cast %47 : vector<1x128x128xbf16> to vector<128x128xbf16>
    %cst_20 = arith.constant dense<0.000000e+00> : vector<16x128xf32>
    %49 = tpu.matmul %46, %48, %cst_20 {dimension_numbers = #tpu.dot_dimension_numbers<[1], [0], [0], [1], [0, 0, 1, 1], [], []>} : vector<16x128xbf16>, vector<128x128xbf16>, vector<16x128xf32> -> vector<16x128xf32>
    %50 = arith.addf %45, %49 : vector<16x128xf32>
    %c0_21 = arith.constant 0 : index
    %c0_22 = arith.constant 0 : index
    %51 = vector.load %arg7[%c0_21, %c0_22] : memref<1x128xf32, #tpu.memory_space<vmem>>, vector<1x128xf32>
    %52 = vector.broadcast %51 : vector<1x128xf32> to vector<16x128xf32>
    %53 = arith.addf %50, %52 : vector<16x128xf32>
    %cst_23 = arith.constant 0.000000e+00 : f32
    %54 = vector.broadcast %cst_23 : f32 to vector<16x128xf32>
    %55 = arith.maximumf %53, %54 : vector<16x128xf32>
    %56 = arith.truncf %55 : vector<16x128xf32> to vector<16x128xbf16>
    %c0_24 = arith.constant 0 : index
    %c0_25 = arith.constant 0 : index
    %57 = vector.load %arg8[%c0_24, %c0_25] : memref<128x128xbf16, #tpu.memory_space<vmem>>, vector<128x128xbf16>
    %cst_26 = arith.constant dense<0.000000e+00> : vector<16x128xf32>
    %58 = tpu.matmul %56, %57, %cst_26 {dimension_numbers = #tpu.dot_dimension_numbers<[1], [0], [0], [1], [0, 0, 1, 1], [], []>} : vector<16x128xbf16>, vector<128x128xbf16>, vector<16x128xf32> -> vector<16x128xf32>
    %c0_27 = arith.constant 0 : index
    %c0_28 = arith.constant 0 : index
    %59 = vector.load %arg9[%c0_27, %c0_28] : memref<1x128xf32, #tpu.memory_space<vmem>>, vector<1x128xf32>
    %60 = vector.broadcast %59 : vector<1x128xf32> to vector<16x128xf32>
    %61 = arith.addf %58, %60 : vector<16x128xf32>
    %c0_29 = arith.constant 0 : index
    %c0_30 = arith.constant 0 : index
    %62 = vector.load %arg10[%c0_29, %c0_30] : memref<128x128xbf16, #tpu.memory_space<vmem>>, vector<128x128xbf16>
    %cst_31 = arith.constant dense<0.000000e+00> : vector<16x128xf32>
    %63 = tpu.matmul %21, %62, %cst_31 {dimension_numbers = #tpu.dot_dimension_numbers<[1], [0], [0], [1], [0, 0, 1, 1], [], []>} : vector<16x128xbf16>, vector<128x128xbf16>, vector<16x128xf32> -> vector<16x128xf32>
    %c0_32 = arith.constant 0 : index
    %c0_33 = arith.constant 0 : index
    %64 = vector.load %arg11[%c0_32, %c0_33] : memref<1x128xf32, #tpu.memory_space<vmem>>, vector<1x128xf32>
    %65 = vector.broadcast %64 : vector<1x128xf32> to vector<16x128xf32>
    %66 = arith.addf %63, %65 : vector<16x128xf32>
    %67 = arith.addf %61, %66 : vector<16x128xf32>
    %cst_34 = arith.constant 0.000000e+00 : f32
    %68 = vector.broadcast %cst_34 : f32 to vector<16x128xf32>
    %69 = arith.maximumf %67, %68 : vector<16x128xf32>
    %70 = vector.shape_cast %69 : vector<16x128xf32> to vector<1x16x128xf32>
    %71 = arith.truncf %70 : vector<1x16x128xf32> to vector<1x16x128xbf16>
    %72 = vector.shape_cast %71 : vector<1x16x128xbf16> to vector<16x128xbf16>
    %c0_35 = arith.constant 0 : index
    %c0_36 = arith.constant 0 : index
    %73 = vector.load %arg12[%c0_35, %c0_36] : memref<128x128xbf16, #tpu.memory_space<vmem>>, vector<128x128xbf16>
    %cst_37 = arith.constant dense<0.000000e+00> : vector<16x128xf32>
    %74 = tpu.matmul %72, %73, %cst_37 {dimension_numbers = #tpu.dot_dimension_numbers<[1], [0], [0], [1], [0, 0, 1, 1], [], []>} : vector<16x128xbf16>, vector<128x128xbf16>, vector<16x128xf32> -> vector<16x128xf32>
    %c0_38 = arith.constant 0 : index
    %c0_39 = arith.constant 0 : index
    %75 = vector.load %arg13[%c0_38, %c0_39] : memref<1x128xf32, #tpu.memory_space<vmem>>, vector<1x128xf32>
    %76 = vector.broadcast %75 : vector<1x128xf32> to vector<16x128xf32>
    %77 = arith.addf %74, %76 : vector<16x128xf32>
    %cst_40 = arith.constant 0.000000e+00 : f32
    %78 = vector.broadcast %cst_40 : f32 to vector<16x128xf32>
    %79 = arith.maximumf %77, %78 : vector<16x128xf32>
    %80 = arith.truncf %79 : vector<16x128xf32> to vector<16x128xbf16>
    %81 = vector.shape_cast %80 : vector<16x128xbf16> to vector<1x16x128xbf16>
    %cst_41 = arith.constant 0.000000e+00 : bf16
    %82 = vector.broadcast %cst_41 : bf16 to vector<1x1x128xbf16>
    %83 = vector.extract_strided_slice %81 {offsets = [0, 0, 0], sizes = [1, 15, 128], strides = [1, 1, 1]} : vector<1x16x128xbf16> to vector<1x15x128xbf16>
    %84 = tpu.concatenate %82, %83 in 1 : vector<1x1x128xbf16>, vector<1x15x128xbf16> -> vector<1x16x128xbf16>
    %85 = vector.extract_strided_slice %81 {offsets = [0, 1, 0], sizes = [1, 15, 128], strides = [1, 1, 1]} : vector<1x16x128xbf16> to vector<1x15x128xbf16>
    %86 = tpu.concatenate %85, %82 in 1 : vector<1x15x128xbf16>, vector<1x1x128xbf16> -> vector<1x16x128xbf16>
    %c0_42 = arith.constant 0 : index
    %c0_43 = arith.constant 0 : index
    %c0_44 = arith.constant 0 : index
    %87 = vector.load %arg14[%c0_42, %c0_43, %c0_44] : memref<3x128x128xbf16, #tpu.memory_space<vmem>>, vector<3x128x128xbf16>
    %88 = vector.shape_cast %84 : vector<1x16x128xbf16> to vector<16x128xbf16>
    %89 = vector.extract_strided_slice %87 {offsets = [0, 0, 0], sizes = [1, 128, 128], strides = [1, 1, 1]} : vector<3x128x128xbf16> to vector<1x128x128xbf16>
    %90 = vector.shape_cast %89 : vector<1x128x128xbf16> to vector<128x128xbf16>
    %cst_45 = arith.constant dense<0.000000e+00> : vector<16x128xf32>
    %91 = tpu.matmul %88, %90, %cst_45 {dimension_numbers = #tpu.dot_dimension_numbers<[1], [0], [0], [1], [0, 0, 1, 1], [], []>} : vector<16x128xbf16>, vector<128x128xbf16>, vector<16x128xf32> -> vector<16x128xf32>
    %92 = vector.shape_cast %81 : vector<1x16x128xbf16> to vector<16x128xbf16>
    %93 = vector.extract_strided_slice %87 {offsets = [1, 0, 0], sizes = [1, 128, 128], strides = [1, 1, 1]} : vector<3x128x128xbf16> to vector<1x128x128xbf16>
    %94 = vector.shape_cast %93 : vector<1x128x128xbf16> to vector<128x128xbf16>
    %cst_46 = arith.constant dense<0.000000e+00> : vector<16x128xf32>
    %95 = tpu.matmul %92, %94, %cst_46 {dimension_numbers = #tpu.dot_dimension_numbers<[1], [0], [0], [1], [0, 0, 1, 1], [], []>} : vector<16x128xbf16>, vector<128x128xbf16>, vector<16x128xf32> -> vector<16x128xf32>
    %96 = arith.addf %91, %95 : vector<16x128xf32>
    %97 = vector.shape_cast %86 : vector<1x16x128xbf16> to vector<16x128xbf16>
    %98 = vector.extract_strided_slice %87 {offsets = [2, 0, 0], sizes = [1, 128, 128], strides = [1, 1, 1]} : vector<3x128x128xbf16> to vector<1x128x128xbf16>
    %99 = vector.shape_cast %98 : vector<1x128x128xbf16> to vector<128x128xbf16>
    %cst_47 = arith.constant dense<0.000000e+00> : vector<16x128xf32>
    %100 = tpu.matmul %97, %99, %cst_47 {dimension_numbers = #tpu.dot_dimension_numbers<[1], [0], [0], [1], [0, 0, 1, 1], [], []>} : vector<16x128xbf16>, vector<128x128xbf16>, vector<16x128xf32> -> vector<16x128xf32>
    %101 = arith.addf %96, %100 : vector<16x128xf32>
    %c0_48 = arith.constant 0 : index
    %c0_49 = arith.constant 0 : index
    %102 = vector.load %arg15[%c0_48, %c0_49] : memref<1x128xf32, #tpu.memory_space<vmem>>, vector<1x128xf32>
    %103 = vector.broadcast %102 : vector<1x128xf32> to vector<16x128xf32>
    %104 = arith.addf %101, %103 : vector<16x128xf32>
    %cst_50 = arith.constant 0.000000e+00 : f32
    %105 = vector.broadcast %cst_50 : f32 to vector<16x128xf32>
    %106 = arith.maximumf %104, %105 : vector<16x128xf32>
    %107 = arith.truncf %106 : vector<16x128xf32> to vector<16x128xbf16>
    %c0_51 = arith.constant 0 : index
    %c0_52 = arith.constant 0 : index
    %108 = vector.load %arg16[%c0_51, %c0_52] : memref<128x128xbf16, #tpu.memory_space<vmem>>, vector<128x128xbf16>
    %cst_53 = arith.constant dense<0.000000e+00> : vector<16x128xf32>
    %109 = tpu.matmul %107, %108, %cst_53 {dimension_numbers = #tpu.dot_dimension_numbers<[1], [0], [0], [1], [0, 0, 1, 1], [], []>} : vector<16x128xbf16>, vector<128x128xbf16>, vector<16x128xf32> -> vector<16x128xf32>
    %c0_54 = arith.constant 0 : index
    %c0_55 = arith.constant 0 : index
    %110 = vector.load %arg17[%c0_54, %c0_55] : memref<1x128xf32, #tpu.memory_space<vmem>>, vector<1x128xf32>
    %111 = vector.broadcast %110 : vector<1x128xf32> to vector<16x128xf32>
    %112 = arith.addf %109, %111 : vector<16x128xf32>
    %113 = vector.shape_cast %70 : vector<1x16x128xf32> to vector<16x128xf32>
    %114 = arith.addf %112, %113 : vector<16x128xf32>
    %cst_56 = arith.constant 0.000000e+00 : f32
    %115 = vector.broadcast %cst_56 : f32 to vector<16x128xf32>
    %116 = arith.maximumf %114, %115 : vector<16x128xf32>
    %117 = vector.shape_cast %116 : vector<16x128xf32> to vector<1x16x128xf32>
    %118 = arith.truncf %117 : vector<1x16x128xf32> to vector<1x16x128xbf16>
    %119 = vector.shape_cast %118 : vector<1x16x128xbf16> to vector<16x128xbf16>
    %c0_57 = arith.constant 0 : index
    %c0_58 = arith.constant 0 : index
    %120 = vector.load %arg18[%c0_57, %c0_58] : memref<128x128xbf16, #tpu.memory_space<vmem>>, vector<128x128xbf16>
    %cst_59 = arith.constant dense<0.000000e+00> : vector<16x128xf32>
    %121 = tpu.matmul %119, %120, %cst_59 {dimension_numbers = #tpu.dot_dimension_numbers<[1], [0], [0], [1], [0, 0, 1, 1], [], []>} : vector<16x128xbf16>, vector<128x128xbf16>, vector<16x128xf32> -> vector<16x128xf32>
    %c0_60 = arith.constant 0 : index
    %c0_61 = arith.constant 0 : index
    %122 = vector.load %arg19[%c0_60, %c0_61] : memref<1x128xf32, #tpu.memory_space<vmem>>, vector<1x128xf32>
    %123 = vector.broadcast %122 : vector<1x128xf32> to vector<16x128xf32>
    %124 = arith.addf %121, %123 : vector<16x128xf32>
    %cst_62 = arith.constant 0.000000e+00 : f32
    %125 = vector.broadcast %cst_62 : f32 to vector<16x128xf32>
    %126 = arith.maximumf %124, %125 : vector<16x128xf32>
    %127 = arith.truncf %126 : vector<16x128xf32> to vector<16x128xbf16>
    %128 = vector.shape_cast %127 : vector<16x128xbf16> to vector<1x16x128xbf16>
    %cst_63 = arith.constant 0.000000e+00 : bf16
    %129 = vector.broadcast %cst_63 : bf16 to vector<1x1x128xbf16>
    %130 = vector.shape_cast %128 : vector<1x16x128xbf16> to vector<1x8x2x128xbf16>
    %131 = vector.extract_strided_slice %130 {offsets = [0, 0, 0, 0], sizes = [1, 8, 1, 128], strides = [1, 1, 1, 1]} : vector<1x8x2x128xbf16> to vector<1x8x1x128xbf16>
    %132 = vector.shape_cast %131 : vector<1x8x1x128xbf16> to vector<1x8x128xbf16>
    %133 = vector.extract_strided_slice %130 {offsets = [0, 0, 1, 0], sizes = [1, 8, 1, 128], strides = [1, 1, 1, 1]} : vector<1x8x2x128xbf16> to vector<1x8x1x128xbf16>
    %134 = vector.shape_cast %133 : vector<1x8x1x128xbf16> to vector<1x8x128xbf16>
    %135 = vector.extract_strided_slice %134 {offsets = [0, 0, 0], sizes = [1, 7, 128], strides = [1, 1, 1]} : vector<1x8x128xbf16> to vector<1x7x128xbf16>
    %136 = tpu.concatenate %129, %135 in 1 : vector<1x1x128xbf16>, vector<1x7x128xbf16> -> vector<1x8x128xbf16>
    %c0_64 = arith.constant 0 : index
    %c0_65 = arith.constant 0 : index
    %c0_66 = arith.constant 0 : index
    %137 = vector.load %arg20[%c0_64, %c0_65, %c0_66] : memref<3x128x128xbf16, #tpu.memory_space<vmem>>, vector<3x128x128xbf16>
    %138 = vector.shape_cast %136 : vector<1x8x128xbf16> to vector<8x128xbf16>
    %139 = vector.extract_strided_slice %137 {offsets = [0, 0, 0], sizes = [1, 128, 128], strides = [1, 1, 1]} : vector<3x128x128xbf16> to vector<1x128x128xbf16>
    %140 = vector.shape_cast %139 : vector<1x128x128xbf16> to vector<128x128xbf16>
    %cst_67 = arith.constant dense<0.000000e+00> : vector<8x128xf32>
    %141 = tpu.matmul %138, %140, %cst_67 {dimension_numbers = #tpu.dot_dimension_numbers<[1], [0], [0], [1], [0, 0, 1, 1], [], []>} : vector<8x128xbf16>, vector<128x128xbf16>, vector<8x128xf32> -> vector<8x128xf32>
    %142 = vector.shape_cast %132 : vector<1x8x128xbf16> to vector<8x128xbf16>
    %143 = vector.extract_strided_slice %137 {offsets = [1, 0, 0], sizes = [1, 128, 128], strides = [1, 1, 1]} : vector<3x128x128xbf16> to vector<1x128x128xbf16>
    %144 = vector.shape_cast %143 : vector<1x128x128xbf16> to vector<128x128xbf16>
    %cst_68 = arith.constant dense<0.000000e+00> : vector<8x128xf32>
    %145 = tpu.matmul %142, %144, %cst_68 {dimension_numbers = #tpu.dot_dimension_numbers<[1], [0], [0], [1], [0, 0, 1, 1], [], []>} : vector<8x128xbf16>, vector<128x128xbf16>, vector<8x128xf32> -> vector<8x128xf32>
    %146 = arith.addf %141, %145 : vector<8x128xf32>
    %147 = vector.shape_cast %134 : vector<1x8x128xbf16> to vector<8x128xbf16>
    %148 = vector.extract_strided_slice %137 {offsets = [2, 0, 0], sizes = [1, 128, 128], strides = [1, 1, 1]} : vector<3x128x128xbf16> to vector<1x128x128xbf16>
    %149 = vector.shape_cast %148 : vector<1x128x128xbf16> to vector<128x128xbf16>
    %cst_69 = arith.constant dense<0.000000e+00> : vector<8x128xf32>
    %150 = tpu.matmul %147, %149, %cst_69 {dimension_numbers = #tpu.dot_dimension_numbers<[1], [0], [0], [1], [0, 0, 1, 1], [], []>} : vector<8x128xbf16>, vector<128x128xbf16>, vector<8x128xf32> -> vector<8x128xf32>
    %151 = arith.addf %146, %150 : vector<8x128xf32>
    %c0_70 = arith.constant 0 : index
    %c0_71 = arith.constant 0 : index
    %152 = vector.load %arg21[%c0_70, %c0_71] : memref<1x128xf32, #tpu.memory_space<vmem>>, vector<1x128xf32>
    %153 = vector.broadcast %152 : vector<1x128xf32> to vector<8x128xf32>
    %154 = arith.addf %151, %153 : vector<8x128xf32>
    %cst_72 = arith.constant 0.000000e+00 : f32
    %155 = vector.broadcast %cst_72 : f32 to vector<8x128xf32>
    %156 = arith.maximumf %154, %155 : vector<8x128xf32>
    %157 = arith.truncf %156 : vector<8x128xf32> to vector<8x128xbf16>
    %c0_73 = arith.constant 0 : index
    %c0_74 = arith.constant 0 : index
    %158 = vector.load %arg22[%c0_73, %c0_74] : memref<128x128xbf16, #tpu.memory_space<vmem>>, vector<128x128xbf16>
    %cst_75 = arith.constant dense<0.000000e+00> : vector<8x128xf32>
    %159 = tpu.matmul %157, %158, %cst_75 {dimension_numbers = #tpu.dot_dimension_numbers<[1], [0], [0], [1], [0, 0, 1, 1], [], []>} : vector<8x128xbf16>, vector<128x128xbf16>, vector<8x128xf32> -> vector<8x128xf32>
    %c0_76 = arith.constant 0 : index
    %c0_77 = arith.constant 0 : index
    %160 = vector.load %arg23[%c0_76, %c0_77] : memref<1x128xf32, #tpu.memory_space<vmem>>, vector<1x128xf32>
    %161 = vector.broadcast %160 : vector<1x128xf32> to vector<8x128xf32>
    %162 = arith.addf %159, %161 : vector<8x128xf32>
    %163 = vector.shape_cast %118 : vector<1x16x128xbf16> to vector<1x8x2x128xbf16>
    %164 = vector.extract_strided_slice %163 {offsets = [0, 0, 0, 0], sizes = [1, 8, 1, 128], strides = [1, 1, 1, 1]} : vector<1x8x2x128xbf16> to vector<1x8x1x128xbf16>
    %165 = vector.shape_cast %164 : vector<1x8x1x128xbf16> to vector<1x8x128xbf16>
    %166 = vector.shape_cast %165 : vector<1x8x128xbf16> to vector<8x128xbf16>
    %c0_78 = arith.constant 0 : index
    %c0_79 = arith.constant 0 : index
    %167 = vector.load %arg24[%c0_78, %c0_79] : memref<128x128xbf16, #tpu.memory_space<vmem>>, vector<128x128xbf16>
    %cst_80 = arith.constant dense<0.000000e+00> : vector<8x128xf32>
    %168 = tpu.matmul %166, %167, %cst_80 {dimension_numbers = #tpu.dot_dimension_numbers<[1], [0], [0], [1], [0, 0, 1, 1], [], []>} : vector<8x128xbf16>, vector<128x128xbf16>, vector<8x128xf32> -> vector<8x128xf32>
    %c0_81 = arith.constant 0 : index
    %c0_82 = arith.constant 0 : index
    %169 = vector.load %arg25[%c0_81, %c0_82] : memref<1x128xf32, #tpu.memory_space<vmem>>, vector<1x128xf32>
    %170 = vector.broadcast %169 : vector<1x128xf32> to vector<8x128xf32>
    %171 = arith.addf %168, %170 : vector<8x128xf32>
    %172 = arith.addf %162, %171 : vector<8x128xf32>
    %cst_83 = arith.constant 0.000000e+00 : f32
    %173 = vector.broadcast %cst_83 : f32 to vector<8x128xf32>
    %174 = arith.maximumf %172, %173 : vector<8x128xf32>
    %175 = vector.shape_cast %174 : vector<8x128xf32> to vector<1x8x128xf32>
    %176 = arith.truncf %175 : vector<1x8x128xf32> to vector<1x8x128xbf16>
    %177 = vector.shape_cast %176 : vector<1x8x128xbf16> to vector<8x128xbf16>
    %c0_84 = arith.constant 0 : index
    %c0_85 = arith.constant 0 : index
    %178 = vector.load %arg26[%c0_84, %c0_85] : memref<128x128xbf16, #tpu.memory_space<vmem>>, vector<128x128xbf16>
    %cst_86 = arith.constant dense<0.000000e+00> : vector<8x128xf32>
    %179 = tpu.matmul %177, %178, %cst_86 {dimension_numbers = #tpu.dot_dimension_numbers<[1], [0], [0], [1], [0, 0, 1, 1], [], []>} : vector<8x128xbf16>, vector<128x128xbf16>, vector<8x128xf32> -> vector<8x128xf32>
    %c0_87 = arith.constant 0 : index
    %c0_88 = arith.constant 0 : index
    %180 = vector.load %arg27[%c0_87, %c0_88] : memref<1x128xf32, #tpu.memory_space<vmem>>, vector<1x128xf32>
    %181 = vector.broadcast %180 : vector<1x128xf32> to vector<8x128xf32>
    %182 = arith.addf %179, %181 : vector<8x128xf32>
    %cst_89 = arith.constant 0.000000e+00 : f32
    %183 = vector.broadcast %cst_89 : f32 to vector<8x128xf32>
    %184 = arith.maximumf %182, %183 : vector<8x128xf32>
    %185 = arith.truncf %184 : vector<8x128xf32> to vector<8x128xbf16>
    %186 = vector.shape_cast %185 : vector<8x128xbf16> to vector<1x8x128xbf16>
    %cst_90 = arith.constant 0.000000e+00 : bf16
    %187 = vector.broadcast %cst_90 : bf16 to vector<1x1x128xbf16>
    %188 = vector.extract_strided_slice %186 {offsets = [0, 0, 0], sizes = [1, 7, 128], strides = [1, 1, 1]} : vector<1x8x128xbf16> to vector<1x7x128xbf16>
    %189 = tpu.concatenate %187, %188 in 1 : vector<1x1x128xbf16>, vector<1x7x128xbf16> -> vector<1x8x128xbf16>
    %190 = vector.extract_strided_slice %186 {offsets = [0, 1, 0], sizes = [1, 7, 128], strides = [1, 1, 1]} : vector<1x8x128xbf16> to vector<1x7x128xbf16>
    %191 = tpu.concatenate %190, %187 in 1 : vector<1x7x128xbf16>, vector<1x1x128xbf16> -> vector<1x8x128xbf16>
    %c0_91 = arith.constant 0 : index
    %c0_92 = arith.constant 0 : index
    %c0_93 = arith.constant 0 : index
    %192 = vector.load %arg28[%c0_91, %c0_92, %c0_93] : memref<3x128x128xbf16, #tpu.memory_space<vmem>>, vector<3x128x128xbf16>
    %193 = vector.shape_cast %189 : vector<1x8x128xbf16> to vector<8x128xbf16>
    %194 = vector.extract_strided_slice %192 {offsets = [0, 0, 0], sizes = [1, 128, 128], strides = [1, 1, 1]} : vector<3x128x128xbf16> to vector<1x128x128xbf16>
    %195 = vector.shape_cast %194 : vector<1x128x128xbf16> to vector<128x128xbf16>
    %cst_94 = arith.constant dense<0.000000e+00> : vector<8x128xf32>
    %196 = tpu.matmul %193, %195, %cst_94 {dimension_numbers = #tpu.dot_dimension_numbers<[1], [0], [0], [1], [0, 0, 1, 1], [], []>} : vector<8x128xbf16>, vector<128x128xbf16>, vector<8x128xf32> -> vector<8x128xf32>
    %197 = vector.shape_cast %186 : vector<1x8x128xbf16> to vector<8x128xbf16>
    %198 = vector.extract_strided_slice %192 {offsets = [1, 0, 0], sizes = [1, 128, 128], strides = [1, 1, 1]} : vector<3x128x128xbf16> to vector<1x128x128xbf16>
    %199 = vector.shape_cast %198 : vector<1x128x128xbf16> to vector<128x128xbf16>
    %cst_95 = arith.constant dense<0.000000e+00> : vector<8x128xf32>
    %200 = tpu.matmul %197, %199, %cst_95 {dimension_numbers = #tpu.dot_dimension_numbers<[1], [0], [0], [1], [0, 0, 1, 1], [], []>} : vector<8x128xbf16>, vector<128x128xbf16>, vector<8x128xf32> -> vector<8x128xf32>
    %201 = arith.addf %196, %200 : vector<8x128xf32>
    %202 = vector.shape_cast %191 : vector<1x8x128xbf16> to vector<8x128xbf16>
    %203 = vector.extract_strided_slice %192 {offsets = [2, 0, 0], sizes = [1, 128, 128], strides = [1, 1, 1]} : vector<3x128x128xbf16> to vector<1x128x128xbf16>
    %204 = vector.shape_cast %203 : vector<1x128x128xbf16> to vector<128x128xbf16>
    %cst_96 = arith.constant dense<0.000000e+00> : vector<8x128xf32>
    %205 = tpu.matmul %202, %204, %cst_96 {dimension_numbers = #tpu.dot_dimension_numbers<[1], [0], [0], [1], [0, 0, 1, 1], [], []>} : vector<8x128xbf16>, vector<128x128xbf16>, vector<8x128xf32> -> vector<8x128xf32>
    %206 = arith.addf %201, %205 : vector<8x128xf32>
    %c0_97 = arith.constant 0 : index
    %c0_98 = arith.constant 0 : index
    %207 = vector.load %arg29[%c0_97, %c0_98] : memref<1x128xf32, #tpu.memory_space<vmem>>, vector<1x128xf32>
    %208 = vector.broadcast %207 : vector<1x128xf32> to vector<8x128xf32>
    %209 = arith.addf %206, %208 : vector<8x128xf32>
    %cst_99 = arith.constant 0.000000e+00 : f32
    %210 = vector.broadcast %cst_99 : f32 to vector<8x128xf32>
    %211 = arith.maximumf %209, %210 : vector<8x128xf32>
    %212 = arith.truncf %211 : vector<8x128xf32> to vector<8x128xbf16>
    %c0_100 = arith.constant 0 : index
    %c0_101 = arith.constant 0 : index
    %213 = vector.load %arg30[%c0_100, %c0_101] : memref<128x128xbf16, #tpu.memory_space<vmem>>, vector<128x128xbf16>
    %cst_102 = arith.constant dense<0.000000e+00> : vector<8x128xf32>
    %214 = tpu.matmul %212, %213, %cst_102 {dimension_numbers = #tpu.dot_dimension_numbers<[1], [0], [0], [1], [0, 0, 1, 1], [], []>} : vector<8x128xbf16>, vector<128x128xbf16>, vector<8x128xf32> -> vector<8x128xf32>
    %c0_103 = arith.constant 0 : index
    %c0_104 = arith.constant 0 : index
    %215 = vector.load %arg31[%c0_103, %c0_104] : memref<1x128xf32, #tpu.memory_space<vmem>>, vector<1x128xf32>
    %216 = vector.broadcast %215 : vector<1x128xf32> to vector<8x128xf32>
    %217 = arith.addf %214, %216 : vector<8x128xf32>
    %218 = vector.shape_cast %175 : vector<1x8x128xf32> to vector<8x128xf32>
    %219 = arith.addf %217, %218 : vector<8x128xf32>
    %cst_105 = arith.constant 0.000000e+00 : f32
    %220 = vector.broadcast %cst_105 : f32 to vector<8x128xf32>
    %221 = arith.maximumf %219, %220 : vector<8x128xf32>
    %222 = vector.shape_cast %221 : vector<8x128xf32> to vector<1x8x128xf32>
    %223 = arith.truncf %222 : vector<1x8x128xf32> to vector<1x8x128xbf16>
    %224 = vector.shape_cast %223 : vector<1x8x128xbf16> to vector<8x128xbf16>
    %c0_106 = arith.constant 0 : index
    %c0_107 = arith.constant 0 : index
    %225 = vector.load %arg32[%c0_106, %c0_107] : memref<128x128xbf16, #tpu.memory_space<vmem>>, vector<128x128xbf16>
    %cst_108 = arith.constant dense<0.000000e+00> : vector<8x128xf32>
    %226 = tpu.matmul %224, %225, %cst_108 {dimension_numbers = #tpu.dot_dimension_numbers<[1], [0], [0], [1], [0, 0, 1, 1], [], []>} : vector<8x128xbf16>, vector<128x128xbf16>, vector<8x128xf32> -> vector<8x128xf32>
    %c0_109 = arith.constant 0 : index
    %c0_110 = arith.constant 0 : index
    %227 = vector.load %arg33[%c0_109, %c0_110] : memref<1x128xf32, #tpu.memory_space<vmem>>, vector<1x128xf32>
    %228 = vector.broadcast %227 : vector<1x128xf32> to vector<8x128xf32>
    %229 = arith.addf %226, %228 : vector<8x128xf32>
    %cst_111 = arith.constant 0.000000e+00 : f32
    %230 = vector.broadcast %cst_111 : f32 to vector<8x128xf32>
    %231 = arith.maximumf %229, %230 : vector<8x128xf32>
    %232 = arith.truncf %231 : vector<8x128xf32> to vector<8x128xbf16>
    %233 = vector.shape_cast %232 : vector<8x128xbf16> to vector<1x8x128xbf16>
    %cst_112 = arith.constant 0.000000e+00 : bf16
    %234 = vector.broadcast %cst_112 : bf16 to vector<1x1x128xbf16>
    %235 = vector.shape_cast %233 : vector<1x8x128xbf16> to vector<1x4x2x128xbf16>
    %236 = vector.extract_strided_slice %235 {offsets = [0, 0, 0, 0], sizes = [1, 4, 1, 128], strides = [1, 1, 1, 1]} : vector<1x4x2x128xbf16> to vector<1x4x1x128xbf16>
    %237 = vector.shape_cast %236 : vector<1x4x1x128xbf16> to vector<1x4x128xbf16>
    %238 = vector.extract_strided_slice %235 {offsets = [0, 0, 1, 0], sizes = [1, 4, 1, 128], strides = [1, 1, 1, 1]} : vector<1x4x2x128xbf16> to vector<1x4x1x128xbf16>
    %239 = vector.shape_cast %238 : vector<1x4x1x128xbf16> to vector<1x4x128xbf16>
    %240 = vector.extract_strided_slice %239 {offsets = [0, 0, 0], sizes = [1, 3, 128], strides = [1, 1, 1]} : vector<1x4x128xbf16> to vector<1x3x128xbf16>
    %241 = tpu.concatenate %234, %240 in 1 : vector<1x1x128xbf16>, vector<1x3x128xbf16> -> vector<1x4x128xbf16>
    %c0_113 = arith.constant 0 : index
    %c0_114 = arith.constant 0 : index
    %c0_115 = arith.constant 0 : index
    %242 = vector.load %arg34[%c0_113, %c0_114, %c0_115] : memref<3x128x128xbf16, #tpu.memory_space<vmem>>, vector<3x128x128xbf16>
    %243 = vector.shape_cast %241 : vector<1x4x128xbf16> to vector<4x128xbf16>
    %244 = vector.extract_strided_slice %242 {offsets = [0, 0, 0], sizes = [1, 128, 128], strides = [1, 1, 1]} : vector<3x128x128xbf16> to vector<1x128x128xbf16>
    %245 = vector.shape_cast %244 : vector<1x128x128xbf16> to vector<128x128xbf16>
    %cst_116 = arith.constant dense<0.000000e+00> : vector<4x128xf32>
    %246 = tpu.matmul %243, %245, %cst_116 {dimension_numbers = #tpu.dot_dimension_numbers<[1], [0], [0], [1], [0, 0, 1, 1], [], []>} : vector<4x128xbf16>, vector<128x128xbf16>, vector<4x128xf32> -> vector<4x128xf32>
    %247 = vector.shape_cast %237 : vector<1x4x128xbf16> to vector<4x128xbf16>
    %248 = vector.extract_strided_slice %242 {offsets = [1, 0, 0], sizes = [1, 128, 128], strides = [1, 1, 1]} : vector<3x128x128xbf16> to vector<1x128x128xbf16>
    %249 = vector.shape_cast %248 : vector<1x128x128xbf16> to vector<128x128xbf16>
    %cst_117 = arith.constant dense<0.000000e+00> : vector<4x128xf32>
    %250 = tpu.matmul %247, %249, %cst_117 {dimension_numbers = #tpu.dot_dimension_numbers<[1], [0], [0], [1], [0, 0, 1, 1], [], []>} : vector<4x128xbf16>, vector<128x128xbf16>, vector<4x128xf32> -> vector<4x128xf32>
    %251 = arith.addf %246, %250 : vector<4x128xf32>
    %252 = vector.shape_cast %239 : vector<1x4x128xbf16> to vector<4x128xbf16>
    %253 = vector.extract_strided_slice %242 {offsets = [2, 0, 0], sizes = [1, 128, 128], strides = [1, 1, 1]} : vector<3x128x128xbf16> to vector<1x128x128xbf16>
    %254 = vector.shape_cast %253 : vector<1x128x128xbf16> to vector<128x128xbf16>
    %cst_118 = arith.constant dense<0.000000e+00> : vector<4x128xf32>
    %255 = tpu.matmul %252, %254, %cst_118 {dimension_numbers = #tpu.dot_dimension_numbers<[1], [0], [0], [1], [0, 0, 1, 1], [], []>} : vector<4x128xbf16>, vector<128x128xbf16>, vector<4x128xf32> -> vector<4x128xf32>
    %256 = arith.addf %251, %255 : vector<4x128xf32>
    %c0_119 = arith.constant 0 : index
    %c0_120 = arith.constant 0 : index
    %257 = vector.load %arg35[%c0_119, %c0_120] : memref<1x128xf32, #tpu.memory_space<vmem>>, vector<1x128xf32>
    %258 = vector.broadcast %257 : vector<1x128xf32> to vector<4x128xf32>
    %259 = arith.addf %256, %258 : vector<4x128xf32>
    %cst_121 = arith.constant 0.000000e+00 : f32
    %260 = vector.broadcast %cst_121 : f32 to vector<4x128xf32>
    %261 = arith.maximumf %259, %260 : vector<4x128xf32>
    %262 = arith.truncf %261 : vector<4x128xf32> to vector<4x128xbf16>
    %c0_122 = arith.constant 0 : index
    %c0_123 = arith.constant 0 : index
    %263 = vector.load %arg36[%c0_122, %c0_123] : memref<128x128xbf16, #tpu.memory_space<vmem>>, vector<128x128xbf16>
    %cst_124 = arith.constant dense<0.000000e+00> : vector<4x128xf32>
    %264 = tpu.matmul %262, %263, %cst_124 {dimension_numbers = #tpu.dot_dimension_numbers<[1], [0], [0], [1], [0, 0, 1, 1], [], []>} : vector<4x128xbf16>, vector<128x128xbf16>, vector<4x128xf32> -> vector<4x128xf32>
    %c0_125 = arith.constant 0 : index
    %c0_126 = arith.constant 0 : index
    %265 = vector.load %arg37[%c0_125, %c0_126] : memref<1x128xf32, #tpu.memory_space<vmem>>, vector<1x128xf32>
    %266 = vector.broadcast %265 : vector<1x128xf32> to vector<4x128xf32>
    %267 = arith.addf %264, %266 : vector<4x128xf32>
    %268 = vector.shape_cast %223 : vector<1x8x128xbf16> to vector<1x4x2x128xbf16>
    %269 = vector.extract_strided_slice %268 {offsets = [0, 0, 0, 0], sizes = [1, 4, 1, 128], strides = [1, 1, 1, 1]} : vector<1x4x2x128xbf16> to vector<1x4x1x128xbf16>
    %270 = vector.shape_cast %269 : vector<1x4x1x128xbf16> to vector<1x4x128xbf16>
    %271 = vector.shape_cast %270 : vector<1x4x128xbf16> to vector<4x128xbf16>
    %c0_127 = arith.constant 0 : index
    %c0_128 = arith.constant 0 : index
    %272 = vector.load %arg38[%c0_127, %c0_128] : memref<128x128xbf16, #tpu.memory_space<vmem>>, vector<128x128xbf16>
    %cst_129 = arith.constant dense<0.000000e+00> : vector<4x128xf32>
    %273 = tpu.matmul %271, %272, %cst_129 {dimension_numbers = #tpu.dot_dimension_numbers<[1], [0], [0], [1], [0, 0, 1, 1], [], []>} : vector<4x128xbf16>, vector<128x128xbf16>, vector<4x128xf32> -> vector<4x128xf32>
    %c0_130 = arith.constant 0 : index
    %c0_131 = arith.constant 0 : index
    %274 = vector.load %arg39[%c0_130, %c0_131] : memref<1x128xf32, #tpu.memory_space<vmem>>, vector<1x128xf32>
    %275 = vector.broadcast %274 : vector<1x128xf32> to vector<4x128xf32>
    %276 = arith.addf %273, %275 : vector<4x128xf32>
    %277 = arith.addf %267, %276 : vector<4x128xf32>
    %cst_132 = arith.constant 0.000000e+00 : f32
    %278 = vector.broadcast %cst_132 : f32 to vector<4x128xf32>
    %279 = arith.maximumf %277, %278 : vector<4x128xf32>
    %280 = vector.shape_cast %279 : vector<4x128xf32> to vector<1x4x128xf32>
    %281 = arith.truncf %280 : vector<1x4x128xf32> to vector<1x4x128xbf16>
    %282 = vector.shape_cast %281 : vector<1x4x128xbf16> to vector<4x128xbf16>
    %c0_133 = arith.constant 0 : index
    %c0_134 = arith.constant 0 : index
    %283 = vector.load %arg40[%c0_133, %c0_134] : memref<128x128xbf16, #tpu.memory_space<vmem>>, vector<128x128xbf16>
    %cst_135 = arith.constant dense<0.000000e+00> : vector<4x128xf32>
    %284 = tpu.matmul %282, %283, %cst_135 {dimension_numbers = #tpu.dot_dimension_numbers<[1], [0], [0], [1], [0, 0, 1, 1], [], []>} : vector<4x128xbf16>, vector<128x128xbf16>, vector<4x128xf32> -> vector<4x128xf32>
    %c0_136 = arith.constant 0 : index
    %c0_137 = arith.constant 0 : index
    %285 = vector.load %arg41[%c0_136, %c0_137] : memref<1x128xf32, #tpu.memory_space<vmem>>, vector<1x128xf32>
    %286 = vector.broadcast %285 : vector<1x128xf32> to vector<4x128xf32>
    %287 = arith.addf %284, %286 : vector<4x128xf32>
    %cst_138 = arith.constant 0.000000e+00 : f32
    %288 = vector.broadcast %cst_138 : f32 to vector<4x128xf32>
    %289 = arith.maximumf %287, %288 : vector<4x128xf32>
    %290 = arith.truncf %289 : vector<4x128xf32> to vector<4x128xbf16>
    %291 = vector.shape_cast %290 : vector<4x128xbf16> to vector<1x4x128xbf16>
    %cst_139 = arith.constant 0.000000e+00 : bf16
    %292 = vector.broadcast %cst_139 : bf16 to vector<1x1x128xbf16>
    %293 = vector.extract_strided_slice %291 {offsets = [0, 0, 0], sizes = [1, 3, 128], strides = [1, 1, 1]} : vector<1x4x128xbf16> to vector<1x3x128xbf16>
    %294 = tpu.concatenate %292, %293 in 1 : vector<1x1x128xbf16>, vector<1x3x128xbf16> -> vector<1x4x128xbf16>
    %295 = vector.extract_strided_slice %291 {offsets = [0, 1, 0], sizes = [1, 3, 128], strides = [1, 1, 1]} : vector<1x4x128xbf16> to vector<1x3x128xbf16>
    %296 = tpu.concatenate %295, %292 in 1 : vector<1x3x128xbf16>, vector<1x1x128xbf16> -> vector<1x4x128xbf16>
    %c0_140 = arith.constant 0 : index
    %c0_141 = arith.constant 0 : index
    %c0_142 = arith.constant 0 : index
    %297 = vector.load %arg42[%c0_140, %c0_141, %c0_142] : memref<3x128x128xbf16, #tpu.memory_space<vmem>>, vector<3x128x128xbf16>
    %298 = vector.shape_cast %294 : vector<1x4x128xbf16> to vector<4x128xbf16>
    %299 = vector.extract_strided_slice %297 {offsets = [0, 0, 0], sizes = [1, 128, 128], strides = [1, 1, 1]} : vector<3x128x128xbf16> to vector<1x128x128xbf16>
    %300 = vector.shape_cast %299 : vector<1x128x128xbf16> to vector<128x128xbf16>
    %cst_143 = arith.constant dense<0.000000e+00> : vector<4x128xf32>
    %301 = tpu.matmul %298, %300, %cst_143 {dimension_numbers = #tpu.dot_dimension_numbers<[1], [0], [0], [1], [0, 0, 1, 1], [], []>} : vector<4x128xbf16>, vector<128x128xbf16>, vector<4x128xf32> -> vector<4x128xf32>
    %302 = vector.shape_cast %291 : vector<1x4x128xbf16> to vector<4x128xbf16>
    %303 = vector.extract_strided_slice %297 {offsets = [1, 0, 0], sizes = [1, 128, 128], strides = [1, 1, 1]} : vector<3x128x128xbf16> to vector<1x128x128xbf16>
    %304 = vector.shape_cast %303 : vector<1x128x128xbf16> to vector<128x128xbf16>
    %cst_144 = arith.constant dense<0.000000e+00> : vector<4x128xf32>
    %305 = tpu.matmul %302, %304, %cst_144 {dimension_numbers = #tpu.dot_dimension_numbers<[1], [0], [0], [1], [0, 0, 1, 1], [], []>} : vector<4x128xbf16>, vector<128x128xbf16>, vector<4x128xf32> -> vector<4x128xf32>
    %306 = arith.addf %301, %305 : vector<4x128xf32>
    %307 = vector.shape_cast %296 : vector<1x4x128xbf16> to vector<4x128xbf16>
    %308 = vector.extract_strided_slice %297 {offsets = [2, 0, 0], sizes = [1, 128, 128], strides = [1, 1, 1]} : vector<3x128x128xbf16> to vector<1x128x128xbf16>
    %309 = vector.shape_cast %308 : vector<1x128x128xbf16> to vector<128x128xbf16>
    %cst_145 = arith.constant dense<0.000000e+00> : vector<4x128xf32>
    %310 = tpu.matmul %307, %309, %cst_145 {dimension_numbers = #tpu.dot_dimension_numbers<[1], [0], [0], [1], [0, 0, 1, 1], [], []>} : vector<4x128xbf16>, vector<128x128xbf16>, vector<4x128xf32> -> vector<4x128xf32>
    %311 = arith.addf %306, %310 : vector<4x128xf32>
    %c0_146 = arith.constant 0 : index
    %c0_147 = arith.constant 0 : index
    %312 = vector.load %arg43[%c0_146, %c0_147] : memref<1x128xf32, #tpu.memory_space<vmem>>, vector<1x128xf32>
    %313 = vector.broadcast %312 : vector<1x128xf32> to vector<4x128xf32>
    %314 = arith.addf %311, %313 : vector<4x128xf32>
    %cst_148 = arith.constant 0.000000e+00 : f32
    %315 = vector.broadcast %cst_148 : f32 to vector<4x128xf32>
    %316 = arith.maximumf %314, %315 : vector<4x128xf32>
    %317 = arith.truncf %316 : vector<4x128xf32> to vector<4x128xbf16>
    %c0_149 = arith.constant 0 : index
    %c0_150 = arith.constant 0 : index
    %318 = vector.load %arg44[%c0_149, %c0_150] : memref<128x128xbf16, #tpu.memory_space<vmem>>, vector<128x128xbf16>
    %cst_151 = arith.constant dense<0.000000e+00> : vector<4x128xf32>
    %319 = tpu.matmul %317, %318, %cst_151 {dimension_numbers = #tpu.dot_dimension_numbers<[1], [0], [0], [1], [0, 0, 1, 1], [], []>} : vector<4x128xbf16>, vector<128x128xbf16>, vector<4x128xf32> -> vector<4x128xf32>
    %c0_152 = arith.constant 0 : index
    %c0_153 = arith.constant 0 : index
    %320 = vector.load %arg45[%c0_152, %c0_153] : memref<1x128xf32, #tpu.memory_space<vmem>>, vector<1x128xf32>
    %321 = vector.broadcast %320 : vector<1x128xf32> to vector<4x128xf32>
    %322 = arith.addf %319, %321 : vector<4x128xf32>
    %323 = vector.shape_cast %280 : vector<1x4x128xf32> to vector<4x128xf32>
    %324 = arith.addf %322, %323 : vector<4x128xf32>
    %cst_154 = arith.constant 0.000000e+00 : f32
    %325 = vector.broadcast %cst_154 : f32 to vector<4x128xf32>
    %326 = arith.maximumf %324, %325 : vector<4x128xf32>
    %327 = vector.shape_cast %326 : vector<4x128xf32> to vector<1x4x128xf32>
    %328 = arith.truncf %327 : vector<1x4x128xf32> to vector<1x4x128xbf16>
    %329 = vector.shape_cast %328 : vector<1x4x128xbf16> to vector<4x128xbf16>
    %c0_155 = arith.constant 0 : index
    %c0_156 = arith.constant 0 : index
    %330 = vector.load %arg46[%c0_155, %c0_156] : memref<128x128xbf16, #tpu.memory_space<vmem>>, vector<128x128xbf16>
    %cst_157 = arith.constant dense<0.000000e+00> : vector<4x128xf32>
    %331 = tpu.matmul %329, %330, %cst_157 {dimension_numbers = #tpu.dot_dimension_numbers<[1], [0], [0], [1], [0, 0, 1, 1], [], []>} : vector<4x128xbf16>, vector<128x128xbf16>, vector<4x128xf32> -> vector<4x128xf32>
    %c0_158 = arith.constant 0 : index
    %c0_159 = arith.constant 0 : index
    %332 = vector.load %arg47[%c0_158, %c0_159] : memref<1x128xf32, #tpu.memory_space<vmem>>, vector<1x128xf32>
    %333 = vector.broadcast %332 : vector<1x128xf32> to vector<4x128xf32>
    %334 = arith.addf %331, %333 : vector<4x128xf32>
    %cst_160 = arith.constant 0.000000e+00 : f32
    %335 = vector.broadcast %cst_160 : f32 to vector<4x128xf32>
    %336 = arith.maximumf %334, %335 : vector<4x128xf32>
    %337 = arith.truncf %336 : vector<4x128xf32> to vector<4x128xbf16>
    %338 = vector.shape_cast %337 : vector<4x128xbf16> to vector<1x4x128xbf16>
    %cst_161 = arith.constant 0.000000e+00 : bf16
    %339 = vector.broadcast %cst_161 : bf16 to vector<1x1x128xbf16>
    %340 = vector.shape_cast %338 : vector<1x4x128xbf16> to vector<1x2x2x128xbf16>
    %341 = vector.extract_strided_slice %340 {offsets = [0, 0, 0, 0], sizes = [1, 2, 1, 128], strides = [1, 1, 1, 1]} : vector<1x2x2x128xbf16> to vector<1x2x1x128xbf16>
    %342 = vector.shape_cast %341 : vector<1x2x1x128xbf16> to vector<1x2x128xbf16>
    %343 = vector.extract_strided_slice %340 {offsets = [0, 0, 1, 0], sizes = [1, 2, 1, 128], strides = [1, 1, 1, 1]} : vector<1x2x2x128xbf16> to vector<1x2x1x128xbf16>
    %344 = vector.shape_cast %343 : vector<1x2x1x128xbf16> to vector<1x2x128xbf16>
    %345 = vector.extract_strided_slice %344 {offsets = [0, 0, 0], sizes = [1, 1, 128], strides = [1, 1, 1]} : vector<1x2x128xbf16> to vector<1x1x128xbf16>
    %346 = tpu.concatenate %339, %345 in 1 : vector<1x1x128xbf16>, vector<1x1x128xbf16> -> vector<1x2x128xbf16>
    %c0_162 = arith.constant 0 : index
    %c0_163 = arith.constant 0 : index
    %c0_164 = arith.constant 0 : index
    %347 = vector.load %arg48[%c0_162, %c0_163, %c0_164] : memref<3x128x128xbf16, #tpu.memory_space<vmem>>, vector<3x128x128xbf16>
    %348 = vector.shape_cast %346 : vector<1x2x128xbf16> to vector<2x128xbf16>
    %349 = vector.extract_strided_slice %347 {offsets = [0, 0, 0], sizes = [1, 128, 128], strides = [1, 1, 1]} : vector<3x128x128xbf16> to vector<1x128x128xbf16>
    %350 = vector.shape_cast %349 : vector<1x128x128xbf16> to vector<128x128xbf16>
    %cst_165 = arith.constant dense<0.000000e+00> : vector<2x128xf32>
    %351 = tpu.matmul %348, %350, %cst_165 {dimension_numbers = #tpu.dot_dimension_numbers<[1], [0], [0], [1], [0, 0, 1, 1], [], []>} : vector<2x128xbf16>, vector<128x128xbf16>, vector<2x128xf32> -> vector<2x128xf32>
    %352 = vector.shape_cast %342 : vector<1x2x128xbf16> to vector<2x128xbf16>
    %353 = vector.extract_strided_slice %347 {offsets = [1, 0, 0], sizes = [1, 128, 128], strides = [1, 1, 1]} : vector<3x128x128xbf16> to vector<1x128x128xbf16>
    %354 = vector.shape_cast %353 : vector<1x128x128xbf16> to vector<128x128xbf16>
    %cst_166 = arith.constant dense<0.000000e+00> : vector<2x128xf32>
    %355 = tpu.matmul %352, %354, %cst_166 {dimension_numbers = #tpu.dot_dimension_numbers<[1], [0], [0], [1], [0, 0, 1, 1], [], []>} : vector<2x128xbf16>, vector<128x128xbf16>, vector<2x128xf32> -> vector<2x128xf32>
    %356 = arith.addf %351, %355 : vector<2x128xf32>
    %357 = vector.shape_cast %344 : vector<1x2x128xbf16> to vector<2x128xbf16>
    %358 = vector.extract_strided_slice %347 {offsets = [2, 0, 0], sizes = [1, 128, 128], strides = [1, 1, 1]} : vector<3x128x128xbf16> to vector<1x128x128xbf16>
    %359 = vector.shape_cast %358 : vector<1x128x128xbf16> to vector<128x128xbf16>
    %cst_167 = arith.constant dense<0.000000e+00> : vector<2x128xf32>
    %360 = tpu.matmul %357, %359, %cst_167 {dimension_numbers = #tpu.dot_dimension_numbers<[1], [0], [0], [1], [0, 0, 1, 1], [], []>} : vector<2x128xbf16>, vector<128x128xbf16>, vector<2x128xf32> -> vector<2x128xf32>
    %361 = arith.addf %356, %360 : vector<2x128xf32>
    %c0_168 = arith.constant 0 : index
    %c0_169 = arith.constant 0 : index
    %362 = vector.load %arg49[%c0_168, %c0_169] : memref<1x128xf32, #tpu.memory_space<vmem>>, vector<1x128xf32>
    %363 = vector.broadcast %362 : vector<1x128xf32> to vector<2x128xf32>
    %364 = arith.addf %361, %363 : vector<2x128xf32>
    %cst_170 = arith.constant 0.000000e+00 : f32
    %365 = vector.broadcast %cst_170 : f32 to vector<2x128xf32>
    %366 = arith.maximumf %364, %365 : vector<2x128xf32>
    %367 = arith.truncf %366 : vector<2x128xf32> to vector<2x128xbf16>
    %c0_171 = arith.constant 0 : index
    %c0_172 = arith.constant 0 : index
    %368 = vector.load %arg50[%c0_171, %c0_172] : memref<128x256xbf16, #tpu.memory_space<vmem>>, vector<128x256xbf16>
    %cst_173 = arith.constant dense<0.000000e+00> : vector<2x256xf32>
    %369 = tpu.matmul %367, %368, %cst_173 {dimension_numbers = #tpu.dot_dimension_numbers<[1], [0], [0], [1], [0, 0, 1, 1], [], []>} : vector<2x128xbf16>, vector<128x256xbf16>, vector<2x256xf32> -> vector<2x256xf32>
    %c0_174 = arith.constant 0 : index
    %c0_175 = arith.constant 0 : index
    %370 = vector.load %arg51[%c0_174, %c0_175] : memref<1x256xf32, #tpu.memory_space<vmem>>, vector<1x256xf32>
    %371 = vector.broadcast %370 : vector<1x256xf32> to vector<2x256xf32>
    %372 = arith.addf %369, %371 : vector<2x256xf32>
    %373 = vector.shape_cast %328 : vector<1x4x128xbf16> to vector<1x2x2x128xbf16>
    %374 = vector.extract_strided_slice %373 {offsets = [0, 0, 0, 0], sizes = [1, 2, 1, 128], strides = [1, 1, 1, 1]} : vector<1x2x2x128xbf16> to vector<1x2x1x128xbf16>
    %375 = vector.shape_cast %374 : vector<1x2x1x128xbf16> to vector<1x2x128xbf16>
    %376 = vector.shape_cast %375 : vector<1x2x128xbf16> to vector<2x128xbf16>
    %c0_176 = arith.constant 0 : index
    %c0_177 = arith.constant 0 : index
    %377 = vector.load %arg52[%c0_176, %c0_177] : memref<128x256xbf16, #tpu.memory_space<vmem>>, vector<128x256xbf16>
    %cst_178 = arith.constant dense<0.000000e+00> : vector<2x256xf32>
    %378 = tpu.matmul %376, %377, %cst_178 {dimension_numbers = #tpu.dot_dimension_numbers<[1], [0], [0], [1], [0, 0, 1, 1], [], []>} : vector<2x128xbf16>, vector<128x256xbf16>, vector<2x256xf32> -> vector<2x256xf32>
    %c0_179 = arith.constant 0 : index
    %c0_180 = arith.constant 0 : index
    %379 = vector.load %arg53[%c0_179, %c0_180] : memref<1x256xf32, #tpu.memory_space<vmem>>, vector<1x256xf32>
    %380 = vector.broadcast %379 : vector<1x256xf32> to vector<2x256xf32>
    %381 = arith.addf %378, %380 : vector<2x256xf32>
    %382 = arith.addf %372, %381 : vector<2x256xf32>
    %cst_181 = arith.constant 0.000000e+00 : f32
    %383 = vector.broadcast %cst_181 : f32 to vector<2x256xf32>
    %384 = arith.maximumf %382, %383 : vector<2x256xf32>
    %385 = vector.shape_cast %384 : vector<2x256xf32> to vector<1x2x256xf32>
    %386 = arith.truncf %385 : vector<1x2x256xf32> to vector<1x2x256xbf16>
    %387 = vector.shape_cast %386 : vector<1x2x256xbf16> to vector<2x256xbf16>
    %c0_182 = arith.constant 0 : index
    %c0_183 = arith.constant 0 : index
    %388 = vector.load %arg54[%c0_182, %c0_183] : memref<256x128xbf16, #tpu.memory_space<vmem>>, vector<256x128xbf16>
    %cst_184 = arith.constant dense<0.000000e+00> : vector<2x128xf32>
    %389 = tpu.matmul %387, %388, %cst_184 {dimension_numbers = #tpu.dot_dimension_numbers<[1], [0], [0], [1], [0, 0, 1, 1], [], []>} : vector<2x256xbf16>, vector<256x128xbf16>, vector<2x128xf32> -> vector<2x128xf32>
    %c0_185 = arith.constant 0 : index
    %c0_186 = arith.constant 0 : index
    %390 = vector.load %arg55[%c0_185, %c0_186] : memref<1x128xf32, #tpu.memory_space<vmem>>, vector<1x128xf32>
    %391 = vector.broadcast %390 : vector<1x128xf32> to vector<2x128xf32>
    %392 = arith.addf %389, %391 : vector<2x128xf32>
    %cst_187 = arith.constant 0.000000e+00 : f32
    %393 = vector.broadcast %cst_187 : f32 to vector<2x128xf32>
    %394 = arith.maximumf %392, %393 : vector<2x128xf32>
    %395 = arith.truncf %394 : vector<2x128xf32> to vector<2x128xbf16>
    %396 = vector.shape_cast %395 : vector<2x128xbf16> to vector<1x2x128xbf16>
    %cst_188 = arith.constant 0.000000e+00 : bf16
    %397 = vector.broadcast %cst_188 : bf16 to vector<1x1x128xbf16>
    %398 = vector.extract_strided_slice %396 {offsets = [0, 0, 0], sizes = [1, 1, 128], strides = [1, 1, 1]} : vector<1x2x128xbf16> to vector<1x1x128xbf16>
    %399 = tpu.concatenate %397, %398 in 1 : vector<1x1x128xbf16>, vector<1x1x128xbf16> -> vector<1x2x128xbf16>
    %400 = vector.extract_strided_slice %396 {offsets = [0, 1, 0], sizes = [1, 1, 128], strides = [1, 1, 1]} : vector<1x2x128xbf16> to vector<1x1x128xbf16>
    %401 = tpu.concatenate %400, %397 in 1 : vector<1x1x128xbf16>, vector<1x1x128xbf16> -> vector<1x2x128xbf16>
    %c0_189 = arith.constant 0 : index
    %c0_190 = arith.constant 0 : index
    %c0_191 = arith.constant 0 : index
    %402 = vector.load %arg56[%c0_189, %c0_190, %c0_191] : memref<3x128x128xbf16, #tpu.memory_space<vmem>>, vector<3x128x128xbf16>
    %403 = vector.shape_cast %399 : vector<1x2x128xbf16> to vector<2x128xbf16>
    %404 = vector.extract_strided_slice %402 {offsets = [0, 0, 0], sizes = [1, 128, 128], strides = [1, 1, 1]} : vector<3x128x128xbf16> to vector<1x128x128xbf16>
    %405 = vector.shape_cast %404 : vector<1x128x128xbf16> to vector<128x128xbf16>
    %cst_192 = arith.constant dense<0.000000e+00> : vector<2x128xf32>
    %406 = tpu.matmul %403, %405, %cst_192 {dimension_numbers = #tpu.dot_dimension_numbers<[1], [0], [0], [1], [0, 0, 1, 1], [], []>} : vector<2x128xbf16>, vector<128x128xbf16>, vector<2x128xf32> -> vector<2x128xf32>
    %407 = vector.shape_cast %396 : vector<1x2x128xbf16> to vector<2x128xbf16>
    %408 = vector.extract_strided_slice %402 {offsets = [1, 0, 0], sizes = [1, 128, 128], strides = [1, 1, 1]} : vector<3x128x128xbf16> to vector<1x128x128xbf16>
    %409 = vector.shape_cast %408 : vector<1x128x128xbf16> to vector<128x128xbf16>
    %cst_193 = arith.constant dense<0.000000e+00> : vector<2x128xf32>
    %410 = tpu.matmul %407, %409, %cst_193 {dimension_numbers = #tpu.dot_dimension_numbers<[1], [0], [0], [1], [0, 0, 1, 1], [], []>} : vector<2x128xbf16>, vector<128x128xbf16>, vector<2x128xf32> -> vector<2x128xf32>
    %411 = arith.addf %406, %410 : vector<2x128xf32>
    %412 = vector.shape_cast %401 : vector<1x2x128xbf16> to vector<2x128xbf16>
    %413 = vector.extract_strided_slice %402 {offsets = [2, 0, 0], sizes = [1, 128, 128], strides = [1, 1, 1]} : vector<3x128x128xbf16> to vector<1x128x128xbf16>
    %414 = vector.shape_cast %413 : vector<1x128x128xbf16> to vector<128x128xbf16>
    %cst_194 = arith.constant dense<0.000000e+00> : vector<2x128xf32>
    %415 = tpu.matmul %412, %414, %cst_194 {dimension_numbers = #tpu.dot_dimension_numbers<[1], [0], [0], [1], [0, 0, 1, 1], [], []>} : vector<2x128xbf16>, vector<128x128xbf16>, vector<2x128xf32> -> vector<2x128xf32>
    %416 = arith.addf %411, %415 : vector<2x128xf32>
    %c0_195 = arith.constant 0 : index
    %c0_196 = arith.constant 0 : index
    %417 = vector.load %arg57[%c0_195, %c0_196] : memref<1x128xf32, #tpu.memory_space<vmem>>, vector<1x128xf32>
    %418 = vector.broadcast %417 : vector<1x128xf32> to vector<2x128xf32>
    %419 = arith.addf %416, %418 : vector<2x128xf32>
    %cst_197 = arith.constant 0.000000e+00 : f32
    %420 = vector.broadcast %cst_197 : f32 to vector<2x128xf32>
    %421 = arith.maximumf %419, %420 : vector<2x128xf32>
    %422 = arith.truncf %421 : vector<2x128xf32> to vector<2x128xbf16>
    %c0_198 = arith.constant 0 : index
    %c0_199 = arith.constant 0 : index
    %423 = vector.load %arg58[%c0_198, %c0_199] : memref<128x256xbf16, #tpu.memory_space<vmem>>, vector<128x256xbf16>
    %cst_200 = arith.constant dense<0.000000e+00> : vector<2x256xf32>
    %424 = tpu.matmul %422, %423, %cst_200 {dimension_numbers = #tpu.dot_dimension_numbers<[1], [0], [0], [1], [0, 0, 1, 1], [], []>} : vector<2x128xbf16>, vector<128x256xbf16>, vector<2x256xf32> -> vector<2x256xf32>
    %c0_201 = arith.constant 0 : index
    %c0_202 = arith.constant 0 : index
    %425 = vector.load %arg59[%c0_201, %c0_202] : memref<1x256xf32, #tpu.memory_space<vmem>>, vector<1x256xf32>
    %426 = vector.broadcast %425 : vector<1x256xf32> to vector<2x256xf32>
    %427 = arith.addf %424, %426 : vector<2x256xf32>
    %428 = vector.shape_cast %385 : vector<1x2x256xf32> to vector<2x256xf32>
    %429 = arith.addf %427, %428 : vector<2x256xf32>
    %cst_203 = arith.constant 0.000000e+00 : f32
    %430 = vector.broadcast %cst_203 : f32 to vector<2x256xf32>
    %431 = arith.maximumf %429, %430 : vector<2x256xf32>
    %432 = vector.shape_cast %431 : vector<2x256xf32> to vector<1x2x256xf32>
    %c0_204 = arith.constant 0 : index
    %c0_205 = arith.constant 0 : index
    %c0_206 = arith.constant 0 : index
    %433 = vector.load %arg60[%c0_204, %c0_205, %c0_206] : memref<1x2x256xf32, #tpu.memory_space<vmem>>, vector<1x2x256xf32>
    tpu.vector_store %arg60[%c0_204, %c0_205, %c0_206], %432 {strides = array<i32>} : memref<1x2x256xf32, #tpu.memory_space<vmem>>, vector<1x2x256xf32>,
    return
  }
  func.func @transform_0(%arg0: i32) -> (i32, i32, i32) {
    %c0_i32 = arith.constant 0 : i32
    %c0_i32_0 = arith.constant 0 : i32
    %c0_i32_1 = arith.constant 0 : i32
    return %arg0, %c0_i32, %c0_i32_0 : i32, i32, i32
  }
  func.func @transform_1(%arg0: i32) -> (i32, i32) {
    %c0_i32 = arith.constant 0 : i32
    %c0_i32_0 = arith.constant 0 : i32
    %c0_i32_1 = arith.constant 0 : i32
    return %c0_i32, %c0_i32_0 : i32, i32
  }
  func.func @transform_2(%arg0: i32) -> (i32, i32) {
    %c0_i32 = arith.constant 0 : i32
    %c0_i32_0 = arith.constant 0 : i32
    %c0_i32_1 = arith.constant 0 : i32
    return %c0_i32, %c0_i32_0 : i32, i32
  }
  func.func @transform_3(%arg0: i32) -> (i32, i32) {
    %c0_i32 = arith.constant 0 : i32
    %c0_i32_0 = arith.constant 0 : i32
    %c0_i32_1 = arith.constant 0 : i32
    return %c0_i32, %c0_i32_0 : i32, i32
  }
  func.func @transform_4(%arg0: i32) -> (i32, i32) {
    %c0_i32 = arith.constant 0 : i32
    %c0_i32_0 = arith.constant 0 : i32
    %c0_i32_1 = arith.constant 0 : i32
    return %c0_i32, %c0_i32_0 : i32, i32
  }
  func.func @transform_5(%arg0: i32) -> (i32, i32, i32) {
    %c0_i32 = arith.constant 0 : i32
    %c0_i32_0 = arith.constant 0 : i32
    %c0_i32_1 = arith.constant 0 : i32
    %c0_i32_2 = arith.constant 0 : i32
    return %c0_i32, %c0_i32_0, %c0_i32_1 : i32, i32, i32
  }
  func.func @transform_6(%arg0: i32) -> (i32, i32) {
    %c0_i32 = arith.constant 0 : i32
    %c0_i32_0 = arith.constant 0 : i32
    %c0_i32_1 = arith.constant 0 : i32
    return %c0_i32, %c0_i32_0 : i32, i32
  }
  func.func @transform_7(%arg0: i32) -> (i32, i32) {
    %c0_i32 = arith.constant 0 : i32
    %c0_i32_0 = arith.constant 0 : i32
    %c0_i32_1 = arith.constant 0 : i32
    return %c0_i32, %c0_i32_0 : i32, i32
  }
  func.func @transform_8(%arg0: i32) -> (i32, i32) {
    %c0_i32 = arith.constant 0 : i32
    %c0_i32_0 = arith.constant 0 : i32
    %c0_i32_1 = arith.constant 0 : i32
    return %c0_i32, %c0_i32_0 : i32, i32
  }
  func.func @transform_9(%arg0: i32) -> (i32, i32) {
    %c0_i32 = arith.constant 0 : i32
    %c0_i32_0 = arith.constant 0 : i32
    %c0_i32_1 = arith.constant 0 : i32
    return %c0_i32, %c0_i32_0 : i32, i32
  }
  func.func @transform_10(%arg0: i32) -> (i32, i32) {
    %c0_i32 = arith.constant 0 : i32
    %c0_i32_0 = arith.constant 0 : i32
    %c0_i32_1 = arith.constant 0 : i32
    return %c0_i32, %c0_i32_0 : i32, i32
  }
  func.func @transform_11(%arg0: i32) -> (i32, i32) {
    %c0_i32 = arith.constant 0 : i32
    %c0_i32_0 = arith.constant 0 : i32
    %c0_i32_1 = arith.constant 0 : i32
    return %c0_i32, %c0_i32_0 : i32, i32
  }
  func.func @transform_12(%arg0: i32) -> (i32, i32) {
    %c0_i32 = arith.constant 0 : i32
    %c0_i32_0 = arith.constant 0 : i32
    %c0_i32_1 = arith.constant 0 : i32
    return %c0_i32, %c0_i32_0 : i32, i32
  }
  func.func @transform_13(%arg0: i32) -> (i32, i32, i32) {
    %c0_i32 = arith.constant 0 : i32
    %c0_i32_0 = arith.constant 0 : i32
    %c0_i32_1 = arith.constant 0 : i32
    %c0_i32_2 = arith.constant 0 : i32
    return %c0_i32, %c0_i32_0, %c0_i32_1 : i32, i32, i32
  }
  func.func @transform_14(%arg0: i32) -> (i32, i32) {
    %c0_i32 = arith.constant 0 : i32
    %c0_i32_0 = arith.constant 0 : i32
    %c0_i32_1 = arith.constant 0 : i32
    return %c0_i32, %c0_i32_0 : i32, i32
  }
  func.func @transform_15(%arg0: i32) -> (i32, i32) {
    %c0_i32 = arith.constant 0 : i32
    %c0_i32_0 = arith.constant 0 : i32
    %c0_i32_1 = arith.constant 0 : i32
    return %c0_i32, %c0_i32_0 : i32, i32
  }
  func.func @transform_16(%arg0: i32) -> (i32, i32) {
    %c0_i32 = arith.constant 0 : i32
    %c0_i32_0 = arith.constant 0 : i32
    %c0_i32_1 = arith.constant 0 : i32
    return %c0_i32, %c0_i32_0 : i32, i32
  }
  func.func @transform_17(%arg0: i32) -> (i32, i32) {
    %c0_i32 = arith.constant 0 : i32
    %c0_i32_0 = arith.constant 0 : i32
    %c0_i32_1 = arith.constant 0 : i32
    return %c0_i32, %c0_i32_0 : i32, i32
  }
  func.func @transform_18(%arg0: i32) -> (i32, i32) {
    %c0_i32 = arith.constant 0 : i32
    %c0_i32_0 = arith.constant 0 : i32
    %c0_i32_1 = arith.constant 0 : i32
    return %c0_i32, %c0_i32_0 : i32, i32
  }
  func.func @transform_19(%arg0: i32) -> (i32, i32, i32) {
    %c0_i32 = arith.constant 0 : i32
    %c0_i32_0 = arith.constant 0 : i32
    %c0_i32_1 = arith.constant 0 : i32
    %c0_i32_2 = arith.constant 0 : i32
    return %c0_i32, %c0_i32_0, %c0_i32_1 : i32, i32, i32
  }
  func.func @transform_20(%arg0: i32) -> (i32, i32) {
    %c0_i32 = arith.constant 0 : i32
    %c0_i32_0 = arith.constant 0 : i32
    %c0_i32_1 = arith.constant 0 : i32
    return %c0_i32, %c0_i32_0 : i32, i32
  }
  func.func @transform_21(%arg0: i32) -> (i32, i32) {
    %c0_i32 = arith.constant 0 : i32
    %c0_i32_0 = arith.constant 0 : i32
    %c0_i32_1 = arith.constant 0 : i32
    return %c0_i32, %c0_i32_0 : i32, i32
  }
  func.func @transform_22(%arg0: i32) -> (i32, i32) {
    %c0_i32 = arith.constant 0 : i32
    %c0_i32_0 = arith.constant 0 : i32
    %c0_i32_1 = arith.constant 0 : i32
    return %c0_i32, %c0_i32_0 : i32, i32
  }
  func.func @transform_23(%arg0: i32) -> (i32, i32) {
    %c0_i32 = arith.constant 0 : i32
    %c0_i32_0 = arith.constant 0 : i32
    %c0_i32_1 = arith.constant 0 : i32
    return %c0_i32, %c0_i32_0 : i32, i32
  }
  func.func @transform_24(%arg0: i32) -> (i32, i32) {
    %c0_i32 = arith.constant 0 : i32
    %c0_i32_0 = arith.constant 0 : i32
    %c0_i32_1 = arith.constant 0 : i32
    return %c0_i32, %c0_i32_0 : i32, i32
  }
  func.func @transform_25(%arg0: i32) -> (i32, i32) {
    %c0_i32 = arith.constant 0 : i32
    %c0_i32_0 = arith.constant 0 : i32
    %c0_i32_1 = arith.constant 0 : i32
    return %c0_i32, %c0_i32_0 : i32, i32
  }
  func.func @transform_26(%arg0: i32) -> (i32, i32) {
    %c0_i32 = arith.constant 0 : i32
    %c0_i32_0 = arith.constant 0 : i32
    %c0_i32_1 = arith.constant 0 : i32
    return %c0_i32, %c0_i32_0 : i32, i32
  }
  func.func @transform_27(%arg0: i32) -> (i32, i32, i32) {
    %c0_i32 = arith.constant 0 : i32
    %c0_i32_0 = arith.constant 0 : i32
    %c0_i32_1 = arith.constant 0 : i32
    %c0_i32_2 = arith.constant 0 : i32
    return %c0_i32, %c0_i32_0, %c0_i32_1 : i32, i32, i32
  }
  func.func @transform_28(%arg0: i32) -> (i32, i32) {
    %c0_i32 = arith.constant 0 : i32
    %c0_i32_0 = arith.constant 0 : i32
    %c0_i32_1 = arith.constant 0 : i32
    return %c0_i32, %c0_i32_0 : i32, i32
  }
  func.func @transform_29(%arg0: i32) -> (i32, i32) {
    %c0_i32 = arith.constant 0 : i32
    %c0_i32_0 = arith.constant 0 : i32
    %c0_i32_1 = arith.constant 0 : i32
    return %c0_i32, %c0_i32_0 : i32, i32
  }
  func.func @transform_30(%arg0: i32) -> (i32, i32) {
    %c0_i32 = arith.constant 0 : i32
    %c0_i32_0 = arith.constant 0 : i32
    %c0_i32_1 = arith.constant 0 : i32
    return %c0_i32, %c0_i32_0 : i32, i32
  }
  func.func @transform_31(%arg0: i32) -> (i32, i32) {
    %c0_i32 = arith.constant 0 : i32
    %c0_i32_0 = arith.constant 0 : i32
    %c0_i32_1 = arith.constant 0 : i32
    return %c0_i32, %c0_i32_0 : i32, i32
  }
  func.func @transform_32(%arg0: i32) -> (i32, i32) {
    %c0_i32 = arith.constant 0 : i32
    %c0_i32_0 = arith.constant 0 : i32
    %c0_i32_1 = arith.constant 0 : i32
    return %c0_i32, %c0_i32_0 : i32, i32
  }
  func.func @transform_33(%arg0: i32) -> (i32, i32, i32) {
    %c0_i32 = arith.constant 0 : i32
    %c0_i32_0 = arith.constant 0 : i32
    %c0_i32_1 = arith.constant 0 : i32
    %c0_i32_2 = arith.constant 0 : i32
    return %c0_i32, %c0_i32_0, %c0_i32_1 : i32, i32, i32
  }
  func.func @transform_34(%arg0: i32) -> (i32, i32) {
    %c0_i32 = arith.constant 0 : i32
    %c0_i32_0 = arith.constant 0 : i32
    %c0_i32_1 = arith.constant 0 : i32
    return %c0_i32, %c0_i32_0 : i32, i32
  }
  func.func @transform_35(%arg0: i32) -> (i32, i32) {
    %c0_i32 = arith.constant 0 : i32
    %c0_i32_0 = arith.constant 0 : i32
    %c0_i32_1 = arith.constant 0 : i32
    return %c0_i32, %c0_i32_0 : i32, i32
  }
  func.func @transform_36(%arg0: i32) -> (i32, i32) {
    %c0_i32 = arith.constant 0 : i32
    %c0_i32_0 = arith.constant 0 : i32
    %c0_i32_1 = arith.constant 0 : i32
    return %c0_i32, %c0_i32_0 : i32, i32
  }
  func.func @transform_37(%arg0: i32) -> (i32, i32) {
    %c0_i32 = arith.constant 0 : i32
    %c0_i32_0 = arith.constant 0 : i32
    %c0_i32_1 = arith.constant 0 : i32
    return %c0_i32, %c0_i32_0 : i32, i32
  }
  func.func @transform_38(%arg0: i32) -> (i32, i32) {
    %c0_i32 = arith.constant 0 : i32
    %c0_i32_0 = arith.constant 0 : i32
    %c0_i32_1 = arith.constant 0 : i32
    return %c0_i32, %c0_i32_0 : i32, i32
  }
  func.func @transform_39(%arg0: i32) -> (i32, i32) {
    %c0_i32 = arith.constant 0 : i32
    %c0_i32_0 = arith.constant 0 : i32
    %c0_i32_1 = arith.constant 0 : i32
    return %c0_i32, %c0_i32_0 : i32, i32
  }
  func.func @transform_40(%arg0: i32) -> (i32, i32) {
    %c0_i32 = arith.constant 0 : i32
    %c0_i32_0 = arith.constant 0 : i32
    %c0_i32_1 = arith.constant 0 : i32
    return %c0_i32, %c0_i32_0 : i32, i32
  }
  func.func @transform_41(%arg0: i32) -> (i32, i32, i32) {
    %c0_i32 = arith.constant 0 : i32
    %c0_i32_0 = arith.constant 0 : i32
    %c0_i32_1 = arith.constant 0 : i32
    %c0_i32_2 = arith.constant 0 : i32
    return %c0_i32, %c0_i32_0, %c0_i32_1 : i32, i32, i32
  }
  func.func @transform_42(%arg0: i32) -> (i32, i32) {
    %c0_i32 = arith.constant 0 : i32
    %c0_i32_0 = arith.constant 0 : i32
    %c0_i32_1 = arith.constant 0 : i32
    return %c0_i32, %c0_i32_0 : i32, i32
  }
  func.func @transform_43(%arg0: i32) -> (i32, i32) {
    %c0_i32 = arith.constant 0 : i32
    %c0_i32_0 = arith.constant 0 : i32
    %c0_i32_1 = arith.constant 0 : i32
    return %c0_i32, %c0_i32_0 : i32, i32
  }
  func.func @transform_44(%arg0: i32) -> (i32, i32) {
    %c0_i32 = arith.constant 0 : i32
    %c0_i32_0 = arith.constant 0 : i32
    %c0_i32_1 = arith.constant 0 : i32
    return %c0_i32, %c0_i32_0 : i32, i32
  }
  func.func @transform_45(%arg0: i32) -> (i32, i32) {
    %c0_i32 = arith.constant 0 : i32
    %c0_i32_0 = arith.constant 0 : i32
    %c0_i32_1 = arith.constant 0 : i32
    return %c0_i32, %c0_i32_0 : i32, i32
  }
  func.func @transform_46(%arg0: i32) -> (i32, i32) {
    %c0_i32 = arith.constant 0 : i32
    %c0_i32_0 = arith.constant 0 : i32
    %c0_i32_1 = arith.constant 0 : i32
    return %c0_i32, %c0_i32_0 : i32, i32
  }
  func.func @transform_47(%arg0: i32) -> (i32, i32, i32) {
    %c0_i32 = arith.constant 0 : i32
    %c0_i32_0 = arith.constant 0 : i32
    %c0_i32_1 = arith.constant 0 : i32
    %c0_i32_2 = arith.constant 0 : i32
    return %c0_i32, %c0_i32_0, %c0_i32_1 : i32, i32, i32
  }
  func.func @transform_48(%arg0: i32) -> (i32, i32) {
    %c0_i32 = arith.constant 0 : i32
    %c0_i32_0 = arith.constant 0 : i32
    %c0_i32_1 = arith.constant 0 : i32
    return %c0_i32, %c0_i32_0 : i32, i32
  }
  func.func @transform_49(%arg0: i32) -> (i32, i32) {
    %c0_i32 = arith.constant 0 : i32
    %c0_i32_0 = arith.constant 0 : i32
    %c0_i32_1 = arith.constant 0 : i32
    return %c0_i32, %c0_i32_0 : i32, i32
  }
  func.func @transform_50(%arg0: i32) -> (i32, i32) {
    %c0_i32 = arith.constant 0 : i32
    %c0_i32_0 = arith.constant 0 : i32
    %c0_i32_1 = arith.constant 0 : i32
    return %c0_i32, %c0_i32_0 : i32, i32
  }
  func.func @transform_51(%arg0: i32) -> (i32, i32) {
    %c0_i32 = arith.constant 0 : i32
    %c0_i32_0 = arith.constant 0 : i32
    %c0_i32_1 = arith.constant 0 : i32
    return %c0_i32, %c0_i32_0 : i32, i32
  }
  func.func @transform_52(%arg0: i32) -> (i32, i32) {
    %c0_i32 = arith.constant 0 : i32
    %c0_i32_0 = arith.constant 0 : i32
    %c0_i32_1 = arith.constant 0 : i32
    return %c0_i32, %c0_i32_0 : i32, i32
  }
  func.func @transform_53(%arg0: i32) -> (i32, i32) {
    %c0_i32 = arith.constant 0 : i32
    %c0_i32_0 = arith.constant 0 : i32
    %c0_i32_1 = arith.constant 0 : i32
    return %c0_i32, %c0_i32_0 : i32, i32
  }
  func.func @transform_54(%arg0: i32) -> (i32, i32) {
    %c0_i32 = arith.constant 0 : i32
    %c0_i32_0 = arith.constant 0 : i32
    %c0_i32_1 = arith.constant 0 : i32
    return %c0_i32, %c0_i32_0 : i32, i32
  }
  func.func @transform_55(%arg0: i32) -> (i32, i32, i32) {
    %c0_i32 = arith.constant 0 : i32
    %c0_i32_0 = arith.constant 0 : i32
    %c0_i32_1 = arith.constant 0 : i32
    %c0_i32_2 = arith.constant 0 : i32
    return %c0_i32, %c0_i32_0, %c0_i32_1 : i32, i32, i32
  }
  func.func @transform_56(%arg0: i32) -> (i32, i32) {
    %c0_i32 = arith.constant 0 : i32
    %c0_i32_0 = arith.constant 0 : i32
    %c0_i32_1 = arith.constant 0 : i32
    return %c0_i32, %c0_i32_0 : i32, i32
  }
  func.func @transform_57(%arg0: i32) -> (i32, i32) {
    %c0_i32 = arith.constant 0 : i32
    %c0_i32_0 = arith.constant 0 : i32
    %c0_i32_1 = arith.constant 0 : i32
    return %c0_i32, %c0_i32_0 : i32, i32
  }
  func.func @transform_58(%arg0: i32) -> (i32, i32) {
    %c0_i32 = arith.constant 0 : i32
    %c0_i32_0 = arith.constant 0 : i32
    %c0_i32_1 = arith.constant 0 : i32
    return %c0_i32, %c0_i32_0 : i32, i32
  }
  func.func @transform_59(%arg0: i32) -> (i32, i32, i32) {
    %c0_i32 = arith.constant 0 : i32
    %c0_i32_0 = arith.constant 0 : i32
    %c0_i32_1 = arith.constant 0 : i32
    return %arg0, %c0_i32, %c0_i32_0 : i32, i32, i32
  }
}

</mosaic_0001>

<bundles_post_ra>
// kernel: resnet1d_forward.1
= control target key start
LH: loop header
LB: loop body
LE: loop exit
PB: predicated region body
PF: predicated region fallthrough
CT: control target
= control target key end

     0   :  { %s12965_s6 = smov 1   ;;  %s12966_s10 = smov 2   ;;  %s15037_s0 = inlined_call_operand.smem [shape: u32[60], index: -1, kind: input, shape index: {}] }
   0x1   :  { %s13083_s5 = sld [smem:[%s15037_s0]]   ;;  %s12967_s14 = smov 3  }
   0x2   :  { %s13088_s9 = sld [smem:[%s15037_s0 + %s12965_s6]]   ;;  %s12968_s18 = smov 4  }
   0x3   :  { %s13093_s13 = sld [smem:[%s15037_s0 + %s12966_s10]]   ;;  %s12969_s22 = smov 5  }
   0x4   :  { %s13098_s17 = sld [smem:[%s15037_s0 + %s12967_s14]]   ;;  %s12970_s26 = smov 6  }
   0x5   :  { %s13103_s21 = sld [smem:[%s15037_s0 + %s12968_s18]]   ;;  %s12971_s30 = smov 7  }
   0x6   :  { %s13108_s25 = sld [smem:[%s15037_s0 + %s12969_s22]]   ;;  %s12972_s4 = smov 8  }
   0x7   :  { %15130 = sst [smem:[#allocation92_spill]] %s13083_s5  ;;  %s12973_s10 = smov 9  }
   0x8   :  { %15131 = sst [smem:[#allocation93_spill]] %s13088_s9  ;;  %s12974_s15 = smov 10  }
   0x9   :  { %15132 = sst [smem:[#allocation94_spill]] %s13093_s13  ;;  %s12975_s20 = smov 11  }
   0xa   :  { %15133 = sst [smem:[#allocation95_spill]] %s13098_s17  ;;  %s12977_s1 = smov 13  }
   0xb   :  { %s13113_s29 = sld [smem:[%s15037_s0 + %s12970_s26]]   ;;  %s12976_s26 = smov 12  }
   0xc   :  { %15134 = sst [smem:[#allocation96_spill]] %s13108_s25  ;;  %s12978_s7 = smov 14  }
   0xd   :  { %s13118_s3 = sld [smem:[%s15037_s0 + %s12971_s30]]   ;;  %s12980_s22 = smov 16  }
   0xe   :  { %s13123_s8 = sld [smem:[%s15037_s0 + %s12972_s4]]   ;;  %s12981_s28 = smov 17  }
   0xf   :  { %s13128_s14 = sld [smem:[%s15037_s0 + %s12973_s10]]  }
  0x10   :  { %s13133_s19 = sld [smem:[%s15037_s0 + %s12974_s15]]   ;;  %s12979_s15 = smov 15  }
  0x11   :  { %15135 = sst [smem:[#allocation97_spill]] %s13113_s29 }
  0x12   :  { %s13138_s24 = sld [smem:[%s15037_s0 + %s12975_s20]]  }
  0x13   :  { %15136 = sst [smem:[#allocation98_spill]] %s13118_s3 }
  0x14   :  { %15137 = sst [smem:[#allocation99_spill]] %s13123_s8 }
  0x15   :  { %s13143_s30 = sld [smem:[%s15037_s0 + %s12976_s26]]  }
  0x16   :  { %15138 = sst [smem:[#allocation100_spill]] %s13133_s19 }
  0x17   :  { %s13148_s6 = sld [smem:[%s15037_s0 + %s12977_s1]]  }
  0x18   :  { %s13153_s12 = sld [smem:[%s15037_s0 + %s12978_s7]]   ;;  %s12982_s7 = smov 18  }
  0x19   :  { %s13158_s20 = sld [smem:[%s15037_s0 + %s12979_s15]]   ;;  %s12983_s15 = smov 19  }
  0x1a   :  { %s13163_s27 = sld [smem:[%s15037_s0 + %s12980_s22]]   ;;  %s12984_s22 = smov 20  }
  0x1b   :  { %15139 = sst [smem:[#allocation101_spill]] %s13143_s30 }
  0x1c   :  { %s13168_s4 = sld [smem:[%s15037_s0 + %s12981_s28]]   ;;  %s12985_s28 = smov 21  }
  0x1d   :  { %15140 = sst [smem:[#allocation102_spill]] %s13148_s6 }
  0x1e   :  { %15141 = sst [smem:[#allocation103_spill]] %s13153_s12 }
  0x1f   :  { %15142 = sst [smem:[#allocation104_spill]] %s13158_s20 }
  0x20   :  { %s13173_s6 = sld [smem:[%s15037_s0 + %s12982_s7]]   ;;  %s12986_s7 = smov 22  }
  0x21   :  { %s13178_s25 = sld [smem:[%s15037_s0 + %s12983_s15]]   ;;  %s12987_s15 = smov 23  }
  0x22   :  { %15143 = sst [smem:[#allocation105_spill]] %s13168_s4 }
  0x23   :  { %s13183_s5 = sld [smem:[%s15037_s0 + %s12984_s22]]   ;;  %s12988_s22 = smov 24  }
  0x24   :  { %s13188_s4 = sld [smem:[%s15037_s0 + %s12985_s28]]   ;;  %s12989_s28 = smov 25  }
  0x25   :  { %s13193_s20 = sld [smem:[%s15037_s0 + %s12986_s7]]   ;;  %s12990_s7 = smov 26  }
  0x26   :  { %15144 = sst [smem:[#allocation106_spill]] %s13173_s6 }
  0x27   :  { %15145 = sst [smem:[#allocation107_spill]] %s13178_s25 }
  0x28   :  { %s13198_s25 = sld [smem:[%s15037_s0 + %s12987_s15]]   ;;  %s12991_s15 = smov 27  }
  0x29   :  { %15146 = sst [smem:[#allocation108_spill]] %s13183_s5 }
  0x2a   :  { %15147 = sst [smem:[#allocation109_spill]] %s13188_s4 }
  0x2b   :  { %15148 = sst [smem:[#allocation110_spill]] %s13193_s20 }
  0x2c   :  { %s13203_s5 = sld [smem:[%s15037_s0 + %s12988_s22]]   ;;  %s12992_s22 = smov 28  }
  0x2d   :  { %s13208_s30 = sld [smem:[%s15037_s0 + %s12989_s28]]   ;;  %s12993_s28 = smov 29  }
  0x2e   :  { %s13213_s20 = sld [smem:[%s15037_s0 + %s12990_s7]]   ;;  %s12994_s7 = smov 30  }
  0x2f   :  { %s13218_s19 = sld [smem:[%s15037_s0 + %s12991_s15]]   ;;  %s12995_s15 = smov 31  }
  0x30   :  { %s13228_s8 = sld [smem:[%s15037_s0 + %s12993_s28]]   ;;  %s12997_s28 = smov 33  }
  0x32   :  { %15149 = sst [smem:[#allocation111_spill]] %s13203_s5 }
  0x33   :  { %s13223_s5 = sld [smem:[%s15037_s0 + %s12992_s22]]   ;;  %s12996_s22 = smov 32  }
  0x34   :  { %15150 = sst [smem:[#allocation112_spill]] %s13213_s20 }
  0x35   :  { %15151 = sst [smem:[#allocation113_spill]] %s13218_s19 }
  0x36   :  { %15153 = sst [smem:[#allocation115_spill]] %s13228_s8 }
  0x37   :  { %s13233_s20 = sld [smem:[%s15037_s0 + %s12994_s7]]   ;;  %s12998_s7 = smov 34  }
  0x38   :  { %s13238_s19 = sld [smem:[%s15037_s0 + %s12995_s15]]   ;;  %s12999_s15 = smov 35  }
  0x39   :  { %15152 = sst [smem:[#allocation114_spill]] %s13223_s5 }
  0x3a   :  { %s13243_s29 = sld [smem:[%s15037_s0 + %s12996_s22]]   ;;  %s13000_s22 = smov 36  }
  0x3b   :  { %s13248_s8 = sld [smem:[%s15037_s0 + %s12997_s28]]   ;;  %s13001_s28 = smov 37  }
  0x3c   :  { %s13253_s17 = sld [smem:[%s15037_s0 + %s12998_s7]]   ;;  %s13002_s7 = smov 38  }
  0x3d   :  { %s13263_s9 = sld [smem:[%s15037_s0 + %s13000_s22]]   ;;  %s13004_s22 = smov 40  }
  0x3e   :  { %15154 = sst [smem:[#allocation116_spill]] %s13238_s19 }
  0x3f   :  { %s13258_s19 = sld [smem:[%s15037_s0 + %s12999_s15]]   ;;  %s13003_s15 = smov 39  }
  0x41   :  { %15155 = sst [smem:[#allocation117_spill]] %s13248_s8 }
  0x42   :  { %15156 = sst [smem:[#allocation118_spill]] %s13253_s17 }
  0x43   :  { %15158 = sst [smem:[#allocation120_spill]] %s13263_s9 }
  0x44   :  { %s13268_s8 = sld [smem:[%s15037_s0 + %s13001_s28]]   ;;  %s13005_s28 = smov 41  }
  0x45   :  { %15157 = sst [smem:[#allocation119_spill]] %s13258_s19 }
  0x46   :  { %s13273_s17 = sld [smem:[%s15037_s0 + %s13002_s7]]   ;;  %s13006_s7 = smov 42  }
  0x47   :  { %s13278_s19 = sld [smem:[%s15037_s0 + %s13003_s15]]   ;;  %s13007_s15 = smov 43  }
  0x48   :  { %s13283_s9 = sld [smem:[%s15037_s0 + %s13004_s22]]   ;;  %s13008_s22 = smov 44  }
  0x4a   :  { %15159 = sst [smem:[#allocation121_spill]] %s13268_s8 }
  0x4b   :  { %s13288_s8 = sld [smem:[%s15037_s0 + %s13005_s28]]   ;;  %s13009_s28 = smov 45  }
  0x4c   :  { %15160 = sst [smem:[#allocation122_spill]] %s13273_s17 }
  0x4d   :  { %15161 = sst [smem:[#allocation123_spill]] %s13278_s19 }
  0x4e   :  { %15162 = sst [smem:[#allocation124_spill]] %s13283_s9 }
  0x4f   :  { %s13293_s17 = sld [smem:[%s15037_s0 + %s13006_s7]]   ;;  %s13010_s7 = smov 46  }
  0x50   :  { %s13298_s19 = sld [smem:[%s15037_s0 + %s13007_s15]]   ;;  %s13011_s15 = smov 47  }
  0x51   :  { %15163 = sst [smem:[#allocation125_spill]] %s13288_s8 }
  0x52   :  { %s13303_s9 = sld [smem:[%s15037_s0 + %s13008_s22]]   ;;  %s13012_s22 = smov 48  }
  0x53   :  { %s13308_s8 = sld [smem:[%s15037_s0 + %s13009_s28]]   ;;  %s13013_s28 = smov 49  }
  0x55   :  { %15164 = sst [smem:[#allocation126_spill]] %s13293_s17 }
  0x56   :  { %15165 = sst [smem:[#allocation127_spill]] %s13298_s19 }
  0x57   :  { %s13313_s17 = sld [smem:[%s15037_s0 + %s13010_s7]]   ;;  %s13014_s7 = smov 50  }
  0x58   :  { %15166 = sst [smem:[#allocation128_spill]] %s13303_s9 }
  0x59   :  { %15167 = sst [smem:[#allocation129_spill]] %s13308_s8 }
  0x5a   :  { %s13318_s19 = sld [smem:[%s15037_s0 + %s13011_s15]]   ;;  %s13015_s15 = smov 51  }
  0x5b   :  { %s13323_s9 = sld [smem:[%s15037_s0 + %s13012_s22]]   ;;  %s13016_s22 = smov 52  }
  0x5c   :  { %s13328_s8 = sld [smem:[%s15037_s0 + %s13013_s28]]   ;;  %s13017_s28 = smov 53  }
  0x5d   :  { %15168 = sst [smem:[#allocation130_spill]] %s13313_s17 }
  0x5e   :  { %s13333_s17 = sld [smem:[%s15037_s0 + %s13014_s7]]   ;;  %s13018_s7 = smov 54  }
  0x60   :  { %15169 = sst [smem:[#allocation131_spill]] %s13318_s19 }
  0x61   :  { %15170 = sst [smem:[#allocation132_spill]] %s13323_s9 }
  0x62   :  { %15171 = sst [smem:[#allocation133_spill]] %s13328_s8 }
  0x63   :  { %s13338_s19 = sld [smem:[%s15037_s0 + %s13015_s15]]   ;;  %s13019_s15 = smov 55  }
  0x64   :  { %15172 = sst [smem:[#allocation134_spill]] %s13333_s17 }
  0x65   :  { %s13343_s9 = sld [smem:[%s15037_s0 + %s13016_s22]]   ;;  %s13020_s22 = smov 56  }
  0x66   :  { %s13348_s8 = sld [smem:[%s15037_s0 + %s13017_s28]]   ;;  %s13021_s28 = smov 57  }
  0x67   :  { %s13353_s17 = sld [smem:[%s15037_s0 + %s13018_s7]]   ;;  %s13022_s7 = smov 58  }
  0x69   :  { %15173 = sst [smem:[#allocation135_spill]] %s13338_s19 }
  0x6a   :  { %s13358_s19 = sld [smem:[%s15037_s0 + %s13019_s15]]   ;;  %s13023_s15 = smov 59  }
  0x6b   :  { %15174 = sst [smem:[#allocation136_spill]] %s13343_s9 }
  0x6c   :  { %15175 = sst [smem:[#allocation137_spill]] %s13348_s8 }
  0x6d   :  { %15176 = sst [smem:[#allocation138_spill]] %s13353_s17 }
  0x6e   :  { %s13363_s9 = sld [smem:[%s15037_s0 + %s13020_s22]]  }
  0x6f   :  { %s13368_s8 = sld [smem:[%s15037_s0 + %s13021_s28]]  }
  0x70   :  { %15177 = sst [smem:[#allocation139_spill]] %s13358_s19 }
  0x71   :  { %s13373_s17 = sld [smem:[%s15037_s0 + %s13022_s7]]  }
  0x72   :  { %s13378_s19 = sld [smem:[%s15037_s0 + %s13023_s15]]  }
  0x75   :  { %15178 = sst [smem:[#allocation140_spill]] %s13368_s8 }
  0x76   :  { %124 = vsyncpa [#allocation3], 0 }
  0x77   :  { %125 = vsyncpa [#allocation6], 0 }
  0x78   :  { %126 = vsyncpa [#allocation9], 0 }
  0x79   :  { %127 = vsyncpa [#allocation12], 0 }
  0x7a   :  { %128 = vsyncpa [#allocation15], 0 }
  0x7b   :  { %129 = vsyncpa [#allocation18], 0 }
  0x7c   :  { %130 = vsyncpa [#allocation21], 0 }
  0x7d   :  { %131 = vsyncpa [#allocation24], 0 }
  0x7e   :  { %132 = vsyncpa [#allocation27], 0 }
  0x7f   :  { %133 = vsyncpa [#allocation30], 0 }
  0x80   :  { %134 = vsyncpa [#allocation33], 0 }
  0x81   :  { %135 = vsyncpa [#allocation36], 0 }
  0x82   :  { %136 = vsyncpa [#allocation39], 0 }
  0x83   :  { %137 = vsyncpa [#allocation42], 0 }
  0x84   :  { %138 = vsyncpa [#allocation45], 0 }
  0x85   :  { %139 = vsyncpa [#allocation48], 0 }
  0x86   :  { %140 = vsyncpa [#allocation51], 0 }
  0x87   :  { %141 = vsyncpa [#allocation54], 0 }
  0x88   :  { %142 = vsyncpa [#allocation57], 0 }
  0x89   :  { %143 = vsyncpa [#allocation60], 0 }
  0x8a   :  { %144 = vsyncpa [#allocation63], 0 }
  0x8b   :  { %145 = vsyncpa [#allocation66], 0 }
  0x8c   :  { %146 = vsyncpa [#allocation4], 0 }
  0x8d   :  { %148 = vsyncpa [#allocation4 + $0x1], 0  ;;  %s13380_s0 = smov 0   ;;  %s13382_s22 = smov 0  }
  0x8e   :  { %s13384_s23 = smov 0   ;;  %s13386_s26 = smov 0  }
  0x8f LB: > { %s15179_s8 = sld [smem:[#allocation140_spill]]  ;;  %s15180_s12 = sld [smem:[#allocation103_spill]]  ;;  %s12959_s23 = sphi %s13384_s23, %s15251_s23   ;;  %s12955_s22 = sphi %s13382_s22, %s15253_s22   ;;  %s12951_s0 = sphi %s13380_s0, %s15252_s0   ;;  %s12963_s26 = sphi %s13386_s26, %s15249_s26  }
  0x90   : > { %s15181_s6 = sld [smem:[#allocation106_spill]]  ;;  %s15183_s4 = sld [smem:[#allocation109_spill]] }
  0x91   : > { %s15182_s5 = sld [smem:[#allocation114_spill]]  ;;  %s15185_s13 = sld [smem:[#allocation94_spill]] }
  0x92   : > { %s15184_s3 = sld [smem:[#allocation98_spill]]  ;;  %15186 = sst [smem:[#allocation141_spill]] %s12959_s23 }
  0x93   : > { %s13401_s28 = sadd.s32 4294967295, %s12963_s26   ;;  %s9108_s1 = sadd.s32 4294967294, %s12963_s26  }
  0x94   : > { %s13405_s2 = sadd.s32 1, %s12963_s26   ;;  %s1405_s7 = sadd.s32 1, %s12959_s23 }
  0x95   : > { %15187 = sst [smem:[#allocation142_spill]] %s13405_s2  ;;  %s1402_s10 = ssub.s32 %s12963_s26, %s13405_s2 }
  0x96   : > { %p1415_p0 = scmp.ne.s32.totalorder %s12959_s23, %s12955_s22  ;;  %p1403_p1 = scmp.eq.s32.totalorder %s1402_s10, 0 }
  0x97   : > { %p1416_p2 = scmp.eq.s32.totalorder %s13401_s28, 1  ;;  %p1421_p3 = scmp.ne.s32.totalorder %s12955_s22, %s12951_s0 }
  0x98   : > { %p1422_p4 = scmp.eq.s32.totalorder %s9108_s1, 1  ;;  %p9109_p7 = scmp.ge.s32.totalorder %s12963_s26, 1 }
  0x99   : > { %s13416_s11 = scalar_select %p1403_p1, %s12959_s23, %s1405_s7  }
  0x9a   : > { %p13418_p5 = por %p1416_p2, %p1415_p0  ;;  %p13422_p6 = por %p1422_p4, %p1421_p3 }
  0x9b   : > { %15188 = sst [smem:[#allocation143_spill]] %s13416_s11  ;;  %p1429_p8 = scmp.lt.s32.totalorder %s12963_s26, 3 }
  0x9c   : > { %s15189_s15 = scalar_select %p13418_p5, 1, 0 }
  0x9d   : > { %s15190_s16 = scalar_select %p13422_p6, 1, 0 }
  0x9e   : > { %p13428_p9 = pnand %p9109_p7, %p1429_p8 }
  0x9f   : > { %15191 = sst [smem:[#allocation144_spill]] %s15190_s16  ;;  %p11049_p10 = scmp.eq.s32.totalorder (!%p13428_p9), %s13401_s28, 0 }
  0xa0   : > { %1433 = sbr.rel (%p13428_p9) target bundleno = 1223 (0x4c7), region = 12  ;;  %s13024_s1 = smov (!%p13428_p9), [#allocation5]  }
  0xa1   : > { %s1455_s7 = sshll.u32 (!%p13428_p9), %s13024_s1, 4  ;;  %s13025_s10 = smov (!%p13428_p9), [#allocation8]   ;;  %s1456_s7 = int_to_ptr.vmem [resolvable:$true] %s1455_s7 }
  0xa2   : > { %s1479_s11 = sshll.u32 (!%p13428_p9), %s13025_s10, 4  ;;  %s11695_s23 = scalar_lea.hbm (!%p13428_p9), %s15185_s13, 16  ;;  %s1480_s11 = int_to_ptr.vmem [resolvable:$true] %s1479_s11 }
  0xa3   : > { %p11696_p11 = scmp.ne.s32.totalorder (!%p13428_p9), %s15185_s13, %s11695_s23  ;;  %p11701_p0 = scmp.lt.u32.totalorder (!%p13428_p9), %s11695_s23, %s15185_s13 }
  0xa5   : > { %p11697_p12 = pnand (!%p13428_p9), %p11696_p11, %p11049_p10 }
  0xa7   : > { %p11698_p13 = pneg %p11697_p12 }
  0xa9   : > { %p11703_p1 = pnand %p11701_p0, %p11698_p13 }
  0xab   : > { %11706 = shalt.err (!%p11703_p1)
}
  0xac   : > { %s11707_s2 = scalar_lea.vmem %s1456_s7, 16  ;;  %s11713_s16 = scalar_lea.vmem %s1456_s7, 32 }
  0xad   : > { %p11708_p2 = scmp.ne.s32.totalorder %s1456_s7, %s11707_s2  ;;  %p11714_p7 = scmp.lt.s32.totalorder %s1456_s7, %s1456_s7 }
  0xae   : > { %p11715_p8 = scmp.lt.s32.totalorder %s11713_s16, %s11707_s2 }
  0xaf   : > { %p11709_p3 = pnand %p11708_p2, %p11049_p10 }
  0xb0   : > { %p11716_p6 = por %p11715_p8, %p11714_p7 }
  0xb1   : > { %p11710_p4 = pneg %p11709_p3 }
  0xb3   : > { %p11717_p5 = pnand %p11716_p6, %p11710_p4 }
  0xb5   : > { %11720 = shalt.err (!%p11717_p5)
}
  0xb6   : > { %10874 = dma.hbm_to_vmem [thread:$0]  (%p11049_p10), %s15185_s13, 16, %s1456_s7, [#allocation6]  }
  0xb7   : > { %s11721_s23 = scalar_lea.hbm %s13103_s21, 16 }
  0xb8   : > { %p11722_p11 = scmp.ne.s32.totalorder %s13103_s21, %s11721_s23  ;;  %p11727_p0 = scmp.lt.u32.totalorder %s11721_s23, %s13103_s21 }
  0xba   : > { %p11723_p12 = pnand %p11722_p11, %p11049_p10 }
  0xbc   : > { %p11724_p13 = pneg %p11723_p12 }
  0xbe   : > { %p11729_p1 = pnand %p11727_p0, %p11724_p13 }
  0xc0   : > { %11732 = shalt.err (!%p11729_p1)
}
  0xc1   : > { %s11733_s2 = scalar_lea.vmem %s1480_s11, 16  ;;  %s11739_s16 = scalar_lea.vmem %s1480_s11, 32 }
  0xc2   : > { %p11734_p5 = scmp.ne.s32.totalorder %s1480_s11, %s11733_s2  ;;  %p11740_p3 = scmp.lt.s32.totalorder %s1480_s11, %s1480_s11 }
  0xc3   : > { %p11741_p4 = scmp.lt.s32.totalorder %s11739_s16, %s11733_s2 }
  0xc4   : > { %p11735_p6 = pnand %p11734_p5, %p11049_p10 }
  0xc5   : > { %p11742_p7 = por %p11741_p4, %p11740_p3 }
  0xc6   : > { %p11736_p2 = pneg %p11735_p6 }
  0xc8   : > { %p11743_p8 = pnand %p11742_p7, %p11736_p2 }
  0xca   : > { %11746 = shalt.err (!%p11743_p8)
}
  0xcb   : > { %10878 = dma.hbm_to_vmem [thread:$0]  (%p11049_p10), %s13103_s21, 16, %s1480_s11, [#allocation9]  }
  0xcc   : > { %s13026_s1 = smov [#allocation11]   ;;  %s13027_s10 = smov [#allocation14]  }
  0xcd   : > { %s1503_s7 = sshll.u32 %s13026_s1, 4  ;;  %s1527_s23 = sshll.u32 %s13027_s10, 4  ;;  %s1504_s7 = int_to_ptr.vmem [resolvable:$true] %s1503_s7  ;;  %s1528_s23 = int_to_ptr.vmem [resolvable:$true] %s1527_s23 }
  0xce   : > { %s11747_s13 = scalar_lea.hbm %s15184_s3, 1024 }
  0xcf   : > { %p11748_p11 = scmp.ne.s32.totalorder %s15184_s3, %s11747_s13  ;;  %p11753_p0 = scmp.lt.u32.totalorder %s11747_s13, %s15184_s3 }
  0xd1   : > { %p11749_p12 = pnand %p11748_p11, %p11049_p10 }
  0xd3   : > { %p11750_p13 = pneg %p11749_p12 }
  0xd5   : > { %p11755_p1 = pnand %p11753_p0, %p11750_p13 }
  0xd7   : > { %11758 = shalt.err (!%p11755_p1)
}
  0xd8   : > { %s11759_s2 = scalar_lea.vmem %s1504_s7, 1024  ;;  %p11766_p3 = scmp.lt.s32.totalorder %s1504_s7, %s1504_s7 }
  0xd9   : > { %p11760_p5 = scmp.ne.s32.totalorder %s1504_s7, %s11759_s2  ;;  %p11767_p4 = scmp.lt.s32.totalorder %s11759_s2, %s11759_s2 }
  0xdb   : > { %p11761_p6 = pnand %p11760_p5, %p11049_p10  ;;  %p11768_p7 = por %p11767_p4, %p11766_p3 }
  0xdd   : > { %p11762_p2 = pneg %p11761_p6 }
  0xdf   : > { %p11769_p8 = pnand %p11768_p7, %p11762_p2 }
  0xe1   : > { %11772 = shalt.err (!%p11769_p8)
}
  0xe2   : > { %s15086_s11 = smov 64   ;;  %s15088_s13 = smov 4  }
  0xe3   : > { %10882 = dma.hbm_to_vmem [thread:$0]  (%p11049_p10), %s15184_s3, 1024, %s1504_s7, [#allocation12], %s15086_s11, %s15086_s11, %s15088_s13  }
  0xe4   : > { %s11773_s16 = scalar_lea.hbm %s13128_s14, 1024 }
  0xe5   : > { %p11774_p11 = scmp.ne.s32.totalorder %s13128_s14, %s11773_s16  ;;  %p11779_p0 = scmp.lt.u32.totalorder %s11773_s16, %s13128_s14 }
  0xe7   : > { %p11775_p12 = pnand %p11774_p11, %p11049_p10 }
  0xe9   : > { %p11776_p13 = pneg %p11775_p12 }
  0xeb   : > { %p11781_p1 = pnand %p11779_p0, %p11776_p13 }
  0xed   : > { %11784 = shalt.err (!%p11781_p1)
}
  0xee   : > { %s11785_s1 = scalar_lea.vmem %s1528_s23, 1024  ;;  %p11792_p3 = scmp.lt.s32.totalorder %s1528_s23, %s1528_s23 }
  0xef   : > { %p11786_p5 = scmp.ne.s32.totalorder %s1528_s23, %s11785_s1  ;;  %p11793_p4 = scmp.lt.s32.totalorder %s11785_s1, %s11785_s1 }
  0xf1   : > { %p11787_p6 = pnand %p11786_p5, %p11049_p10  ;;  %p11794_p7 = por %p11793_p4, %p11792_p3 }
  0xf3   : > { %p11788_p2 = pneg %p11787_p6 }
  0xf5   : > { %p11795_p8 = pnand %p11794_p7, %p11788_p2 }
  0xf7   : > { %11798 = shalt.err (!%p11795_p8)
}
  0xf8   : > { %10886 = dma.hbm_to_vmem [thread:$0]  (%p11049_p10), %s13128_s14, 1024, %s1528_s23, [#allocation15], %s15086_s11, %s15086_s11, %s15088_s13  }
  0xf9   : > { %s13030_s7 = smov [#allocation17]   ;;  %s13031_s2 = smov [#allocation20]  }
  0xfa   : > { %s1551_s10 = sshll.u32 %s13030_s7, 4  ;;  %s1579_s16 = sshll.u32 %s13031_s2, 4  ;;  %s1552_s10 = int_to_ptr.vmem [resolvable:$true] %s1551_s10  ;;  %s1580_s16 = int_to_ptr.vmem [resolvable:$true] %s1579_s16 }
  0xfb   : > { %s11799_s1 = scalar_lea.hbm %s13138_s24, 1024 }
  0xfc   : > { %p11800_p11 = scmp.ne.s32.totalorder %s13138_s24, %s11799_s1  ;;  %p11805_p0 = scmp.lt.u32.totalorder %s11799_s1, %s13138_s24 }
  0xfe   : > { %p11801_p12 = pnand %p11800_p11, %p11049_p10 }
 0x100   : > { %p11802_p13 = pneg %p11801_p12 }
 0x102   : > { %p11807_p1 = pnand %p11805_p0, %p11802_p13 }
 0x104   : > { %11810 = shalt.err (!%p11807_p1)
}
 0x105   : > { %s11811_s3 = scalar_lea.vmem %s1552_s10, 1024  ;;  %p11818_p3 = scmp.lt.s32.totalorder %s1552_s10, %s1552_s10 }
 0x106   : > { %p11812_p5 = scmp.ne.s32.totalorder %s1552_s10, %s11811_s3  ;;  %p11819_p4 = scmp.lt.s32.totalorder %s11811_s3, %s11811_s3 }
 0x108   : > { %p11813_p6 = pnand %p11812_p5, %p11049_p10  ;;  %p11820_p7 = por %p11819_p4, %p11818_p3 }
 0x10a   : > { %p11814_p2 = pneg %p11813_p6 }
 0x10c   : > { %p11821_p8 = pnand %p11820_p7, %p11814_p2 }
 0x10e   : > { %11824 = shalt.err (!%p11821_p8)
}
 0x10f   : > { %10890 = dma.hbm_to_vmem [thread:$0]  (%p11049_p10), %s13138_s24, 1024, %s1552_s10, [#allocation18], %s15086_s11, %s15086_s11, %s15088_s13  }
 0x110   : > { %s11825_s23 = scalar_lea.hbm %s15180_s12, 16 }
 0x111   : > { %p11826_p11 = scmp.ne.s32.totalorder %s15180_s12, %s11825_s23  ;;  %p11831_p0 = scmp.lt.u32.totalorder %s11825_s23, %s15180_s12 }
 0x113   : > { %p11827_p12 = pnand %p11826_p11, %p11049_p10 }
 0x115   : > { %p11828_p13 = pneg %p11827_p12 }
 0x117   : > { %p11833_p1 = pnand %p11831_p0, %p11828_p13 }
 0x119   : > { %11836 = shalt.err (!%p11833_p1)
}
 0x11a   : > { %s11837_s3 = scalar_lea.vmem %s1580_s16, 16  ;;  %s11843_s7 = scalar_lea.vmem %s1580_s16, 32 }
 0x11b   : > { %p11838_p5 = scmp.ne.s32.totalorder %s1580_s16, %s11837_s3  ;;  %p11844_p3 = scmp.lt.s32.totalorder %s1580_s16, %s1580_s16 }
 0x11c   : > { %p11845_p4 = scmp.lt.s32.totalorder %s11843_s7, %s11837_s3 }
 0x11d   : > { %p11839_p6 = pnand %p11838_p5, %p11049_p10 }
 0x11e   : > { %p11846_p7 = por %p11845_p4, %p11844_p3 }
 0x11f   : > { %p11840_p2 = pneg %p11839_p6 }
 0x121   : > { %p11847_p8 = pnand %p11846_p7, %p11840_p2 }
 0x123   : > { %11850 = shalt.err (!%p11847_p8)
}
 0x124   : > { %10894 = dma.hbm_to_vmem [thread:$0]  (%p11049_p10), %s15180_s12, 16, %s1580_s16, [#allocation21]  }
 0x125   : > { %s13032_s10 = smov [#allocation23]   ;;  %s13033_s1 = smov [#allocation26]  }
 0x126   : > { %s1603_s2 = sshll.u32 %s13032_s10, 4  ;;  %s1627_s23 = sshll.u32 %s13033_s1, 4  ;;  %s1604_s2 = int_to_ptr.vmem [resolvable:$true] %s1603_s2  ;;  %s1628_s23 = int_to_ptr.vmem [resolvable:$true] %s1627_s23 }
 0x127   : > { %s11851_s11 = scalar_lea.hbm %s13163_s27, 16 }
 0x128   : > { %p11852_p11 = scmp.ne.s32.totalorder %s13163_s27, %s11851_s11  ;;  %p11857_p0 = scmp.lt.u32.totalorder %s11851_s11, %s13163_s27 }
 0x12a   : > { %p11853_p12 = pnand %p11852_p11, %p11049_p10 }
 0x12c   : > { %p11854_p13 = pneg %p11853_p12 }
 0x12e   : > { %p11859_p1 = pnand %p11857_p0, %p11854_p13 }
 0x130   : > { %11862 = shalt.err (!%p11859_p1)
}
 0x131   : > { %s11863_s3 = scalar_lea.vmem %s1604_s2, 16  ;;  %s11869_s16 = scalar_lea.vmem %s1604_s2, 32 }
 0x132   : > { %p11864_p5 = scmp.ne.s32.totalorder %s1604_s2, %s11863_s3  ;;  %p11870_p3 = scmp.lt.s32.totalorder %s1604_s2, %s1604_s2 }
 0x133   : > { %p11871_p4 = scmp.lt.s32.totalorder %s11869_s16, %s11863_s3 }
 0x134   : > { %p11865_p6 = pnand %p11864_p5, %p11049_p10 }
 0x135   : > { %p11872_p7 = por %p11871_p4, %p11870_p3 }
 0x136   : > { %p11866_p2 = pneg %p11865_p6 }
 0x138   : > { %p11873_p8 = pnand %p11872_p7, %p11866_p2 }
 0x13a   : > { %11876 = shalt.err (!%p11873_p8)
}
 0x13b   : > { %10898 = dma.hbm_to_vmem [thread:$0]  (%p11049_p10), %s13163_s27, 16, %s1604_s2, [#allocation24]  }
 0x13c   : > { %s11877_s11 = scalar_lea.hbm %s15181_s6, 16 }
 0x13d   : > { %p11878_p11 = scmp.ne.s32.totalorder %s15181_s6, %s11877_s11  ;;  %p11883_p0 = scmp.lt.u32.totalorder %s11877_s11, %s15181_s6 }
 0x13f   : > { %p11879_p12 = pnand %p11878_p11, %p11049_p10 }
 0x141   : > { %p11880_p13 = pneg %p11879_p12 }
 0x143   : > { %p11885_p1 = pnand %p11883_p0, %p11880_p13 }
 0x145   : > { %11888 = shalt.err (!%p11885_p1)
}
 0x146   : > { %s11889_s7 = scalar_lea.vmem %s1628_s23, 16  ;;  %s11895_s10 = scalar_lea.vmem %s1628_s23, 32 }
 0x147   : > { %p11890_p5 = scmp.ne.s32.totalorder %s1628_s23, %s11889_s7  ;;  %p11896_p3 = scmp.lt.s32.totalorder %s1628_s23, %s1628_s23 }
 0x148   : > { %p11897_p4 = scmp.lt.s32.totalorder %s11895_s10, %s11889_s7 }
 0x149   : > { %p11891_p6 = pnand %p11890_p5, %p11049_p10 }
 0x14a   : > { %p11898_p7 = por %p11897_p4, %p11896_p3 }
 0x14b   : > { %p11892_p2 = pneg %p11891_p6 }
 0x14d   : > { %p11899_p8 = pnand %p11898_p7, %p11892_p2 }
 0x14f   : > { %11902 = shalt.err (!%p11899_p8)
}
 0x150   : > { %10902 = dma.hbm_to_vmem [thread:$0]  (%p11049_p10), %s15181_s6, 16, %s1628_s23, [#allocation27]  }
 0x151   : > { %s13034_s2 = smov [#allocation29]   ;;  %s13035_s3 = smov [#allocation32]  }
 0x152   : > { %s1651_s1 = sshll.u32 %s13034_s2, 4  ;;  %s1675_s16 = sshll.u32 %s13035_s3, 4  ;;  %s1652_s1 = int_to_ptr.vmem [resolvable:$true] %s1651_s1  ;;  %s1676_s16 = int_to_ptr.vmem [resolvable:$true] %s1675_s16 }
 0x153   : > { %s11903_s11 = scalar_lea.hbm %s15183_s4, 1024 }
 0x154   : > { %p11904_p11 = scmp.ne.s32.totalorder %s15183_s4, %s11903_s11  ;;  %p11909_p0 = scmp.lt.u32.totalorder %s11903_s11, %s15183_s4 }
 0x156   : > { %p11905_p12 = pnand %p11904_p11, %p11049_p10 }
 0x158   : > { %p11906_p13 = pneg %p11905_p12 }
 0x15a   : > { %p11911_p1 = pnand %p11909_p0, %p11906_p13 }
 0x15c   : > { %11914 = shalt.err (!%p11911_p1)
}
 0x15d   : > { %s11915_s7 = scalar_lea.vmem %s1652_s1, 1024  ;;  %p11922_p3 = scmp.lt.s32.totalorder %s1652_s1, %s1652_s1 }
 0x15e   : > { %p11916_p5 = scmp.ne.s32.totalorder %s1652_s1, %s11915_s7  ;;  %p11923_p4 = scmp.lt.s32.totalorder %s11915_s7, %s11915_s7 }
 0x160   : > { %p11917_p6 = pnand %p11916_p5, %p11049_p10  ;;  %p11924_p7 = por %p11923_p4, %p11922_p3 }
 0x162   : > { %p11918_p2 = pneg %p11917_p6 }
 0x164   : > { %p11925_p8 = pnand %p11924_p7, %p11918_p2 }
 0x166   : > { %11928 = shalt.err (!%p11925_p8)
}
 0x167   : > { %s15193_s23 = smov 64   ;;  %s11929_s10 = scalar_lea.hbm %s13198_s25, 1024 }
 0x168   : > { %10906 = dma.hbm_to_vmem [thread:$0]  (%p11049_p10), %s15183_s4, 1024, %s1652_s1, [#allocation30], %s15193_s23, %s15193_s23, %s15088_s13  }
 0x169   : > { %p11930_p11 = scmp.ne.s32.totalorder %s13198_s25, %s11929_s10  ;;  %p11935_p0 = scmp.lt.u32.totalorder %s11929_s10, %s13198_s25 }
 0x16b   : > { %p11931_p12 = pnand %p11930_p11, %p11049_p10 }
 0x16d   : > { %p11932_p13 = pneg %p11931_p12 }
 0x16f   : > { %p11937_p1 = pnand %p11935_p0, %p11932_p13 }
 0x171   : > { %11940 = shalt.err (!%p11937_p1)
}
 0x172   : > { %s11941_s2 = scalar_lea.vmem %s1676_s16, 1024  ;;  %p11948_p3 = scmp.lt.s32.totalorder %s1676_s16, %s1676_s16 }
 0x173   : > { %p11942_p5 = scmp.ne.s32.totalorder %s1676_s16, %s11941_s2  ;;  %p11949_p4 = scmp.lt.s32.totalorder %s11941_s2, %s11941_s2 }
 0x175   : > { %p11943_p6 = pnand %p11942_p5, %p11049_p10  ;;  %p11950_p7 = por %p11949_p4, %p11948_p3 }
 0x177   : > { %p11944_p2 = pneg %p11943_p6 }
 0x179   : > { %p11951_p8 = pnand %p11950_p7, %p11944_p2 }
 0x17b   : > { %11954 = shalt.err (!%p11951_p8)
}
 0x17c   : > { %10910 = dma.hbm_to_vmem [thread:$0]  (%p11049_p10), %s13198_s25, 1024, %s1676_s16, [#allocation33], %s15193_s23, %s15193_s23, %s15088_s13  }
 0x17d   : > { %s13036_s1 = smov [#allocation35]   ;;  %s13037_s11 = smov [#allocation38]  }
 0x17e   : > { %s1699_s3 = sshll.u32 %s13036_s1, 4  ;;  %s1727_s7 = sshll.u32 %s13037_s11, 4  ;;  %s1700_s3 = int_to_ptr.vmem [resolvable:$true] %s1699_s3  ;;  %s1728_s7 = int_to_ptr.vmem [resolvable:$true] %s1727_s7 }
 0x17f   : > { %s11955_s10 = scalar_lea.hbm %s13208_s30, 1024 }
 0x180   : > { %p11956_p11 = scmp.ne.s32.totalorder %s13208_s30, %s11955_s10  ;;  %p11961_p0 = scmp.lt.u32.totalorder %s11955_s10, %s13208_s30 }
 0x182   : > { %p11957_p12 = pnand %p11956_p11, %p11049_p10 }
 0x184   : > { %p11958_p13 = pneg %p11957_p12 }
 0x186   : > { %p11963_p1 = pnand %p11961_p0, %p11958_p13 }
 0x188   : > { %11966 = shalt.err (!%p11963_p1)
}
 0x189   : > { %s11967_s2 = scalar_lea.vmem %s1700_s3, 1024  ;;  %p11974_p3 = scmp.lt.s32.totalorder %s1700_s3, %s1700_s3 }
 0x18a   : > { %p11968_p5 = scmp.ne.s32.totalorder %s1700_s3, %s11967_s2  ;;  %p11975_p4 = scmp.lt.s32.totalorder %s11967_s2, %s11967_s2 }
 0x18c   : > { %p11969_p6 = pnand %p11968_p5, %p11049_p10  ;;  %p11976_p7 = por %p11975_p4, %p11974_p3 }
 0x18e   : > { %p11970_p2 = pneg %p11969_p6 }
 0x190   : > { %p11977_p8 = pnand %p11976_p7, %p11970_p2 }
 0x192   : > { %11980 = shalt.err (!%p11977_p8)
}
 0x193   : > { %10914 = dma.hbm_to_vmem [thread:$0]  (%p11049_p10), %s13208_s30, 1024, %s1700_s3, [#allocation36], %s15193_s23, %s15193_s23, %s15088_s13  }
 0x194   : > { %s11981_s16 = scalar_lea.hbm %s15182_s5, 16 }
 0x195   : > { %p11982_p11 = scmp.ne.s32.totalorder %s15182_s5, %s11981_s16  ;;  %p11987_p0 = scmp.lt.u32.totalorder %s11981_s16, %s15182_s5 }
 0x197   : > { %p11983_p12 = pnand %p11982_p11, %p11049_p10 }
 0x199   : > { %p11984_p13 = pneg %p11983_p12 }
 0x19b   : > { %p11989_p1 = pnand %p11987_p0, %p11984_p13 }
 0x19d   : > { %11992 = shalt.err (!%p11989_p1)
}
 0x19e   : > { %s11993_s1 = scalar_lea.vmem %s1728_s7, 16  ;;  %s11999_s11 = scalar_lea.vmem %s1728_s7, 32 }
 0x19f   : > { %p11994_p5 = scmp.ne.s32.totalorder %s1728_s7, %s11993_s1  ;;  %p12000_p3 = scmp.lt.s32.totalorder %s1728_s7, %s1728_s7 }
 0x1a0   : > { %p12001_p4 = scmp.lt.s32.totalorder %s11999_s11, %s11993_s1 }
 0x1a1   : > { %p11995_p6 = pnand %p11994_p5, %p11049_p10 }
 0x1a2   : > { %p12002_p7 = por %p12001_p4, %p12000_p3 }
 0x1a3   : > { %p11996_p2 = pneg %p11995_p6 }
 0x1a5   : > { %p12003_p8 = pnand %p12002_p7, %p11996_p2 }
 0x1a7   : > { %12006 = shalt.err (!%p12003_p8)
}
 0x1a8   : > { %10918 = dma.hbm_to_vmem [thread:$0]  (%p11049_p10), %s15182_s5, 16, %s1728_s7, [#allocation39]  }
 0x1a9   : > { %s13038_s3 = smov [#allocation41]   ;;  %s13039_s2 = smov [#allocation44]  }
 0x1aa   : > { %s1751_s10 = sshll.u32 %s13038_s3, 4  ;;  %s1775_s16 = sshll.u32 %s13039_s2, 4  ;;  %s1752_s10 = int_to_ptr.vmem [resolvable:$true] %s1751_s10  ;;  %s1776_s16 = int_to_ptr.vmem [resolvable:$true] %s1775_s16 }
 0x1ab   : > { %s12007_s13 = scalar_lea.hbm %s13233_s20, 16 }
 0x1ac   : > { %p12008_p11 = scmp.ne.s32.totalorder %s13233_s20, %s12007_s13  ;;  %p12013_p0 = scmp.lt.u32.totalorder %s12007_s13, %s13233_s20 }
 0x1ae   : > { %p12009_p12 = pnand %p12008_p11, %p11049_p10 }
 0x1b0   : > { %p12010_p13 = pneg %p12009_p12 }
 0x1b2   : > { %p12015_p1 = pnand %p12013_p0, %p12010_p13 }
 0x1b4   : > { %12018 = shalt.err (!%p12015_p1)
}
 0x1b5   : > { %s12019_s1 = scalar_lea.vmem %s1752_s10, 16  ;;  %s12025_s7 = scalar_lea.vmem %s1752_s10, 32 }
 0x1b6   : > { %p12020_p5 = scmp.ne.s32.totalorder %s1752_s10, %s12019_s1  ;;  %p12026_p3 = scmp.lt.s32.totalorder %s1752_s10, %s1752_s10 }
 0x1b7   : > { %p12027_p4 = scmp.lt.s32.totalorder %s12025_s7, %s12019_s1 }
 0x1b8   : > { %p12021_p6 = pnand %p12020_p5, %p11049_p10 }
 0x1b9   : > { %p12028_p7 = por %p12027_p4, %p12026_p3 }
 0x1ba   : > { %p12022_p2 = pneg %p12021_p6 }
 0x1bc   : > { %p12029_p8 = pnand %p12028_p7, %p12022_p2 }
 0x1be   : > { %12032 = shalt.err (!%p12029_p8)
}
 0x1bf   : > { %10922 = dma.hbm_to_vmem [thread:$0]  (%p11049_p10), %s13233_s20, 16, %s1752_s10, [#allocation42]  }
 0x1c0   : > { %s12033_s13 = scalar_lea.hbm %s13243_s29, 16 }
 0x1c1   : > { %p12034_p11 = scmp.ne.s32.totalorder %s13243_s29, %s12033_s13  ;;  %p12039_p0 = scmp.lt.u32.totalorder %s12033_s13, %s13243_s29 }
 0x1c3   : > { %p12035_p12 = pnand %p12034_p11, %p11049_p10 }
 0x1c5   : > { %p12036_p13 = pneg %p12035_p12 }
 0x1c7   : > { %p12041_p1 = pnand %p12039_p0, %p12036_p13 }
 0x1c9   : > { %12044 = shalt.err (!%p12041_p1)
}
 0x1ca   : > { %s12045_s11 = scalar_lea.vmem %s1776_s16, 16  ;;  %s12051_s3 = scalar_lea.vmem %s1776_s16, 32 }
 0x1cb   : > { %p12046_p5 = scmp.ne.s32.totalorder %s1776_s16, %s12045_s11  ;;  %p12052_p3 = scmp.lt.s32.totalorder %s1776_s16, %s1776_s16 }
 0x1cc   : > { %p12053_p4 = scmp.lt.s32.totalorder %s12051_s3, %s12045_s11 }
 0x1cd   : > { %p12047_p6 = pnand %p12046_p5, %p11049_p10 }
 0x1ce   : > { %p12054_p7 = por %p12053_p4, %p12052_p3 }
 0x1cf   : > { %p12048_p2 = pneg %p12047_p6 }
 0x1d1   : > { %p12055_p8 = pnand %p12054_p7, %p12048_p2 }
 0x1d3   : > { %12058 = shalt.err (!%p12055_p8)
}
 0x1d4   : > { %s15194_s10 = sld [smem:[#allocation119_spill]]  ;;  %s13040_s2 = smov [#allocation47]  }
 0x1d5   : > { %10926 = dma.hbm_to_vmem [thread:$0]  (%p11049_p10), %s13243_s29, 16, %s1776_s16, [#allocation45]  }
 0x1d6   : > { %s1799_s1 = sshll.u32 %s13040_s2, 4  ;;  %s13041_s7 = smov [#allocation50]   ;;  %s1800_s1 = int_to_ptr.vmem [resolvable:$true] %s1799_s1 }
 0x1d7   : > { %s1823_s13 = sshll.u32 %s13041_s7, 4  ;;  %s1824_s13 = int_to_ptr.vmem [resolvable:$true] %s1823_s13 }
 0x1da   : > { %s12059_s4 = scalar_lea.hbm %s15194_s10, 1024 }
 0x1db   : > { %p12060_p11 = scmp.ne.s32.totalorder %s15194_s10, %s12059_s4  ;;  %p12065_p0 = scmp.lt.u32.totalorder %s12059_s4, %s15194_s10 }
 0x1dd   : > { %p12061_p12 = pnand %p12060_p11, %p11049_p10 }
 0x1df   : > { %p12062_p13 = pneg %p12061_p12 }
 0x1e1   : > { %p12067_p1 = pnand %p12065_p0, %p12062_p13 }
 0x1e3   : > { %12070 = shalt.err (!%p12067_p1)
}
 0x1e4   : > { %s12071_s11 = scalar_lea.vmem %s1800_s1, 1024  ;;  %p12078_p3 = scmp.lt.s32.totalorder %s1800_s1, %s1800_s1 }
 0x1e5   : > { %p12072_p5 = scmp.ne.s32.totalorder %s1800_s1, %s12071_s11  ;;  %p12079_p4 = scmp.lt.s32.totalorder %s12071_s11, %s12071_s11 }
 0x1e7   : > { %p12073_p6 = pnand %p12072_p5, %p11049_p10  ;;  %p12080_p7 = por %p12079_p4, %p12078_p3 }
 0x1e9   : > { %p12074_p2 = pneg %p12073_p6 }
 0x1eb   : > { %p12081_p8 = pnand %p12080_p7, %p12074_p2 }
 0x1ed   : > { %12084 = shalt.err (!%p12081_p8)
}
 0x1ee   : > { %s15195_s16 = smov 4   ;;  %s15196_s4 = sld [smem:[#allocation121_spill]] }
 0x1ef   : > { %10930 = dma.hbm_to_vmem [thread:$0]  (%p11049_p10), %s15194_s10, 1024, %s1800_s1, [#allocation48], %s15193_s23, %s15193_s23, %s15195_s16  }
 0x1f4   : > { %s12085_s3 = scalar_lea.hbm %s15196_s4, 1024 }
 0x1f5   : > { %p12086_p11 = scmp.ne.s32.totalorder %s15196_s4, %s12085_s3  ;;  %p12091_p0 = scmp.lt.u32.totalorder %s12085_s3, %s15196_s4 }
 0x1f7   : > { %p12087_p12 = pnand %p12086_p11, %p11049_p10 }
 0x1f9   : > { %p12088_p13 = pneg %p12087_p12 }
 0x1fb   : > { %p12093_p1 = pnand %p12091_p0, %p12088_p13 }
 0x1fd   : > { %12096 = shalt.err (!%p12093_p1)
}
 0x1fe   : > { %s12097_s2 = scalar_lea.vmem %s1824_s13, 1024  ;;  %p12104_p3 = scmp.lt.s32.totalorder %s1824_s13, %s1824_s13 }
 0x1ff   : > { %p12098_p5 = scmp.ne.s32.totalorder %s1824_s13, %s12097_s2  ;;  %p12105_p4 = scmp.lt.s32.totalorder %s12097_s2, %s12097_s2 }
 0x201   : > { %p12099_p6 = pnand %p12098_p5, %p11049_p10  ;;  %p12106_p7 = por %p12105_p4, %p12104_p3 }
 0x203   : > { %p12100_p2 = pneg %p12099_p6 }
 0x205   : > { %p12107_p8 = pnand %p12106_p7, %p12100_p2 }
 0x207   : > { %12110 = shalt.err (!%p12107_p8)
}
 0x208   : > { %s15197_s1 = sld [smem:[#allocation123_spill]]  ;;  %s13042_s7 = smov [#allocation53]  }
 0x209   : > { %10934 = dma.hbm_to_vmem [thread:$0]  (%p11049_p10), %s15196_s4, 1024, %s1824_s13, [#allocation51], %s15193_s23, %s15193_s23, %s15195_s16  }
 0x20a   : > { %s1847_s11 = sshll.u32 %s13042_s7, 4  ;;  %s13043_s3 = smov [#allocation56]   ;;  %s1848_s11 = int_to_ptr.vmem [resolvable:$true] %s1847_s11 }
 0x20b   : > { %s1875_s5 = sshll.u32 %s13043_s3, 4  ;;  %s1876_s5 = int_to_ptr.vmem [resolvable:$true] %s1875_s5 }
 0x20e   : > { %s12111_s2 = scalar_lea.hbm %s15197_s1, 1024 }
 0x20f   : > { %p12112_p11 = scmp.ne.s32.totalorder %s15197_s1, %s12111_s2  ;;  %p12117_p0 = scmp.lt.u32.totalorder %s12111_s2, %s15197_s1 }
 0x211   : > { %p12113_p12 = pnand %p12112_p11, %p11049_p10 }
 0x213   : > { %p12114_p13 = pneg %p12113_p12 }
 0x215   : > { %p12119_p1 = pnand %p12117_p0, %p12114_p13 }
 0x217   : > { %12122 = shalt.err (!%p12119_p1)
}
 0x218   : > { %s12123_s6 = scalar_lea.vmem %s1848_s11, 1024  ;;  %p12130_p3 = scmp.lt.s32.totalorder %s1848_s11, %s1848_s11 }
 0x219   : > { %p12124_p5 = scmp.ne.s32.totalorder %s1848_s11, %s12123_s6  ;;  %p12131_p4 = scmp.lt.s32.totalorder %s12123_s6, %s12123_s6 }
 0x21b   : > { %p12125_p6 = pnand %p12124_p5, %p11049_p10  ;;  %p12132_p7 = por %p12131_p4, %p12130_p3 }
 0x21d   : > { %p12126_p2 = pneg %p12125_p6 }
 0x21f   : > { %p12133_p8 = pnand %p12132_p7, %p12126_p2 }
 0x221   : > { %12136 = shalt.err (!%p12133_p8)
}
 0x222   : > { %s15198_s13 = sld [smem:[#allocation126_spill]] }
 0x223   : > { %10938 = dma.hbm_to_vmem [thread:$0]  (%p11049_p10), %s15197_s1, 1024, %s1848_s11, [#allocation54], %s15193_s23, %s15193_s23, %s15195_s16  }
 0x228   : > { %s12137_s7 = scalar_lea.hbm %s15198_s13, 16 }
 0x229   : > { %p12138_p11 = scmp.ne.s32.totalorder %s15198_s13, %s12137_s7  ;;  %p12143_p0 = scmp.lt.u32.totalorder %s12137_s7, %s15198_s13 }
 0x22b   : > { %p12139_p12 = pnand %p12138_p11, %p11049_p10 }
 0x22d   : > { %p12140_p13 = pneg %p12139_p12 }
 0x22f   : > { %p12145_p1 = pnand %p12143_p0, %p12140_p13 }
 0x231   : > { %12148 = shalt.err (!%p12145_p1)
}
 0x232   : > { %s12149_s6 = scalar_lea.vmem %s1876_s5, 16  ;;  %s12155_s3 = scalar_lea.vmem %s1876_s5, 32 }
 0x233   : > { %p12150_p5 = scmp.ne.s32.totalorder %s1876_s5, %s12149_s6  ;;  %p12156_p3 = scmp.lt.s32.totalorder %s1876_s5, %s1876_s5 }
 0x234   : > { %p12157_p4 = scmp.lt.s32.totalorder %s12155_s3, %s12149_s6 }
 0x235   : > { %p12151_p6 = pnand %p12150_p5, %p11049_p10 }
 0x236   : > { %p12158_p7 = por %p12157_p4, %p12156_p3 }
 0x237   : > { %p12152_p2 = pneg %p12151_p6 }
 0x239   : > { %p12159_p8 = pnand %p12158_p7, %p12152_p2 }
 0x23b   : > { %12162 = shalt.err (!%p12159_p8)
}
 0x23c   : > { %s15199_s11 = sld [smem:[#allocation128_spill]]  ;;  %s13044_s2 = smov [#allocation59]  }
 0x23d   : > { %10942 = dma.hbm_to_vmem [thread:$0]  (%p11049_p10), %s15198_s13, 16, %s1876_s5, [#allocation57]  }
 0x23e   : > { %s1899_s7 = sshll.u32 %s13044_s2, 4  ;;  %s13045_s1 = smov [#allocation62]   ;;  %s1900_s7 = int_to_ptr.vmem [resolvable:$true] %s1899_s7 }
 0x23f   : > { %s1927_s4 = sshll.u32 %s13045_s1, 4  ;;  %s1928_s4 = int_to_ptr.vmem [resolvable:$true] %s1927_s4 }
 0x242   : > { %s12163_s10 = scalar_lea.hbm %s15199_s11, 16 }
 0x243   : > { %p12164_p11 = scmp.ne.s32.totalorder %s15199_s11, %s12163_s10  ;;  %p12169_p0 = scmp.lt.u32.totalorder %s12163_s10, %s15199_s11 }
 0x245   : > { %p12165_p12 = pnand %p12164_p11, %p11049_p10 }
 0x247   : > { %p12166_p13 = pneg %p12165_p12 }
 0x249   : > { %p12171_p1 = pnand %p12169_p0, %p12166_p13 }
 0x24b   : > { %12174 = shalt.err (!%p12171_p1)
}
 0x24c   : > { %s12175_s6 = scalar_lea.vmem %s1900_s7, 16  ;;  %s12181_s5 = scalar_lea.vmem %s1900_s7, 32 }
 0x24d   : > { %p12176_p5 = scmp.ne.s32.totalorder %s1900_s7, %s12175_s6  ;;  %p12182_p3 = scmp.lt.s32.totalorder %s1900_s7, %s1900_s7 }
 0x24e   : > { %p12183_p4 = scmp.lt.s32.totalorder %s12181_s5, %s12175_s6 }
 0x24f   : > { %p12177_p6 = pnand %p12176_p5, %p11049_p10 }
 0x250   : > { %p12184_p7 = por %p12183_p4, %p12182_p3 }
 0x251   : > { %p12178_p2 = pneg %p12177_p6 }
 0x253   : > { %p12185_p8 = pnand %p12184_p7, %p12178_p2 }
 0x255   : > { %12188 = shalt.err (!%p12185_p8)
}
 0x256   : > { %s15200_s1 = sld [smem:[#allocation132_spill]] }
 0x257   : > { %10946 = dma.hbm_to_vmem [thread:$0]  (%p11049_p10), %s15199_s11, 16, %s1900_s7, [#allocation60]  }
 0x25c   : > { %s12189_s10 = scalar_lea.hbm %s15200_s1, 16 }
 0x25d   : > { %p12190_p11 = scmp.ne.s32.totalorder %s15200_s1, %s12189_s10  ;;  %p12195_p0 = scmp.lt.u32.totalorder %s12189_s10, %s15200_s1 }
 0x25f   : > { %p12191_p12 = pnand %p12190_p11, %p11049_p10 }
 0x261   : > { %p12192_p13 = pneg %p12191_p12 }
 0x263   : > { %p12197_p1 = pnand %p12195_p0, %p12192_p13 }
 0x265   : > { %12200 = shalt.err (!%p12197_p1)
}
 0x266   : > { %s12201_s3 = scalar_lea.vmem %s1928_s4, 16  ;;  %s12207_s2 = scalar_lea.vmem %s1928_s4, 32 }
 0x267   : > { %p12202_p5 = scmp.ne.s32.totalorder %s1928_s4, %s12201_s3  ;;  %p12208_p3 = scmp.lt.s32.totalorder %s1928_s4, %s1928_s4 }
 0x268   : > { %p12209_p4 = scmp.lt.s32.totalorder %s12207_s2, %s12201_s3 }
 0x269   : > { %p12203_p6 = pnand %p12202_p5, %p11049_p10 }
 0x26a   : > { %p12210_p7 = por %p12209_p4, %p12208_p3 }
 0x26b   : > { %p12204_p2 = pneg %p12203_p6 }
 0x26d   : > { %p12211_p8 = pnand %p12210_p7, %p12204_p2 }
 0x26f   : > { %12214 = shalt.err (!%p12211_p8)
}
 0x270   : > { %s15201_s7 = sld [smem:[#allocation136_spill]]  ;;  %s13046_s6 = smov [#allocation65]  }
 0x271   : > { %10950 = dma.hbm_to_vmem [thread:$0]  (%p11049_p10), %s15200_s1, 16, %s1928_s4, [#allocation63]  }
 0x272   : > { %s1955_s5 = sshll.u32 %s13046_s6, 4  ;;  %s1956_s5 = int_to_ptr.vmem [resolvable:$true] %s1955_s5 }
 0x276   : > { %s12215_s10 = scalar_lea.hbm %s15201_s7, 32 }
 0x277   : > { %p12216_p11 = scmp.ne.s32.totalorder %s15201_s7, %s12215_s10  ;;  %p12221_p0 = scmp.lt.u32.totalorder %s12215_s10, %s15201_s7 }
 0x279   : > { %p12217_p12 = pnand %p12216_p11, %p11049_p10 }
 0x27b   : > { %p12218_p13 = pneg %p12217_p12 }
 0x27d   : > { %p12223_p1 = pnand %p12221_p0, %p12218_p13 }
 0x27f   : > { %12226 = shalt.err (!%p12223_p1)
}
 0x280   : > { %s12227_s3 = scalar_lea.vmem %s1956_s5, 32  ;;  %p12234_p3 = scmp.lt.s32.totalorder %s1956_s5, %s1956_s5 }
 0x281   : > { %p12228_p5 = scmp.ne.s32.totalorder %s1956_s5, %s12227_s3  ;;  %p12235_p4 = scmp.lt.s32.totalorder %s12227_s3, %s12227_s3 }
 0x283   : > { %p12229_p6 = pnand %p12228_p5, %p11049_p10  ;;  %p12236_p7 = por %p12235_p4, %p12234_p3 }
 0x285   : > { %p12230_p2 = pneg %p12229_p6 }
 0x287   : > { %p12237_p8 = pnand %p12236_p7, %p12230_p2 }
 0x289   : > { %12240 = shalt.err (!%p12237_p8)
}
 0x28a   : > { %s15202_s4 = sld [smem:[#allocation93_spill]]  ;;  %s13047_s2 = smov [#allocation2]  }
 0x28b   : > { %10954 = dma.hbm_to_vmem [thread:$0]  (%p11049_p10), %s15201_s7, 32, %s1956_s5, [#allocation66]  }
 0x28c   : > { %s1441_s6 = sshll.u32 %s13047_s2, 4  ;;  %s13048_s10 = smov [#allocation7]   ;;  %s1442_s6 = int_to_ptr.vmem [resolvable:$true] %s1441_s6 }
 0x28d   : > { %s1465_s1 = sshll.u32 %s13048_s10, 4  ;;  %s1466_s1 = int_to_ptr.vmem [resolvable:$true] %s1465_s1 }
 0x290   : > { %s12241_s11 = scalar_lea.hbm %s15202_s4, 1024 }
 0x291   : > { %p12242_p11 = scmp.ne.s32.totalorder %s15202_s4, %s12241_s11  ;;  %p12247_p0 = scmp.lt.u32.totalorder %s12241_s11, %s15202_s4 }
 0x293   : > { %p12243_p12 = pnand %p12242_p11, %p11049_p10 }
 0x295   : > { %p12244_p13 = pneg %p12243_p12 }
 0x297   : > { %p12249_p1 = pnand %p12247_p0, %p12244_p13 }
 0x299   : > { %12252 = shalt.err (!%p12249_p1)
}
 0x29a   : > { %s12253_s3 = scalar_lea.vmem %s1442_s6, 1024  ;;  %p12260_p3 = scmp.lt.s32.totalorder %s1442_s6, %s1442_s6 }
 0x29b   : > { %p12254_p5 = scmp.ne.s32.totalorder %s1442_s6, %s12253_s3  ;;  %p12261_p4 = scmp.lt.s32.totalorder %s12253_s3, %s12253_s3 }
 0x29d   : > { %p12255_p6 = pnand %p12254_p5, %p11049_p10  ;;  %p12262_p7 = por %p12261_p4, %p12260_p3 }
 0x29f   : > { %p12256_p2 = pneg %p12255_p6 }
 0x2a1   : > { %p12263_p8 = pnand %p12262_p7, %p12256_p2 }
 0x2a3   : > { %12266 = shalt.err (!%p12263_p8)
}
 0x2a4   : > { %s15203_s11 = sld [smem:[#allocation95_spill]] }
 0x2a5   : > { %10872 = dma.hbm_to_vmem [thread:$0]  (%p11049_p10), %s15202_s4, 1024, %s1442_s6, [#allocation3], %s15193_s23, %s15193_s23, %s15195_s16  }
 0x2aa   : > { %s12267_s5 = scalar_lea.hbm %s15203_s11, 1024 }
 0x2ab   : > { %p12268_p11 = scmp.ne.s32.totalorder %s15203_s11, %s12267_s5  ;;  %p12273_p0 = scmp.lt.u32.totalorder %s12267_s5, %s15203_s11 }
 0x2ad   : > { %p12269_p12 = pnand %p12268_p11, %p11049_p10 }
 0x2af   : > { %p12270_p13 = pneg %p12269_p12 }
 0x2b1   : > { %p12275_p1 = pnand %p12273_p0, %p12270_p13 }
 0x2b3   : > { %12278 = shalt.err (!%p12275_p1)
}
 0x2b4   : > { %s12279_s2 = scalar_lea.vmem %s1466_s1, 1024  ;;  %p12286_p3 = scmp.lt.s32.totalorder %s1466_s1, %s1466_s1 }
 0x2b5   : > { %p12280_p5 = scmp.ne.s32.totalorder %s1466_s1, %s12279_s2  ;;  %p12287_p4 = scmp.lt.s32.totalorder %s12279_s2, %s12279_s2 }
 0x2b7   : > { %p12281_p6 = pnand %p12280_p5, %p11049_p10  ;;  %p12288_p7 = por %p12287_p4, %p12286_p3 }
 0x2b9   : > { %p12282_p2 = pneg %p12281_p6 }
 0x2bb   : > { %p12289_p8 = pnand %p12288_p7, %p12282_p2 }
 0x2bd   : > { %12292 = shalt.err (!%p12289_p8)
}
 0x2be   : > { %s15204_s6 = sld [smem:[#allocation97_spill]]  ;;  %s13049_s10 = smov [#allocation10]  }
 0x2bf   : > { %10876 = dma.hbm_to_vmem [thread:$0]  (%p11049_p10), %s15203_s11, 1024, %s1466_s1, [#allocation6], %s15193_s23, %s15193_s23, %s15195_s16  }
 0x2c0   : > { %s1493_s3 = sshll.u32 %s13049_s10, 4  ;;  %s13050_s5 = smov [#allocation13]   ;;  %s1494_s3 = int_to_ptr.vmem [resolvable:$true] %s1493_s3 }
 0x2c1   : > { %s1517_s4 = sshll.u32 %s13050_s5, 4  ;;  %s1518_s4 = int_to_ptr.vmem [resolvable:$true] %s1517_s4 }
 0x2c4   : > { %s12293_s2 = scalar_lea.hbm %s15204_s6, 16 }
 0x2c5   : > { %p12294_p11 = scmp.ne.s32.totalorder %s15204_s6, %s12293_s2  ;;  %p12299_p0 = scmp.lt.u32.totalorder %s12293_s2, %s15204_s6 }
 0x2c7   : > { %p12295_p12 = pnand %p12294_p11, %p11049_p10 }
 0x2c9   : > { %p12296_p13 = pneg %p12295_p12 }
 0x2cb   : > { %p12301_p1 = pnand %p12299_p0, %p12296_p13 }
 0x2cd   : > { %12304 = shalt.err (!%p12301_p1)
}
 0x2ce   : > { %s12305_s7 = scalar_lea.vmem %s1494_s3, 16  ;;  %s12311_s1 = scalar_lea.vmem %s1494_s3, 32 }
 0x2cf   : > { %p12306_p5 = scmp.ne.s32.totalorder %s1494_s3, %s12305_s7  ;;  %p12312_p3 = scmp.lt.s32.totalorder %s1494_s3, %s1494_s3 }
 0x2d0   : > { %p12313_p4 = scmp.lt.s32.totalorder %s12311_s1, %s12305_s7 }
 0x2d1   : > { %p12307_p6 = pnand %p12306_p5, %p11049_p10 }
 0x2d2   : > { %p12314_p7 = por %p12313_p4, %p12312_p3 }
 0x2d3   : > { %p12308_p2 = pneg %p12307_p6 }
 0x2d5   : > { %p12315_p8 = pnand %p12314_p7, %p12308_p2 }
 0x2d7   : > { %12318 = shalt.err (!%p12315_p8)
}
 0x2d8   : > { %s15205_s10 = sld [smem:[#allocation99_spill]] }
 0x2d9   : > { %10880 = dma.hbm_to_vmem [thread:$0]  (%p11049_p10), %s15204_s6, 16, %s1494_s3, [#allocation9]  }
 0x2de   : > { %s12319_s5 = scalar_lea.hbm %s15205_s10, 16 }
 0x2df   : > { %p12320_p11 = scmp.ne.s32.totalorder %s15205_s10, %s12319_s5  ;;  %p12325_p0 = scmp.lt.u32.totalorder %s12319_s5, %s15205_s10 }
 0x2e1   : > { %p12321_p12 = pnand %p12320_p11, %p11049_p10 }
 0x2e3   : > { %p12322_p13 = pneg %p12321_p12 }
 0x2e5   : > { %p12327_p1 = pnand %p12325_p0, %p12322_p13 }
 0x2e7   : > { %12330 = shalt.err (!%p12327_p1)
}
 0x2e8   : > { %s12331_s7 = scalar_lea.vmem %s1518_s4, 16  ;;  %s12337_s2 = scalar_lea.vmem %s1518_s4, 32 }
 0x2e9   : > { %p12332_p5 = scmp.ne.s32.totalorder %s1518_s4, %s12331_s7  ;;  %p12338_p3 = scmp.lt.s32.totalorder %s1518_s4, %s1518_s4 }
 0x2ea   : > { %p12339_p4 = scmp.lt.s32.totalorder %s12337_s2, %s12331_s7 }
 0x2eb   : > { %p12333_p6 = pnand %p12332_p5, %p11049_p10 }
 0x2ec   : > { %p12340_p7 = por %p12339_p4, %p12338_p3 }
 0x2ed   : > { %p12334_p2 = pneg %p12333_p6 }
 0x2ef   : > { %p12341_p8 = pnand %p12340_p7, %p12334_p2 }
 0x2f1   : > { %12344 = shalt.err (!%p12341_p8)
}
 0x2f2   : > { %s15206_s3 = sld [smem:[#allocation100_spill]]  ;;  %s13051_s1 = smov [#allocation16]  }
 0x2f3   : > { %10884 = dma.hbm_to_vmem [thread:$0]  (%p11049_p10), %s15205_s10, 16, %s1518_s4, [#allocation12]  }
 0x2f4   : > { %s1541_s5 = sshll.u32 %s13051_s1, 4  ;;  %s13052_s6 = smov [#allocation19]   ;;  %s1542_s5 = int_to_ptr.vmem [resolvable:$true] %s1541_s5 }
 0x2f5   : > { %s1565_s11 = sshll.u32 %s13052_s6, 4  ;;  %s1566_s11 = int_to_ptr.vmem [resolvable:$true] %s1565_s11 }
 0x2f8   : > { %s12345_s12 = scalar_lea.hbm %s15206_s3, 16 }
 0x2f9   : > { %p12346_p11 = scmp.ne.s32.totalorder %s15206_s3, %s12345_s12  ;;  %p12351_p0 = scmp.lt.u32.totalorder %s12345_s12, %s15206_s3 }
 0x2fb   : > { %p12347_p12 = pnand %p12346_p11, %p11049_p10 }
 0x2fd   : > { %p12348_p13 = pneg %p12347_p12 }
 0x2ff   : > { %p12353_p1 = pnand %p12351_p0, %p12348_p13 }
 0x301   : > { %12356 = shalt.err (!%p12353_p1)
}
 0x302   : > { %s12357_s7 = scalar_lea.vmem %s1542_s5, 16  ;;  %s12363_s4 = scalar_lea.vmem %s1542_s5, 32 }
 0x303   : > { %p12358_p5 = scmp.ne.s32.totalorder %s1542_s5, %s12357_s7  ;;  %p12364_p3 = scmp.lt.s32.totalorder %s1542_s5, %s1542_s5 }
 0x304   : > { %p12365_p4 = scmp.lt.s32.totalorder %s12363_s4, %s12357_s7 }
 0x305   : > { %p12359_p6 = pnand %p12358_p5, %p11049_p10 }
 0x306   : > { %p12366_p7 = por %p12365_p4, %p12364_p3 }
 0x307   : > { %p12360_p2 = pneg %p12359_p6 }
 0x309   : > { %p12367_p8 = pnand %p12366_p7, %p12360_p2 }
 0x30b   : > { %12370 = shalt.err (!%p12367_p8)
}
 0x30c   : > { %s15207_s6 = sld [smem:[#allocation101_spill]] }
 0x30d   : > { %10888 = dma.hbm_to_vmem [thread:$0]  (%p11049_p10), %s15206_s3, 16, %s1542_s5, [#allocation15]  }
 0x312   : > { %s12371_s12 = scalar_lea.hbm %s15207_s6, 16 }
 0x313   : > { %p12372_p11 = scmp.ne.s32.totalorder %s15207_s6, %s12371_s12  ;;  %p12377_p0 = scmp.lt.u32.totalorder %s12371_s12, %s15207_s6 }
 0x315   : > { %p12373_p12 = pnand %p12372_p11, %p11049_p10 }
 0x317   : > { %p12374_p13 = pneg %p12373_p12 }
 0x319   : > { %p12379_p1 = pnand %p12377_p0, %p12374_p13 }
 0x31b   : > { %12382 = shalt.err (!%p12379_p1)
}
 0x31c   : > { %s12383_s2 = scalar_lea.vmem %s1566_s11, 16  ;;  %s12389_s1 = scalar_lea.vmem %s1566_s11, 32 }
 0x31d   : > { %p12384_p5 = scmp.ne.s32.totalorder %s1566_s11, %s12383_s2  ;;  %p12390_p3 = scmp.lt.s32.totalorder %s1566_s11, %s1566_s11 }
 0x31e   : > { %p12391_p4 = scmp.lt.s32.totalorder %s12389_s1, %s12383_s2 }
 0x31f   : > { %p12385_p6 = pnand %p12384_p5, %p11049_p10 }
 0x320   : > { %p12392_p7 = por %p12391_p4, %p12390_p3 }
 0x321   : > { %p12386_p2 = pneg %p12385_p6 }
 0x323   : > { %p12393_p8 = pnand %p12392_p7, %p12386_p2 }
 0x325   : > { %12396 = shalt.err (!%p12393_p8)
}
 0x326   : > { %s15208_s5 = sld [smem:[#allocation104_spill]]  ;;  %s13053_s7 = smov [#allocation22]  }
 0x327   : > { %10892 = dma.hbm_to_vmem [thread:$0]  (%p11049_p10), %s15207_s6, 16, %s1566_s11, [#allocation18]  }
 0x328   : > { %s1589_s4 = sshll.u32 %s13053_s7, 4  ;;  %s13054_s12 = smov [#allocation25]   ;;  %s1590_s4 = int_to_ptr.vmem [resolvable:$true] %s1589_s4 }
 0x329   : > { %s1613_s3 = sshll.u32 %s13054_s12, 4  ;;  %s1614_s3 = int_to_ptr.vmem [resolvable:$true] %s1613_s3 }
 0x32c   : > { %s12397_s10 = scalar_lea.hbm %s15208_s5, 1024 }
 0x32d   : > { %p12398_p11 = scmp.ne.s32.totalorder %s15208_s5, %s12397_s10  ;;  %p12403_p0 = scmp.lt.u32.totalorder %s12397_s10, %s15208_s5 }
 0x32f   : > { %p12399_p12 = pnand %p12398_p11, %p11049_p10 }
 0x331   : > { %p12400_p13 = pneg %p12399_p12 }
 0x333   : > { %p12405_p1 = pnand %p12403_p0, %p12400_p13 }
 0x335   : > { %12408 = shalt.err (!%p12405_p1)
}
 0x336   : > { %s12409_s2 = scalar_lea.vmem %s1590_s4, 1024  ;;  %p12416_p3 = scmp.lt.s32.totalorder %s1590_s4, %s1590_s4 }
 0x337   : > { %p12410_p5 = scmp.ne.s32.totalorder %s1590_s4, %s12409_s2  ;;  %p12417_p4 = scmp.lt.s32.totalorder %s12409_s2, %s12409_s2 }
 0x339   : > { %p12411_p6 = pnand %p12410_p5, %p11049_p10  ;;  %p12418_p7 = por %p12417_p4, %p12416_p3 }
 0x33b   : > { %p12412_p2 = pneg %p12411_p6 }
 0x33d   : > { %p12419_p8 = pnand %p12418_p7, %p12412_p2 }
 0x33f   : > { %12422 = shalt.err (!%p12419_p8)
}
 0x340   : > { %s15209_s11 = sld [smem:[#allocation105_spill]] }
 0x341   : > { %10896 = dma.hbm_to_vmem [thread:$0]  (%p11049_p10), %s15208_s5, 1024, %s1590_s4, [#allocation21], %s15193_s23, %s15193_s23, %s15195_s16  }
 0x346   : > { %s12423_s10 = scalar_lea.hbm %s15209_s11, 1024 }
 0x347   : > { %p12424_p11 = scmp.ne.s32.totalorder %s15209_s11, %s12423_s10  ;;  %p12429_p0 = scmp.lt.u32.totalorder %s12423_s10, %s15209_s11 }
 0x349   : > { %p12425_p12 = pnand %p12424_p11, %p11049_p10 }
 0x34b   : > { %p12426_p13 = pneg %p12425_p12 }
 0x34d   : > { %p12431_p1 = pnand %p12429_p0, %p12426_p13 }
 0x34f   : > { %12434 = shalt.err (!%p12431_p1)
}
 0x350   : > { %s12435_s1 = scalar_lea.vmem %s1614_s3, 1024  ;;  %p12442_p3 = scmp.lt.s32.totalorder %s1614_s3, %s1614_s3 }
 0x351   : > { %p12436_p5 = scmp.ne.s32.totalorder %s1614_s3, %s12435_s1  ;;  %p12443_p4 = scmp.lt.s32.totalorder %s12435_s1, %s12435_s1 }
 0x353   : > { %p12437_p6 = pnand %p12436_p5, %p11049_p10  ;;  %p12444_p7 = por %p12443_p4, %p12442_p3 }
 0x355   : > { %p12438_p2 = pneg %p12437_p6 }
 0x357   : > { %p12445_p8 = pnand %p12444_p7, %p12438_p2 }
 0x359   : > { %12448 = shalt.err (!%p12445_p8)
}
 0x35a   : > { %s15210_s7 = sld [smem:[#allocation108_spill]]  ;;  %s13055_s4 = smov [#allocation28]  }
 0x35b   : > { %10900 = dma.hbm_to_vmem [thread:$0]  (%p11049_p10), %s15209_s11, 1024, %s1614_s3, [#allocation24], %s15193_s23, %s15193_s23, %s15195_s16  }
 0x35c   : > { %s1641_s12 = sshll.u32 %s13055_s4, 4  ;;  %s13056_s2 = smov [#allocation31]   ;;  %s1642_s12 = int_to_ptr.vmem [resolvable:$true] %s1641_s12 }
 0x35d   : > { %s1665_s10 = sshll.u32 %s13056_s2, 4  ;;  %s1666_s10 = int_to_ptr.vmem [resolvable:$true] %s1665_s10 }
 0x360   : > { %s12449_s1 = scalar_lea.hbm %s15210_s7, 16 }
 0x361   : > { %p12450_p11 = scmp.ne.s32.totalorder %s15210_s7, %s12449_s1  ;;  %p12455_p0 = scmp.lt.u32.totalorder %s12449_s1, %s15210_s7 }
 0x363   : > { %p12451_p12 = pnand %p12450_p11, %p11049_p10 }
 0x365   : > { %p12452_p13 = pneg %p12451_p12 }
 0x367   : > { %p12457_p1 = pnand %p12455_p0, %p12452_p13 }
 0x369   : > { %12460 = shalt.err (!%p12457_p1)
}
 0x36a   : > { %s12461_s5 = scalar_lea.vmem %s1642_s12, 16  ;;  %s12467_s3 = scalar_lea.vmem %s1642_s12, 32 }
 0x36b   : > { %p12462_p5 = scmp.ne.s32.totalorder %s1642_s12, %s12461_s5  ;;  %p12468_p3 = scmp.lt.s32.totalorder %s1642_s12, %s1642_s12 }
 0x36c   : > { %p12469_p4 = scmp.lt.s32.totalorder %s12467_s3, %s12461_s5 }
 0x36d   : > { %p12463_p6 = pnand %p12462_p5, %p11049_p10 }
 0x36e   : > { %p12470_p7 = por %p12469_p4, %p12468_p3 }
 0x36f   : > { %p12464_p2 = pneg %p12463_p6 }
 0x371   : > { %p12471_p8 = pnand %p12470_p7, %p12464_p2 }
 0x373   : > { %12474 = shalt.err (!%p12471_p8)
}
 0x374   : > { %s15211_s4 = sld [smem:[#allocation110_spill]] }
 0x375   : > { %10904 = dma.hbm_to_vmem [thread:$0]  (%p11049_p10), %s15210_s7, 16, %s1642_s12, [#allocation27]  }
 0x37a   : > { %s12475_s2 = scalar_lea.hbm %s15211_s4, 16 }
 0x37b   : > { %p12476_p11 = scmp.ne.s32.totalorder %s15211_s4, %s12475_s2  ;;  %p12481_p0 = scmp.lt.u32.totalorder %s12475_s2, %s15211_s4 }
 0x37d   : > { %p12477_p12 = pnand %p12476_p11, %p11049_p10 }
 0x37f   : > { %p12478_p13 = pneg %p12477_p12 }
 0x381   : > { %p12483_p1 = pnand %p12481_p0, %p12478_p13 }
 0x383   : > { %12486 = shalt.err (!%p12483_p1)
}
 0x384   : > { %s12487_s5 = scalar_lea.vmem %s1666_s10, 16  ;;  %s12493_s1 = scalar_lea.vmem %s1666_s10, 32 }
 0x385   : > { %p12488_p5 = scmp.ne.s32.totalorder %s1666_s10, %s12487_s5  ;;  %p12494_p3 = scmp.lt.s32.totalorder %s1666_s10, %s1666_s10 }
 0x386   : > { %p12495_p4 = scmp.lt.s32.totalorder %s12493_s1, %s12487_s5 }
 0x387   : > { %p12489_p6 = pnand %p12488_p5, %p11049_p10 }
 0x388   : > { %p12496_p7 = por %p12495_p4, %p12494_p3 }
 0x389   : > { %p12490_p2 = pneg %p12489_p6 }
 0x38b   : > { %p12497_p8 = pnand %p12496_p7, %p12490_p2 }
 0x38d   : > { %12500 = shalt.err (!%p12497_p8)
}
 0x38e   : > { %s15212_s12 = sld [smem:[#allocation111_spill]]  ;;  %s13057_s3 = smov [#allocation34]  }
 0x38f   : > { %10908 = dma.hbm_to_vmem [thread:$0]  (%p11049_p10), %s15211_s4, 16, %s1666_s10, [#allocation30]  }
 0x390   : > { %s1689_s2 = sshll.u32 %s13057_s3, 4  ;;  %s13058_s6 = smov [#allocation37]   ;;  %s1690_s2 = int_to_ptr.vmem [resolvable:$true] %s1689_s2 }
 0x391   : > { %s1713_s7 = sshll.u32 %s13058_s6, 4  ;;  %s1714_s7 = int_to_ptr.vmem [resolvable:$true] %s1713_s7 }
 0x394   : > { %s12501_s11 = scalar_lea.hbm %s15212_s12, 16 }
 0x395   : > { %p12502_p11 = scmp.ne.s32.totalorder %s15212_s12, %s12501_s11  ;;  %p12507_p0 = scmp.lt.u32.totalorder %s12501_s11, %s15212_s12 }
 0x397   : > { %p12503_p12 = pnand %p12502_p11, %p11049_p10 }
 0x399   : > { %p12504_p13 = pneg %p12503_p12 }
 0x39b   : > { %p12509_p1 = pnand %p12507_p0, %p12504_p13 }
 0x39d   : > { %12512 = shalt.err (!%p12509_p1)
}
 0x39e   : > { %s12513_s5 = scalar_lea.vmem %s1690_s2, 16  ;;  %s12519_s10 = scalar_lea.vmem %s1690_s2, 32 }
 0x39f   : > { %p12514_p5 = scmp.ne.s32.totalorder %s1690_s2, %s12513_s5  ;;  %p12520_p3 = scmp.lt.s32.totalorder %s1690_s2, %s1690_s2 }
 0x3a0   : > { %p12521_p4 = scmp.lt.s32.totalorder %s12519_s10, %s12513_s5 }
 0x3a1   : > { %p12515_p6 = pnand %p12514_p5, %p11049_p10 }
 0x3a2   : > { %p12522_p7 = por %p12521_p4, %p12520_p3 }
 0x3a3   : > { %p12516_p2 = pneg %p12515_p6 }
 0x3a5   : > { %p12523_p8 = pnand %p12522_p7, %p12516_p2 }
 0x3a7   : > { %12526 = shalt.err (!%p12523_p8)
}
 0x3a8   : > { %s15213_s6 = sld [smem:[#allocation112_spill]] }
 0x3a9   : > { %10912 = dma.hbm_to_vmem [thread:$0]  (%p11049_p10), %s15212_s12, 16, %s1690_s2, [#allocation33]  }
 0x3ae   : > { %s12527_s11 = scalar_lea.hbm %s15213_s6, 16 }
 0x3af   : > { %p12528_p11 = scmp.ne.s32.totalorder %s15213_s6, %s12527_s11  ;;  %p12533_p0 = scmp.lt.u32.totalorder %s12527_s11, %s15213_s6 }
 0x3b1   : > { %p12529_p12 = pnand %p12528_p11, %p11049_p10 }
 0x3b3   : > { %p12530_p13 = pneg %p12529_p12 }
 0x3b5   : > { %p12535_p1 = pnand %p12533_p0, %p12530_p13 }
 0x3b7   : > { %12538 = shalt.err (!%p12535_p1)
}
 0x3b8   : > { %s12539_s1 = scalar_lea.vmem %s1714_s7, 16  ;;  %s12545_s3 = scalar_lea.vmem %s1714_s7, 32 }
 0x3b9   : > { %p12540_p5 = scmp.ne.s32.totalorder %s1714_s7, %s12539_s1  ;;  %p12546_p3 = scmp.lt.s32.totalorder %s1714_s7, %s1714_s7 }
 0x3ba   : > { %p12547_p4 = scmp.lt.s32.totalorder %s12545_s3, %s12539_s1 }
 0x3bb   : > { %p12541_p6 = pnand %p12540_p5, %p11049_p10 }
 0x3bc   : > { %p12548_p7 = por %p12547_p4, %p12546_p3 }
 0x3bd   : > { %p12542_p2 = pneg %p12541_p6 }
 0x3bf   : > { %p12549_p8 = pnand %p12548_p7, %p12542_p2 }
 0x3c1   : > { %12552 = shalt.err (!%p12549_p8)
}
 0x3c2   : > { %s15214_s2 = sld [smem:[#allocation115_spill]]  ;;  %s13059_s5 = smov [#allocation40]  }
 0x3c3   : > { %10916 = dma.hbm_to_vmem [thread:$0]  (%p11049_p10), %s15213_s6, 16, %s1714_s7, [#allocation36]  }
 0x3c4   : > { %s1737_s10 = sshll.u32 %s13059_s5, 4  ;;  %s13060_s11 = smov [#allocation43]   ;;  %s1738_s10 = int_to_ptr.vmem [resolvable:$true] %s1737_s10 }
 0x3c5   : > { %s1761_s4 = sshll.u32 %s13060_s11, 4  ;;  %s1762_s4 = int_to_ptr.vmem [resolvable:$true] %s1761_s4 }
 0x3c8   : > { %s12553_s12 = scalar_lea.hbm %s15214_s2, 1024 }
 0x3c9   : > { %p12554_p11 = scmp.ne.s32.totalorder %s15214_s2, %s12553_s12  ;;  %p12559_p0 = scmp.lt.u32.totalorder %s12553_s12, %s15214_s2 }
 0x3cb   : > { %p12555_p12 = pnand %p12554_p11, %p11049_p10 }
 0x3cd   : > { %p12556_p13 = pneg %p12555_p12 }
 0x3cf   : > { %p12561_p1 = pnand %p12559_p0, %p12556_p13 }
 0x3d1   : > { %12564 = shalt.err (!%p12561_p1)
}
 0x3d2   : > { %s12565_s1 = scalar_lea.vmem %s1738_s10, 1024  ;;  %p12572_p3 = scmp.lt.s32.totalorder %s1738_s10, %s1738_s10 }
 0x3d3   : > { %p12566_p5 = scmp.ne.s32.totalorder %s1738_s10, %s12565_s1  ;;  %p12573_p4 = scmp.lt.s32.totalorder %s12565_s1, %s12565_s1 }
 0x3d5   : > { %p12567_p6 = pnand %p12566_p5, %p11049_p10  ;;  %p12574_p7 = por %p12573_p4, %p12572_p3 }
 0x3d7   : > { %p12568_p2 = pneg %p12567_p6 }
 0x3d9   : > { %p12575_p8 = pnand %p12574_p7, %p12568_p2 }
 0x3db   : > { %12578 = shalt.err (!%p12575_p8)
}
 0x3dc   : > { %s15215_s7 = sld [smem:[#allocation116_spill]] }
 0x3dd   : > { %10920 = dma.hbm_to_vmem [thread:$0]  (%p11049_p10), %s15214_s2, 1024, %s1738_s10, [#allocation39], %s15193_s23, %s15193_s23, %s15195_s16  }
 0x3e2   : > { %s12579_s12 = scalar_lea.hbm %s15215_s7, 1024 }
 0x3e3   : > { %p12580_p11 = scmp.ne.s32.totalorder %s15215_s7, %s12579_s12  ;;  %p12585_p0 = scmp.lt.u32.totalorder %s12579_s12, %s15215_s7 }
 0x3e5   : > { %p12581_p12 = pnand %p12580_p11, %p11049_p10 }
 0x3e7   : > { %p12582_p13 = pneg %p12581_p12 }
 0x3e9   : > { %p12587_p1 = pnand %p12585_p0, %p12582_p13 }
 0x3eb   : > { %12590 = shalt.err (!%p12587_p1)
}
 0x3ec   : > { %s12591_s3 = scalar_lea.vmem %s1762_s4, 1024  ;;  %p12598_p3 = scmp.lt.s32.totalorder %s1762_s4, %s1762_s4 }
 0x3ed   : > { %p12592_p5 = scmp.ne.s32.totalorder %s1762_s4, %s12591_s3  ;;  %p12599_p4 = scmp.lt.s32.totalorder %s12591_s3, %s12591_s3 }
 0x3ef   : > { %p12593_p6 = pnand %p12592_p5, %p11049_p10  ;;  %p12600_p7 = por %p12599_p4, %p12598_p3 }
 0x3f1   : > { %p12594_p2 = pneg %p12593_p6 }
 0x3f3   : > { %p12601_p8 = pnand %p12600_p7, %p12594_p2 }
 0x3f5   : > { %12604 = shalt.err (!%p12601_p8)
}
 0x3f6   : > { %s15216_s5 = sld [smem:[#allocation118_spill]]  ;;  %s13061_s10 = smov [#allocation46]  }
 0x3f7   : > { %10924 = dma.hbm_to_vmem [thread:$0]  (%p11049_p10), %s15215_s7, 1024, %s1762_s4, [#allocation42], %s15193_s23, %s15193_s23, %s15195_s16  }
 0x3f8   : > { %s1789_s11 = sshll.u32 %s13061_s10, 4  ;;  %s13062_s1 = smov [#allocation49]   ;;  %s1790_s11 = int_to_ptr.vmem [resolvable:$true] %s1789_s11 }
 0x3f9   : > { %s1813_s12 = sshll.u32 %s13062_s1, 4  ;;  %s1814_s12 = int_to_ptr.vmem [resolvable:$true] %s1813_s12 }
 0x3fc   : > { %s12605_s3 = scalar_lea.hbm %s15216_s5, 16 }
 0x3fd   : > { %p12606_p11 = scmp.ne.s32.totalorder %s15216_s5, %s12605_s3  ;;  %p12611_p0 = scmp.lt.u32.totalorder %s12605_s3, %s15216_s5 }
 0x3ff   : > { %p12607_p12 = pnand %p12606_p11, %p11049_p10 }
 0x401   : > { %p12608_p13 = pneg %p12607_p12 }
 0x403   : > { %p12613_p1 = pnand %p12611_p0, %p12608_p13 }
 0x405   : > { %12616 = shalt.err (!%p12613_p1)
}
 0x406   : > { %s12617_s2 = scalar_lea.vmem %s1790_s11, 16  ;;  %s12623_s4 = scalar_lea.vmem %s1790_s11, 32 }
 0x407   : > { %p12618_p5 = scmp.ne.s32.totalorder %s1790_s11, %s12617_s2  ;;  %p12624_p3 = scmp.lt.s32.totalorder %s1790_s11, %s1790_s11 }
 0x408   : > { %p12625_p4 = scmp.lt.s32.totalorder %s12623_s4, %s12617_s2 }
 0x409   : > { %p12619_p6 = pnand %p12618_p5, %p11049_p10 }
 0x40a   : > { %p12626_p7 = por %p12625_p4, %p12624_p3 }
 0x40b   : > { %p12620_p2 = pneg %p12619_p6 }
 0x40d   : > { %p12627_p8 = pnand %p12626_p7, %p12620_p2 }
 0x40f   : > { %12630 = shalt.err (!%p12627_p8)
}
 0x410   : > { %s15217_s10 = sld [smem:[#allocation120_spill]] }
 0x411   : > { %10928 = dma.hbm_to_vmem [thread:$0]  (%p11049_p10), %s15216_s5, 16, %s1790_s11, [#allocation45]  }
 0x416   : > { %s12631_s1 = scalar_lea.hbm %s15217_s10, 16 }
 0x417   : > { %p12632_p11 = scmp.ne.s32.totalorder %s15217_s10, %s12631_s1  ;;  %p12637_p0 = scmp.lt.u32.totalorder %s12631_s1, %s15217_s10 }
 0x419   : > { %p12633_p12 = pnand %p12632_p11, %p11049_p10 }
 0x41b   : > { %p12634_p13 = pneg %p12633_p12 }
 0x41d   : > { %p12639_p1 = pnand %p12637_p0, %p12634_p13 }
 0x41f   : > { %12642 = shalt.err (!%p12639_p1)
}
 0x420   : > { %s12643_s2 = scalar_lea.vmem %s1814_s12, 16  ;;  %s12649_s3 = scalar_lea.vmem %s1814_s12, 32 }
 0x421   : > { %p12644_p5 = scmp.ne.s32.totalorder %s1814_s12, %s12643_s2  ;;  %p12650_p3 = scmp.lt.s32.totalorder %s1814_s12, %s1814_s12 }
 0x422   : > { %p12651_p4 = scmp.lt.s32.totalorder %s12649_s3, %s12643_s2 }
 0x423   : > { %p12645_p6 = pnand %p12644_p5, %p11049_p10 }
 0x424   : > { %p12652_p7 = por %p12651_p4, %p12650_p3 }
 0x425   : > { %p12646_p2 = pneg %p12645_p6 }
 0x427   : > { %p12653_p8 = pnand %p12652_p7, %p12646_p2 }
 0x429   : > { %12656 = shalt.err (!%p12653_p8)
}
 0x42a   : > { %s15218_s11 = sld [smem:[#allocation122_spill]]  ;;  %s13063_s4 = smov [#allocation52]  }
 0x42b   : > { %10932 = dma.hbm_to_vmem [thread:$0]  (%p11049_p10), %s15217_s10, 16, %s1814_s12, [#allocation48]  }
 0x42c   : > { %s1837_s1 = sshll.u32 %s13063_s4, 4  ;;  %s13064_s5 = smov [#allocation55]   ;;  %s1838_s1 = int_to_ptr.vmem [resolvable:$true] %s1837_s1 }
 0x42d   : > { %s1861_s6 = sshll.u32 %s13064_s5, 4  ;;  %s1862_s6 = int_to_ptr.vmem [resolvable:$true] %s1861_s6 }
 0x430   : > { %s12657_s7 = scalar_lea.hbm %s15218_s11, 16 }
 0x431   : > { %p12658_p11 = scmp.ne.s32.totalorder %s15218_s11, %s12657_s7  ;;  %p12663_p0 = scmp.lt.u32.totalorder %s12657_s7, %s15218_s11 }
 0x433   : > { %p12659_p12 = pnand %p12658_p11, %p11049_p10 }
 0x435   : > { %p12660_p13 = pneg %p12659_p12 }
 0x437   : > { %p12665_p1 = pnand %p12663_p0, %p12660_p13 }
 0x439   : > { %12668 = shalt.err (!%p12665_p1)
}
 0x43a   : > { %s12669_s2 = scalar_lea.vmem %s1838_s1, 16  ;;  %s12675_s12 = scalar_lea.vmem %s1838_s1, 32 }
 0x43b   : > { %p12670_p5 = scmp.ne.s32.totalorder %s1838_s1, %s12669_s2  ;;  %p12676_p3 = scmp.lt.s32.totalorder %s1838_s1, %s1838_s1 }
 0x43c   : > { %p12677_p4 = scmp.lt.s32.totalorder %s12675_s12, %s12669_s2 }
 0x43d   : > { %p12671_p6 = pnand %p12670_p5, %p11049_p10 }
 0x43e   : > { %p12678_p7 = por %p12677_p4, %p12676_p3 }
 0x43f   : > { %p12672_p2 = pneg %p12671_p6 }
 0x441   : > { %p12679_p8 = pnand %p12678_p7, %p12672_p2 }
 0x443   : > { %12682 = shalt.err (!%p12679_p8)
}
 0x444   : > { %s15219_s5 = sld [smem:[#allocation124_spill]] }
 0x445   : > { %10936 = dma.hbm_to_vmem [thread:$0]  (%p11049_p10), %s15218_s11, 16, %s1838_s1, [#allocation51]  }
 0x44a   : > { %s12683_s7 = scalar_lea.hbm %s15219_s5, 16 }
 0x44b   : > { %p12684_p11 = scmp.ne.s32.totalorder %s15219_s5, %s12683_s7  ;;  %p12689_p0 = scmp.lt.u32.totalorder %s12683_s7, %s15219_s5 }
 0x44d   : > { %p12685_p12 = pnand %p12684_p11, %p11049_p10 }
 0x44f   : > { %p12686_p13 = pneg %p12685_p12 }
 0x451   : > { %p12691_p1 = pnand %p12689_p0, %p12686_p13 }
 0x453   : > { %12694 = shalt.err (!%p12691_p1)
}
 0x454   : > { %s12695_s3 = scalar_lea.vmem %s1862_s6, 16  ;;  %s12701_s4 = scalar_lea.vmem %s1862_s6, 32 }
 0x455   : > { %p12696_p5 = scmp.ne.s32.totalorder %s1862_s6, %s12695_s3  ;;  %p12702_p3 = scmp.lt.s32.totalorder %s1862_s6, %s1862_s6 }
 0x456   : > { %p12703_p4 = scmp.lt.s32.totalorder %s12701_s4, %s12695_s3 }
 0x457   : > { %p12697_p6 = pnand %p12696_p5, %p11049_p10 }
 0x458   : > { %p12704_p7 = por %p12703_p4, %p12702_p3 }
 0x459   : > { %p12698_p2 = pneg %p12697_p6 }
 0x45b   : > { %p12705_p8 = pnand %p12704_p7, %p12698_p2 }
 0x45d   : > { %12708 = shalt.err (!%p12705_p8)
}
 0x45e   : > { %s15220_s1 = sld [smem:[#allocation127_spill]]  ;;  %s13065_s2 = smov [#allocation58]  }
 0x45f   : > { %10940 = dma.hbm_to_vmem [thread:$0]  (%p11049_p10), %s15219_s5, 16, %s1862_s6, [#allocation54]  }
 0x460   : > { %s1885_s12 = sshll.u32 %s13065_s2, 4  ;;  %s13066_s7 = smov [#allocation61]   ;;  %s1886_s12 = int_to_ptr.vmem [resolvable:$true] %s1885_s12 }
 0x461   : > { %s1913_s10 = sshll.u32 %s13066_s7, 4  ;;  %s1914_s10 = int_to_ptr.vmem [resolvable:$true] %s1913_s10 }
 0x464   : > { %s12709_s11 = scalar_lea.hbm %s15220_s1, 1024 }
 0x465   : > { %p12710_p11 = scmp.ne.s32.totalorder %s15220_s1, %s12709_s11  ;;  %p12715_p0 = scmp.lt.u32.totalorder %s12709_s11, %s15220_s1 }
 0x467   : > { %p12711_p12 = pnand %p12710_p11, %p11049_p10 }
 0x469   : > { %p12712_p13 = pneg %p12711_p12 }
 0x46b   : > { %p12717_p1 = pnand %p12715_p0, %p12712_p13 }
 0x46d   : > { %12720 = shalt.err (!%p12717_p1)
}
 0x46e   : > { %s12721_s3 = scalar_lea.vmem %s1886_s12, 1024  ;;  %p12728_p3 = scmp.lt.s32.totalorder %s1886_s12, %s1886_s12 }
 0x46f   : > { %p12722_p5 = scmp.ne.s32.totalorder %s1886_s12, %s12721_s3  ;;  %p12729_p4 = scmp.lt.s32.totalorder %s12721_s3, %s12721_s3 }
 0x471   : > { %p12723_p6 = pnand %p12722_p5, %p11049_p10  ;;  %p12730_p7 = por %p12729_p4, %p12728_p3 }
 0x473   : > { %p12724_p2 = pneg %p12723_p6 }
 0x475   : > { %p12731_p8 = pnand %p12730_p7, %p12724_p2 }
 0x477   : > { %12734 = shalt.err (!%p12731_p8)
}
 0x478   : > { %s15221_s6 = sld [smem:[#allocation130_spill]] }
 0x479   : > { %10944 = dma.hbm_to_vmem [thread:$0]  (%p11049_p10), %s15220_s1, 1024, %s1886_s12, [#allocation57], %s15193_s23, %s15193_s23, %s15195_s16  }
 0x47e   : > { %s12735_s11 = scalar_lea.hbm %s15221_s6, 16 }
 0x47f   : > { %p12736_p11 = scmp.ne.s32.totalorder %s15221_s6, %s12735_s11  ;;  %p12741_p0 = scmp.lt.u32.totalorder %s12735_s11, %s15221_s6 }
 0x481   : > { %p12737_p12 = pnand %p12736_p11, %p11049_p10 }
 0x483   : > { %p12738_p13 = pneg %p12737_p12 }
 0x485   : > { %p12743_p1 = pnand %p12741_p0, %p12738_p13 }
 0x487   : > { %12746 = shalt.err (!%p12743_p1)
}
 0x488   : > { %s12747_s4 = scalar_lea.vmem %s1914_s10, 16  ;;  %s12753_s2 = scalar_lea.vmem %s1914_s10, 32 }
 0x489   : > { %p12748_p5 = scmp.ne.s32.totalorder %s1914_s10, %s12747_s4  ;;  %p12754_p3 = scmp.lt.s32.totalorder %s1914_s10, %s1914_s10 }
 0x48a   : > { %p12755_p4 = scmp.lt.s32.totalorder %s12753_s2, %s12747_s4 }
 0x48b   : > { %p12749_p6 = pnand %p12748_p5, %p11049_p10 }
 0x48c   : > { %p12756_p7 = por %p12755_p4, %p12754_p3 }
 0x48d   : > { %p12750_p2 = pneg %p12749_p6 }
 0x48f   : > { %p12757_p8 = pnand %p12756_p7, %p12750_p2 }
 0x491   : > { %12760 = shalt.err (!%p12757_p8)
}
 0x492   : > { %s15222_s23 = sld [smem:[#allocation134_spill]]  ;;  %s13067_s12 = smov [#allocation64]  }
 0x493   : > { %10948 = dma.hbm_to_vmem [thread:$0]  (%p11049_p10), %s15221_s6, 16, %s1914_s10, [#allocation60]  }
 0x494   : > { %s1941_s7 = sshll.u32 %s13067_s12, 4  ;;  %s13068_s3 = smov [#allocation67]   ;;  %s1942_s7 = int_to_ptr.vmem [resolvable:$true] %s1941_s7 }
 0x495   : > { %s1969_s11 = sshll.u32 %s13068_s3, 4  ;;  %s1970_s11 = int_to_ptr.vmem [resolvable:$true] %s1969_s11 }
 0x498   : > { %s15223_s16 = smov %s15222_s23  ;;  %s12761_s1 = scalar_lea.hbm %s15222_s23, 32 }
 0x499   : > { %p12762_p11 = scmp.ne.s32.totalorder %s15223_s16, %s12761_s1  ;;  %p12767_p0 = scmp.lt.u32.totalorder %s12761_s1, %s15223_s16 }
 0x49b   : > { %p12763_p12 = pnand %p12762_p11, %p11049_p10 }
 0x49d   : > { %p12764_p13 = pneg %p12763_p12 }
 0x49f   : > { %p12769_p1 = pnand %p12767_p0, %p12764_p13 }
 0x4a1   : > { %12772 = shalt.err (!%p12769_p1)
}
 0x4a2   : > { %s12773_s4 = scalar_lea.vmem %s1942_s7, 32  ;;  %p12780_p3 = scmp.lt.s32.totalorder %s1942_s7, %s1942_s7 }
 0x4a3   : > { %p12774_p5 = scmp.ne.s32.totalorder %s1942_s7, %s12773_s4  ;;  %p12781_p4 = scmp.lt.s32.totalorder %s12773_s4, %s12773_s4 }
 0x4a5   : > { %p12775_p6 = pnand %p12774_p5, %p11049_p10  ;;  %p12782_p7 = por %p12781_p4, %p12780_p3 }
 0x4a7   : > { %p12776_p2 = pneg %p12775_p6 }
 0x4a9   : > { %p12783_p8 = pnand %p12782_p7, %p12776_p2 }
 0x4ab   : > { %12786 = shalt.err (!%p12783_p8)
}
 0x4ac   : > { %s15224_s10 = sld [smem:[#allocation138_spill]] }
 0x4ad   : > { %10952 = dma.hbm_to_vmem [thread:$0]  (%p11049_p10), %s15223_s16, 32, %s1942_s7, [#allocation63]  }
 0x4b2   : > { %s12787_s1 = scalar_lea.hbm %s15224_s10, 16 }
 0x4b3   : > { %p12788_p11 = scmp.ne.s32.totalorder %s15224_s10, %s12787_s1  ;;  %p12793_p0 = scmp.lt.u32.totalorder %s12787_s1, %s15224_s10 }
 0x4b5   : > { %p12789_p12 = pnand %p12788_p11, %p11049_p10 }
 0x4b7   : > { %p12790_p13 = pneg %p12789_p12 }
 0x4b9   : > { %p12795_p1 = pnand %p12793_p0, %p12790_p13 }
 0x4bb   : > { %12798 = shalt.err (!%p12795_p1)
}
 0x4bc   : > { %s12799_s2 = scalar_lea.vmem %s1970_s11, 16  ;;  %s12805_s23 = scalar_lea.vmem %s1970_s11, 32 }
 0x4bd   : > { %p12800_p5 = scmp.ne.s32.totalorder %s1970_s11, %s12799_s2  ;;  %p12806_p3 = scmp.lt.s32.totalorder %s1970_s11, %s1970_s11 }
 0x4be   : > { %p12807_p4 = scmp.lt.s32.totalorder %s12805_s23, %s12799_s2 }
 0x4bf   : > { %p12801_p6 = pnand %p12800_p5, %p11049_p10 }
 0x4c0   : > { %p12808_p7 = por %p12807_p4, %p12806_p3 }
 0x4c1   : > { %p12802_p2 = pneg %p12801_p6 }
 0x4c3   : > { %p12809_p8 = pnand %p12808_p7, %p12802_p2 }
 0x4c5   : > { %12812 = shalt.err (!%p12809_p8)
}
 0x4c6   : > { %10956 = dma.hbm_to_vmem [thread:$0]  (%p11049_p10), %s15224_s10, 16, %s1970_s11, [#allocation66]  }
 0x4c7 PF: > { %2002 = sbr.rel (%p13428_p9) target bundleno = 7288 (0x1c78), region = 256  ;;  %p11092_p11 = scmp.eq.s32.totalorder (!%p13428_p9), %s13401_s28, 0 }
 0x4ce   : > { %12858 = dma.done.wait (%p11092_p11), [#allocation3], 1024  }
 0x4cf   : > { %12860 = vsyncadd (%p11092_p11), [#allocation3], 4294966272 }
 0x4d0   : > { %12862 = dma.done.wait (%p11092_p11), [#allocation6], 1040  }
 0x4d1   : > { %12864 = vsyncadd (%p11092_p11), [#allocation6], 4294966256 }
 0x4d2   : > { %12866 = dma.done.wait (%p11092_p11), [#allocation9], 32  }
 0x4d3   : > { %12868 = vsyncadd (%p11092_p11), [#allocation9], 4294967264 }
 0x4d4   : > { %12870 = dma.done.wait (%p11092_p11), [#allocation12], 1040  }
 0x4d5   : > { %12872 = vsyncadd (%p11092_p11), [#allocation12], 4294966256 }
 0x4d6   : > { %12874 = dma.done.wait (%p11092_p11), [#allocation15], 1040  }
 0x4d7   : > { %12876 = vsyncadd (%p11092_p11), [#allocation15], 4294966256 }
 0x4d8   : > { %12878 = dma.done.wait (%p11092_p11), [#allocation18], 1040  }
 0x4d9   : > { %12880 = vsyncadd (%p11092_p11), [#allocation18], 4294966256 }
 0x4da   : > { %12882 = dma.done.wait (%p11092_p11), [#allocation21], 1040  }
 0x4db   : > { %12884 = vsyncadd (%p11092_p11), [#allocation21], 4294966256 }
 0x4dc   : > { %12886 = dma.done.wait (%p11092_p11), [#allocation24], 1040  }
 0x4dd   : > { %12888 = vsyncadd (%p11092_p11), [#allocation24], 4294966256 }
 0x4de   : > { %12890 = dma.done.wait (%p11092_p11), [#allocation27], 32  }
 0x4df   : > { %12892 = vsyncadd (%p11092_p11), [#allocation27], 4294967264 }
 0x4e0   : > { %12894 = dma.done.wait (%p11092_p11), [#allocation30], 1040  }
 0x4e1   : > { %12896 = vsyncadd (%p11092_p11), [#allocation30], 4294966256 }
 0x4e2   : > { %12898 = dma.done.wait (%p11092_p11), [#allocation33], 1040  }
 0x4e3   : > { %12900 = vsyncadd (%p11092_p11), [#allocation33], 4294966256 }
 0x4e4   : > { %12902 = dma.done.wait (%p11092_p11), [#allocation36], 1040  }
 0x4e5   : > { %12904 = vsyncadd (%p11092_p11), [#allocation36], 4294966256 }
 0x4e6   : > { %12906 = dma.done.wait (%p11092_p11), [#allocation39], 1040  }
 0x4e7   : > { %12908 = vsyncadd (%p11092_p11), [#allocation39], 4294966256 }
 0x4e8   : > { %12910 = dma.done.wait (%p11092_p11), [#allocation42], 1040  }
 0x4e9   : > { %12912 = vsyncadd (%p11092_p11), [#allocation42], 4294966256 }
 0x4ea   : > { %12914 = dma.done.wait (%p11092_p11), [#allocation45], 32  }
 0x4eb   : > { %12916 = vsyncadd (%p11092_p11), [#allocation45], 4294967264 }
 0x4ec   : > { %12918 = dma.done.wait (%p11092_p11), [#allocation48], 1040  }
 0x4ed   : > { %12920 = vsyncadd (%p11092_p11), [#allocation48], 4294966256 }
 0x4ee   : > { %12922 = dma.done.wait (%p11092_p11), [#allocation51], 1040  }
 0x4ef   : > { %12924 = vsyncadd (%p11092_p11), [#allocation51], 4294966256 }
 0x4f0   : > { %12926 = dma.done.wait (%p11092_p11), [#allocation54], 1040  }
 0x4f1   : > { %12928 = vsyncadd (%p11092_p11), [#allocation54], 4294966256 }
 0x4f2   : > { %12930 = dma.done.wait (%p11092_p11), [#allocation57], 1040  }
 0x4f3   : > { %12932 = vsyncadd (%p11092_p11), [#allocation57], 4294966256 }
 0x4f4   : > { %12934 = dma.done.wait (%p11092_p11), [#allocation60], 32  }
 0x4f5   : > { %12936 = vsyncadd (%p11092_p11), [#allocation60], 4294967264 }
 0x4f6   : > { %12938 = dma.done.wait (%p11092_p11), [#allocation63], 48  }
 0x4f7   : > { %12940 = vsyncadd (%p11092_p11), [#allocation63], 4294967248 }
 0x4f8   : > { %12942 = dma.done.wait (%p11092_p11), [#allocation66], 48  }
 0x4f9   : > { %12944 = vsyncadd (%p11092_p11), [#allocation66], 4294967248  ;;  %s15225_s18 = sld [smem:[#allocation92_spill]]  ;;  %p2306_p9 = scmp.lt.s32.totalorder %s13401_s28, 1  ;;  %v13069_v0 = vmov 0.0   ;;  %v11277_v1 = vld [vmem:[#allocation2] sm:$0xff]   ;;  %v2460_v25 = vlaneseq }
 0x4fa   : > { %10043 = vmatprep.subr.bf16.mxu1 %v13069_v0  ;;  %v11278_v2 = vld [vmem:[#allocation2 + $0x8] sm:$0xff]   ;;  %10023 = vmatprep.subr.bf16.mxu0 %v11277_v1  ;;  %v11279_v3 = vld [vmem:[#allocation2 + $0x10] sm:$0xff]   ;;  %v11280_v4 = vld [vmem:[#allocation2 + $0x18] sm:$0xff]   ;;  %s15226_s11 = sld [smem:[#allocation96_spill]]  ;;  %vm13070_vm0 = vmmov 0   ;;  %vm2596_vm1 = vcmask 1041409  }
 0x4fb   : > { %s2307_s12 = scalar_select %p2306_p9, %s13401_s28, 1  ;;  %10024 = vmatpush3.bf16.msra.mxu0 %v11277_v1  ;;  %v11281_v6 = vld [vmem:[#allocation2 + $0x20] sm:$0xff]   ;;  %v11282_v8 = vld [vmem:[#allocation2 + $0x28] sm:$0xff]   ;;  %v11283_v9 = vld [vmem:[#allocation2 + $0x30] sm:$0xff]   ;;  %10059 = vmatprep.mubr.msk.bf16.mxu1 %vm13070_vm0, %v13069_v0  ;;  %v14033_v26 = vshrl.u32 %v2460_v25, 7  ;;  %vm2584_vm2 = vcmask 1042434  }
 0x4fc   : > { %10025 = vmatprep.subr.bf16.mxu0 %v11278_v2  ;;  %v11287_v7 = vld [vmem:[#allocation7] sm:$0xff]   ;;  %v11284_v10 = vld [vmem:[#allocation2 + $0x38] sm:$0xff]   ;;  %v11288_v12 = vld [vmem:[#allocation7 + $0x8] sm:$0xff]   ;;  %v13071_v29 = vmov 1983009808   ;;  %vm2586_vm3 = vcmask 1043459  }
 0x4fd   : > { %s9629_s7 = sshll.u32 %s2307_s12, 4  ;;  %10044 = vmatpush3.bf16.msra.mxu1 %v11287_v7  ;;  %v11289_v13 = vld [vmem:[#allocation7 + $0x10] sm:$0xff]   ;;  %v11290_v14 = vld [vmem:[#allocation7 + $0x18] sm:$0xff]   ;;  %v11291_v15 = vld [vmem:[#allocation7 + $0x20] sm:$0xff]   ;;  %v14036_v27 = vsub.s32 1, %v14033_v26  ;;  %v14039_v28 = vsub.s32 0, %v14033_v26  ;;  %v2458_v30 = vunpack.c.l.s4 %v13071_v29 }
 0x4fe   : > { %10045 = vmatprep.subr.bf16.mxu1 %v13069_v0  ;;  %v11292_v16 = vld [vmem:[#allocation7 + $0x28] sm:$0xff]   ;;  %v11293_v17 = vld [vmem:[#allocation7 + $0x30] sm:$0xff]   ;;  %v11294_v18 = vld [vmem:[#allocation7 + $0x38] sm:$0xff]   ;;  %vm2588_vm4 = vcmask 1044484   ;;  %vm2590_vm5 = vcmask 1045509   ;;  %vm2592_vm6 = vcmask 1046534  }
 0x4ff   : > { %s2310_s3 = scalar_lea.vmem %s15225_s18, %s9629_s7  ;;  %10026 = vmatpush3.bf16.msra.mxu0 %v11278_v2  ;;  %v9201_v31 = vld [vmem:[#allocation5] ss:$0 sm:$0xff]  ;;  %v2459_v32 = vunpack.c.0.s8 %v2458_v30  ;;  %vm2594_vm7 = vcmask 1047559   ;;  %vm2606_vm8 = vcmask 1040384   ;;  %vm2837_vm9 = vsmask.f32 256 }
 0x500   : > { %10027 = vmatprep.subr.bf16.mxu0 %v11279_v3  ;;  %v11285_v5 = vld [vmem:[%s2310_s3] sm:$0xff]   ;;  %v11286_v11 = vld [vmem:[%s2310_s3 + $0x8] sm:$0xff]   ;;  %v11297_v21 = vld [vmem:[%s15226_s11 + $0x50] sm:$0xff]   ;;  %vm2843_vm11 = vcmask 1047552   ;;  %vm2844_vm12 = vsmask.f32 7424 }
 0x501   : > { %10039 = vmatprep.mubr.bf16.mxu0 %v11285_v5  ;;  %10046 = vmatpush3.bf16.msra.mxu1 %v11288_v12  ;;  %v11295_v19 = vld [vmem:[%s15226_s11 + $0x40] sm:$0xff]   ;;  %v11296_v20 = vld [vmem:[%s15226_s11 + $0x48] sm:$0xff]   ;;  %v11299_v22 = vld [vmem:[%s15226_s11 + $0x58] sm:$0xff]   ;;  %v14042_v35 = vsub.s32 %v2459_v32, %v14033_v26  ;;  %s15231_s4 = sld [smem:[#allocation102_spill]]  ;;  %s15232_s1 = sld [smem:[#allocation107_spill]]  ;;  %vm5164_vm14 = vcmask 1043456  }
 0x502   : > { %10047 = vmatprep.subr.bf16.mxu1 %v13069_v0  ;;  %v11301_v23 = vld [vmem:[%s15226_s11 + $0x60] sm:$0xff]   ;;  %v11303_v24 = vld [vmem:[%s15226_s11 + $0x68] sm:$0xff]   ;;  %vm14173_vm10 = vmand %vm2606_vm8, %vm2837_vm9  ;;  %s15233_s2 = sld [smem:[#allocation113_spill]]  ;;  %vm5165_vm15 = vsmask.f32 3328  ;;  %s15234_s23 = sld [smem:[#allocation117_spill]] }
 0x503   : > { %10028 = vmatpush3.bf16.msra.mxu0 %v11279_v3  ;;  %vm14193_vm13 = vmand %vm2843_vm11, %vm2844_vm12  ;;  %s15236_s12 = sld [smem:[#allocation125_spill]]  ;;  %s15237_s7 = sld [smem:[#allocation129_spill]] }
 0x504   : > { %10029 = vmatprep.subr.bf16.mxu0 %v11280_v4  ;;  %s15238_s3 = sld [smem:[#allocation131_spill]]  ;;  %p15246_p12 = scmp.ne.s32.totalorder %s15189_s15, 0 }
 0x505   : > { %10048 = vmatpush3.bf16.msra.mxu1 %v11289_v13 }
 0x506   : > { %10049 = vmatprep.subr.bf16.mxu1 %v13069_v0 }
 0x507   : > { %10030 = vmatpush3.bf16.msra.mxu0 %v11280_v4 }
 0x508   : > { %10031 = vmatprep.subr.bf16.mxu0 %v11281_v6  ;;  %s15235_s18 = smov %s15234_s23 }
 0x509   : > { %10050 = vmatpush3.bf16.msra.mxu1 %v11290_v14 }
 0x50a   : > { %10051 = vmatprep.subr.bf16.mxu1 %v13069_v0 }
 0x50b   : > { %10032 = vmatpush3.bf16.msra.mxu0 %v11281_v6 }
 0x50c   : > { %10033 = vmatprep.subr.bf16.mxu0 %v11282_v8 }
 0x50d   : > { %10052 = vmatpush3.bf16.msra.mxu1 %v11291_v15 }
 0x50e   : > { %10053 = vmatprep.subr.bf16.mxu1 %v13069_v0 }
 0x50f   : > { %10034 = vmatpush3.bf16.msra.mxu0 %v11282_v8 }
 0x510   : > { %10035 = vmatprep.subr.bf16.mxu0 %v11283_v9 }
 0x511   : > { %10054 = vmatpush3.bf16.msra.mxu1 %v11292_v16 }
 0x512   : > { %10055 = vmatprep.subr.bf16.mxu1 %v13069_v0 }
 0x513   : > { %10036 = vmatpush3.bf16.msra.mxu0 %v11283_v9 }
 0x514   : > { %10037 = vmatprep.subr.bf16.mxu0 %v11284_v10 }
 0x515   : > { %10056 = vmatpush3.bf16.msra.mxu1 %v11293_v17 }
 0x516   : > { %10057 = vmatprep.subr.bf16.mxu1 %v13069_v0 }
 0x517   : > { %10038 = vmatpush3.bf16.msra.mxu0 %v11284_v10 }
 0x518   : > { %10063 = vmatprep.subr.bf16.mxu0 %v13069_v0 }
 0x519   : > { %10058 = vmatpush3.bf16.msra.mxu1 %v11294_v18 }
 0x51a   : > { %10040 = vmatmul.mubr.bf16.vlgmr.msra.gmra.mrb[0].mxu0 %v11286_v11  ;;  %10083 = vmatprep.subr.bf16.mxu1 %v13069_v0 }
 0x51b   : > { %10079 = vmatprep.mubr.msk.bf16.mxu0 %vm13070_vm0, %v13069_v0  ;;  %10064 = vmatpush3.bf16.msra.mxu0 %v11295_v19 }
 0x51c   : > { %10065 = vmatprep.subr.bf16.mxu0 %v13069_v0 }
 0x51f   : > { %10066 = vmatpush3.bf16.msra.mxu0 %v11296_v20 }
 0x520   : > { %10067 = vmatprep.subr.bf16.mxu0 %v13069_v0 }
 0x523   : > { %10068 = vmatpush3.bf16.msra.mxu0 %v11297_v21 }
 0x524   : > { %10069 = vmatprep.subr.bf16.mxu0 %v13069_v0 }
 0x527   : > { %10070 = vmatpush3.bf16.msra.mxu0 %v11299_v22 }
 0x528   : > { %10071 = vmatprep.subr.bf16.mxu0 %v13069_v0 }
 0x52b   : > { %10072 = vmatpush3.bf16.msra.mxu0 %v11301_v23 }
 0x52c   : > { %10073 = vmatprep.subr.bf16.mxu0 %v13069_v0 }
 0x52f   : > { %10074 = vmatpush3.bf16.msra.mxu0 %v11303_v24 }
 0x530   : > { %10075 = vmatprep.subr.bf16.mxu0 %v13069_v0 }
 0x5ed   : > { %v10041_v33 = vpop.f32.mrb[0].mxu0 }
 0x5ee   : > { %v2442_v34 = vadd.f32 %v10041_v33, %v9201_v31  ;;  %v2433_v36 = vpop.f32.mrb[1].mxu0 }
 0x5ef   : > { %v2434_v37 = vadd.f32 %v9201_v31, %v2433_v36  ;;  %v10042_v38 = vpop.f32.mrb[2].mxu0 }
 0x5f0   : > { %v2450_v39 = vmax.f32 %v2442_v34, 0.0  ;;  %v2445_v40 = vadd.f32 %v10042_v38, %v9201_v31  ;;  %v2436_v41 = vpop.f32.mrb[3].mxu0 }
 0x5f1   : > { %v2448_v42 = vmax.f32 %v2434_v37, 0.0  ;;  %v2437_v43 = vadd.f32 %v9201_v31, %v2436_v41 }
 0x5f2   : > { %v2490_v44 = vcombine.high %v2450_v39, %v2450_v39  ;;  %v2497_v45 = vrot.slane %v2450_v39, %v14042_v35  ;;  %v2451_v46 = vmax.f32 %v2445_v40, 0.0 }
 0x5f3   : > { %v2456_v47 = vcombine.high %v2448_v42, %v2448_v42  ;;  %v2463_v48 = vrot.slane %v2448_v42, %v14042_v35  ;;  %v2449_v49 = vmax.f32 %v2437_v43, 0.0 }
 0x5f4   : > { %v2504_v50 = vrot.slane %v2490_v44, %v14042_v35  ;;  %v2505_v51 = vcombine.high %v2497_v45, %v2497_v45  ;;  %v14048_v52 = vrot.slane %v2497_v45, %v14036_v27  ;;  %v2643_v53 = vrot.slane %v2497_v45, %v14039_v28 }
 0x5f5   : > { %v2470_v54 = vrot.slane %v2456_v47, %v14042_v35  ;;  %v2471_v55 = vcombine.high %v2463_v48, %v2463_v48  ;;  %v2527_v56 = vrot.slane %v2463_v48, %v14036_v27  ;;  %v2611_v57 = vrot.slane %v2463_v48, %v14039_v28 }
 0x5f6   : > { %v2506_v58 = vcombine.high %v2504_v50, %v2504_v50  ;;  %v14055_v59 = vrot.slane %v2505_v51, %v14036_v27  ;;  %v14058_v60 = vrot.slane %v2504_v50, %v14036_v27  ;;  %v2647_v61 = vrot.slane %v2505_v51, %v14039_v28 }
 0x5f7   : > { %v2651_v62 = vrot.slane %v2504_v50, %v14039_v28  ;;  %v2472_v63 = vcombine.high %v2470_v54, %v2470_v54  ;;  %v2531_v1 = vrot.slane %v2471_v55, %v14036_v27  ;;  %v2535_v2 = vrot.slane %v2470_v54, %v14036_v27 }
 0x5f8   : > { %v14065_v3 = vrot.slane %v2506_v58, %v14036_v27  ;;  %v2655_v4 = vrot.slane %v2506_v58, %v14039_v28  ;;  %v2679_v5 = vsel %vm2596_vm1, %v2647_v61, %v2643_v53  ;;  %v2701_v6 = vsel %vm2596_vm1, %v14055_v59, %v14048_v52 }
 0x5f9   : > { %v2680_v7 = vsel %vm2584_vm2, %v2651_v62, %v2679_v5  ;;  %v2702_v8 = vsel %vm2584_vm2, %v14058_v60, %v2701_v6  ;;  %v2539_v9 = vrot.slane %v2472_v63, %v14036_v27  ;;  %v2585_v10 = vsel %vm2584_vm2, %v2531_v1, %v2527_v56 }
 0x5fa   : > { %v2587_v11 = vsel %vm2586_vm3, %v2535_v2, %v2585_v10  ;;  %v2615_v12 = vrot.slane %v2471_v55, %v14039_v28  ;;  %v2619_v13 = vrot.slane %v2470_v54, %v14039_v28  ;;  %v2623_v14 = vrot.slane %v2472_v63, %v14039_v28 }
 0x5fb   : > { %v2694_v15 = vsel %vm2596_vm1, %v2531_v1, %v2527_v56  ;;  %v2507_v16 = vcombine.high %v2451_v46, %v2451_v46  ;;  %v2514_v17 = vrot.slane %v2451_v46, %v14042_v35  ;;  %v2681_v18 = vsel %vm2586_vm3, %v2655_v4, %v2680_v7 }
 0x5fc   : > { %v2672_v19 = vsel %vm2596_vm1, %v2615_v12, %v2611_v57  ;;  %v2695_v20 = vsel %vm2584_vm2, %v2535_v2, %v2694_v15  ;;  %v2703_v21 = vsel %vm2586_vm3, %v14065_v3, %v2702_v8  ;;  %v2473_v22 = vcombine.high %v2449_v49, %v2449_v49 }
 0x5fd   : > { %v2673_v23 = vsel %vm2584_vm2, %v2619_v13, %v2672_v19  ;;  %v2521_v24 = vrot.slane %v2507_v16, %v14042_v35  ;;  %v2522_v25 = vcombine.high %v2514_v17, %v2514_v17  ;;  %v2575_v29 = vrot.slane %v2514_v17, %v14036_v27 }
 0x5fe   : > { %v2659_v30 = vrot.slane %v2514_v17, %v14039_v28  ;;  %v2480_v31 = vrot.slane %v2449_v49, %v14042_v35  ;;  %v2487_v32 = vrot.slane %v2473_v22, %v14042_v35  ;;  %v2589_v33 = vsel %vm2588_vm4, %v2539_v9, %v2587_v11  ;;  %v11298_v22 = vld [vmem:[%s15226_s11] sm:$0xff]  }
 0x5ff   : > { %v2523_v34 = vcombine.high %v2521_v24, %v2521_v24  ;;  %v2579_v36 = vrot.slane %v2522_v25, %v14036_v27  ;;  %v2583_v37 = vrot.slane %v2521_v24, %v14036_v27  ;;  %v2663_v38 = vrot.slane %v2522_v25, %v14039_v28  ;;  %v11304_v25 = vld [vmem:[%s15226_s11 + $0x18] sm:$0xff]  }
 0x600   : > { %v2667_v39 = vrot.slane %v2521_v24, %v14039_v28  ;;  %v2682_v40 = vsel %vm2588_vm4, %v2659_v30, %v2681_v18  ;;  %v2704_v41 = vsel %vm2588_vm4, %v2575_v29, %v2703_v21  ;;  %v2488_v42 = vcombine.high %v2480_v31, %v2480_v31  ;;  %v11302_v24 = vld [vmem:[%s15226_s11 + $0x10] sm:$0xff]   ;;  %v11306_v30 = vld [vmem:[%s15226_s11 + $0x20] sm:$0xff]  }
 0x601   : > { %v2671_v43 = vrot.slane %v2523_v34, %v14039_v28  ;;  %v2489_v44 = vcombine.high %v2487_v32, %v2487_v32  ;;  %v2543_v35 = vrot.slane %v2480_v31, %v14036_v27  ;;  %v2551_v45 = vrot.slane %v2487_v32, %v14036_v27 }
 0x602   : > { %v2547_v46 = vrot.slane %v2488_v42, %v14036_v27  ;;  %v2627_v47 = vrot.slane %v2480_v31, %v14039_v28  ;;  %v2631_v48 = vrot.slane %v2488_v42, %v14039_v28  ;;  %v2635_v49 = vrot.slane %v2487_v32, %v14039_v28  ;;  %v11307_v31 = vld [vmem:[%s15226_s11 + $0x78] sm:$0xff]   ;;  %v11308_v32 = vld [vmem:[%s15226_s11 + $0x28] sm:$0xff]  }
 0x603   : > { %v2591_v50 = vsel %vm2590_vm5, %v2543_v35, %v2589_v33  ;;  %v2639_v51 = vrot.slane %v2489_v44, %v14039_v28  ;;  %v2674_v53 = vsel %vm2586_vm3, %v2623_v14, %v2673_v23  ;;  %v2696_v54 = vsel %vm2586_vm3, %v2539_v9, %v2695_v20  ;;  %v11300_v23 = vld [vmem:[%s15226_s11 + $0x8] sm:$0xff]   ;;  %v11309_v33 = vld [vmem:[%s15226_s11 + $0x30] sm:$0xff]  }
 0x604   : > { %v2675_v55 = vsel %vm2588_vm4, %v2627_v47, %v2674_v53  ;;  %v2697_v56 = vsel %vm2588_vm4, %v2543_v35, %v2696_v54  ;;  %v2555_v57 = vrot.slane %v2489_v44, %v14036_v27  ;;  %v2593_v58 = vsel %vm2592_vm6, %v2547_v46, %v2591_v50  ;;  %v11310_v35 = vld [vmem:[%s15226_s11 + $0x80] sm:$0xff]   ;;  %v11312_v47 = vld [vmem:[%s15226_s11 + $0x88] sm:$0xff]   ;;  %v11313_v53 = vld [vmem:[%s15226_s11 + $0x90] sm:$0xff]  }
 0x605   : > { %v2595_v61 = vsel %vm2594_vm7, %v2551_v45, %v2593_v58  ;;  %v2676_v62 = vsel %vm2590_vm5, %v2631_v48, %v2675_v55  ;;  %v2683_v63 = vsel %vm2590_vm5, %v2663_v38, %v2682_v40  ;;  %v2693_v1 = vrot.slane %v2523_v34, %v14036_v27  ;;  %v11311_v34 = vld [vmem:[%s15226_s11 + $0x38] sm:$0xff]   ;;  %v11317_v58 = vld [vmem:[%s15226_s11 + $0xb0] sm:$0xff]  }
 0x606   : > { %v2597_v2 = vsel %vm2596_vm1, %v14048_v52, %v2555_v57  ;;  %v2607_v4 = vsel %vm2606_vm8, 0.0, %v2595_v61  ;;  %v2677_v5 = vsel %vm2592_vm6, %v2635_v49, %v2676_v62  ;;  %v2684_v6 = vsel %vm2592_vm6, %v2667_v39, %v2683_v63  ;;  %v11314_v55 = vld [vmem:[%s15226_s11 + $0x98] sm:$0xff]  }
 0x607   : > { %v2598_v7 = vsel %vm2584_vm2, %v14055_v59, %v2597_v2  ;;  %v2678_v8 = vsel %vm2594_vm7, %v2639_v51, %v2677_v5  ;;  %v2685_v9 = vsel %vm2594_vm7, %v2671_v43, %v2684_v6  ;;  %v2698_v10 = vsel %vm2590_vm5, %v2547_v46, %v2697_v56  ;;  %v11315_v56 = vld [vmem:[%s15226_s11 + $0xa0] sm:$0xff]   ;;  %v11318_v62 = vld [vmem:[%s15226_s11 + $0xb8] sm:$0xff]   ;;  %v11320_v5 = vld [vmem:[#allocation11 + $0x8] sm:$0xff]  }
 0x608   : > { %v2599_v11 = vsel %vm2586_vm3, %v14058_v60, %v2598_v7  ;;  %v2688_v52 = vmax.f32 %v2607_v4, %v2678_v8  ;;  %v2699_v12 = vsel %vm2592_vm6, %v2551_v45, %v2698_v10  ;;  %v2705_v13 = vsel %vm2590_vm5, %v2579_v36, %v2704_v41  ;;  %v11319_v4 = vld [vmem:[#allocation11] sm:$0xff]   ;;  %v11321_v6 = vld [vmem:[#allocation11 + $0x10] sm:$0xff]   ;;  %v11322_v7 = vld [vmem:[#allocation11 + $0x18] sm:$0xff]  }
 0x609   : > { %v2600_v14 = vsel %vm2588_vm4, %v14065_v3, %v2599_v11  ;;  %v2700_v59 = vsel %vm2594_vm7, %v2555_v57, %v2699_v12  ;;  %v2706_v15 = vsel %vm2592_vm6, %v2583_v37, %v2705_v13  ;;  %v11316_v57 = vld [vmem:[%s15226_s11 + $0xa8] sm:$0xff]   ;;  %v11325_v10 = vld [vmem:[#allocation11 + $0x30] sm:$0xff]   ;;  %v11326_v11 = vld [vmem:[#allocation11 + $0x38] sm:$0xff]  }
 0x60a   : > { %v2601_v16 = vsel %vm2590_vm5, %v2575_v29, %v2600_v14  ;;  %v2707_v17 = vsel %vm2594_vm7, %v2693_v1, %v2706_v15  ;;  %v2710_v18 = vmax.f32 %v2688_v52, %v2700_v59  ;;  %v11305_v29 = vld [vmem:[%s15226_s11 + $0x70] sm:$0xff]   ;;  %v11323_v8 = vld [vmem:[#allocation11 + $0x20] sm:$0xff]   ;;  %v11337_v13 = vld [vmem:[#allocation17 + $0x10] sm:$0xff]  }
 0x60b   : > { %v2602_v60 = vsel %vm2592_vm6, %v2579_v36, %v2601_v16  ;;  %10076 = vmatpush3.bf16.msra.mxu0 %v11305_v29  ;;  %v9212_v36 = vld [vmem:[#allocation8] ss:$0 sm:$0xff]  ;;  %v11335_v52 = vld [vmem:[#allocation17] sm:$0xff]   ;;  %v11336_v12 = vld [vmem:[#allocation17 + $0x8] sm:$0xff]  }
 0x60c   : > { %v2603_v19 = vsel %vm2594_vm7, %v2583_v37, %v2602_v60  ;;  %10077 = vmatprep.subr.bf16.mxu0 %v13069_v0  ;;  %v11338_v14 = vld [vmem:[#allocation17 + $0x18] sm:$0xff]   ;;  %v11339_v59 = vld [vmem:[#allocation17 + $0x20] sm:$0xff]   ;;  %v11340_v15 = vld [vmem:[#allocation17 + $0x28] sm:$0xff]  }
 0x60d   : > { %v2689_v20 = vmax.f32 %v2603_v19, %v2685_v9  ;;  %v11324_v9 = vld [vmem:[#allocation11 + $0x28] sm:$0xff]   ;;  %v9245_v29 = vld [vmem:[#allocation10] ss:$0 sm:$0xff] }
 0x60e   : > { %v11371_v1 = vld [vmem:[#allocation22 + $0x20] sm:$0xff]  }
 0x60f   : > { %v2711_v21 = vmax.f32 %v2689_v20, %v2707_v17  ;;  %10078 = vmatpush3.bf16.msra.mxu0 %v11307_v31  ;;  %v11682_v50 = vld [vmem:[%s15179_s8 + $0x34] ss:$8 sps:$4 sm:$0xff]  }
 0x610   : > { %10103 = vmatprep.subr.bf16.mxu0 %v13069_v0 }
 0x611   : > { %v14143_v3 = vpack.c.bf16 %v2711_v21, %v2710_v18 }
 0x613   : > { %10060 = vmatmul.mubr.bf16.vlgmr.msra.gmra.mrb[0].mxu1 %v14143_v3 }
 0x614   : > { %10084 = vmatpush3.bf16.msra.mxu1 %v11298_v22  ;;  %10099 = vmatprep.mubr.msk.bf16.mxu1 %vm13070_vm0, %v13069_v0 }
 0x615   : > { %10085 = vmatprep.subr.bf16.mxu1 %v13069_v0 }
 0x618   : > { %10086 = vmatpush3.bf16.msra.mxu1 %v11300_v23 }
 0x619   : > { %10087 = vmatprep.subr.bf16.mxu1 %v13069_v0 }
 0x61c   : > { %10088 = vmatpush3.bf16.msra.mxu1 %v11302_v24 }
 0x61d   : > { %10089 = vmatprep.subr.bf16.mxu1 %v13069_v0 }
 0x620   : > { %10090 = vmatpush3.bf16.msra.mxu1 %v11304_v25 }
 0x621   : > { %10091 = vmatprep.subr.bf16.mxu1 %v13069_v0 }
 0x624   : > { %10092 = vmatpush3.bf16.msra.mxu1 %v11306_v30 }
 0x625   : > { %10093 = vmatprep.subr.bf16.mxu1 %v13069_v0 }
 0x628   : > { %10094 = vmatpush3.bf16.msra.mxu1 %v11308_v32 }
 0x629   : > { %10095 = vmatprep.subr.bf16.mxu1 %v13069_v0 }
 0x62c   : > { %10096 = vmatpush3.bf16.msra.mxu1 %v11309_v33 }
 0x62d   : > { %10097 = vmatprep.subr.bf16.mxu1 %v13069_v0 }
 0x630   : > { %10098 = vmatpush3.bf16.msra.mxu1 %v11311_v34 }
 0x631   : > { %10123 = vmatprep.subr.bf16.mxu1 %v13069_v0 }
 0x6e6   : > { %v2818_v37 = vpop.f32.mrb[0].mxu1 }
 0x6e7   : > { %v2819_v38 = vadd.f32 %v9212_v36, %v2818_v37  ;;  %v10061_v39 = vpop.f32.mrb[1].mxu1 }
 0x6e8   : > { %v2821_v40 = vpop.f32.mrb[2].mxu1 }
 0x6e9   : > { %v2822_v41 = vadd.f32 %v9212_v36, %v2821_v40  ;;  %v10062_v42 = vpop.f32.mrb[3].mxu1  ;;  %v2825_v43 = vmax.f32 %v2819_v38, 0.0  ;;  %v11327_v40 = vld [vmem:[#allocation14] sm:$0xff]  }
 0x6ea   : > { %v11328_v42 = vld [vmem:[#allocation14 + $0x8] sm:$0xff]  }
 0x6eb   : > { %v2826_v44 = vmax.f32 %v2822_v41, 0.0 }
 0x6ed   : > { %v2827_v45 = vpack.c.bf16 %v2826_v44, %v2825_v43  ;;  %v11329_v43 = vld [vmem:[#allocation14 + $0x10] sm:$0xff]   ;;  %v11330_v44 = vld [vmem:[#allocation14 + $0x18] sm:$0xff]  }
 0x6ef   : > { %v2829_v46 = vshrl.u32 %v2827_v45, 16  ;;  %10080 = vmatmul.mubr.bf16.vlgmr.msra.gmra.mrb[4].mxu0 %v2827_v45  ;;  %v2832_v49 = vshll.u32 %v2827_v45, 16  ;;  %v11332_v45 = vld [vmem:[#allocation14 + $0x28] sm:$0xff]  }
 0x6f0   : > { %10104 = vmatpush3.bf16.msra.mxu0 %v11310_v35  ;;  %10119 = vmatprep.mubr.msk.bf16.mxu0 %vm13070_vm0, %v13069_v0  ;;  %v11331_v35 = vld [vmem:[#allocation14 + $0x20] sm:$0xff]  }
 0x6f1   : > { %10105 = vmatprep.subr.bf16.mxu0 %v13069_v0  ;;  %v2831_v48 = vrot.slane %v2829_v46, 7  ;;  %v2840_v61 = vrot.slane %v2832_v49, 1 }
 0x6f3   : > { %v2834_v51 = vor.u32 %v2832_v49, %v2831_v48  ;;  %v2841_v63 = vor.u32 %v2840_v61, %v2829_v46  ;;  %v11333_v46 = vld [vmem:[#allocation14 + $0x30] sm:$0xff]   ;;  %v11342_v49 = vld [vmem:[#allocation17 + $0x38] sm:$0xff]  }
 0x6f4   : > { %10106 = vmatpush3.bf16.msra.mxu0 %v11312_v47  ;;  %v11334_v47 = vld [vmem:[#allocation14 + $0x38] sm:$0xff]  }
 0x6f5   : > { %v2839_v54 = vsel %vm14173_vm10, 0, %v2834_v51  ;;  %10107 = vmatprep.subr.bf16.mxu0 %v13069_v0  ;;  %v2846_v2 = vsel %vm14193_vm13, %v2841_v63, 0  ;;  %v11341_v48 = vld [vmem:[#allocation17 + $0x30] sm:$0xff]  }
 0x6f6   : > { %10100 = vmatmul.mubr.bf16.vlgmr.msra.gmra.mrb[4].mxu1 %v2839_v54  ;;  %v11346_v51 = vld [vmem:[%s15231_s4] sm:$0xff]   ;;  %v11352_v54 = vld [vmem:[%s15231_s4 + $0x18] sm:$0xff]  }
 0x6f7   : > { %10139 = vmatprep.mubr.msk.bf16.mxu1 %vm13070_vm0, %v13069_v0  ;;  %10124 = vmatpush3.bf16.msra.mxu1 %v11319_v4 }
 0x6f8   : > { %10108 = vmatpush3.bf16.msra.mxu0 %v11313_v53  ;;  %10125 = vmatprep.subr.bf16.mxu1 %v13069_v0  ;;  %v11348_v53 = vld [vmem:[%s15231_s4 + $0x8] sm:$0xff]  }
 0x6f9   : > { %10109 = vmatprep.subr.bf16.mxu0 %v13069_v0 }
 0x6fb   : > { %10126 = vmatpush3.bf16.msra.mxu1 %v11320_v5 }
 0x6fc   : > { %10110 = vmatpush3.bf16.msra.mxu0 %v11314_v55  ;;  %10127 = vmatprep.subr.bf16.mxu1 %v13069_v0  ;;  %v9246_v55 = vld [vmem:[#allocation13] ss:$0 sm:$0xff] }
 0x6fd   : > { %10111 = vmatprep.subr.bf16.mxu0 %v13069_v0 }
 0x6ff   : > { %10128 = vmatpush3.bf16.msra.mxu1 %v11321_v6 }
 0x700   : > { %10112 = vmatpush3.bf16.msra.mxu0 %v11315_v56  ;;  %10129 = vmatprep.subr.bf16.mxu1 %v13069_v0  ;;  %v9255_v56 = vld [vmem:[#allocation16] ss:$0 sm:$0xff] }
 0x701   : > { %10113 = vmatprep.subr.bf16.mxu0 %v13069_v0 }
 0x703   : > { %10130 = vmatpush3.bf16.msra.mxu1 %v11322_v7  ;;  %v11343_v7 = vld [vmem:[%s15231_s4 + $0x40] sm:$0xff]  }
 0x704   : > { %10114 = vmatpush3.bf16.msra.mxu0 %v11316_v57  ;;  %10131 = vmatprep.subr.bf16.mxu1 %v13069_v0  ;;  %v10843_v57 = vadd.f32 %v9255_v56, %v9246_v55  ;;  %v11376_v55 = vld [vmem:[#allocation25 + $0x8] sm:$0xff]   ;;  %v11377_v56 = vld [vmem:[#allocation25 + $0x10] sm:$0xff]  }
 0x705   : > { %10115 = vmatprep.subr.bf16.mxu0 %v13069_v0 }
 0x707   : > { %10132 = vmatpush3.bf16.msra.mxu1 %v11323_v8 }
 0x708   : > { %10116 = vmatpush3.bf16.msra.mxu0 %v11317_v58  ;;  %10133 = vmatprep.subr.bf16.mxu1 %v13069_v0 }
 0x709   : > { %10117 = vmatprep.subr.bf16.mxu0 %v13069_v0 }
 0x70b   : > { %10134 = vmatpush3.bf16.msra.mxu1 %v11324_v9  ;;  %v11344_v9 = vld [vmem:[%s15231_s4 + $0x48] sm:$0xff]  }
 0x70c   : > { %10118 = vmatpush3.bf16.msra.mxu0 %v11318_v62  ;;  %10135 = vmatprep.subr.bf16.mxu1 %v13069_v0 }
 0x70d   : > { %10163 = vmatprep.subr.bf16.mxu0 %v13069_v0 }
 0x70f   : > { %10120 = vmatmul.mubr.bf16.vlgmr.msra.gmra.mrb[8].mxu0 %v2846_v2  ;;  %10136 = vmatpush3.bf16.msra.mxu1 %v11325_v10  ;;  %v11345_v10 = vld [vmem:[%s15231_s4 + $0x50] sm:$0xff]  }
 0x710   : > { %10179 = vmatprep.mubr.msk.bf16.mxu0 %vm13070_vm0, %v13069_v0  ;;  %10137 = vmatprep.subr.bf16.mxu1 %v13069_v0 }
 0x711   : > { %10164 = vmatpush3.bf16.msra.mxu0 %v11335_v52  ;;  %v11349_v52 = vld [vmem:[%s15231_s4 + $0x60] sm:$0xff]  }
 0x712   : > { %10165 = vmatprep.subr.bf16.mxu0 %v13069_v0 }
 0x713   : > { %10138 = vmatpush3.bf16.msra.mxu1 %v11326_v11  ;;  %v11347_v11 = vld [vmem:[%s15231_s4 + $0x58] sm:$0xff]  }
 0x714   : > { %10143 = vmatprep.subr.bf16.mxu1 %v13069_v0 }
 0x715   : > { %10166 = vmatpush3.bf16.msra.mxu0 %v11336_v12  ;;  %v11351_v12 = vld [vmem:[%s15231_s4 + $0x68] sm:$0xff]  }
 0x716   : > { %10167 = vmatprep.subr.bf16.mxu0 %v13069_v0 }
 0x719   : > { %10168 = vmatpush3.bf16.msra.mxu0 %v11337_v13  ;;  %v11353_v13 = vld [vmem:[%s15231_s4 + $0x70] sm:$0xff]  }
 0x71a   : > { %10169 = vmatprep.subr.bf16.mxu0 %v13069_v0 }
 0x71d   : > { %10170 = vmatpush3.bf16.msra.mxu0 %v11338_v14  ;;  %v11354_v14 = vld [vmem:[%s15231_s4 + $0x20] sm:$0xff]  }
 0x71e   : > { %10171 = vmatprep.subr.bf16.mxu0 %v13069_v0 }
 0x721   : > { %10172 = vmatpush3.bf16.msra.mxu0 %v11339_v59  ;;  %v11355_v59 = vld [vmem:[%s15231_s4 + $0x78] sm:$0xff]  }
 0x722   : > { %10173 = vmatprep.subr.bf16.mxu0 %v13069_v0 }
 0x725   : > { %10174 = vmatpush3.bf16.msra.mxu0 %v11340_v15  ;;  %v11356_v15 = vld [vmem:[%s15231_s4 + $0x28] sm:$0xff]  }
 0x726   : > { %10175 = vmatprep.subr.bf16.mxu0 %v13069_v0 }
 0x729   : > { %10176 = vmatpush3.bf16.msra.mxu0 %v11341_v48  ;;  %v11369_v48 = vld [vmem:[#allocation22 + $0x10] sm:$0xff]  }
 0x72a   : > { %10177 = vmatprep.subr.bf16.mxu0 %v13069_v0 }
 0x72d   : > { %10178 = vmatpush3.bf16.msra.mxu0 %v11342_v49  ;;  %v11370_v49 = vld [vmem:[#allocation22 + $0x18] sm:$0xff]  }
 0x72e   : > { %10183 = vmatprep.subr.bf16.mxu0 %v13069_v0 }
 0x7c2   : > { %v2977_v16 = vpop.f32.mrb[4].mxu0 }
 0x7c3   : > { %v10081_v17 = vpop.f32.mrb[5].mxu0 }
 0x7c4   : > { %v2980_v18 = vpop.f32.mrb[6].mxu0  ;;  %v11359_v17 = vld [vmem:[%s15231_s4 + $0x38] sm:$0xff]  }
 0x7c5   : > { %v10082_v60 = vpop.f32.mrb[7].mxu0 }
 0x7c9   : > { %v3066_v19 = vpop.f32.mrb[4].mxu1 }
 0x7ca   : > { %v3067_v20 = vadd.f32 %v3066_v19, %v2977_v16  ;;  %v10101_v21 = vpop.f32.mrb[5].mxu1  ;;  %v11357_v16 = vld [vmem:[%s15231_s4 + $0x30] sm:$0xff]  }
 0x7cb   : > { %v3069_v22 = vpop.f32.mrb[6].mxu1 }
 0x7cc   : > { %v3070_v23 = vadd.f32 %v3069_v22, %v2980_v18  ;;  %v10102_v24 = vpop.f32.mrb[7].mxu1  ;;  %v9264_v18 = vld [vmem:[#allocation19] ss:$0 sm:$0xff] }
 0x7e2   : > { %v3155_v25 = vpop.f32.mrb[8].mxu0 }
 0x7e3   : > { %v3162_v30 = vadd.f32 %v3155_v25, %v3067_v20  ;;  %v10121_v31 = vpop.f32.mrb[9].mxu0 }
 0x7e4   : > { %v3158_v32 = vpop.f32.mrb[10].mxu0 }
 0x7e5   : > { %v3171_v33 = vadd.f32 %v9245_v29, %v3162_v30  ;;  %v3163_v34 = vadd.f32 %v3158_v32, %v3070_v23  ;;  %v10122_v36 = vpop.f32.mrb[11].mxu0  ;;  %v11360_v32 = vld [vmem:[%s15231_s4 + $0x88] sm:$0xff]  }
 0x7e7   : > { %v3172_v37 = vadd.f32 %v9245_v29, %v3163_v34  ;;  %v3173_v38 = vmax.f32 %v3171_v33, 0.0  ;;  %v11358_v29 = vld [vmem:[%s15231_s4 + $0x80] sm:$0xff]  }
 0x7e9   : > { %v3174_v39 = vmax.f32 %v3172_v37, 0.0  ;;  %v11361_v37 = vld [vmem:[%s15231_s4 + $0x90] sm:$0xff]  }
 0x7eb   : > { %v3175_v41 = vpack.c.bf16 %v3174_v39, %v3173_v38  ;;  %v11362_v39 = vld [vmem:[%s15231_s4 + $0x98] sm:$0xff]  }
 0x7ed   : > { %10140 = vmatmul.mubr.bf16.vlgmr.msra.gmra.mrb[8].mxu1 %v3175_v41  ;;  %v11364_v41 = vld [vmem:[%s15231_s4 + $0xa8] sm:$0xff]  }
 0x7ee   : > { %10144 = vmatpush3.bf16.msra.mxu1 %v11327_v40  ;;  %10159 = vmatprep.mubr.msk.bf16.mxu1 %vm13070_vm0, %v13069_v0  ;;  %v11363_v40 = vld [vmem:[%s15231_s4 + $0xa0] sm:$0xff]  }
 0x7ef   : > { %10145 = vmatprep.subr.bf16.mxu1 %v13069_v0 }
 0x7f2   : > { %10146 = vmatpush3.bf16.msra.mxu1 %v11328_v42  ;;  %v11365_v42 = vld [vmem:[%s15231_s4 + $0xb0] sm:$0xff]  }
 0x7f3   : > { %10147 = vmatprep.subr.bf16.mxu1 %v13069_v0 }
 0x7f6   : > { %10148 = vmatpush3.bf16.msra.mxu1 %v11329_v43 }
 0x7f7   : > { %10149 = vmatprep.subr.bf16.mxu1 %v13069_v0 }
 0x7fa   : > { %10150 = vmatpush3.bf16.msra.mxu1 %v11330_v44  ;;  %v11366_v44 = vld [vmem:[%s15231_s4 + $0xb8] sm:$0xff]  }
 0x7fb   : > { %10151 = vmatprep.subr.bf16.mxu1 %v13069_v0 }
 0x7fe   : > { %10152 = vmatpush3.bf16.msra.mxu1 %v11331_v35 }
 0x7ff   : > { %10153 = vmatprep.subr.bf16.mxu1 %v13069_v0 }
 0x802   : > { %10154 = vmatpush3.bf16.msra.mxu1 %v11332_v45 }
 0x803   : > { %10155 = vmatprep.subr.bf16.mxu1 %v13069_v0 }
 0x806   : > { %10156 = vmatpush3.bf16.msra.mxu1 %v11333_v46  ;;  %v11367_v46 = vld [vmem:[#allocation22] sm:$0xff]  }
 0x807   : > { %10157 = vmatprep.subr.bf16.mxu1 %v13069_v0 }
 0x80a   : > { %10158 = vmatpush3.bf16.msra.mxu1 %v11334_v47  ;;  %v11368_v47 = vld [vmem:[#allocation22 + $0x8] sm:$0xff]  }
 0x80b   : > { %10203 = vmatprep.subr.bf16.mxu1 %v13069_v0 }
 0x80d   : > { %10160 = vmatmul.mubr.bf16.vlgmr.msra.gmra.mrb[8].mxu1 %v14143_v3  ;;  %v11350_v3 = vld [vmem:[%s15231_s4 + $0x10] sm:$0xff]  }
 0x80e   : > { %10219 = vmatprep.mubr.msk.bf16.mxu1 %vm13070_vm0, %v13069_v0  ;;  %10204 = vmatpush3.bf16.msra.mxu1 %v11346_v51  ;;  %v11372_v51 = vld [vmem:[#allocation22 + $0x28] sm:$0xff]  }
 0x80f   : > { %10205 = vmatprep.subr.bf16.mxu1 %v13069_v0 }
 0x812   : > { %10206 = vmatpush3.bf16.msra.mxu1 %v11348_v53  ;;  %v11373_v53 = vld [vmem:[#allocation22 + $0x30] sm:$0xff]  }
 0x813   : > { %10207 = vmatprep.subr.bf16.mxu1 %v13069_v0 }
 0x816   : > { %10208 = vmatpush3.bf16.msra.mxu1 %v11350_v3  ;;  %v11374_v3 = vld [vmem:[#allocation22 + $0x38] sm:$0xff]  }
 0x817   : > { %10209 = vmatprep.subr.bf16.mxu1 %v13069_v0 }
 0x81a   : > { %10210 = vmatpush3.bf16.msra.mxu1 %v11352_v54  ;;  %v11375_v54 = vld [vmem:[#allocation25] sm:$0xff]  }
 0x81b   : > { %10211 = vmatprep.subr.bf16.mxu1 %v13069_v0 }
 0x81e   : > { %10212 = vmatpush3.bf16.msra.mxu1 %v11354_v14  ;;  %v9297_v14 = vld [vmem:[#allocation20] ss:$0 sm:$0xff] }
 0x81f   : > { %10213 = vmatprep.subr.bf16.mxu1 %v13069_v0 }
 0x822   : > { %10214 = vmatpush3.bf16.msra.mxu1 %v11356_v15 }
 0x823   : > { %10215 = vmatprep.subr.bf16.mxu1 %v13069_v0 }
 0x826   : > { %10216 = vmatpush3.bf16.msra.mxu1 %v11357_v16 }
 0x827   : > { %10217 = vmatprep.subr.bf16.mxu1 %v13069_v0 }
 0x82a   : > { %10218 = vmatpush3.bf16.msra.mxu1 %v11359_v17 }
 0x82b   : > { %10243 = vmatprep.subr.bf16.mxu1 %v13069_v0 }
 0x8e0   : > { %v3393_v58 = vpop.f32.mrb[8].mxu1 }
 0x8e1   : > { %v14239_v61 = vadd.f32 %v10843_v57, %v3393_v58  ;;  %v10161_v62 = vpop.f32.mrb[9].mxu1  ;;  %v11379_v58 = vld [vmem:[#allocation25 + $0x20] sm:$0xff]  }
 0x8e2   : > { %v3396_v63 = vpop.f32.mrb[10].mxu1 }
 0x8e3   : > { %v14241_v2 = vadd.f32 %v10843_v57, %v3396_v63  ;;  %v10162_v4 = vpop.f32.mrb[11].mxu1  ;;  %v3402_v5 = vmax.f32 %v14239_v61, 0.0  ;;  %v11378_v57 = vld [vmem:[#allocation25 + $0x18] sm:$0xff]  }
 0x8e5   : > { %v3403_v6 = vmax.f32 %v14241_v2, 0.0 }
 0x8e7   : > { %v3404_v8 = vpack.c.bf16 %v3403_v6, %v3402_v5 }
 0x8e9   : > { %10180 = vmatmul.mubr.bf16.vlgmr.msra.gmra.mrb[12].mxu0 %v3404_v8 }
 0x8ea   : > { %10184 = vmatpush3.bf16.msra.mxu0 %v11343_v7  ;;  %10199 = vmatprep.mubr.msk.bf16.mxu0 %vm13070_vm0, %v13069_v0 }
 0x8eb   : > { %10185 = vmatprep.subr.bf16.mxu0 %v13069_v0 }
 0x8ee   : > { %10186 = vmatpush3.bf16.msra.mxu0 %v11344_v9 }
 0x8ef   : > { %10187 = vmatprep.subr.bf16.mxu0 %v13069_v0 }
 0x8f2   : > { %10188 = vmatpush3.bf16.msra.mxu0 %v11345_v10 }
 0x8f3   : > { %10189 = vmatprep.subr.bf16.mxu0 %v13069_v0 }
 0x8f6   : > { %10190 = vmatpush3.bf16.msra.mxu0 %v11347_v11 }
 0x8f7   : > { %10191 = vmatprep.subr.bf16.mxu0 %v13069_v0 }
 0x8fa   : > { %10192 = vmatpush3.bf16.msra.mxu0 %v11349_v52 }
 0x8fb   : > { %10193 = vmatprep.subr.bf16.mxu0 %v13069_v0 }
 0x8fe   : > { %10194 = vmatpush3.bf16.msra.mxu0 %v11351_v12 }
 0x8ff   : > { %10195 = vmatprep.subr.bf16.mxu0 %v13069_v0 }
 0x902   : > { %10196 = vmatpush3.bf16.msra.mxu0 %v11353_v13 }
 0x903   : > { %10197 = vmatprep.subr.bf16.mxu0 %v13069_v0 }
 0x906   : > { %10198 = vmatpush3.bf16.msra.mxu0 %v11355_v59 }
 0x907   : > { %10223 = vmatprep.subr.bf16.mxu0 %v13069_v0 }
 0x9bc   : > { %v3510_v60 = vpop.f32.mrb[12].mxu0 }
 0x9bd   : > { %v3511_v19 = vadd.f32 %v9264_v18, %v3510_v60  ;;  %v10181_v20 = vpop.f32.mrb[13].mxu0 }
 0x9be   : > { %v3513_v21 = vpop.f32.mrb[14].mxu0 }
 0x9bf   : > { %v3514_v22 = vadd.f32 %v9264_v18, %v3513_v21  ;;  %v10182_v23 = vpop.f32.mrb[15].mxu0  ;;  %v3517_v24 = vmax.f32 %v3511_v19, 0.0 }
 0x9c0   : > { %v11380_v23 = vld [vmem:[#allocation25 + $0x28] sm:$0xff]  }
 0x9c1   : > { %v3518_v25 = vmax.f32 %v3514_v22, 0.0 }
 0x9c3   : > { %v3519_v30 = vpack.c.bf16 %v3518_v25, %v3517_v24  ;;  %v11381_v24 = vld [vmem:[#allocation25 + $0x30] sm:$0xff]   ;;  %v11382_v25 = vld [vmem:[#allocation25 + $0x38] sm:$0xff]  }
 0x9c5   : > { %v3521_v31 = vshrl.u32 %v3519_v30, 16  ;;  %10200 = vmatmul.mubr.bf16.vlgmr.msra.gmra.mrb[16].mxu0 %v3519_v30  ;;  %v3524_v34 = vshll.u32 %v3519_v30, 16  ;;  %v13072_v30 = vmov 1966171168  }
 0x9c6   : > { %10224 = vmatpush3.bf16.msra.mxu0 %v11358_v29  ;;  %10239 = vmatprep.mubr.msk.bf16.mxu0 %vm13070_vm0, %v13069_v0  ;;  %v9298_v29 = vld [vmem:[#allocation23] ss:$0 sm:$0xff] }
 0x9c7   : > { %10225 = vmatprep.subr.bf16.mxu0 %v13069_v0  ;;  %v3523_v33 = vrot.slane %v3521_v31, 7  ;;  %v3529_v43 = vrot.slane %v3524_v34, 1 }
 0x9c9   : > { %v3526_v36 = vor.u32 %v3524_v34, %v3523_v33  ;;  %v3530_v35 = vor.u32 %v3529_v43, %v3521_v31  ;;  %v4097_v31 = vunpack.c.l.s4 %v13072_v30 }
 0x9ca   : > { %10226 = vmatpush3.bf16.msra.mxu0 %v11360_v32 }
 0x9cb   : > { %v3528_v38 = vsel %vm14173_vm10, 0, %v3526_v36  ;;  %10227 = vmatprep.subr.bf16.mxu0 %v13069_v0  ;;  %v3532_v45 = vsel %vm14193_vm13, %v3530_v35, 0 }
 0x9cc   : > { %10220 = vmatmul.mubr.bf16.vlgmr.msra.gmra.mrb[12].mxu1 %v3528_v38 }
 0x9cd   : > { %10259 = vmatprep.mubr.msk.bf16.mxu1 %vm13070_vm0, %v13069_v0  ;;  %10244 = vmatpush3.bf16.msra.mxu1 %v11367_v46 }
 0x9ce   : > { %10228 = vmatpush3.bf16.msra.mxu0 %v11361_v37  ;;  %10245 = vmatprep.subr.bf16.mxu1 %v13069_v0  ;;  %v4098_v37 = vunpack.c.0.s8 %v4097_v31 }
 0x9cf   : > { %10229 = vmatprep.subr.bf16.mxu0 %v13069_v0 }
 0x9d1   : > { %10246 = vmatpush3.bf16.msra.mxu1 %v11368_v47 }
 0x9d2   : > { %10230 = vmatpush3.bf16.msra.mxu0 %v11362_v39  ;;  %10247 = vmatprep.subr.bf16.mxu1 %v13069_v0 }
 0x9d3   : > { %10231 = vmatprep.subr.bf16.mxu0 %v13069_v0 }
 0x9d5   : > { %10248 = vmatpush3.bf16.msra.mxu1 %v11369_v48 }
 0x9d6   : > { %10232 = vmatpush3.bf16.msra.mxu0 %v11363_v40  ;;  %10249 = vmatprep.subr.bf16.mxu1 %v13069_v0 }
 0x9d7   : > { %10233 = vmatprep.subr.bf16.mxu0 %v13069_v0 }
 0x9d9   : > { %10250 = vmatpush3.bf16.msra.mxu1 %v11370_v49 }
 0x9da   : > { %10234 = vmatpush3.bf16.msra.mxu0 %v11364_v41  ;;  %10251 = vmatprep.subr.bf16.mxu1 %v13069_v0 }
 0x9db   : > { %10235 = vmatprep.subr.bf16.mxu0 %v13069_v0 }
 0x9dd   : > { %10252 = vmatpush3.bf16.msra.mxu1 %v11371_v1 }
 0x9de   : > { %10236 = vmatpush3.bf16.msra.mxu0 %v11365_v42  ;;  %10253 = vmatprep.subr.bf16.mxu1 %v13069_v0  ;;  %v14324_v42 = vsub.s32 %v4098_v37, %v14033_v26  ;;  %v11383_v37 = vld [vmem:[%s15232_s1 + $0x40] sm:$0xff]  }
 0x9df   : > { %10237 = vmatprep.subr.bf16.mxu0 %v13069_v0 }
 0x9e1   : > { %10254 = vmatpush3.bf16.msra.mxu1 %v11372_v51 }
 0x9e2   : > { %10238 = vmatpush3.bf16.msra.mxu0 %v11366_v44  ;;  %10255 = vmatprep.subr.bf16.mxu1 %v13069_v0 }
 0x9e3   : > { %10263 = vmatprep.subr.bf16.mxu0 %v13069_v0 }
 0x9e5   : > { %10240 = vmatmul.mubr.bf16.vlgmr.msra.gmra.mrb[20].mxu0 %v3532_v45  ;;  %10256 = vmatpush3.bf16.msra.mxu1 %v11373_v53 }
 0x9e6   : > { %10279 = vmatprep.mubr.msk.bf16.mxu0 %vm13070_vm0, %v13069_v0  ;;  %10257 = vmatprep.subr.bf16.mxu1 %v13069_v0 }
 0x9e7   : > { %10264 = vmatpush3.bf16.msra.mxu0 %v11375_v54 }
 0x9e8   : > { %10265 = vmatprep.subr.bf16.mxu0 %v13069_v0 }
 0x9e9   : > { %10258 = vmatpush3.bf16.msra.mxu1 %v11374_v3 }
 0x9ea   : > { %10283 = vmatprep.subr.bf16.mxu1 %v13069_v0 }
 0x9eb   : > { %10266 = vmatpush3.bf16.msra.mxu0 %v11376_v55 }
 0x9ec   : > { %10267 = vmatprep.subr.bf16.mxu0 %v13069_v0 }
 0x9ef   : > { %10268 = vmatpush3.bf16.msra.mxu0 %v11377_v56 }
 0x9f0   : > { %10269 = vmatprep.subr.bf16.mxu0 %v13069_v0 }
 0x9f3   : > { %10270 = vmatpush3.bf16.msra.mxu0 %v11378_v57 }
 0x9f4   : > { %10271 = vmatprep.subr.bf16.mxu0 %v13069_v0 }
 0x9f7   : > { %10272 = vmatpush3.bf16.msra.mxu0 %v11379_v58 }
 0x9f8   : > { %10273 = vmatprep.subr.bf16.mxu0 %v13069_v0 }
 0x9fb   : > { %10274 = vmatpush3.bf16.msra.mxu0 %v11380_v23 }
 0x9fc   : > { %10275 = vmatprep.subr.bf16.mxu0 %v13069_v0 }
 0x9ff   : > { %10276 = vmatpush3.bf16.msra.mxu0 %v11381_v24 }
 0xa00   : > { %10277 = vmatprep.subr.bf16.mxu0 %v13069_v0 }
 0xa03   : > { %10278 = vmatpush3.bf16.msra.mxu0 %v11382_v25 }
 0xa04   : > { %10303 = vmatprep.subr.bf16.mxu0 %v13069_v0 }
 0xa98   : > { %v3663_v62 = vpop.f32.mrb[16].mxu0 }
 0xa99   : > { %v10201_v63 = vpop.f32.mrb[17].mxu0 }
 0xa9a   : > { %v3666_v4 = vpop.f32.mrb[18].mxu0 }
 0xa9b   : > { %v10202_v7 = vpop.f32.mrb[19].mxu0 }
 0xa9f   : > { %v3752_v8 = vpop.f32.mrb[12].mxu1 }
 0xaa0   : > { %v3753_v9 = vadd.f32 %v3752_v8, %v3663_v62  ;;  %v10221_v10 = vpop.f32.mrb[13].mxu1 }
 0xaa1   : > { %v3755_v11 = vpop.f32.mrb[14].mxu1 }
 0xaa2   : > { %v3756_v52 = vadd.f32 %v3755_v11, %v3666_v4  ;;  %v10222_v12 = vpop.f32.mrb[15].mxu1 }
 0xab8   : > { %v3841_v13 = vpop.f32.mrb[20].mxu0 }
 0xab9   : > { %v3848_v59 = vadd.f32 %v3841_v13, %v3753_v9  ;;  %v10241_v15 = vpop.f32.mrb[21].mxu0 }
 0xaba   : > { %v3844_v16 = vpop.f32.mrb[22].mxu0 }
 0xabb   : > { %v3857_v17 = vadd.f32 %v9297_v14, %v3848_v59  ;;  %v3849_v18 = vadd.f32 %v3844_v16, %v3756_v52  ;;  %v10242_v60 = vpop.f32.mrb[23].mxu0 }
 0xabd   : > { %v3858_v19 = vadd.f32 %v9297_v14, %v3849_v18  ;;  %v3859_v20 = vmax.f32 %v3857_v17, 0.0 }
 0xabf   : > { %v3860_v21 = vmax.f32 %v3858_v19, 0.0 }
 0xac1   : > { %v3861_v22 = vpack.c.bf16 %v3860_v21, %v3859_v20 }
 0xac3   : > { %10260 = vmatmul.mubr.bf16.vlgmr.msra.gmra.mrb[16].mxu1 %v3861_v22 }
 0xac4   : > { %10299 = vmatprep.mubr.msk.bf16.mxu1 %vm13070_vm0, %v13069_v0  ;;  %10284 = vmatpush3.bf16.msra.mxu1 %v11383_v37 }
 0xac5   : > { %10285 = vmatprep.subr.bf16.mxu1 %v13069_v0 }
 0xb96   : > { %v3967_v32 = vpop.f32.mrb[16].mxu1 }
 0xb97   : > { %v3968_v33 = vadd.f32 %v9298_v29, %v3967_v32  ;;  %v10261_v34 = vpop.f32.mrb[17].mxu1 }
 0xb98   : > { %v3970_v36 = vpop.f32.mrb[18].mxu1 }
 0xb99   : > { %v3974_v38 = vadd.f32 %v3968_v33, %v3402_v5  ;;  %v3971_v39 = vadd.f32 %v9298_v29, %v3970_v36  ;;  %v10262_v40 = vpop.f32.mrb[19].mxu1 }
 0xb9a   : > { %v11386_v40 = vld [vmem:[%s15232_s1 + $0x8] sm:$0xff]  }
 0xb9b   : > { %v3975_v41 = vadd.f32 %v3971_v39, %v3403_v6  ;;  %v3976_v43 = vmax.f32 %v3974_v38, 0.0  ;;  %v11384_v38 = vld [vmem:[%s15232_s1] sm:$0xff]   ;;  %v11385_v39 = vld [vmem:[%s15232_s1 + $0x48] sm:$0xff]  }
 0xb9c   : > { %10286 = vmatpush3.bf16.msra.mxu1 %v11385_v39 }
 0xb9d   : > { %v3977_v44 = vmax.f32 %v3975_v41, 0.0  ;;  %10287 = vmatprep.subr.bf16.mxu1 %v13069_v0  ;;  %v11387_v41 = vld [vmem:[%s15232_s1 + $0x50] sm:$0xff]  }
 0xb9f   : > { %v3978_v35 = vpack.c.bf16 %v3977_v44, %v3976_v43  ;;  %v9351_v45 = vpack.c.bf16 %v3977_v44, %v3977_v44  ;;  %v11388_v43 = vld [vmem:[%s15232_s1 + $0x10] sm:$0xff]   ;;  %v11389_v44 = vld [vmem:[%s15232_s1 + $0x58] sm:$0xff]  }
 0xba0   : > { %10288 = vmatpush3.bf16.msra.mxu1 %v11387_v41 }
 0xba1   : > { %v4747_v46 = vrot.slane %v3978_v35, %v14324_v42  ;;  %v4754_v47 = vrot.slane %v9351_v45, %v14324_v42  ;;  %10280 = vmatmul.mubr.bf16.vlgmr.msra.gmra.mrb[24].mxu0 %v3978_v35  ;;  %10289 = vmatprep.subr.bf16.mxu1 %v13069_v0  ;;  %v11390_v35 = vld [vmem:[%s15232_s1 + $0x18] sm:$0xff]   ;;  %v11391_v45 = vld [vmem:[%s15232_s1 + $0x60] sm:$0xff]  }
 0xba2   : > { %10319 = vmatprep.mubr.msk.bf16.mxu0 %vm13070_vm0, %v13069_v0  ;;  %10304 = vmatpush3.bf16.msra.mxu0 %v11384_v38 }
 0xba3   : > { %v4755_v61 = vcombine.high %v4747_v46, %v4747_v46  ;;  %v4756_v5 = vcombine.high %v4754_v47, %v4754_v47  ;;  %v4763_v2 = vrot.slane %v4747_v46, %v14324_v42  ;;  %v4770_v6 = vrot.slane %v4754_v47, %v14324_v42  ;;  %10305 = vmatprep.subr.bf16.mxu0 %v13069_v0  ;;  %v11392_v46 = vld [vmem:[%s15232_s1 + $0x20] sm:$0xff]   ;;  %v11393_v47 = vld [vmem:[%s15232_s1 + $0x68] sm:$0xff]  }
 0xba4   : > { %10290 = vmatpush3.bf16.msra.mxu1 %v11389_v44 }
 0xba5   : > { %v4777_v26 = vrot.slane %v4755_v61, %v14324_v42  ;;  %v4784_v48 = vrot.slane %v4756_v5, %v14324_v42  ;;  %v4785_v49 = vcombine.high %v4763_v2, %v4763_v2  ;;  %v4786_v1 = vcombine.high %v4770_v6, %v4770_v6  ;;  %10291 = vmatprep.subr.bf16.mxu1 %v13069_v0  ;;  %v11394_v61 = vld [vmem:[%s15232_s1 + $0x28] sm:$0xff]   ;;  %v11395_v5 = vld [vmem:[%s15232_s1 + $0x70] sm:$0xff]  }
 0xba6   : > { %v4818_v51 = vrot.slane %v4763_v2, %v14324_v42  ;;  %v4874_v53 = vrot.slane %v4770_v6, %v14324_v42  ;;  %10306 = vmatpush3.bf16.msra.mxu0 %v11386_v40  ;;  %v11396_v2 = vld [vmem:[%s15232_s1 + $0x30] sm:$0xff]   ;;  %v11397_v6 = vld [vmem:[%s15232_s1 + $0x78] sm:$0xff]  }
 0xba7   : > { %v4787_v3 = vcombine.high %v4777_v26, %v4777_v26  ;;  %v4788_v54 = vcombine.high %v4784_v48, %v4784_v48  ;;  %v4832_v55 = vrot.slane %v4777_v26, %v14324_v42  ;;  %v4846_v56 = vrot.slane %v4785_v49, %v14324_v42  ;;  %10307 = vmatprep.subr.bf16.mxu0 %v13069_v0  ;;  %v11398_v26 = vld [vmem:[%s15232_s1 + $0x38] sm:$0xff]  }
 0xba8   : > { %v4825_v57 = vrot.slane %v4818_v51, %v14324_v42  ;;  %v4881_v58 = vrot.slane %v4874_v53, %v14324_v42  ;;  %v4888_v62 = vrot.slane %v4784_v48, %v14324_v42  ;;  %v4902_v63 = vrot.slane %v4786_v1, %v14324_v42  ;;  %10292 = vmatpush3.bf16.msra.mxu1 %v11391_v45  ;;  %v9307_v48 = vld [vmem:[#allocation26] ss:$0 sm:$0xff] }
 0xba9   : > { %v4839_v4 = vrot.slane %v4832_v55, %v14324_v42  ;;  %v4853_v7 = vrot.slane %v4846_v56, %v14324_v42  ;;  %v4860_v8 = vrot.slane %v4787_v3, %v14324_v42  ;;  %v4916_v9 = vrot.slane %v4788_v54, %v14324_v42  ;;  %10293 = vmatprep.subr.bf16.mxu1 %v13069_v0 }
 0xbaa   : > { %v4895_v10 = vrot.slane %v4888_v62, %v14324_v42  ;;  %v4909_v11 = vrot.slane %v4902_v63, %v14324_v42  ;;  %v4924_v59 = vunpack.c.l.b16 %v4825_v57  ;;  %v4928_v15 = vunpack.c.l.b16 %v4881_v58  ;;  %10308 = vmatpush3.bf16.msra.mxu0 %v11388_v43 }
 0xbab   : > { %v4867_v52 = vrot.slane %v4860_v8, %v14324_v42  ;;  %v4925_v12 = vunpack.c.l.b16 %v4839_v4  ;;  %v4926_v13 = vunpack.c.l.b16 %v4853_v7  ;;  %v4923_v14 = vrot.slane %v4916_v9, %v14324_v42  ;;  %10309 = vmatprep.subr.bf16.mxu0 %v13069_v0 }
 0xbac   : > { %v4929_v17 = vunpack.c.l.b16 %v4895_v10  ;;  %v4930_v19 = vunpack.c.l.b16 %v4909_v11  ;;  %v4938_v23 = vrot.slane %v4928_v15, 4  ;;  %10294 = vmatpush3.bf16.msra.mxu1 %v11393_v47 }
 0xbad   : > { %v4927_v16 = vunpack.c.l.b16 %v4867_v52  ;;  %v4932_v18 = vrot.slane %v4925_v12, 7  ;;  %v4934_v60 = vrot.slane %v4926_v13, 6  ;;  %v4931_v22 = vunpack.c.l.b16 %v4923_v14  ;;  %10295 = vmatprep.subr.bf16.mxu1 %v13069_v0 }
 0xbae   : > { %v4940_v25 = vrot.slane %v4929_v17, 3  ;;  %v4942_v31 = vrot.slane %v4930_v19, 2  ;;  %10310 = vmatpush3.bf16.msra.mxu0 %v11390_v35 }
 0xbaf   : > { %v4933_v20 = vsel %vm2596_vm1, %v4932_v18, %v4924_v59  ;;  %v4936_v21 = vrot.slane %v4927_v16, 5  ;;  %v4944_v33 = vrot.slane %v4931_v22, 1  ;;  %10311 = vmatprep.subr.bf16.mxu0 %v13069_v0 }
 0xbb0   : > { %v4935_v24 = vsel %vm2584_vm2, %v4934_v60, %v4933_v20  ;;  %10296 = vmatpush3.bf16.msra.mxu1 %v11395_v5 }
 0xbb1   : > { %v4937_v29 = vsel %vm2586_vm3, %v4936_v21, %v4935_v24  ;;  %10297 = vmatprep.subr.bf16.mxu1 %v13069_v0 }
 0xbb2   : > { %v4939_v30 = vsel %vm2588_vm4, %v4938_v23, %v4937_v29  ;;  %10312 = vmatpush3.bf16.msra.mxu0 %v11392_v46 }
 0xbb3   : > { %v4941_v32 = vsel %vm2590_vm5, %v4940_v25, %v4939_v30  ;;  %10313 = vmatprep.subr.bf16.mxu0 %v13069_v0 }
 0xbb4   : > { %v4943_v34 = vsel %vm2592_vm6, %v4942_v31, %v4941_v32  ;;  %10298 = vmatpush3.bf16.msra.mxu1 %v11397_v6 }
 0xbb5   : > { %v14357_v36 = vsel %vm2594_vm7, %v4944_v33, %v4943_v34  ;;  %10323 = vmatprep.subr.bf16.mxu1 %v13069_v0 }
 0xbb6   : > { %10314 = vmatpush3.bf16.msra.mxu0 %v11394_v61 }
 0xbb7   : > { %10315 = vmatprep.subr.bf16.mxu0 %v13069_v0 }
 0xbba   : > { %10316 = vmatpush3.bf16.msra.mxu0 %v11396_v2 }
 0xbbb   : > { %10317 = vmatprep.subr.bf16.mxu0 %v13069_v0 }
 0xbbe   : > { %10318 = vmatpush3.bf16.msra.mxu0 %v11398_v26 }
 0xbbf   : > { %10343 = vmatprep.subr.bf16.mxu0 %v13069_v0 }
 0xc74   : > { %v4084_v49 = vpop.f32.mrb[24].mxu0 }
 0xc75   : > { %v4085_v1 = vadd.f32 %v9307_v48, %v4084_v49  ;;  %v10281_v51 = vpop.f32.mrb[25].mxu0 }
 0xc76   : > { %v4087_v53 = vpop.f32.mrb[26].mxu0 }
 0xc77   : > { %v4088_v3 = vadd.f32 %v9307_v48, %v4087_v53  ;;  %v10282_v54 = vpop.f32.mrb[27].mxu0  ;;  %v4091_v55 = vmax.f32 %v4085_v1, 0.0 }
 0xc79   : > { %v4092_v56 = vmax.f32 %v4088_v3, 0.0 }
 0xc7b   : > { %v4093_v57 = vpack.c.bf16 %v4092_v56, %v4091_v55  ;;  %v9316_v58 = vpack.c.bf16 %v4092_v56, %v4092_v56 }
 0xc7d   : > { %v4102_v62 = vrot.slane %v4093_v57, %v14324_v42  ;;  %v4109_v63 = vrot.slane %v9316_v58, %v14324_v42 }
 0xc7f   : > { %v4110_v4 = vcombine.high %v4102_v62, %v4102_v62  ;;  %v4111_v7 = vcombine.high %v4109_v63, %v4109_v63  ;;  %v4118_v8 = vrot.slane %v4102_v62, %v14324_v42  ;;  %v4125_v9 = vrot.slane %v4109_v63, %v14324_v42 }
 0xc81   : > { %v4132_v10 = vrot.slane %v4110_v4, %v14324_v42  ;;  %v4139_v11 = vrot.slane %v4111_v7, %v14324_v42  ;;  %v4140_v52 = vcombine.high %v4118_v8, %v4118_v8  ;;  %v4141_v12 = vcombine.high %v4125_v9, %v4125_v9 }
 0xc82   : > { %v4150_v13 = vrot.slane %v4118_v8, %v14324_v42  ;;  %v4206_v14 = vrot.slane %v4125_v9, %v14324_v42 }
 0xc83   : > { %v4142_v59 = vcombine.high %v4132_v10, %v4132_v10  ;;  %v4143_v15 = vcombine.high %v4139_v11, %v4139_v11  ;;  %v4164_v16 = vrot.slane %v4132_v10, %v14324_v42  ;;  %v4178_v17 = vrot.slane %v4140_v52, %v14324_v42 }
 0xc84   : > { %v4157_v18 = vrot.slane %v4150_v13, %v14324_v42  ;;  %v4213_v60 = vrot.slane %v4206_v14, %v14324_v42  ;;  %v4220_v19 = vrot.slane %v4139_v11, %v14324_v42  ;;  %v4234_v20 = vrot.slane %v4141_v12, %v14324_v42  ;;  %v11399_v14 = vld [vmem:[%s15232_s1 + $0x80] sm:$0xff]  }
 0xc85   : > { %v4171_v21 = vrot.slane %v4164_v16, %v14324_v42  ;;  %v4185_v22 = vrot.slane %v4178_v17, %v14324_v42  ;;  %v4192_v23 = vrot.slane %v4142_v59, %v14324_v42  ;;  %v4318_v24 = vrot.slane %v4143_v15, %v14324_v42 }
 0xc86   : > { %v4227_v25 = vrot.slane %v4220_v19, %v14324_v42  ;;  %v4241_v29 = vrot.slane %v4234_v20, %v14324_v42  ;;  %v4242_v30 = vunpack.c.l.b16 %v4157_v18  ;;  %v4246_v31 = vunpack.c.l.b16 %v4213_v60  ;;  %v11400_v18 = vld [vmem:[%s15232_s1 + $0x88] sm:$0xff]   ;;  %v11401_v60 = vld [vmem:[%s15232_s1 + $0x90] sm:$0xff]   ;;  %v11402_v19 = vld [vmem:[%s15232_s1 + $0x98] sm:$0xff]  }
 0xc87   : > { %v4199_v32 = vrot.slane %v4192_v23, %v14324_v42  ;;  %v4243_v33 = vunpack.c.l.b16 %v4171_v21  ;;  %v4244_v34 = vunpack.c.l.b16 %v4185_v22  ;;  %v4325_v40 = vrot.slane %v4318_v24, %v14324_v42  ;;  %v11403_v20 = vld [vmem:[%s15232_s1 + $0xa0] sm:$0xff]   ;;  %v11404_v21 = vld [vmem:[%s15232_s1 + $0xa8] sm:$0xff]   ;;  %v11405_v22 = vld [vmem:[%s15232_s1 + $0xb0] sm:$0xff]  }
 0xc88   : > { %v4247_v37 = vunpack.c.l.b16 %v4227_v25  ;;  %v4248_v38 = vunpack.c.l.b16 %v4241_v29  ;;  %v4513_v39 = vrot.slane %v4242_v30, 1  ;;  %v4255_v45 = vrot.slane %v4246_v31, 4  ;;  %v11406_v23 = vld [vmem:[%s15232_s1 + $0xb8] sm:$0xff]  }
 0xc89   : > { %v4245_v41 = vunpack.c.l.b16 %v4199_v32  ;;  %v4249_v43 = vrot.slane %v4243_v33, 7  ;;  %v4251_v44 = vrot.slane %v4244_v34, 6  ;;  %v4515_v35 = vrot.slane %v4244_v34, 7  ;;  %v11407_v25 = vld [vmem:[#allocation29] sm:$0xff]   ;;  %v11408_v29 = vld [vmem:[#allocation29 + $0x8] sm:$0xff]   ;;  %v11413_v34 = vld [vmem:[#allocation29 + $0x30] sm:$0xff]  }
 0xc8a   : > { %v4257_v46 = vrot.slane %v4247_v37, 3  ;;  %v4514_v47 = vsel %vm2596_vm1, %v4243_v33, %v4513_v39  ;;  %v4519_v61 = vrot.slane %v4246_v31, 5  ;;  %v4521_v49 = vrot.slane %v4247_v37, 4  ;;  %v11410_v31 = vld [vmem:[#allocation29 + $0x18] sm:$0xff]   ;;  %v11411_v32 = vld [vmem:[#allocation29 + $0x20] sm:$0xff]   ;;  %v11412_v33 = vld [vmem:[#allocation29 + $0x28] sm:$0xff]  }
 0xc8b   : > { %v4250_v5 = vsel %vm2584_vm2, %v4249_v43, %v4242_v30  ;;  %v4253_v2 = vrot.slane %v4245_v41, 5  ;;  %v4327_v6 = vsel %vm2596_vm1, %v4249_v43, %v4242_v30  ;;  %v4517_v26 = vrot.slane %v4245_v41, 6  ;;  %v11409_v30 = vld [vmem:[#allocation29 + $0x10] sm:$0xff]   ;;  %v11414_v37 = vld [vmem:[#allocation29 + $0x38] sm:$0xff]   ;;  %v11427_v43 = vld [vmem:[#allocation35 + $0x20] sm:$0xff]  }
 0xc8c   : > { %v4328_v48 = vsel %vm2584_vm2, %v4251_v44, %v4327_v6  ;;  %v4326_v1 = vunpack.c.l.b16 %v4325_v40  ;;  %v4252_v51 = vsel %vm2586_vm3, %v4251_v44, %v4250_v5  ;;  %v4259_v53 = vrot.slane %v4248_v38, 2  ;;  %v11424_v39 = vld [vmem:[#allocation35 + $0x8] sm:$0xff]   ;;  %v11425_v40 = vld [vmem:[#allocation35 + $0x10] sm:$0xff]   ;;  %v11426_v41 = vld [vmem:[#allocation35 + $0x18] sm:$0xff]  }
 0xc8d   : > { %v4329_v3 = vsel %vm2586_vm3, %v4253_v2, %v4328_v48  ;;  %v4254_v54 = vsel %vm2588_vm4, %v4253_v2, %v4252_v51  ;;  %v4516_v55 = vsel %vm2584_vm2, %v4515_v35, %v4514_v47  ;;  %v4523_v62 = vrot.slane %v4248_v38, 3  ;;  %v11423_v38 = vld [vmem:[#allocation35] sm:$0xff]   ;;  %v11428_v44 = vld [vmem:[#allocation35 + $0x28] sm:$0xff]  }
 0xc8e   : > { %v4330_v56 = vsel %vm2588_vm4, %v4255_v45, %v4329_v3  ;;  %v4256_v57 = vsel %vm2590_vm5, %v4255_v45, %v4254_v54  ;;  %v4518_v58 = vsel %vm2586_vm3, %v4517_v26, %v4516_v55  ;;  %v4333_v4 = vrot.slane %v4326_v1, 1 }
 0xc8f   : > { %v4331_v63 = vsel %vm2590_vm5, %v4257_v46, %v4330_v56  ;;  %v4258_v7 = vsel %vm2592_vm6, %v4257_v46, %v4256_v57  ;;  %v4520_v8 = vsel %vm2588_vm4, %v4519_v61, %v4518_v58  ;;  %v4525_v52 = vrot.slane %v4326_v1, 2  ;;  %v11415_v56 = vld [vmem:[#allocation32] sm:$0xff]   ;;  %v11416_v58 = vld [vmem:[#allocation32 + $0x8] sm:$0xff]   ;;  %vm5166_vm4 = vmand %vm5164_vm14, %vm5165_vm15 }
 0xc90   : > { %v4332_v9 = vsel %vm2592_vm6, %v4259_v53, %v4331_v63  ;;  %v4260_v10 = vsel %vm2594_vm7, %v4259_v53, %v4258_v7  ;;  %v4522_v11 = vsel %vm2590_vm5, %v4521_v49, %v4520_v8  ;;  %v9341_v49 = vld [vmem:[#allocation28] ss:$0 sm:$0xff]  ;;  %v11420_v7 = vld [vmem:[#allocation32 + $0x28] sm:$0xff]   ;;  %v11421_v8 = vld [vmem:[#allocation32 + $0x30] sm:$0xff]  }
 0xc91   : > { %v4334_v12 = vsel %vm2594_vm7, %v4333_v4, %v4332_v9  ;;  %v4261_v13 = vpack.c.b16 %v4260_v10, %v4260_v10  ;;  %v4524_v59 = vsel %vm2592_vm6, %v4523_v62, %v4522_v11  ;;  %v11417_v62 = vld [vmem:[#allocation32 + $0x10] sm:$0xff]   ;;  %v11418_v63 = vld [vmem:[#allocation32 + $0x18] sm:$0xff]   ;;  %v11419_v4 = vld [vmem:[#allocation32 + $0x20] sm:$0xff]   ;;  %v4946_v10 = vpack.c.b16 %v14357_v36, %v14357_v36 }
 0xc92   : > { %v4335_v15 = vpack.c.b16 %v4334_v12, %v4334_v12  ;;  %v4526_v16 = vsel %vm2594_vm7, %v4525_v52, %v4524_v59  ;;  %v11422_v9 = vld [vmem:[#allocation32 + $0x38] sm:$0xff]   ;;  %v11434_v12 = vld [vmem:[%s15233_s2] sm:$0xff]  }
 0xc93   : > { %v4263_v17 = vsel %vm14173_vm10, 0, %v4261_v13  ;;  %v4527_v24 = vpack.c.b16 %v4526_v16, %v4526_v16  ;;  %v11429_v11 = vld [vmem:[#allocation35 + $0x30] sm:$0xff]   ;;  %v11430_v52 = vld [vmem:[#allocation35 + $0x38] sm:$0xff]   ;;  %v11442_v59 = vld [vmem:[%s15233_s2 + $0x20] sm:$0xff]  }
 0xc94   : > { %10300 = vmatmul.mubr.bf16.vlgmr.msra.gmra.mrb[20].mxu1 %v4335_v15  ;;  %10320 = vmatmul.mubr.bf16.vlgmr.msra.gmra.mrb[28].mxu0 %v4263_v17  ;;  %v11436_v36 = vld [vmem:[%s15233_s2 + $0x8] sm:$0xff]   ;;  %v11438_v13 = vld [vmem:[%s15233_s2 + $0x10] sm:$0xff]  }
 0xc95   : > { %10324 = vmatpush3.bf16.msra.mxu1 %v11399_v14  ;;  %10339 = vmatprep.mubr.msk.bf16.mxu1 %vm13070_vm0, %v13069_v0  ;;  %v11440_v14 = vld [vmem:[%s15233_s2 + $0x18] sm:$0xff]   ;;  %v9342_v15 = vld [vmem:[#allocation31] ss:$0 sm:$0xff]  ;;  %v9352_v16 = vld [vmem:[#allocation34] ss:$0 sm:$0xff] }
 0xc96   : > { %10325 = vmatprep.subr.bf16.mxu1 %v13069_v0  ;;  %10359 = vmatprep.mubr.msk.bf16.mxu0 %vm13070_vm0, %v13069_v0  ;;  %v10847_v17 = vadd.f32 %v9352_v16, %v9342_v15 }
 0xc97   : > { %10344 = vmatpush3.bf16.msra.mxu0 %v11407_v25  ;;  %v11432_v25 = vld [vmem:[%s15233_s2 + $0x48] sm:$0xff]  }
 0xc98   : > { %10345 = vmatprep.subr.bf16.mxu0 %v13069_v0 }
 0xc99   : > { %10326 = vmatpush3.bf16.msra.mxu1 %v11400_v18 }
 0xc9a   : > { %10327 = vmatprep.subr.bf16.mxu1 %v13069_v0 }
 0xc9b   : > { %10346 = vmatpush3.bf16.msra.mxu0 %v11408_v29  ;;  %v11433_v29 = vld [vmem:[%s15233_s2 + $0x50] sm:$0xff]  }
 0xc9c   : > { %10347 = vmatprep.subr.bf16.mxu0 %v13069_v0 }
 0xc9d   : > { %10328 = vmatpush3.bf16.msra.mxu1 %v11401_v60 }
 0xc9e   : > { %10329 = vmatprep.subr.bf16.mxu1 %v13069_v0 }
 0xc9f   : > { %10348 = vmatpush3.bf16.msra.mxu0 %v11409_v30  ;;  %v11435_v30 = vld [vmem:[%s15233_s2 + $0x58] sm:$0xff]  }
 0xca0   : > { %10349 = vmatprep.subr.bf16.mxu0 %v13069_v0 }
 0xca1   : > { %10330 = vmatpush3.bf16.msra.mxu1 %v11402_v19 }
 0xca2   : > { %10331 = vmatprep.subr.bf16.mxu1 %v13069_v0 }
 0xca3   : > { %10350 = vmatpush3.bf16.msra.mxu0 %v11410_v31  ;;  %v11437_v31 = vld [vmem:[%s15233_s2 + $0x60] sm:$0xff]  }
 0xca4   : > { %10351 = vmatprep.subr.bf16.mxu0 %v13069_v0 }
 0xca5   : > { %10332 = vmatpush3.bf16.msra.mxu1 %v11403_v20 }
 0xca6   : > { %10333 = vmatprep.subr.bf16.mxu1 %v13069_v0 }
 0xca7   : > { %10352 = vmatpush3.bf16.msra.mxu0 %v11411_v32  ;;  %v11439_v32 = vld [vmem:[%s15233_s2 + $0x68] sm:$0xff]  }
 0xca8   : > { %10353 = vmatprep.subr.bf16.mxu0 %v13069_v0 }
 0xca9   : > { %10334 = vmatpush3.bf16.msra.mxu1 %v11404_v21 }
 0xcaa   : > { %10335 = vmatprep.subr.bf16.mxu1 %v13069_v0 }
 0xcab   : > { %10354 = vmatpush3.bf16.msra.mxu0 %v11412_v33  ;;  %v11441_v33 = vld [vmem:[%s15233_s2 + $0x70] sm:$0xff]  }
 0xcac   : > { %10355 = vmatprep.subr.bf16.mxu0 %v13069_v0 }
 0xcad   : > { %10336 = vmatpush3.bf16.msra.mxu1 %v11405_v22 }
 0xcae   : > { %10337 = vmatprep.subr.bf16.mxu1 %v13069_v0 }
 0xcaf   : > { %10356 = vmatpush3.bf16.msra.mxu0 %v11413_v34  ;;  %v11443_v34 = vld [vmem:[%s15233_s2 + $0x78] sm:$0xff]  }
 0xcb0   : > { %10357 = vmatprep.subr.bf16.mxu0 %v13069_v0 }
 0xcb1   : > { %10338 = vmatpush3.bf16.msra.mxu1 %v11406_v23  ;;  %v11431_v23 = vld [vmem:[%s15233_s2 + $0x40] sm:$0xff]  }
 0xcb2   : > { %10383 = vmatprep.subr.bf16.mxu1 %v13069_v0 }
 0xcb3   : > { %10358 = vmatpush3.bf16.msra.mxu0 %v11414_v37  ;;  %v11444_v37 = vld [vmem:[%s15233_s2 + $0x28] sm:$0xff]  }
 0xcb4   : > { %10340 = vmatmul.mubr.bf16.vlgmr.msra.gmra.mrb[24].mxu1 %v4527_v24  ;;  %10363 = vmatprep.subr.bf16.mxu0 %v13069_v0 }
 0xcb5   : > { %10399 = vmatprep.mubr.msk.bf16.mxu1 %vm13070_vm0, %v13069_v0  ;;  %10384 = vmatpush3.bf16.msra.mxu1 %v11423_v38  ;;  %v11445_v38 = vld [vmem:[%s15233_s2 + $0x30] sm:$0xff]  }
 0xcb6   : > { %10385 = vmatprep.subr.bf16.mxu1 %v13069_v0 }
 0xcb9   : > { %10386 = vmatpush3.bf16.msra.mxu1 %v11424_v39  ;;  %v11447_v39 = vld [vmem:[%s15233_s2 + $0x38] sm:$0xff]  }
 0xcba   : > { %10387 = vmatprep.subr.bf16.mxu1 %v13069_v0 }
 0xcbd   : > { %10388 = vmatpush3.bf16.msra.mxu1 %v11425_v40  ;;  %v9361_v40 = vld [vmem:[#allocation37] ss:$0 sm:$0xff] }
 0xcbe   : > { %10389 = vmatprep.subr.bf16.mxu1 %v13069_v0 }
 0xcc1   : > { %10390 = vmatpush3.bf16.msra.mxu1 %v11426_v41 }
 0xcc2   : > { %10391 = vmatprep.subr.bf16.mxu1 %v13069_v0 }
 0xcc5   : > { %10392 = vmatpush3.bf16.msra.mxu1 %v11427_v43 }
 0xcc6   : > { %10393 = vmatprep.subr.bf16.mxu1 %v13069_v0 }
 0xcc9   : > { %10394 = vmatpush3.bf16.msra.mxu1 %v11428_v44 }
 0xcca   : > { %10395 = vmatprep.subr.bf16.mxu1 %v13069_v0 }
 0xccd   : > { %10396 = vmatpush3.bf16.msra.mxu1 %v11429_v11  ;;  %v11462_v11 = vld [vmem:[#allocation40 + $0x38] sm:$0xff]  }
 0xcce   : > { %10397 = vmatprep.subr.bf16.mxu1 %v13069_v0 }
 0xcd1   : > { %10398 = vmatpush3.bf16.msra.mxu1 %v11430_v52  ;;  %v11463_v52 = vld [vmem:[#allocation43] sm:$0xff]  }
 0xcd2   : > { %10403 = vmatprep.subr.bf16.mxu1 %v13069_v0 }
 0xd67   : > { %v4419_v35 = vpop.f32.mrb[20].mxu1  ;;  %v4507_v45 = vpop.f32.mrb[28].mxu0 }
 0xd68   : > { %v4508_v46 = vadd.f32 %v4507_v45, %v4419_v35  ;;  %v10301_v47 = vpop.f32.mrb[21].mxu1  ;;  %v10321_v61 = vpop.f32.mrb[29].mxu0 }
 0xd69   : > { %v4422_v5 = vpop.f32.mrb[22].mxu1  ;;  %v4510_v2 = vpop.f32.mrb[30].mxu0  ;;  %v11446_v47 = vld [vmem:[%s15233_s2 + $0x80] sm:$0xff]  }
 0xd6a   : > { %v10302_v6 = vpop.f32.mrb[23].mxu1  ;;  %v10322_v26 = vpop.f32.mrb[31].mxu0  ;;  %v11448_v2 = vld [vmem:[%s15233_s2 + $0x88] sm:$0xff]  }
 0xd87   : > { %v4611_v48 = vpop.f32.mrb[24].mxu1 }
 0xd88   : > { %v4617_v1 = vadd.f32 %v4611_v48, %v4508_v46  ;;  %v10341_v51 = vpop.f32.mrb[25].mxu1 }
 0xd89   : > { %v4614_v53 = vpop.f32.mrb[26].mxu1  ;;  %v11450_v51 = vld [vmem:[%s15233_s2 + $0x98] sm:$0xff]  }
 0xd8a   : > { %v4625_v3 = vadd.f32 %v9341_v49, %v4617_v1  ;;  %v10342_v54 = vpop.f32.mrb[27].mxu1  ;;  %v11449_v49 = vld [vmem:[%s15233_s2 + $0x90] sm:$0xff]   ;;  %v11451_v53 = vld [vmem:[%s15233_s2 + $0xa0] sm:$0xff]  }
 0xd8b   : > { %v11453_v54 = vld [vmem:[%s15233_s2 + $0xb0] sm:$0xff]  }
 0xd8c   : > { %v4626_v55 = vmax.f32 %v4625_v3, 0.0  ;;  %v11452_v3 = vld [vmem:[%s15233_s2 + $0xa8] sm:$0xff]  }
 0xd8e   : > { %v4627_v57 = vpack.c.bf16 %v4626_v55, %v4626_v55 }
 0xd90   : > { %10360 = vmatmul.mubr.bf16.vlgmr.msra.gmra.mrb[32].mxu0 %v4627_v57 }
 0xd91   : > { %10364 = vmatpush3.bf16.msra.mxu0 %v11415_v56  ;;  %10379 = vmatprep.mubr.msk.bf16.mxu0 %vm13070_vm0, %v13069_v0  ;;  %v11454_v56 = vld [vmem:[%s15233_s2 + $0xb8] sm:$0xff]  }
 0xd92   : > { %10365 = vmatprep.subr.bf16.mxu0 %v13069_v0 }
 0xd95   : > { %10366 = vmatpush3.bf16.msra.mxu0 %v11416_v58 }
 0xd96   : > { %10367 = vmatprep.subr.bf16.mxu0 %v13069_v0 }
 0xd99   : > { %10368 = vmatpush3.bf16.msra.mxu0 %v11417_v62  ;;  %v11455_v62 = vld [vmem:[#allocation40] sm:$0xff]  }
 0xd9a   : > { %10369 = vmatprep.subr.bf16.mxu0 %v13069_v0 }
 0xd9d   : > { %10370 = vmatpush3.bf16.msra.mxu0 %v11418_v63  ;;  %v11456_v63 = vld [vmem:[#allocation40 + $0x8] sm:$0xff]  }
 0xd9e   : > { %10371 = vmatprep.subr.bf16.mxu0 %v13069_v0 }
 0xda1   : > { %10372 = vmatpush3.bf16.msra.mxu0 %v11419_v4  ;;  %v11457_v4 = vld [vmem:[#allocation40 + $0x10] sm:$0xff]  }
 0xda2   : > { %10373 = vmatprep.subr.bf16.mxu0 %v13069_v0 }
 0xda5   : > { %10374 = vmatpush3.bf16.msra.mxu0 %v11420_v7  ;;  %v11458_v7 = vld [vmem:[#allocation40 + $0x18] sm:$0xff]  }
 0xda6   : > { %10375 = vmatprep.subr.bf16.mxu0 %v13069_v0 }
 0xda9   : > { %10376 = vmatpush3.bf16.msra.mxu0 %v11421_v8  ;;  %v11459_v8 = vld [vmem:[#allocation40 + $0x20] sm:$0xff]  }
 0xdaa   : > { %10377 = vmatprep.subr.bf16.mxu0 %v13069_v0 }
 0xdad   : > { %10378 = vmatpush3.bf16.msra.mxu0 %v11422_v9  ;;  %v11460_v9 = vld [vmem:[#allocation40 + $0x28] sm:$0xff]  }
 0xdae   : > { %10423 = vmatprep.subr.bf16.mxu0 %v13069_v0 }
 0xdb0   : > { %10380 = vmatmul.mubr.bf16.vlgmr.msra.gmra.mrb[32].mxu0 %v4946_v10  ;;  %v11461_v10 = vld [vmem:[#allocation40 + $0x30] sm:$0xff]  }
 0xdb1   : > { %10439 = vmatprep.mubr.msk.bf16.mxu0 %vm13070_vm0, %v13069_v0  ;;  %10424 = vmatpush3.bf16.msra.mxu0 %v11434_v12  ;;  %v11464_v12 = vld [vmem:[#allocation43 + $0x8] sm:$0xff]  }
 0xdb2   : > { %10425 = vmatprep.subr.bf16.mxu0 %v13069_v0 }
 0xdb5   : > { %10426 = vmatpush3.bf16.msra.mxu0 %v11436_v36  ;;  %v11465_v36 = vld [vmem:[#allocation43 + $0x10] sm:$0xff]  }
 0xdb6   : > { %10427 = vmatprep.subr.bf16.mxu0 %v13069_v0 }
 0xdb9   : > { %10428 = vmatpush3.bf16.msra.mxu0 %v11438_v13  ;;  %v11466_v13 = vld [vmem:[#allocation43 + $0x18] sm:$0xff]  }
 0xdba   : > { %10429 = vmatprep.subr.bf16.mxu0 %v13069_v0 }
 0xdbd   : > { %10430 = vmatpush3.bf16.msra.mxu0 %v11440_v14  ;;  %v11467_v14 = vld [vmem:[#allocation43 + $0x20] sm:$0xff]  }
 0xdbe   : > { %10431 = vmatprep.subr.bf16.mxu0 %v13069_v0 }
 0xdc1   : > { %10432 = vmatpush3.bf16.msra.mxu0 %v11442_v59  ;;  %v11468_v59 = vld [vmem:[#allocation43 + $0x28] sm:$0xff]  }
 0xdc2   : > { %10433 = vmatprep.subr.bf16.mxu0 %v13069_v0 }
 0xdc5   : > { %10434 = vmatpush3.bf16.msra.mxu0 %v11444_v37 }
 0xdc6   : > { %10435 = vmatprep.subr.bf16.mxu0 %v13069_v0 }
 0xdc9   : > { %10436 = vmatpush3.bf16.msra.mxu0 %v11445_v38  ;;  %v11469_v38 = vld [vmem:[#allocation43 + $0x30] sm:$0xff]  }
 0xdca   : > { %10437 = vmatprep.subr.bf16.mxu0 %v13069_v0 }
 0xdcd   : > { %10438 = vmatpush3.bf16.msra.mxu0 %v11447_v39  ;;  %v11470_v39 = vld [vmem:[#allocation43 + $0x38] sm:$0xff]  }
 0xdce   : > { %10463 = vmatprep.subr.bf16.mxu0 %v13069_v0 }
 0xe83   : > { %v5030_v18 = vpop.f32.mrb[32].mxu0 }
 0xe84   : > { %v10848_v60 = vadd.f32 %v10847_v17, %v5030_v18  ;;  %v10381_v19 = vpop.f32.mrb[33].mxu0 }
 0xe85   : > { %v5033_v20 = vpop.f32.mrb[34].mxu0 }
 0xe86   : > { %v14497_v21 = vmax.f32 %v10848_v60, 0.0  ;;  %v10382_v22 = vpop.f32.mrb[35].mxu0 }
 0xe88   : > { %v5038_v24 = vpack.c.bf16 %v14497_v21, %v14497_v21 }
 0xe8a   : > { %10400 = vmatmul.mubr.bf16.vlgmr.msra.gmra.mrb[28].mxu1 %v5038_v24 }
 0xe8b   : > { %10404 = vmatpush3.bf16.msra.mxu1 %v11431_v23  ;;  %10419 = vmatprep.mubr.msk.bf16.mxu1 %vm13070_vm0, %v13069_v0 }
 0xe8c   : > { %10405 = vmatprep.subr.bf16.mxu1 %v13069_v0 }
 0xe8f   : > { %10406 = vmatpush3.bf16.msra.mxu1 %v11432_v25  ;;  %v9394_v25 = vld [vmem:[#allocation38] ss:$0 sm:$0xff] }
 0xe90   : > { %10407 = vmatprep.subr.bf16.mxu1 %v13069_v0 }
 0xe93   : > { %10408 = vmatpush3.bf16.msra.mxu1 %v11433_v29 }
 0xe94   : > { %10409 = vmatprep.subr.bf16.mxu1 %v13069_v0 }
 0xe97   : > { %10410 = vmatpush3.bf16.msra.mxu1 %v11435_v30 }
 0xe98   : > { %10411 = vmatprep.subr.bf16.mxu1 %v13069_v0 }
 0xe9b   : > { %10412 = vmatpush3.bf16.msra.mxu1 %v11437_v31 }
 0xe9c   : > { %10413 = vmatprep.subr.bf16.mxu1 %v13069_v0 }
 0xe9f   : > { %10414 = vmatpush3.bf16.msra.mxu1 %v11439_v32 }
 0xea0   : > { %10415 = vmatprep.subr.bf16.mxu1 %v13069_v0 }
 0xea3   : > { %10416 = vmatpush3.bf16.msra.mxu1 %v11441_v33 }
 0xea4   : > { %10417 = vmatprep.subr.bf16.mxu1 %v13069_v0 }
 0xea7   : > { %10418 = vmatpush3.bf16.msra.mxu1 %v11443_v34 }
 0xea8   : > { %10443 = vmatprep.subr.bf16.mxu1 %v13069_v0 }
 0xf5d   : > { %v5144_v41 = vpop.f32.mrb[28].mxu1 }
 0xf5e   : > { %v5145_v43 = vadd.f32 %v9361_v40, %v5144_v41  ;;  %v10401_v44 = vpop.f32.mrb[29].mxu1  ;;  %v11471_v40 = vld [vmem:[%s15234_s23 + $0x40] sm:$0xff]   ;;  %v11473_v41 = vld [vmem:[%s15235_s18 + $0x48] sm:$0xff]   ;;  %s15239_s23 = sld [smem:[#allocation133_spill]] }
 0xf5f   : > { %v5147_v35 = vpop.f32.mrb[30].mxu1 }
 0xf60   : > { %v5150_v45 = vmax.f32 %v5145_v43, 0.0  ;;  %v10402_v46 = vpop.f32.mrb[31].mxu1  ;;  %v9395_v43 = vld [vmem:[#allocation41] ss:$0 sm:$0xff] }
 0xf62   : > { %v5151_v61 = vpack.c.bf16 %v5150_v45, %v5150_v45 }
 0xf64   : > { %v5153_v5 = vshrl.u32 %v5151_v61, 16  ;;  %10420 = vmatmul.mubr.bf16.vlgmr.msra.gmra.mrb[32].mxu1 %v5151_v61  ;;  %v5156_v6 = vshll.u32 %v5151_v61, 16  ;;  %s15240_s1 = smov %s15239_s23 }
 0xf65   : > { %10444 = vmatpush3.bf16.msra.mxu1 %v11446_v47  ;;  %10459 = vmatprep.mubr.msk.bf16.mxu1 %vm13070_vm0, %v13069_v0 }
 0xf66   : > { %10445 = vmatprep.subr.bf16.mxu1 %v13069_v0  ;;  %v5155_v26 = vrot.slane %v5153_v5, 7  ;;  %v5161_v55 = vrot.slane %v5156_v6, 1 }
 0xf68   : > { %v5158_v48 = vor.u32 %v5156_v6, %v5155_v26  ;;  %v5162_v57 = vor.u32 %v5161_v55, %v5153_v5  ;;  %v11474_v26 = vld [vmem:[%s15235_s18 + $0x8] sm:$0xff]   ;;  %v11483_v55 = vld [vmem:[%s15235_s18 + $0x70] sm:$0xff]  }
 0xf69   : > { %10446 = vmatpush3.bf16.msra.mxu1 %v11448_v2  ;;  %v11472_v2 = vld [vmem:[%s15235_s18] sm:$0xff]  }
 0xf6a   : > { %v5160_v1 = vsel %vm14173_vm10, 0, %v5158_v48  ;;  %10447 = vmatprep.subr.bf16.mxu1 %v13069_v0  ;;  %v5167_v58 = vsel %vm5166_vm4, %v5162_v57, 0  ;;  %v11476_v48 = vld [vmem:[%s15235_s18 + $0x10] sm:$0xff]   ;;  %v11485_v57 = vld [vmem:[%s15235_s18 + $0x78] sm:$0xff]  }
 0xf6b   : > { %10440 = vmatmul.mubr.bf16.vlgmr.msra.gmra.mrb[36].mxu0 %v5160_v1  ;;  %v11478_v1 = vld [vmem:[%s15235_s18 + $0x18] sm:$0xff]  }
 0xf6c   : > { %10479 = vmatprep.mubr.msk.bf16.mxu0 %vm13070_vm0, %v13069_v0  ;;  %10464 = vmatpush3.bf16.msra.mxu0 %v11455_v62  ;;  %v9404_v62 = vld [vmem:[#allocation44] ss:$0 sm:$0xff] }
 0xf6d   : > { %10448 = vmatpush3.bf16.msra.mxu1 %v11449_v49  ;;  %10465 = vmatprep.subr.bf16.mxu0 %v13069_v0  ;;  %v11477_v49 = vld [vmem:[%s15235_s18 + $0x58] sm:$0xff]  }
 0xf6e   : > { %10449 = vmatprep.subr.bf16.mxu1 %v13069_v0 }
 0xf70   : > { %10466 = vmatpush3.bf16.msra.mxu0 %v11456_v63 }
 0xf71   : > { %10450 = vmatpush3.bf16.msra.mxu1 %v11450_v51  ;;  %10467 = vmatprep.subr.bf16.mxu0 %v13069_v0  ;;  %v11479_v51 = vld [vmem:[%s15235_s18 + $0x60] sm:$0xff]  }
 0xf72   : > { %10451 = vmatprep.subr.bf16.mxu1 %v13069_v0 }
 0xf74   : > { %10468 = vmatpush3.bf16.msra.mxu0 %v11457_v4 }
 0xf75   : > { %10452 = vmatpush3.bf16.msra.mxu1 %v11451_v53  ;;  %10469 = vmatprep.subr.bf16.mxu0 %v13069_v0  ;;  %v11480_v53 = vld [vmem:[%s15235_s18 + $0x20] sm:$0xff]  }
 0xf76   : > { %10453 = vmatprep.subr.bf16.mxu1 %v13069_v0 }
 0xf78   : > { %10470 = vmatpush3.bf16.msra.mxu0 %v11458_v7 }
 0xf79   : > { %10454 = vmatpush3.bf16.msra.mxu1 %v11452_v3  ;;  %10471 = vmatprep.subr.bf16.mxu0 %v13069_v0  ;;  %v11481_v3 = vld [vmem:[%s15235_s18 + $0x68] sm:$0xff]  }
 0xf7a   : > { %10455 = vmatprep.subr.bf16.mxu1 %v13069_v0 }
 0xf7c   : > { %10472 = vmatpush3.bf16.msra.mxu0 %v11459_v8 }
 0xf7d   : > { %10456 = vmatpush3.bf16.msra.mxu1 %v11453_v54  ;;  %10473 = vmatprep.subr.bf16.mxu0 %v13069_v0  ;;  %v11482_v54 = vld [vmem:[%s15235_s18 + $0x28] sm:$0xff]  }
 0xf7e   : > { %10457 = vmatprep.subr.bf16.mxu1 %v13069_v0 }
 0xf80   : > { %10474 = vmatpush3.bf16.msra.mxu0 %v11460_v9 }
 0xf81   : > { %10458 = vmatpush3.bf16.msra.mxu1 %v11454_v56  ;;  %10475 = vmatprep.subr.bf16.mxu0 %v13069_v0  ;;  %v11484_v56 = vld [vmem:[%s15235_s18 + $0x30] sm:$0xff]  }
 0xf82   : > { %10483 = vmatprep.subr.bf16.mxu1 %v13069_v0 }
 0xf84   : > { %10460 = vmatmul.mubr.bf16.vlgmr.msra.gmra.mrb[36].mxu1 %v5167_v58  ;;  %10476 = vmatpush3.bf16.msra.mxu0 %v11461_v10  ;;  %v11486_v58 = vld [vmem:[%s15235_s18 + $0x38] sm:$0xff]  }
 0xf85   : > { %10499 = vmatprep.mubr.msk.bf16.mxu1 %vm13070_vm0, %v13069_v0  ;;  %10477 = vmatprep.subr.bf16.mxu0 %v13069_v0 }
 0xf86   : > { %10484 = vmatpush3.bf16.msra.mxu1 %v11463_v52 }
 0xf87   : > { %10485 = vmatprep.subr.bf16.mxu1 %v13069_v0 }
 0xf88   : > { %10478 = vmatpush3.bf16.msra.mxu0 %v11462_v11 }
 0xf89   : > { %10503 = vmatprep.subr.bf16.mxu0 %v13069_v0 }
 0xf8a   : > { %10486 = vmatpush3.bf16.msra.mxu1 %v11464_v12 }
 0xf8b   : > { %10487 = vmatprep.subr.bf16.mxu1 %v13069_v0 }
 0xf8e   : > { %10488 = vmatpush3.bf16.msra.mxu1 %v11465_v36 }
 0xf8f   : > { %10489 = vmatprep.subr.bf16.mxu1 %v13069_v0 }
 0xf92   : > { %10490 = vmatpush3.bf16.msra.mxu1 %v11466_v13 }
 0xf93   : > { %10491 = vmatprep.subr.bf16.mxu1 %v13069_v0 }
 0xf96   : > { %10492 = vmatpush3.bf16.msra.mxu1 %v11467_v14 }
 0xf97   : > { %10493 = vmatprep.subr.bf16.mxu1 %v13069_v0 }
 0xf9a   : > { %10494 = vmatpush3.bf16.msra.mxu1 %v11468_v59 }
 0xf9b   : > { %10495 = vmatprep.subr.bf16.mxu1 %v13069_v0 }
 0xf9e   : > { %10496 = vmatpush3.bf16.msra.mxu1 %v11469_v38 }
 0xf9f   : > { %10497 = vmatprep.subr.bf16.mxu1 %v13069_v0 }
 0xfa2   : > { %10498 = vmatpush3.bf16.msra.mxu1 %v11470_v39 }
 0xfa3   : > { %10523 = vmatprep.subr.bf16.mxu1 %v13069_v0 }
0x1037   : > { %v5298_v15 = vpop.f32.mrb[32].mxu1 }
0x1038   : > { %v10421_v16 = vpop.f32.mrb[33].mxu1 }
0x1039   : > { %v5301_v17 = vpop.f32.mrb[34].mxu1 }
0x103a   : > { %v10422_v18 = vpop.f32.mrb[35].mxu1 }
0x103e   : > { %v5386_v60 = vpop.f32.mrb[36].mxu0 }
0x103f   : > { %v5387_v19 = vadd.f32 %v5386_v60, %v5298_v15  ;;  %v10441_v20 = vpop.f32.mrb[37].mxu0 }
0x1040   : > { %v5389_v22 = vpop.f32.mrb[38].mxu0 }
0x1041   : > { %v10442_v23 = vpop.f32.mrb[39].mxu0 }
0x1057   : > { %v5474_v24 = vpop.f32.mrb[36].mxu1 }
0x1058   : > { %v5480_v29 = vadd.f32 %v5474_v24, %v5387_v19  ;;  %v10461_v30 = vpop.f32.mrb[37].mxu1 }
0x1059   : > { %v5477_v31 = vpop.f32.mrb[38].mxu1 }
0x105a   : > { %v5488_v32 = vadd.f32 %v9394_v25, %v5480_v29  ;;  %v10462_v33 = vpop.f32.mrb[39].mxu1 }
0x105c   : > { %v5489_v34 = vmax.f32 %v5488_v32, 0.0 }
0x105e   : > { %v5490_v37 = vpack.c.bf16 %v5489_v34, %v5489_v34 }
0x1060   : > { %10480 = vmatmul.mubr.bf16.vlgmr.msra.gmra.mrb[40].mxu0 %v5490_v37 }
0x1061   : > { %10519 = vmatprep.mubr.msk.bf16.mxu0 %vm13070_vm0, %v13069_v0  ;;  %10504 = vmatpush3.bf16.msra.mxu0 %v11471_v40 }
0x1062   : > { %10505 = vmatprep.subr.bf16.mxu0 %v13069_v0 }
0x1065   : > { %10506 = vmatpush3.bf16.msra.mxu0 %v11473_v41  ;;  %v11487_v41 = vld [vmem:[%s15235_s18 + $0x80] sm:$0xff]  }
0x1066   : > { %10507 = vmatprep.subr.bf16.mxu0 %v13069_v0 }
0x1133   : > { %v5596_v44 = vpop.f32.mrb[40].mxu0 }
0x1134   : > { %v5597_v35 = vadd.f32 %v9395_v43, %v5596_v44  ;;  %v10481_v45 = vpop.f32.mrb[41].mxu0 }
0x1135   : > { %v5599_v46 = vpop.f32.mrb[42].mxu0  ;;  %v11489_v45 = vld [vmem:[%s15235_s18 + $0x90] sm:$0xff]  }
0x1136   : > { %v5602_v47 = vadd.f32 %v5597_v35, %v14497_v21  ;;  %v10482_v61 = vpop.f32.mrb[43].mxu0  ;;  %v11475_v21 = vld [vmem:[%s15235_s18 + $0x50] sm:$0xff]   ;;  %v11488_v35 = vld [vmem:[%s15235_s18 + $0x88] sm:$0xff]   ;;  %v11490_v46 = vld [vmem:[%s15235_s18 + $0x98] sm:$0xff]  }
0x1137   : > { %10508 = vmatpush3.bf16.msra.mxu0 %v11475_v21 }
0x1138   : > { %v5603_v5 = vmax.f32 %v5602_v47, 0.0  ;;  %10509 = vmatprep.subr.bf16.mxu0 %v13069_v0  ;;  %v11491_v47 = vld [vmem:[%s15235_s18 + $0xa0] sm:$0xff]  }
0x113a   : > { %v14573_v6 = vpack.c.bf16 %v5603_v5, %v5603_v5  ;;  %v11492_v5 = vld [vmem:[%s15235_s18 + $0xa8] sm:$0xff]  }
0x113b   : > { %10510 = vmatpush3.bf16.msra.mxu0 %v11477_v49 }
0x113c   : > { %10500 = vmatmul.mubr.bf16.vlgmr.msra.gmra.mrb[40].mxu1 %v14573_v6  ;;  %10511 = vmatprep.subr.bf16.mxu0 %v13069_v0 }
0x113d   : > { %10524 = vmatpush3.bf16.msra.mxu1 %v11472_v2  ;;  %10539 = vmatprep.mubr.msk.bf16.mxu1 %vm13070_vm0, %v13069_v0 }
0x113e   : > { %10525 = vmatprep.subr.bf16.mxu1 %v13069_v0 }
0x113f   : > { %10512 = vmatpush3.bf16.msra.mxu0 %v11479_v51 }
0x1140   : > { %10513 = vmatprep.subr.bf16.mxu0 %v13069_v0 }
0x1141   : > { %10526 = vmatpush3.bf16.msra.mxu1 %v11474_v26  ;;  %v11493_v26 = vld [vmem:[%s15235_s18 + $0xb0] sm:$0xff]  }
0x1142   : > { %10527 = vmatprep.subr.bf16.mxu1 %v13069_v0 }
0x1143   : > { %10514 = vmatpush3.bf16.msra.mxu0 %v11481_v3  ;;  %v11495_v3 = vld [vmem:[#allocation47] sm:$0xff]  }
0x1144   : > { %10515 = vmatprep.subr.bf16.mxu0 %v13069_v0 }
0x1145   : > { %10528 = vmatpush3.bf16.msra.mxu1 %v11476_v48 }
0x1146   : > { %10529 = vmatprep.subr.bf16.mxu1 %v13069_v0 }
0x1147   : > { %10516 = vmatpush3.bf16.msra.mxu0 %v11483_v55  ;;  %v11497_v55 = vld [vmem:[#allocation47 + $0x10] sm:$0xff]  }
0x1148   : > { %10517 = vmatprep.subr.bf16.mxu0 %v13069_v0 }
0x1149   : > { %10530 = vmatpush3.bf16.msra.mxu1 %v11478_v1  ;;  %v11494_v1 = vld [vmem:[%s15235_s18 + $0xb8] sm:$0xff]  }
0x114a   : > { %10531 = vmatprep.subr.bf16.mxu1 %v13069_v0 }
0x114b   : > { %10518 = vmatpush3.bf16.msra.mxu0 %v11485_v57  ;;  %v11499_v57 = vld [vmem:[#allocation47 + $0x20] sm:$0xff]  }
0x114c   : > { %10543 = vmatprep.subr.bf16.mxu0 %v13069_v0 }
0x114d   : > { %10532 = vmatpush3.bf16.msra.mxu1 %v11480_v53 }
0x114e   : > { %10533 = vmatprep.subr.bf16.mxu1 %v13069_v0 }
0x1151   : > { %10534 = vmatpush3.bf16.msra.mxu1 %v11482_v54  ;;  %v11496_v54 = vld [vmem:[#allocation47 + $0x8] sm:$0xff]  }
0x1152   : > { %10535 = vmatprep.subr.bf16.mxu1 %v13069_v0 }
0x1155   : > { %10536 = vmatpush3.bf16.msra.mxu1 %v11484_v56  ;;  %v11498_v56 = vld [vmem:[#allocation47 + $0x18] sm:$0xff]  }
0x1156   : > { %10537 = vmatprep.subr.bf16.mxu1 %v13069_v0 }
0x1159   : > { %10538 = vmatpush3.bf16.msra.mxu1 %v11486_v58  ;;  %v11500_v58 = vld [vmem:[#allocation47 + $0x28] sm:$0xff]  }
0x115a   : > { %10563 = vmatprep.subr.bf16.mxu1 %v13069_v0 }
0x120f   : > { %v5710_v63 = vpop.f32.mrb[40].mxu1 }
0x1210   : > { %v5711_v4 = vadd.f32 %v9404_v62, %v5710_v63  ;;  %v10501_v7 = vpop.f32.mrb[41].mxu1  ;;  %v11501_v62 = vld [vmem:[#allocation47 + $0x30] sm:$0xff]   ;;  %v11502_v63 = vld [vmem:[#allocation47 + $0x38] sm:$0xff]  }
0x1211   : > { %v5713_v8 = vpop.f32.mrb[42].mxu1  ;;  %v11512_v7 = vld [vmem:[#allocation53 + $0x8] sm:$0xff]  }
0x1212   : > { %v5716_v9 = vmax.f32 %v5711_v4, 0.0  ;;  %v10502_v10 = vpop.f32.mrb[43].mxu1  ;;  %v11511_v4 = vld [vmem:[#allocation53] sm:$0xff]   ;;  %v11513_v8 = vld [vmem:[#allocation53 + $0x10] sm:$0xff]  }
0x1213   : > { %v11515_v10 = vld [vmem:[#allocation53 + $0x20] sm:$0xff]  }
0x1214   : > { %v5717_v11 = vpack.c.bf16 %v5716_v9, %v5716_v9  ;;  %v11514_v9 = vld [vmem:[#allocation53 + $0x18] sm:$0xff]  }
0x1216   : > { %v5725_v52 = vrot.slane %v5717_v11, %v14324_v42  ;;  %v11516_v11 = vld [vmem:[#allocation53 + $0x28] sm:$0xff]  }
0x1218   : > { %v5726_v12 = vcombine.high %v5725_v52, %v5725_v52  ;;  %v5733_v36 = vrot.slane %v5725_v52, %v14324_v42 }
0x121a   : > { %v5740_v13 = vrot.slane %v5726_v12, %v14324_v42  ;;  %v5741_v14 = vcombine.high %v5733_v36, %v5733_v36  ;;  %v5749_v59 = vrot.slane %v5733_v36, %v14324_v42 }
0x121c   : > { %v5742_v15 = vcombine.high %v5740_v13, %v5740_v13  ;;  %v5763_v16 = vrot.slane %v5740_v13, %v14324_v42  ;;  %v5777_v17 = vrot.slane %v5741_v14, %v14324_v42  ;;  %v5756_v18 = vrot.slane %v5749_v59, %v14324_v42 }
0x121e   : > { %v5770_v60 = vrot.slane %v5763_v16, %v14324_v42  ;;  %v5784_v19 = vrot.slane %v5777_v17, %v14324_v42  ;;  %v5849_v20 = vrot.slane %v5742_v15, %v14324_v42  ;;  %v5785_v25 = vunpack.c.l.b16 %v5756_v18 }
0x1220   : > { %v5786_v22 = vunpack.c.l.b16 %v5770_v60  ;;  %v5787_v23 = vunpack.c.l.b16 %v5784_v19  ;;  %v5856_v24 = vrot.slane %v5849_v20, %v14324_v42  ;;  %v6040_v61 = vrot.slane %v5785_v25, 1  ;;  %v9437_v60 = vld [vmem:[#allocation46] ss:$0 sm:$0xff] }
0x1222   : > { %v5788_v29 = vrot.slane %v5786_v22, 7  ;;  %v5790_v30 = vrot.slane %v5787_v23, 6  ;;  %v5857_v31 = vunpack.c.l.b16 %v5856_v24  ;;  %v6042_v2 = vrot.slane %v5787_v23, 7 }
0x1223   : > { %v6041_v21 = vsel %vm2596_vm1, %v5786_v22, %v6040_v61  ;;  %v6265_v22 = vrot.slane %v14573_v6, %v14324_v42  ;;  %v11507_v61 = vld [vmem:[#allocation50 + $0x20] sm:$0xff]  }
0x1224   : > { %v5858_v32 = vsel %vm2596_vm1, %v5788_v29, %v5785_v25  ;;  %v5860_v33 = vrot.slane %v5857_v31, 5  ;;  %v5789_v34 = vsel %vm2584_vm2, %v5788_v29, %v5785_v25  ;;  %v6044_v48 = vrot.slane %v5857_v31, 6  ;;  %v11503_v31 = vld [vmem:[#allocation50] sm:$0xff]  }
0x1225   : > { %v5859_v37 = vsel %vm2584_vm2, %v5790_v30, %v5858_v32  ;;  %v5791_v38 = vsel %vm2586_vm3, %v5790_v30, %v5789_v34  ;;  %v6043_v49 = vsel %vm2584_vm2, %v6042_v2, %v6041_v21  ;;  %v6266_v30 = vcombine.high %v6265_v22, %v6265_v22 }
0x1226   : > { %v5861_v39 = vsel %vm2586_vm3, %v5860_v33, %v5859_v37  ;;  %v5792_v40 = vpack.c.b16 %v5791_v38, %v5791_v38  ;;  %v6045_v51 = vsel %vm2586_vm3, %v6044_v48, %v6043_v49  ;;  %v6273_v33 = vrot.slane %v6265_v22, %v14324_v42  ;;  %v11504_v37 = vld [vmem:[#allocation50 + $0x8] sm:$0xff]   ;;  %v11525_v22 = vld [vmem:[%s15236_s12 + $0x60] sm:$0xff]  }
0x1227   : > { %v5862_v43 = vpack.c.b16 %v5861_v39, %v5861_v39  ;;  %v6046_v53 = vpack.c.b16 %v6045_v51, %v6045_v51  ;;  %v6280_v34 = vrot.slane %v6266_v30, %v14324_v42  ;;  %v11505_v39 = vld [vmem:[#allocation50 + $0x10] sm:$0xff]   ;;  %v11508_v48 = vld [vmem:[#allocation50 + $0x28] sm:$0xff]  }
0x1228   : > { %v5794_v44 = vsel %vm14173_vm10, 0, %v5792_v40  ;;  %v6281_v6 = vcombine.high %v6273_v33, %v6273_v33  ;;  %v11533_v30 = vld [vmem:[%s15236_s12 + $0x30] sm:$0xff]  }
0x1229   : > { %10520 = vmatmul.mubr.bf16.vlgmr.msra.gmra.mrb[44].mxu0 %v5862_v43  ;;  %10540 = vmatmul.mubr.bf16.vlgmr.msra.gmra.mrb[44].mxu1 %v5794_v44  ;;  %v6326_v38 = vrot.slane %v6280_v34, %v14324_v42  ;;  %v6282_v40 = vcombine.high %v6280_v34, %v6280_v34  ;;  %v11506_v44 = vld [vmem:[#allocation50 + $0x18] sm:$0xff]  }
0x122a   : > { %10544 = vmatpush3.bf16.msra.mxu0 %v11487_v41  ;;  %10559 = vmatprep.mubr.msk.bf16.mxu0 %vm13070_vm0, %v13069_v0  ;;  %v6340_v41 = vrot.slane %v6281_v6, %v14324_v42 }
0x122b   : > { %10545 = vmatprep.subr.bf16.mxu0 %v13069_v0  ;;  %10579 = vmatprep.mubr.msk.bf16.mxu1 %vm13070_vm0, %v13069_v0  ;;  %v6333_v43 = vrot.slane %v6326_v38, %v14324_v42 }
0x122c   : > { %10564 = vmatpush3.bf16.msra.mxu1 %v11495_v3 }
0x122d   : > { %10565 = vmatprep.subr.bf16.mxu1 %v13069_v0 }
0x122e   : > { %10546 = vmatpush3.bf16.msra.mxu0 %v11488_v35  ;;  %v6312_v35 = vrot.slane %v6273_v33, %v14324_v42 }
0x122f   : > { %10547 = vmatprep.subr.bf16.mxu0 %v13069_v0 }
0x1230   : > { %10566 = vmatpush3.bf16.msra.mxu1 %v11496_v54 }
0x1231   : > { %10567 = vmatprep.subr.bf16.mxu1 %v13069_v0 }
0x1232   : > { %10548 = vmatpush3.bf16.msra.mxu0 %v11489_v45  ;;  %v6354_v45 = vrot.slane %v6282_v40, %v14324_v42  ;;  %v11534_v40 = vld [vmem:[%s15236_s12 + $0x80] sm:$0xff]  }
0x1233   : > { %10549 = vmatprep.subr.bf16.mxu0 %v13069_v0 }
0x1234   : > { %10568 = vmatpush3.bf16.msra.mxu1 %v11497_v55  ;;  %v6361_v2 = vrot.slane %v6354_v45, %v14324_v42 }
0x1235   : > { %10569 = vmatprep.subr.bf16.mxu1 %v13069_v0 }
0x1236   : > { %10550 = vmatpush3.bf16.msra.mxu0 %v11490_v46  ;;  %v6347_v46 = vrot.slane %v6340_v41, %v14324_v42 }
0x1237   : > { %10551 = vmatprep.subr.bf16.mxu0 %v13069_v0 }
0x1238   : > { %10570 = vmatpush3.bf16.msra.mxu1 %v11498_v56  ;;  %v11510_v56 = vld [vmem:[#allocation50 + $0x38] sm:$0xff]  }
0x1239   : > { %10571 = vmatprep.subr.bf16.mxu1 %v13069_v0 }
0x123a   : > { %10552 = vmatpush3.bf16.msra.mxu0 %v11491_v47  ;;  %v6363_v47 = vunpack.c.l.b16 %v6333_v43 }
0x123b   : > { %10553 = vmatprep.subr.bf16.mxu0 %v13069_v0 }
0x123c   : > { %10572 = vmatpush3.bf16.msra.mxu1 %v11499_v57  ;;  %v6366_v21 = vrot.slane %v6363_v47, 7  ;;  %v11537_v47 = vld [vmem:[%s15236_s12 + $0x90] sm:$0xff]  }
0x123d   : > { %10573 = vmatprep.subr.bf16.mxu1 %v13069_v0 }
0x123e   : > { %10554 = vmatpush3.bf16.msra.mxu0 %v11492_v5  ;;  %v6319_v5 = vrot.slane %v6312_v35, %v14324_v42 }
0x123f   : > { %10555 = vmatprep.subr.bf16.mxu0 %v13069_v0 }
0x1240   : > { %10574 = vmatpush3.bf16.msra.mxu1 %v11500_v58  ;;  %v6362_v49 = vunpack.c.l.b16 %v6319_v5  ;;  %v11538_v5 = vld [vmem:[%s15236_s12 + $0x98] sm:$0xff]  }
0x1241   : > { %10575 = vmatprep.subr.bf16.mxu1 %v13069_v0 }
0x1242   : > { %10556 = vmatpush3.bf16.msra.mxu0 %v11493_v26  ;;  %v6364_v26 = vunpack.c.l.b16 %v6347_v46  ;;  %v6367_v3 = vsel %vm2596_vm1, %v6366_v21, %v6362_v49  ;;  %v11541_v21 = vld [vmem:[%s15236_s12 + $0xb0] sm:$0xff]   ;;  %v11542_v49 = vld [vmem:[%s15236_s12 + $0xb8] sm:$0xff]  }
0x1243   : > { %10557 = vmatprep.subr.bf16.mxu0 %v13069_v0 }
0x1244   : > { %10576 = vmatpush3.bf16.msra.mxu1 %v11501_v62  ;;  %v6368_v51 = vrot.slane %v6364_v26, 6  ;;  %v11517_v62 = vld [vmem:[#allocation53 + $0x30] sm:$0xff]   ;;  %v11540_v26 = vld [vmem:[%s15236_s12 + $0xa8] sm:$0xff]  }
0x1245   : > { %10577 = vmatprep.subr.bf16.mxu1 %v13069_v0 }
0x1246   : > { %10558 = vmatpush3.bf16.msra.mxu0 %v11494_v1  ;;  %v6365_v1 = vunpack.c.l.b16 %v6361_v2  ;;  %v6369_v55 = vsel %vm2584_vm2, %v6368_v51, %v6367_v3  ;;  %v11539_v2 = vld [vmem:[%s15236_s12 + $0xa0] sm:$0xff]   ;;  %vm6590_vm2 = vcmask 1041408   ;;  %v11544_v3 = vld [vmem:[#allocation58 + $0x8] sm:$0xff]  }
0x1247   : > { %10603 = vmatprep.subr.bf16.mxu0 %v13069_v0 }
0x1248   : > { %10578 = vmatpush3.bf16.msra.mxu1 %v11502_v63  ;;  %v6370_v54 = vrot.slane %v6365_v1, 5  ;;  %v11518_v63 = vld [vmem:[#allocation53 + $0x38] sm:$0xff]  }
0x1249   : > { %10560 = vmatmul.mubr.bf16.vlgmr.msra.gmra.mrb[48].mxu0 %v6046_v53  ;;  %10583 = vmatprep.subr.bf16.mxu1 %v13069_v0  ;;  %v11509_v53 = vld [vmem:[#allocation50 + $0x30] sm:$0xff]  }
0x124a   : > { %10619 = vmatprep.mubr.msk.bf16.mxu0 %vm13070_vm0, %v13069_v0  ;;  %10604 = vmatpush3.bf16.msra.mxu0 %v11511_v4  ;;  %v6371_v57 = vsel %vm2586_vm3, %v6370_v54, %v6369_v55  ;;  %v11522_v4 = vld [vmem:[%s15236_s12] sm:$0xff]   ;;  %vm6591_vm3 = vsmask.f32 1280 }
0x124b   : > { %10605 = vmatprep.subr.bf16.mxu0 %v13069_v0  ;;  %v6372_v58 = vpack.c.b16 %v6371_v57, %v6371_v57  ;;  %vm6592_vm5 = vmand %vm6590_vm2, %vm6591_vm3  ;;  %v11545_v54 = vld [vmem:[#allocation58 + $0x10] sm:$0xff]   ;;  %v11546_v55 = vld [vmem:[#allocation58 + $0x18] sm:$0xff]  }
0x124c   : > { %v11548_v57 = vld [vmem:[#allocation58 + $0x28] sm:$0xff]  }
0x124e   : > { %10606 = vmatpush3.bf16.msra.mxu0 %v11512_v7  ;;  %v11524_v7 = vld [vmem:[%s15236_s12 + $0x8] sm:$0xff]  }
0x124f   : > { %10607 = vmatprep.subr.bf16.mxu0 %v13069_v0 }
0x1252   : > { %10608 = vmatpush3.bf16.msra.mxu0 %v11513_v8  ;;  %v11526_v8 = vld [vmem:[%s15236_s12 + $0x10] sm:$0xff]  }
0x1253   : > { %10609 = vmatprep.subr.bf16.mxu0 %v13069_v0 }
0x1256   : > { %10610 = vmatpush3.bf16.msra.mxu0 %v11514_v9  ;;  %v11528_v9 = vld [vmem:[%s15236_s12 + $0x18] sm:$0xff]  }
0x1257   : > { %10611 = vmatprep.subr.bf16.mxu0 %v13069_v0 }
0x125a   : > { %10612 = vmatpush3.bf16.msra.mxu0 %v11515_v10  ;;  %v11530_v10 = vld [vmem:[%s15236_s12 + $0x20] sm:$0xff]  }
0x125b   : > { %10613 = vmatprep.subr.bf16.mxu0 %v13069_v0 }
0x125e   : > { %10614 = vmatpush3.bf16.msra.mxu0 %v11516_v11  ;;  %v9438_v11 = vld [vmem:[#allocation49] ss:$0 sm:$0xff] }
0x125f   : > { %10615 = vmatprep.subr.bf16.mxu0 %v13069_v0 }
0x1262   : > { %10616 = vmatpush3.bf16.msra.mxu0 %v11517_v62  ;;  %v11550_v62 = vld [vmem:[#allocation58 + $0x38] sm:$0xff]  }
0x1263   : > { %10617 = vmatprep.subr.bf16.mxu0 %v13069_v0 }
0x1266   : > { %10618 = vmatpush3.bf16.msra.mxu0 %v11518_v63  ;;  %v11551_v63 = vld [vmem:[%s15237_s7] sm:$0xff]  }
0x1267   : > { %10623 = vmatprep.subr.bf16.mxu0 %v13069_v0 }
0x12fc   : > { %v5946_v52 = vpop.f32.mrb[44].mxu0  ;;  %v6034_v12 = vpop.f32.mrb[44].mxu1 }
0x12fd   : > { %v6035_v36 = vadd.f32 %v6034_v12, %v5946_v52  ;;  %v10521_v13 = vpop.f32.mrb[45].mxu0  ;;  %v10541_v14 = vpop.f32.mrb[45].mxu1  ;;  %v9447_v52 = vld [vmem:[#allocation52] ss:$0 sm:$0xff] }
0x12fe   : > { %v5949_v59 = vpop.f32.mrb[46].mxu0  ;;  %v6037_v15 = vpop.f32.mrb[46].mxu1  ;;  %v10849_v12 = vadd.f32 %v9447_v52, %v9438_v11 }
0x12ff   : > { %v10522_v16 = vpop.f32.mrb[47].mxu0  ;;  %v10542_v17 = vpop.f32.mrb[47].mxu1 }
0x1300   : > { %v11519_v17 = vld [vmem:[%s15236_s12 + $0x40] sm:$0xff]  }
0x131c   : > { %v6130_v18 = vpop.f32.mrb[48].mxu0 }
0x131d   : > { %v6136_v19 = vadd.f32 %v6130_v18, %v6035_v36  ;;  %v10561_v20 = vpop.f32.mrb[49].mxu0 }
0x131e   : > { %v6133_v23 = vpop.f32.mrb[50].mxu0  ;;  %v11523_v20 = vld [vmem:[%s15236_s12 + $0x58] sm:$0xff]  }
0x131f   : > { %v6144_v24 = vadd.f32 %v9437_v60, %v6136_v19  ;;  %v10562_v25 = vpop.f32.mrb[51].mxu0  ;;  %v11520_v60 = vld [vmem:[%s15236_s12 + $0x48] sm:$0xff]   ;;  %v11521_v19 = vld [vmem:[%s15236_s12 + $0x50] sm:$0xff]  }
0x1320   : > { %v11527_v23 = vld [vmem:[%s15236_s12 + $0x68] sm:$0xff]   ;;  %v11531_v25 = vld [vmem:[%s15236_s12 + $0x78] sm:$0xff]  }
0x1321   : > { %v6145_v29 = vmax.f32 %v6144_v24, 0.0  ;;  %v11529_v24 = vld [vmem:[%s15236_s12 + $0x70] sm:$0xff]  }
0x1323   : > { %v6146_v32 = vpack.c.bf16 %v6145_v29, %v6145_v29  ;;  %v11532_v29 = vld [vmem:[%s15236_s12 + $0x28] sm:$0xff]  }
0x1325   : > { %10580 = vmatmul.mubr.bf16.vlgmr.msra.gmra.mrb[48].mxu1 %v6146_v32  ;;  %v9456_v32 = vld [vmem:[#allocation55] ss:$0 sm:$0xff] }
0x1326   : > { %10584 = vmatpush3.bf16.msra.mxu1 %v11503_v31  ;;  %10599 = vmatprep.mubr.msk.bf16.mxu1 %vm13070_vm0, %v13069_v0  ;;  %v11535_v31 = vld [vmem:[%s15236_s12 + $0x38] sm:$0xff]  }
0x1327   : > { %10585 = vmatprep.subr.bf16.mxu1 %v13069_v0 }
0x132a   : > { %10586 = vmatpush3.bf16.msra.mxu1 %v11504_v37 }
0x132b   : > { %10587 = vmatprep.subr.bf16.mxu1 %v13069_v0 }
0x132e   : > { %10588 = vmatpush3.bf16.msra.mxu1 %v11505_v39 }
0x132f   : > { %10589 = vmatprep.subr.bf16.mxu1 %v13069_v0 }
0x1332   : > { %10590 = vmatpush3.bf16.msra.mxu1 %v11506_v44  ;;  %v11536_v44 = vld [vmem:[%s15236_s12 + $0x88] sm:$0xff]  }
0x1333   : > { %10591 = vmatprep.subr.bf16.mxu1 %v13069_v0 }
0x1336   : > { %10592 = vmatpush3.bf16.msra.mxu1 %v11507_v61 }
0x1337   : > { %10593 = vmatprep.subr.bf16.mxu1 %v13069_v0 }
0x133a   : > { %10594 = vmatpush3.bf16.msra.mxu1 %v11508_v48 }
0x133b   : > { %10595 = vmatprep.subr.bf16.mxu1 %v13069_v0 }
0x133e   : > { %10596 = vmatpush3.bf16.msra.mxu1 %v11509_v53  ;;  %v11543_v53 = vld [vmem:[#allocation58] sm:$0xff]  }
0x133f   : > { %10597 = vmatprep.subr.bf16.mxu1 %v13069_v0 }
0x1342   : > { %10598 = vmatpush3.bf16.msra.mxu1 %v11510_v56  ;;  %v11547_v56 = vld [vmem:[#allocation58 + $0x20] sm:$0xff]  }
0x1343   : > { %10643 = vmatprep.subr.bf16.mxu1 %v13069_v0 }
0x1345   : > { %10600 = vmatmul.mubr.bf16.vlgmr.msra.gmra.mrb[48].mxu1 %v6372_v58  ;;  %v11549_v58 = vld [vmem:[#allocation58 + $0x30] sm:$0xff]  }
0x1346   : > { %10659 = vmatprep.mubr.msk.bf16.mxu1 %vm13070_vm0, %v13069_v0  ;;  %10644 = vmatpush3.bf16.msra.mxu1 %v11522_v4  ;;  %v11552_v4 = vld [vmem:[%s15237_s7 + $0x8] sm:$0xff]  }
0x1347   : > { %10645 = vmatprep.subr.bf16.mxu1 %v13069_v0 }
0x134a   : > { %10646 = vmatpush3.bf16.msra.mxu1 %v11524_v7  ;;  %v11553_v7 = vld [vmem:[%s15237_s7 + $0x10] sm:$0xff]  }
0x134b   : > { %10647 = vmatprep.subr.bf16.mxu1 %v13069_v0 }
0x134e   : > { %10648 = vmatpush3.bf16.msra.mxu1 %v11526_v8  ;;  %v11554_v8 = vld [vmem:[%s15237_s7 + $0x18] sm:$0xff]  }
0x134f   : > { %10649 = vmatprep.subr.bf16.mxu1 %v13069_v0 }
0x1352   : > { %10650 = vmatpush3.bf16.msra.mxu1 %v11528_v9  ;;  %v11555_v9 = vld [vmem:[%s15237_s7 + $0x20] sm:$0xff]  }
0x1353   : > { %10651 = vmatprep.subr.bf16.mxu1 %v13069_v0 }
0x1356   : > { %10652 = vmatpush3.bf16.msra.mxu1 %v11530_v10  ;;  %v11556_v10 = vld [vmem:[%s15237_s7 + $0x28] sm:$0xff]  }
0x1357   : > { %10653 = vmatprep.subr.bf16.mxu1 %v13069_v0 }
0x135a   : > { %10654 = vmatpush3.bf16.msra.mxu1 %v11532_v29 }
0x135b   : > { %10655 = vmatprep.subr.bf16.mxu1 %v13069_v0 }
0x135e   : > { %10656 = vmatpush3.bf16.msra.mxu1 %v11533_v30  ;;  %v11557_v30 = vld [vmem:[%s15237_s7 + $0x30] sm:$0xff]  }
0x135f   : > { %10657 = vmatprep.subr.bf16.mxu1 %v13069_v0 }
0x1362   : > { %10658 = vmatpush3.bf16.msra.mxu1 %v11535_v31  ;;  %v11558_v31 = vld [vmem:[%s15237_s7 + $0x38] sm:$0xff]  }
0x1363   : > { %10683 = vmatprep.subr.bf16.mxu1 %v13069_v0 }
0x1418   : > { %v6456_v36 = vpop.f32.mrb[48].mxu1 }
0x1419   : > { %v10850_v13 = vadd.f32 %v10849_v12, %v6456_v36  ;;  %v10601_v14 = vpop.f32.mrb[49].mxu1 }
0x141a   : > { %v6459_v59 = vpop.f32.mrb[50].mxu1 }
0x141b   : > { %v14701_v15 = vmax.f32 %v10850_v13, 0.0  ;;  %v10602_v16 = vpop.f32.mrb[51].mxu1 }
0x141d   : > { %v6464_v18 = vpack.c.bf16 %v14701_v15, %v14701_v15 }
0x141f   : > { %10620 = vmatmul.mubr.bf16.vlgmr.msra.gmra.mrb[52].mxu0 %v6464_v18 }
0x1420   : > { %10624 = vmatpush3.bf16.msra.mxu0 %v11519_v17  ;;  %10639 = vmatprep.mubr.msk.bf16.mxu0 %vm13070_vm0, %v13069_v0 }
0x1421   : > { %10625 = vmatprep.subr.bf16.mxu0 %v13069_v0 }
0x1424   : > { %10626 = vmatpush3.bf16.msra.mxu0 %v11520_v60  ;;  %v9489_v60 = vld [vmem:[#allocation56] ss:$0 sm:$0xff] }
0x1425   : > { %10627 = vmatprep.subr.bf16.mxu0 %v13069_v0 }
0x1428   : > { %10628 = vmatpush3.bf16.msra.mxu0 %v11521_v19 }
0x1429   : > { %10629 = vmatprep.subr.bf16.mxu0 %v13069_v0 }
0x142c   : > { %10630 = vmatpush3.bf16.msra.mxu0 %v11523_v20 }
0x142d   : > { %10631 = vmatprep.subr.bf16.mxu0 %v13069_v0 }
0x1430   : > { %10632 = vmatpush3.bf16.msra.mxu0 %v11525_v22 }
0x1431   : > { %10633 = vmatprep.subr.bf16.mxu0 %v13069_v0 }
0x1434   : > { %10634 = vmatpush3.bf16.msra.mxu0 %v11527_v23 }
0x1435   : > { %10635 = vmatprep.subr.bf16.mxu0 %v13069_v0 }
0x1438   : > { %10636 = vmatpush3.bf16.msra.mxu0 %v11529_v24 }
0x1439   : > { %10637 = vmatprep.subr.bf16.mxu0 %v13069_v0 }
0x143c   : > { %10638 = vmatpush3.bf16.msra.mxu0 %v11531_v25 }
0x143d   : > { %10663 = vmatprep.subr.bf16.mxu0 %v13069_v0 }
0x14f2   : > { %v6570_v33 = vpop.f32.mrb[52].mxu0 }
0x14f3   : > { %v6571_v34 = vadd.f32 %v9456_v32, %v6570_v33  ;;  %v10621_v37 = vpop.f32.mrb[53].mxu0  ;;  %v11563_v32 = vld [vmem:[%s15238_s3 + $0x40] sm:$0xff]   ;;  %v11565_v33 = vld [vmem:[%s15238_s3 + $0x48] sm:$0xff]  }
0x14f4   : > { %v6573_v6 = vpop.f32.mrb[54].mxu0 }
0x14f5   : > { %v6576_v38 = vmax.f32 %v6571_v34, 0.0  ;;  %v10622_v39 = vpop.f32.mrb[55].mxu0  ;;  %v9490_v34 = vld [vmem:[#allocation59] ss:$0 sm:$0xff] }
0x14f7   : > { %v6577_v41 = vpack.c.bf16 %v6576_v38, %v6576_v38 }
0x14f9   : > { %v6579_v43 = vshrl.u32 %v6577_v41, 16  ;;  %10640 = vmatmul.mubr.bf16.vlgmr.msra.gmra.mrb[56].mxu0 %v6577_v41  ;;  %v6582_v35 = vshll.u32 %v6577_v41, 16 }
0x14fa   : > { %10664 = vmatpush3.bf16.msra.mxu0 %v11534_v40  ;;  %10679 = vmatprep.mubr.msk.bf16.mxu0 %vm13070_vm0, %v13069_v0 }
0x14fb   : > { %10665 = vmatprep.subr.bf16.mxu0 %v13069_v0  ;;  %v6581_v45 = vrot.slane %v6579_v43, 7  ;;  %v6587_v48 = vrot.slane %v6582_v35, 1 }
0x14fd   : > { %v6584_v46 = vor.u32 %v6582_v35, %v6581_v45  ;;  %v6588_v1 = vor.u32 %v6587_v48, %v6579_v43  ;;  %v11560_v45 = vld [vmem:[%s15238_s3 + $0x8] sm:$0xff]   ;;  %v11571_v48 = vld [vmem:[%s15238_s3 + $0x60] sm:$0xff]  }
0x14fe   : > { %10666 = vmatpush3.bf16.msra.mxu0 %v11536_v44  ;;  %v11559_v44 = vld [vmem:[%s15238_s3] sm:$0xff]  }
0x14ff   : > { %v6586_v61 = vsel %vm14173_vm10, 0, %v6584_v46  ;;  %10667 = vmatprep.subr.bf16.mxu0 %v13069_v0  ;;  %v6593_v51 = vsel %vm6592_vm5, %v6588_v1, 0  ;;  %v11562_v46 = vld [vmem:[%s15238_s3 + $0x18] sm:$0xff]   ;;  %v11573_v1 = vld [vmem:[%s15238_s3 + $0x70] sm:$0xff]  }
0x1500   : > { %10660 = vmatmul.mubr.bf16.vlgmr.msra.gmra.mrb[52].mxu1 %v6586_v61  ;;  %v11566_v61 = vld [vmem:[%s15238_s3 + $0x28] sm:$0xff]  }
0x1501   : > { %10699 = vmatprep.mubr.msk.bf16.mxu1 %vm13070_vm0, %v13069_v0  ;;  %10684 = vmatpush3.bf16.msra.mxu1 %v11543_v53  ;;  %v9499_v53 = vld [vmem:[#allocation61] ss:$0 sm:$0xff] }
0x1502   : > { %10668 = vmatpush3.bf16.msra.mxu0 %v11537_v47  ;;  %10685 = vmatprep.subr.bf16.mxu1 %v13069_v0  ;;  %v11564_v47 = vld [vmem:[%s15238_s3 + $0x20] sm:$0xff]  }
0x1503   : > { %10669 = vmatprep.subr.bf16.mxu0 %v13069_v0 }
0x1505   : > { %10686 = vmatpush3.bf16.msra.mxu1 %v11544_v3 }
0x1506   : > { %10670 = vmatpush3.bf16.msra.mxu0 %v11538_v5  ;;  %10687 = vmatprep.subr.bf16.mxu1 %v13069_v0  ;;  %v11567_v5 = vld [vmem:[%s15238_s3 + $0x50] sm:$0xff]  }
0x1507   : > { %10671 = vmatprep.subr.bf16.mxu0 %v13069_v0 }
0x1509   : > { %10688 = vmatpush3.bf16.msra.mxu1 %v11545_v54 }
0x150a   : > { %10672 = vmatpush3.bf16.msra.mxu0 %v11539_v2  ;;  %10689 = vmatprep.subr.bf16.mxu1 %v13069_v0  ;;  %v11568_v2 = vld [vmem:[%s15238_s3 + $0x30] sm:$0xff]  }
0x150b   : > { %10673 = vmatprep.subr.bf16.mxu0 %v13069_v0 }
0x150d   : > { %10690 = vmatpush3.bf16.msra.mxu1 %v11546_v55 }
0x150e   : > { %10674 = vmatpush3.bf16.msra.mxu0 %v11540_v26  ;;  %10691 = vmatprep.subr.bf16.mxu1 %v13069_v0  ;;  %v11569_v26 = vld [vmem:[%s15238_s3 + $0x58] sm:$0xff]  }
0x150f   : > { %10675 = vmatprep.subr.bf16.mxu0 %v13069_v0 }
0x1511   : > { %10692 = vmatpush3.bf16.msra.mxu1 %v11547_v56 }
0x1512   : > { %10676 = vmatpush3.bf16.msra.mxu0 %v11541_v21  ;;  %10693 = vmatprep.subr.bf16.mxu1 %v13069_v0  ;;  %v11570_v21 = vld [vmem:[%s15238_s3 + $0x38] sm:$0xff]  }
0x1513   : > { %10677 = vmatprep.subr.bf16.mxu0 %v13069_v0 }
0x1515   : > { %10694 = vmatpush3.bf16.msra.mxu1 %v11548_v57 }
0x1516   : > { %10678 = vmatpush3.bf16.msra.mxu0 %v11542_v49  ;;  %10695 = vmatprep.subr.bf16.mxu1 %v13069_v0  ;;  %v11572_v49 = vld [vmem:[%s15238_s3 + $0x68] sm:$0xff]  }
0x1517   : > { %10703 = vmatprep.subr.bf16.mxu0 %v13069_v0 }
0x1519   : > { %10680 = vmatmul.mubr.bf16.vlgmr.msra.gmra.mrb[60].mxu0 %v6593_v51  ;;  %10696 = vmatpush3.bf16.msra.mxu1 %v11549_v58  ;;  %v11574_v51 = vld [vmem:[%s15238_s3 + $0x78] sm:$0xff]  }
0x151a   : > { %10719 = vmatprep.mubr.msk.bf16.mxu0 %vm13070_vm0, %v13069_v0  ;;  %10697 = vmatprep.subr.bf16.mxu1 %v13069_v0 }
0x151b   : > { %10704 = vmatpush3.bf16.msra.mxu0 %v11551_v63 }
0x151c   : > { %10705 = vmatprep.subr.bf16.mxu0 %v13069_v0 }
0x151d   : > { %10698 = vmatpush3.bf16.msra.mxu1 %v11550_v62 }
0x151e   : > { %10723 = vmatprep.subr.bf16.mxu1 %v13069_v0 }
0x151f   : > { %10706 = vmatpush3.bf16.msra.mxu0 %v11552_v4 }
0x1520   : > { %10707 = vmatprep.subr.bf16.mxu0 %v13069_v0 }
0x1523   : > { %10708 = vmatpush3.bf16.msra.mxu0 %v11553_v7 }
0x1524   : > { %10709 = vmatprep.subr.bf16.mxu0 %v13069_v0 }
0x1527   : > { %10710 = vmatpush3.bf16.msra.mxu0 %v11554_v8 }
0x1528   : > { %10711 = vmatprep.subr.bf16.mxu0 %v13069_v0 }
0x152b   : > { %10712 = vmatpush3.bf16.msra.mxu0 %v11555_v9 }
0x152c   : > { %10713 = vmatprep.subr.bf16.mxu0 %v13069_v0 }
0x152f   : > { %10714 = vmatpush3.bf16.msra.mxu0 %v11556_v10 }
0x1530   : > { %10715 = vmatprep.subr.bf16.mxu0 %v13069_v0 }
0x1533   : > { %10716 = vmatpush3.bf16.msra.mxu0 %v11557_v30 }
0x1534   : > { %10717 = vmatprep.subr.bf16.mxu0 %v13069_v0 }
0x1537   : > { %10718 = vmatpush3.bf16.msra.mxu0 %v11558_v31  ;;  %v11583_v31 = vld [vmem:[%s15239_s23] ss:$8 sps:$4 sm:$0xff]   ;;  %s15241_s23 = sld [smem:[#allocation135_spill]] }
0x1538   : > { %10743 = vmatprep.subr.bf16.mxu0 %v13069_v0 }
0x153d   : > { %s15242_s2 = smov %s15241_s23 }
0x15cc   : > { %v6724_v11 = vpop.f32.mrb[56].mxu0 }
0x15cd   : > { %v10641_v52 = vpop.f32.mrb[57].mxu0 }
0x15ce   : > { %v6727_v12 = vpop.f32.mrb[58].mxu0 }
0x15cf   : > { %v10642_v36 = vpop.f32.mrb[59].mxu0 }
0x15d3   : > { %v6812_v13 = vpop.f32.mrb[52].mxu1 }
0x15d4   : > { %v6813_v14 = vadd.f32 %v6812_v13, %v6724_v11  ;;  %v10661_v59 = vpop.f32.mrb[53].mxu1 }
0x15d5   : > { %v6815_v16 = vpop.f32.mrb[54].mxu1 }
0x15d6   : > { %v10662_v17 = vpop.f32.mrb[55].mxu1  ;;  %v11575_v16 = vld [vmem:[%s15238_s3 + $0x80] sm:$0xff]  }
0x15ec   : > { %v6900_v18 = vpop.f32.mrb[60].mxu0 }
0x15ed   : > { %v6906_v19 = vadd.f32 %v6900_v18, %v6813_v14  ;;  %v10681_v20 = vpop.f32.mrb[61].mxu0  ;;  %v11576_v18 = vld [vmem:[%s15238_s3 + $0x88] sm:$0xff]  }
0x15ee   : > { %v6903_v22 = vpop.f32.mrb[62].mxu0  ;;  %v11579_v20 = vld [vmem:[%s15238_s3 + $0xa0] sm:$0xff]  }
0x15ef   : > { %v6914_v23 = vadd.f32 %v9489_v60, %v6906_v19  ;;  %v10682_v24 = vpop.f32.mrb[63].mxu0  ;;  %v11577_v60 = vld [vmem:[%s15238_s3 + $0x90] sm:$0xff]   ;;  %v11578_v19 = vld [vmem:[%s15238_s3 + $0x98] sm:$0xff]   ;;  %v11580_v22 = vld [vmem:[%s15238_s3 + $0xa8] sm:$0xff]  }
0x15f1   : > { %v6915_v25 = vmax.f32 %v6914_v23, 0.0  ;;  %v11581_v23 = vld [vmem:[%s15238_s3 + $0xb0] sm:$0xff]  }
0x15f3   : > { %v6916_v29 = vpack.c.bf16 %v6915_v25, %v6915_v25  ;;  %v11582_v25 = vld [vmem:[%s15238_s3 + $0xb8] sm:$0xff]  }
0x15f5   : > { %10700 = vmatmul.mubr.bf16.vlgmr.msra.gmra.mrb[56].mxu1 %v6916_v29 }
0x15f6   : > { %10739 = vmatprep.mubr.msk.bf16.mxu1 %vm13070_vm0, %v13069_v0  ;;  %10724 = vmatpush3.bf16.msra.mxu1 %v11563_v32  ;;  %v11585_v32 = vld [vmem:[%s15240_s1 + $0x4] ss:$8 sps:$4 sm:$0xff]  }
0x15f7   : > { %10725 = vmatprep.subr.bf16.mxu1 %v13069_v0 }
0x15fa   : > { %10726 = vmatpush3.bf16.msra.mxu1 %v11565_v33  ;;  %v11588_v33 = vld [vmem:[%s15240_s1 + $0x14] ss:$8 sps:$4 sm:$0xff]  }
0x15fb   : > { %10727 = vmatprep.subr.bf16.mxu1 %v13069_v0 }
0x15fe   : > { %10728 = vmatpush3.bf16.msra.mxu1 %v11567_v5  ;;  %v13073_v5 = vmov 0  }
0x15ff   : > { %10729 = vmatprep.subr.bf16.mxu1 %v13069_v0 }
0x1602   : > { %10730 = vmatpush3.bf16.msra.mxu1 %v11569_v26 }
0x1603   : > { %10731 = vmatprep.subr.bf16.mxu1 %v13069_v0 }
0x1606   : > { %10732 = vmatpush3.bf16.msra.mxu1 %v11571_v48 }
0x1607   : > { %10733 = vmatprep.subr.bf16.mxu1 %v13069_v0 }
0x160a   : > { %10734 = vmatpush3.bf16.msra.mxu1 %v11572_v49 }
0x160b   : > { %10735 = vmatprep.subr.bf16.mxu1 %v13069_v0 }
0x160e   : > { %10736 = vmatpush3.bf16.msra.mxu1 %v11573_v1 }
0x160f   : > { %10737 = vmatprep.subr.bf16.mxu1 %v13069_v0 }
0x1612   : > { %10738 = vmatpush3.bf16.msra.mxu1 %v11574_v51 }
0x1613   : > { %10763 = vmatprep.subr.bf16.mxu1 %v13069_v0 }
0x16c8   : > { %v7022_v37 = vpop.f32.mrb[56].mxu1 }
0x16c9   : > { %v7023_v6 = vadd.f32 %v9490_v34, %v7022_v37  ;;  %v10701_v38 = vpop.f32.mrb[57].mxu1  ;;  %v11586_v34 = vld [vmem:[%s15240_s1 + $0x10] ss:$8 sps:$4 sm:$0xff]   ;;  %v11591_v37 = vld [vmem:[%s15240_s1 + $0x24] ss:$8 sps:$4 sm:$0xff]  }
0x16ca   : > { %v7025_v39 = vpop.f32.mrb[58].mxu1  ;;  %v11594_v38 = vld [vmem:[%s15240_s1 + $0x34] ss:$8 sps:$4 sm:$0xff]  }
0x16cb   : > { %v7028_v40 = vadd.f32 %v7023_v6, %v14701_v15  ;;  %v10702_v41 = vpop.f32.mrb[59].mxu1  ;;  %v11561_v15 = vld [vmem:[%s15238_s3 + $0x10] sm:$0xff]   ;;  %v11589_v6 = vld [vmem:[%s15240_s1 + $0x20] ss:$8 sps:$4 sm:$0xff]   ;;  %s15243_s3 = sld [smem:[#allocation137_spill]] }
0x16cc   : > { %v11592_v39 = vld [vmem:[%s15240_s1 + $0x30] ss:$8 sps:$4 sm:$0xff]   ;;  %v11595_v41 = vld [vmem:[%s15240_s1 + $0x40] ss:$8 sps:$4 sm:$0xff]  }
0x16cd   : > { %v7029_v43 = vmax.f32 %v7028_v40, 0.0  ;;  %v11597_v40 = vld [vmem:[%s15240_s1 + $0x44] ss:$8 sps:$4 sm:$0xff]  }
0x16cf   : > { %v14785_v35 = vpack.c.bf16 %v7029_v43, %v7029_v43  ;;  %v11600_v43 = vld [vmem:[%s15240_s1 + $0x54] ss:$8 sps:$4 sm:$0xff]  }
0x16d1   : > { %10720 = vmatmul.mubr.bf16.vlgmr.msra.gmra.mrb[64].mxu0 %v14785_v35  ;;  %v11632_v26 = vld [vmem:[%s15243_s3] sm:$0xff]   ;;  %v11634_v48 = vld [vmem:[%s15243_s3 + $0x8] sm:$0xff]   ;;  %v11635_v49 = vld [vmem:[%s15243_s3 + $0x50] sm:$0xff]  }
0x16d2   : > { %10744 = vmatpush3.bf16.msra.mxu0 %v11559_v44  ;;  %10759 = vmatprep.mubr.msk.bf16.mxu0 %vm13070_vm0, %v13069_v0  ;;  %v11598_v44 = vld [vmem:[%s15240_s1 + $0x50] ss:$8 sps:$4 sm:$0xff]  }
0x16d3   : > { %10745 = vmatprep.subr.bf16.mxu0 %v13069_v0  ;;  %v11636_v1 = vld [vmem:[%s15243_s3 + $0x10] sm:$0xff]   ;;  %v11637_v51 = vld [vmem:[%s15243_s3 + $0x58] sm:$0xff]  }
0x16d6   : > { %10746 = vmatpush3.bf16.msra.mxu0 %v11560_v45  ;;  %v11603_v45 = vld [vmem:[%s15240_s1 + $0x64] ss:$8 sps:$4 sm:$0xff]  }
0x16d7   : > { %10747 = vmatprep.subr.bf16.mxu0 %v13069_v0 }
0x16da   : > { %10748 = vmatpush3.bf16.msra.mxu0 %v11561_v15  ;;  %v11601_v15 = vld [vmem:[%s15240_s1 + $0x60] ss:$8 sps:$4 sm:$0xff]  }
0x16db   : > { %10749 = vmatprep.subr.bf16.mxu0 %v13069_v0 }
0x16de   : > { %10750 = vmatpush3.bf16.msra.mxu0 %v11562_v46  ;;  %v11606_v46 = vld [vmem:[%s15240_s1 + $0x74] ss:$8 sps:$4 sm:$0xff]  }
0x16df   : > { %10751 = vmatprep.subr.bf16.mxu0 %v13069_v0 }
0x16e2   : > { %10752 = vmatpush3.bf16.msra.mxu0 %v11564_v47  ;;  %v11604_v47 = vld [vmem:[%s15240_s1 + $0x70] ss:$8 sps:$4 sm:$0xff]  }
0x16e3   : > { %10753 = vmatprep.subr.bf16.mxu0 %v13069_v0 }
0x16e6   : > { %10754 = vmatpush3.bf16.msra.mxu0 %v11566_v61  ;;  %v11609_v61 = vld [vmem:[%s15241_s23 + $0x4] ss:$8 sps:$4 sm:$0xff]   ;;  %s15244_s23 = sld [smem:[#allocation139_spill]] }
0x16e7   : > { %10755 = vmatprep.subr.bf16.mxu0 %v13069_v0 }
0x16ea   : > { %10756 = vmatpush3.bf16.msra.mxu0 %v11568_v2  ;;  %v11631_v2 = vld [vmem:[%s15243_s3 + $0x40] sm:$0xff]  }
0x16eb   : > { %10757 = vmatprep.subr.bf16.mxu0 %v13069_v0 }
0x16ec   : > { %s15245_s1 = smov %s15244_s23 }
0x16ee   : > { %10758 = vmatpush3.bf16.msra.mxu0 %v11570_v21  ;;  %v11633_v21 = vld [vmem:[%s15243_s3 + $0x48] sm:$0xff]  }
0x16ef   : > { %7637 = vmatprep.subr.bf16.mxu0 %v11585_v32 }
0x17a4   : > { %v7136_v3 = vpop.f32.mrb[64].mxu0 }
0x17a5   : > { %v7137_v54 = vadd.f32 %v9499_v53, %v7136_v3  ;;  %v10721_v55 = vpop.f32.mrb[65].mxu0  ;;  %v11638_v53 = vld [vmem:[%s15243_s3 + $0x18] sm:$0xff]   ;;  %v11639_v3 = vld [vmem:[%s15243_s3 + $0x60] sm:$0xff]  }
0x17a6   : > { %v7139_v56 = vpop.f32.mrb[66].mxu0  ;;  %v11641_v55 = vld [vmem:[%s15243_s3 + $0x68] sm:$0xff]  }
0x17a7   : > { %v7142_v57 = vmax.f32 %v7137_v54, 0.0  ;;  %v10722_v58 = vpop.f32.mrb[67].mxu0  ;;  %v11640_v54 = vld [vmem:[%s15243_s3 + $0x20] sm:$0xff]   ;;  %v11642_v56 = vld [vmem:[%s15243_s3 + $0x28] sm:$0xff]  }
0x17a9   : > { %v7143_v62 = vpack.c.bf16 %v7142_v57, %v7142_v57 }
0x17ab   : > { %v7151_v63 = vrot.slane %v7143_v62, %v14324_v42  ;;  %v7167_v4 = vsel %vm14173_vm10, 0, %v7143_v62 }
0x17ac   : > { %10760 = vmatmul.mubr.bf16.vlgmr.msra.gmra.mrb[68].mxu0 %v7167_v4 }
0x17ad   : > { %v7152_v7 = vcombine.high %v7151_v63, %v7151_v63  ;;  %v7159_v8 = vrot.slane %v7151_v63, %v14324_v42  ;;  %7638 = vmatpush1.bf16.msra.mxu0 %v11583_v31  ;;  %7669 = vmatprep.mubr.bf16.mxu0 %v13073_v5 }
0x17ae   : > { %7639 = vmatprep.subr.bf16.mxu0 %v11588_v33  ;;  %v11619_v33 = vld [vmem:[%s15242_s2 + $0x40] ss:$8 sps:$4 sm:$0xff]  }
0x17af   : > { %v7166_v9 = vrot.slane %v7152_v7, %v14324_v42  ;;  %v7222_v10 = vrot.slane %v7159_v8, %v14324_v42 }
0x17b1   : > { %v7236_v11 = vrot.slane %v7166_v9, %v14324_v42  ;;  %v7229_v52 = vrot.slane %v7222_v10, %v14324_v42  ;;  %7640 = vmatpush1.bf16.msra.mxu0 %v11586_v34  ;;  %v11624_v34 = vld [vmem:[%s15242_s2 + $0x54] ss:$8 sps:$4 sm:$0xff]  }
0x17b2   : > { %7641 = vmatprep.subr.bf16.mxu0 %v11591_v37 }
0x17b3   : > { %v7243_v12 = vrot.slane %v7236_v11, %v14324_v42  ;;  %v7244_v13 = vunpack.c.l.b16 %v7229_v52  ;;  %v9532_v52 = vld [vmem:[#allocation62] ss:$0 sm:$0xff] }
0x17b5   : > { %v7245_v36 = vunpack.c.l.b16 %v7243_v12  ;;  %v7426_v24 = vrot.slane %v7244_v13, 1  ;;  %7642 = vmatpush1.bf16.msra.mxu0 %v11589_v6 }
0x17b6   : > { %7643 = vmatprep.subr.bf16.mxu0 %v11594_v38  ;;  %v11622_v38 = vld [vmem:[%s15242_s2 + $0x50] ss:$8 sps:$4 sm:$0xff]  }
0x17b7   : > { %v7246_v14 = vrot.slane %v7245_v36, 7  ;;  %v7427_v29 = vsel %vm2596_vm1, %v7245_v36, %v7426_v24  ;;  %v11613_v24 = vld [vmem:[%s15242_s2 + $0x20] ss:$8 sps:$4 sm:$0xff]  }
0x17b8   : > { %v7428_v30 = vpack.c.b16 %v7427_v29, %v7427_v29 }
0x17b9   : > { %v7247_v59 = vsel %vm2596_vm1, %v7246_v14, %v7244_v13  ;;  %7644 = vmatpush1.bf16.msra.mxu0 %v11592_v39  ;;  %v11627_v39 = vld [vmem:[%s15242_s2 + $0x64] ss:$8 sps:$4 sm:$0xff]  }
0x17ba   : > { %v7248_v17 = vpack.c.b16 %v7247_v59, %v7247_v59  ;;  %7645 = vmatprep.subr.bf16.mxu0 %v11597_v40 }
0x17bc   : > { %10740 = vmatmul.mubr.bf16.vlgmr.msra.gmra.mrb[60].mxu1 %v7248_v17  ;;  %v11607_v17 = vld [vmem:[%s15242_s2] ss:$8 sps:$4 sm:$0xff]  }
0x17bd   : > { %10764 = vmatpush3.bf16.msra.mxu1 %v11575_v16  ;;  %10779 = vmatprep.mubr.msk.bf16.mxu1 %vm13070_vm0, %v13069_v0 }
0x17be   : > { %10765 = vmatprep.subr.bf16.mxu1 %v13069_v0  ;;  %7646 = vmatpush1.bf16.msra.mxu0 %v11595_v41 }
0x17bf   : > { %7647 = vmatprep.subr.bf16.mxu0 %v11600_v43  ;;  %v11625_v43 = vld [vmem:[%s15242_s2 + $0x60] ss:$8 sps:$4 sm:$0xff]  }
0x17c1   : > { %10766 = vmatpush3.bf16.msra.mxu1 %v11576_v18 }
0x17c2   : > { %10767 = vmatprep.subr.bf16.mxu1 %v13069_v0  ;;  %7648 = vmatpush1.bf16.msra.mxu0 %v11598_v44  ;;  %v11630_v44 = vld [vmem:[%s15242_s2 + $0x74] ss:$8 sps:$4 sm:$0xff]  }
0x17c3   : > { %7649 = vmatprep.subr.bf16.mxu0 %v11603_v45 }
0x17c5   : > { %10768 = vmatpush3.bf16.msra.mxu1 %v11577_v60  ;;  %v11612_v60 = vld [vmem:[%s15242_s2 + $0x14] ss:$8 sps:$4 sm:$0xff]  }
0x17c6   : > { %10769 = vmatprep.subr.bf16.mxu1 %v13069_v0  ;;  %7650 = vmatpush1.bf16.msra.mxu0 %v11601_v15 }
0x17c7   : > { %7651 = vmatprep.subr.bf16.mxu0 %v11606_v46  ;;  %v11628_v46 = vld [vmem:[%s15242_s2 + $0x70] ss:$8 sps:$4 sm:$0xff]  }
0x17c9   : > { %10770 = vmatpush3.bf16.msra.mxu1 %v11578_v19  ;;  %v7685_v19 = vrot.slane %v14785_v35, %v14324_v42  ;;  %v11616_v35 = vld [vmem:[%s15242_s2 + $0x30] ss:$8 sps:$4 sm:$0xff]  }
0x17ca   : > { %10771 = vmatprep.subr.bf16.mxu1 %v13069_v0  ;;  %7652 = vmatpush1.bf16.msra.mxu0 %v11604_v47 }
0x17cb   : > { %7843 = vmatprep.subr.bf16.mxu0 %v11609_v61  ;;  %v7693_v32 = vrot.slane %v7685_v19, %v14324_v42 }
0x17cd   : > { %10772 = vmatpush3.bf16.msra.mxu1 %v11579_v20  ;;  %v11610_v20 = vld [vmem:[%s15242_s2 + $0x10] ss:$8 sps:$4 sm:$0xff]   ;;  %v7735_v6 = vrot.slane %v7693_v32, %v14324_v42 }
0x17ce   : > { %10773 = vmatprep.subr.bf16.mxu1 %v13069_v0 }
0x17cf   : > { %v7742_v41 = vrot.slane %v7735_v6, %v14324_v42 }
0x17d1   : > { %10774 = vmatpush3.bf16.msra.mxu1 %v11580_v22  ;;  %v11615_v22 = vld [vmem:[%s15242_s2 + $0x24] ss:$8 sps:$4 sm:$0xff]   ;;  %v7757_v15 = vunpack.c.l.b16 %v7742_v41  ;;  %v11665_v41 = vld [vmem:[%s15245_s1 + $0x90] sm:$0xff]  }
0x17d2   : > { %10775 = vmatprep.subr.bf16.mxu1 %v13069_v0 }
0x17d5   : > { %10776 = vmatpush3.bf16.msra.mxu1 %v11581_v23  ;;  %v7686_v23 = vcombine.high %v7685_v19, %v7685_v19  ;;  %v11658_v19 = vld [vmem:[%s15245_s1 + $0x70] sm:$0xff]  }
0x17d6   : > { %10777 = vmatprep.subr.bf16.mxu1 %v13069_v0 }
0x17d7   : > { %v7700_v29 = vrot.slane %v7686_v23, %v14324_v42  ;;  %v11661_v23 = vld [vmem:[%s15245_s1 + $0x30] sm:$0xff]  }
0x17d9   : > { %10778 = vmatpush3.bf16.msra.mxu1 %v11582_v25  ;;  %v11618_v25 = vld [vmem:[%s15242_s2 + $0x34] ss:$8 sps:$4 sm:$0xff]   ;;  %v7749_v31 = vrot.slane %v7700_v29, %v14324_v42 }
0x17da   : > { %9974 = vmatprep.subr.bf16.mxu1 %v11631_v2  ;;  %v11644_v2 = vld [vmem:[%s15243_s3 + $0x30] sm:$0xff]  }
0x17db   : > { %v7756_v37 = vrot.slane %v7749_v31, %v14324_v42  ;;  %v11643_v42 = vld [vmem:[%s15243_s3 + $0x70] sm:$0xff]  }
0x17dc   : > { %10780 = vmatmul.mubr.bf16.vlgmr.msra.gmra.mrb[64].mxu1 %v7428_v30  ;;  %v11621_v30 = vld [vmem:[%s15242_s2 + $0x44] ss:$8 sps:$4 sm:$0xff]   ;;  %v9565_v29 = vld [vmem:[#allocation67] ss:$0 sm:$0xff]  ;;  %s9630_s2 = sshll.u32 %s13401_s28, 6 }
0x17dd   : > { %9975 = vmatpush3.bf16.msra.mxu1 %v11632_v26  ;;  %v7758_v40 = vunpack.c.l.b16 %v7756_v37  ;;  %v11645_v26 = vld [vmem:[%s15243_s3 + $0x78] sm:$0xff]   ;;  %v11663_v37 = vld [vmem:[%s15245_s1 + $0x80] sm:$0xff]   ;;  %s14999_s5 = scalar_lea.hbm %s13378_s19, %s9630_s2 }
0x17de   : > { %9976 = vmatprep.subr.bf16.mxu1 %v11633_v21  ;;  %v11646_v21 = vld [vmem:[%s15243_s3 + $0x38] sm:$0xff]  }
0x17df   : > { %v7759_v45 = vrot.slane %v7758_v40, 7 }
0x17e1   : > { %9977 = vmatpush3.bf16.msra.mxu1 %v11634_v48  ;;  %v7760_v47 = vsel %vm2596_vm1, %v7759_v45, %v7757_v15  ;;  %v11649_v48 = vld [vmem:[%s15244_s23] sm:$0xff]   ;;  %v11668_v45 = vld [vmem:[%s15245_s1 + $0xa8] sm:$0xff]   ;;  %v11670_v15 = vld [vmem:[%s15245_s1 + $0xb8] sm:$0xff]   ;;  %s2303_s23 = sand.u32 1, %s12955_s22  }
0x17e2   : > { %9978 = vmatprep.subr.bf16.mxu1 %v11635_v49  ;;  %v7761_v61 = vpack.c.b16 %v7760_v47, %v7760_v47  ;;  %v11651_v49 = vld [vmem:[%s15245_s1 + $0x8] sm:$0xff]   ;;  %s8565_s6 = scalar_lea.sflag [#allocation4], %s2303_s23 }
0x17e5   : > { %9979 = vmatpush3.bf16.msra.mxu1 %v11636_v1  ;;  %v11653_v1 = vld [vmem:[%s15245_s1 + $0x10] sm:$0xff]  }
0x17e6   : > { %9980 = vmatprep.subr.bf16.mxu1 %v11637_v51  ;;  %v11655_v51 = vld [vmem:[%s15245_s1 + $0x18] sm:$0xff]  }
0x17e9   : > { %9981 = vmatpush3.bf16.msra.mxu1 %v11638_v53  ;;  %v11657_v53 = vld [vmem:[%s15245_s1 + $0x20] sm:$0xff]  }
0x17ea   : > { %9982 = vmatprep.subr.bf16.mxu1 %v11639_v3  ;;  %v7545_v3 = vld [vmem:[#allocation64] sm:$0x3] }
0x17ed   : > { %9983 = vmatpush3.bf16.msra.mxu1 %v11640_v54  ;;  %v7717_v54 = vld [vmem:[#allocation65] sm:$0x3] }
0x17ee   : > { %9984 = vmatprep.subr.bf16.mxu1 %v11641_v55  ;;  %v7550_v55 = vrot.slane %v7545_v3, %v14039_v28 }
0x17f1   : > { %9985 = vmatpush3.bf16.msra.mxu1 %v11642_v56  ;;  %v7722_v56 = vrot.slane %v7717_v54, %v14039_v28 }
0x17f2   : > { %9986 = vmatprep.subr.bf16.mxu1 %v11643_v42  ;;  %v11673_v42 = vld [vmem:[%s15179_s8 + $0x4] ss:$8 sps:$4 sm:$0xff]  }
0x17f5   : > { %9987 = vmatpush3.bf16.msra.mxu1 %v11644_v2  ;;  %v11676_v2 = vld [vmem:[%s15179_s8 + $0x14] ss:$8 sps:$4 sm:$0xff]  }
0x17f6   : > { %9988 = vmatprep.subr.bf16.mxu1 %v11645_v26  ;;  %v11674_v26 = vld [vmem:[%s15179_s8 + $0x10] ss:$8 sps:$4 sm:$0xff]  }
0x17f9   : > { %9989 = vmatpush3.bf16.msra.mxu1 %v11646_v21  ;;  %v11677_v21 = vld [vmem:[%s15179_s8 + $0x20] ss:$8 sps:$4 sm:$0xff]  }
0x17fa   : > { %10783 = vmatprep.subr.bf16.mxu1 %v13069_v0 }
0x187f   : > { %v7420_v57 = vpop.f32.mrb[68].mxu0 }
0x1880   : > { %v10761_v58 = vpop.f32.mrb[69].mxu0 }
0x1881   : > { %v7423_v62 = vpop.f32.mrb[70].mxu0  ;;  %v7726_v58 = vrot.slane %v7717_v54, %v14036_v27  ;;  %v11689_v54 = vld [vmem:[%s15179_s8 + $0x60] ss:$8 sps:$4 sm:$0xff]  }
0x1882   : > { %v10762_v63 = vpop.f32.mrb[71].mxu0  ;;  %v10851_v62 = vadd.f32 %v7722_v56, %v7550_v55  ;;  %v11694_v55 = vld [vmem:[%s15179_s8 + $0x74] ss:$8 sps:$4 sm:$0xff]   ;;  %v11692_v56 = vld [vmem:[%s15179_s8 + $0x70] ss:$8 sps:$4 sm:$0xff]  }
0x188f   : > { %v7332_v4 = vpop.f32.mrb[60].mxu1 }
0x1890   : > { %v7421_v7 = vadd.f32 %v7420_v57, %v7332_v4  ;;  %v10741_v8 = vpop.f32.mrb[61].mxu1  ;;  %v7554_v57 = vrot.slane %v7545_v3, %v14036_v27  ;;  %v11691_v3 = vld [vmem:[%s15179_s8 + $0x64] ss:$8 sps:$4 sm:$0xff]  }
0x1891   : > { %v7335_v9 = vpop.f32.mrb[62].mxu1 }
0x1892   : > { %v10742_v10 = vpop.f32.mrb[63].mxu1  ;;  %v10853_v63 = vadd.f32 %v7726_v58, %v7554_v57 }
0x18af   : > { %v7512_v11 = vpop.f32.mrb[64].mxu1 }
0x18b0   : > { %v7518_v12 = vadd.f32 %v7512_v11, %v7421_v7  ;;  %v10781_v36 = vpop.f32.mrb[65].mxu1 }
0x18b1   : > { %v7515_v13 = vpop.f32.mrb[66].mxu1 }
0x18b2   : > { %v7526_v14 = vadd.f32 %v9532_v52, %v7518_v12  ;;  %v10782_v59 = vpop.f32.mrb[67].mxu1  ;;  %v11647_v13 = vld [vmem:[%s15245_s1 + $0x40] sm:$0xff]  }
0x18b3   : > { %v11648_v59 = vld [vmem:[%s15245_s1 + $0x48] sm:$0xff]  }
0x18b4   : > { %v7527_v16 = vmax.f32 %v7526_v14, 0.0 }
0x18b6   : > { %v7528_v18 = vpack.c.bf16 %v7527_v16, %v7527_v16  ;;  %v11650_v16 = vld [vmem:[%s15245_s1 + $0x50] sm:$0xff]  }
0x18b8   : > { %7670 = vmatmul.mubr.bf16.vlgmr.msra.gmra.mrb[72].mxu0 %v7528_v18  ;;  %v11654_v18 = vld [vmem:[%s15245_s1 + $0x60] sm:$0xff]  }
0x18b9   : > { %7844 = vmatpush1.bf16.msra.mxu0 %v11607_v17  ;;  %7875 = vmatprep.mubr.bf16.mxu0 %v13073_v5  ;;  %v11652_v17 = vld [vmem:[%s15245_s1 + $0x58] sm:$0xff]  }
0x18ba   : > { %7845 = vmatprep.subr.bf16.mxu0 %v11612_v60  ;;  %v11656_v60 = vld [vmem:[%s15245_s1 + $0x68] sm:$0xff]  }
0x18bd   : > { %7846 = vmatpush1.bf16.msra.mxu0 %v11610_v20  ;;  %v11659_v20 = vld [vmem:[%s15245_s1 + $0x28] sm:$0xff]  }
0x18be   : > { %7847 = vmatprep.subr.bf16.mxu0 %v11615_v22  ;;  %v11660_v22 = vld [vmem:[%s15245_s1 + $0x78] sm:$0xff]  }
0x18c1   : > { %7848 = vmatpush1.bf16.msra.mxu0 %v11613_v24  ;;  %v11662_v24 = vld [vmem:[%s15245_s1 + $0x38] sm:$0xff]  }
0x18c2   : > { %7849 = vmatprep.subr.bf16.mxu0 %v11618_v25 }
0x18c5   : > { %7850 = vmatpush1.bf16.msra.mxu0 %v11616_v35 }
0x18c6   : > { %7851 = vmatprep.subr.bf16.mxu0 %v11621_v30 }
0x18c9   : > { %7852 = vmatpush1.bf16.msra.mxu0 %v11619_v33 }
0x18ca   : > { %7853 = vmatprep.subr.bf16.mxu0 %v11624_v34 }
0x18cd   : > { %7854 = vmatpush1.bf16.msra.mxu0 %v11622_v38 }
0x18ce   : > { %7855 = vmatprep.subr.bf16.mxu0 %v11627_v39  ;;  %v11664_v39 = vld [vmem:[%s15245_s1 + $0x88] sm:$0xff]  }
0x18d1   : > { %7856 = vmatpush1.bf16.msra.mxu0 %v11625_v43  ;;  %v11666_v43 = vld [vmem:[%s15245_s1 + $0x98] sm:$0xff]  }
0x18d2   : > { %7857 = vmatprep.subr.bf16.mxu0 %v11630_v44  ;;  %v11667_v44 = vld [vmem:[%s15245_s1 + $0xa0] sm:$0xff]  }
0x18d5   : > { %7858 = vmatpush1.bf16.msra.mxu0 %v11628_v46 }
0x18d6   : > { %10803 = vmatprep.subr.bf16.mxu0 %v13069_v0 }
0x18d8   : > { %7876 = vmatmul.mubr.bf16.vlgmr.msra.gmra.mrb[72].mxu0 %v7761_v61  ;;  %v11671_v61 = vld [vmem:[%s15179_s8] ss:$8 sps:$4 sm:$0xff]  }
0x18d9   : > { %10819 = vmatprep.mubr.msk.bf16.mxu0 %vm13070_vm0, %v13069_v0  ;;  %10804 = vmatpush3.bf16.msra.mxu0 %v11649_v48  ;;  %v11680_v48 = vld [vmem:[%s15179_s8 + $0x30] ss:$8 sps:$4 sm:$0xff]  }
0x18da   : > { %10805 = vmatprep.subr.bf16.mxu0 %v13069_v0 }
0x18dd   : > { %10806 = vmatpush3.bf16.msra.mxu0 %v11651_v49  ;;  %v11685_v49 = vld [vmem:[%s15179_s8 + $0x44] ss:$8 sps:$4 sm:$0xff]  }
0x18de   : > { %10807 = vmatprep.subr.bf16.mxu0 %v13069_v0 }
0x18e1   : > { %10808 = vmatpush3.bf16.msra.mxu0 %v11653_v1  ;;  %v11683_v1 = vld [vmem:[%s15179_s8 + $0x40] ss:$8 sps:$4 sm:$0xff]  }
0x18e2   : > { %10809 = vmatprep.subr.bf16.mxu0 %v13069_v0 }
0x18e5   : > { %10810 = vmatpush3.bf16.msra.mxu0 %v11655_v51  ;;  %v11688_v51 = vld [vmem:[%s15179_s8 + $0x54] ss:$8 sps:$4 sm:$0xff]  }
0x18e6   : > { %10811 = vmatprep.subr.bf16.mxu0 %v13069_v0 }
0x18e9   : > { %10812 = vmatpush3.bf16.msra.mxu0 %v11657_v53  ;;  %v11686_v53 = vld [vmem:[%s15179_s8 + $0x50] ss:$8 sps:$4 sm:$0xff]  }
0x18ea   : > { %10813 = vmatprep.subr.bf16.mxu0 %v13069_v0 }
0x18ed   : > { %10814 = vmatpush3.bf16.msra.mxu0 %v11659_v20 }
0x18ee   : > { %10815 = vmatprep.subr.bf16.mxu0 %v13069_v0 }
0x18f1   : > { %10816 = vmatpush3.bf16.msra.mxu0 %v11661_v23 }
0x18f2   : > { %10817 = vmatprep.subr.bf16.mxu0 %v13069_v0 }
0x18f5   : > { %10818 = vmatpush3.bf16.msra.mxu0 %v11662_v24 }
0x18f6   : > { %8507 = vmatprep.subr.bf16.mxu0 %v11673_v42 }
0x19ab   : > { %v7877_v4 = vpop.f32.mrb[72].mxu0 }
0x19ac   : > { %v10852_v7 = vadd.f32 %v10851_v62, %v7877_v4  ;;  %v7879_v8 = vpop.f32.mrb[73].mxu0 }
0x19ad   : > { %v10854_v9 = vadd.f32 %v10853_v63, %v7879_v8  ;;  %v7881_v10 = vpop.f32.mrb[74].mxu0 }
0x19ae   : > { %v14921_v11 = vmax.f32 %v10852_v7, 0.0  ;;  %v7882_v52 = vpop.f32.mrb[75].mxu0 }
0x19af   : > { %v14923_v12 = vmax.f32 %v10854_v9, 0.0 }
0x19b0   : > { %v7888_v14 = vpack.c.bf16 %v14921_v11, %v14921_v11 }
0x19b1   : > { %v7889_v36 = vpack.c.bf16 %v14923_v12, %v14923_v12 }
0x19b3   : > { %8057 = vmatprep.mubr.bf16.mxu1 %v7889_v36  ;;  %v9606_v36 = vld [vmem:[%s13363_s9] ss:$0 sm:$0xff] }
0x19b4   : > { %8058 = vmatmul.mubr.bf16.vlgmr.msra.gmra.mrb[68].mxu1 %v7888_v14 }
0x19b5   : > { %10784 = vmatpush3.bf16.msra.mxu1 %v11647_v13  ;;  %10799 = vmatprep.mubr.msk.bf16.mxu1 %vm13070_vm0, %v13069_v0 }
0x19b6   : > { %10785 = vmatprep.subr.bf16.mxu1 %v13069_v0 }
0x19b9   : > { %10786 = vmatpush3.bf16.msra.mxu1 %v11648_v59 }
0x19ba   : > { %10787 = vmatprep.subr.bf16.mxu1 %v13069_v0 }
0x19bd   : > { %10788 = vmatpush3.bf16.msra.mxu1 %v11650_v16 }
0x19be   : > { %10789 = vmatprep.subr.bf16.mxu1 %v13069_v0 }
0x19c1   : > { %10790 = vmatpush3.bf16.msra.mxu1 %v11652_v17 }
0x19c2   : > { %10791 = vmatprep.subr.bf16.mxu1 %v13069_v0 }
0x19c5   : > { %10792 = vmatpush3.bf16.msra.mxu1 %v11654_v18 }
0x19c6   : > { %10793 = vmatprep.subr.bf16.mxu1 %v13069_v0 }
0x19c9   : > { %10794 = vmatpush3.bf16.msra.mxu1 %v11656_v60 }
0x19ca   : > { %10795 = vmatprep.subr.bf16.mxu1 %v13069_v0 }
0x19cd   : > { %10796 = vmatpush3.bf16.msra.mxu1 %v11658_v19  ;;  %v8415_v19 = vld [vmem:[%s13373_s17] sm:$0x3] }
0x19ce   : > { %10797 = vmatprep.subr.bf16.mxu1 %v13069_v0  ;;  %v8420_v20 = vrot.slane %v8415_v19, %v14039_v28 }
0x19d1   : > { %10798 = vmatpush3.bf16.msra.mxu1 %v11660_v22  ;;  %v8424_v22 = vrot.slane %v8415_v19, %v14036_v27 }
0x19d2   : > { %10823 = vmatprep.subr.bf16.mxu1 %v13069_v0 }
0x1a87   : > { %v9990_v25 = vpop.f32.mrb[68].mxu1 }
0x1a88   : > { %v9991_v35 = vpop.f32.mrb[69].mxu1 }
0x1a89   : > { %v9992_v30 = vadd.f32 %v9991_v35, %v9990_v25  ;;  %v9993_v31 = vpop.f32.mrb[70].mxu1 }
0x1a8a   : > { %v9994_v32 = vpop.f32.mrb[71].mxu1 }
0x1a8b   : > { %v8060_v33 = vadd.f32 %v9992_v30, %v9565_v29 }
0x1a8d   : > { %v8065_v34 = vmax.f32 %v8060_v33, 0.0 }
0x1a8f   : > { %v8066_v6 = vpack.c.bf16 %v8065_v34, %v8065_v34 }
0x1a91   : > { %10800 = vmatmul.mubr.bf16.vlgmr.msra.gmra.mrb[72].mxu1 %v8066_v6  ;;  %v8068_v38 = vshll.u32 %v8066_v6, 16  ;;  %v8072_v46 = vshrl.u32 %v8066_v6, 16 }
0x1a92   : > { %10824 = vmatpush3.bf16.msra.mxu1 %v11663_v37  ;;  %10839 = vmatprep.mubr.msk.bf16.mxu1 %vm13070_vm0, %v13069_v0 }
0x1a93   : > { %v8071_v40 = vsel %vm14173_vm10, 0, %v8068_v38  ;;  %10825 = vmatprep.subr.bf16.mxu1 %v13069_v0  ;;  %v8075_v47 = vsel %vm14173_vm10, %v8072_v46, 0 }
0x1a94   : > { %10820 = vmatmul.mubr.bf16.vlgmr.msra.gmra.mrb[76].mxu0 %v8071_v40 }
0x1a95   : > { %8539 = vmatprep.mubr.bf16.mxu0 %v13073_v5  ;;  %v11669_v5 = vld [vmem:[%s15245_s1 + $0xb0] sm:$0xff]   ;;  %8508 = vmatpush1.bf16.msra.mxu0 %v11671_v61  ;;  %s9198_s1 = sshll.u32 %s2303_s23, 2 }
0x1a96   : > { %10826 = vmatpush3.bf16.msra.mxu1 %v11664_v39  ;;  %8509 = vmatprep.subr.bf16.mxu0 %v11676_v2  ;;  %s2305_s3 = scalar_lea.vmem [#allocation68], %s9198_s1 }
0x1a97   : > { %10827 = vmatprep.subr.bf16.mxu1 %v13069_v0  ;;  %s8579_s4 = sshll.u32 %s2305_s3, 4  ;;  %s15001_s4 = int_to_ptr.vmem [resolvable:$true] %s8579_s4 }
0x1a98   : > { %s12813_s7 = scalar_lea.vmem %s15001_s4, 64 }
0x1a99   : > { %8510 = vmatpush1.bf16.msra.mxu0 %v11674_v26  ;;  %p12814_p10 = scmp.ne.s32.totalorder %s15001_s4, %s12813_s7 }
0x1a9a   : > { %10828 = vmatpush3.bf16.msra.mxu1 %v11665_v41 }
0x1a9b   : > { %10829 = vmatprep.subr.bf16.mxu1 %v13069_v0  ;;  %p12815_p13 = pnand %p12814_p10, %p15246_p12 }
0x1a9d   : > { %p12816_p0 = pneg %p12815_p13 }
0x1a9e   : > { %10830 = vmatpush3.bf16.msra.mxu1 %v11666_v43 }
0x1a9f   : > { %10831 = vmatprep.subr.bf16.mxu1 %v13069_v0 }
0x1aa2   : > { %10832 = vmatpush3.bf16.msra.mxu1 %v11667_v44 }
0x1aa3   : > { %10833 = vmatprep.subr.bf16.mxu1 %v13069_v0 }
0x1aa6   : > { %10834 = vmatpush3.bf16.msra.mxu1 %v11668_v45 }
0x1aa7   : > { %10835 = vmatprep.subr.bf16.mxu1 %v13069_v0 }
0x1aaa   : > { %10836 = vmatpush3.bf16.msra.mxu1 %v11669_v5 }
0x1aab   : > { %10837 = vmatprep.subr.bf16.mxu1 %v13069_v0  ;;  %v11679_v0 = vld [vmem:[%s15179_s8 + $0x24] ss:$8 sps:$4 sm:$0xff]   ;;  %s13074_s8 = smov [#allocation68]  }
0x1aac   : > { %8511 = vmatprep.subr.bf16.mxu0 %v11679_v0  ;;  %s12817_s28 = sshll.u32 %s13074_s8, 4  ;;  %s12818_s28 = int_to_ptr.vmem [resolvable:$false] %s12817_s28 }
0x1aad   : > { %8512 = vmatpush1.bf16.msra.mxu0 %v11677_v21  ;;  %s12819_s1 = scalar_lea.vmem %s12818_s28, 128  ;;  %p12820_p1 = scmp.lt.s32.totalorder %s15001_s4, %s12818_s28 }
0x1aae   : > { %10838 = vmatpush3.bf16.msra.mxu1 %v11670_v15  ;;  %8513 = vmatprep.subr.bf16.mxu0 %v11682_v50  ;;  %p12821_p5 = scmp.lt.s32.totalorder %s12819_s1, %s12813_s7 }
0x1ab0   : > { %p12822_p6 = por %p12821_p5, %p12820_p1 }
0x1ab1   : > { %10840 = vmatmul.mubr.bf16.vlgmr.msra.gmra.mrb[76].mxu1 %v8075_v47  ;;  %8514 = vmatpush1.bf16.msra.mxu0 %v11680_v48 }
0x1ab2   : > { %8515 = vmatprep.subr.bf16.mxu0 %v11685_v49  ;;  %p12823_p2 = pnand %p12822_p6, %p12816_p0 }
0x1ab5   : > { %8516 = vmatpush1.bf16.msra.mxu0 %v11683_v1 }
0x1ab6   : > { %8517 = vmatprep.subr.bf16.mxu0 %v11688_v51 }
0x1ab9   : > { %8518 = vmatpush1.bf16.msra.mxu0 %v11686_v53 }
0x1aba   : > { %8519 = vmatprep.subr.bf16.mxu0 %v11691_v3 }
0x1abd   : > { %8520 = vmatpush1.bf16.msra.mxu0 %v11689_v54 }
0x1abe   : > { %8521 = vmatprep.subr.bf16.mxu0 %v11694_v55 }
0x1ac1   : > { %8522 = vmatpush1.bf16.msra.mxu0 %v11692_v56 }
0x1b64   : > { %v8206_v57 = vpop.f32.mrb[72].mxu1 }
0x1b65   : > { %v10801_v58 = vpop.f32.mrb[73].mxu1 }
0x1b66   : > { %v8209_v62 = vpop.f32.mrb[74].mxu1 }
0x1b67   : > { %v10802_v63 = vpop.f32.mrb[75].mxu1  ;;  %v8294_v4 = vpop.f32.mrb[76].mxu0 }
0x1b68   : > { %v8295_v7 = vadd.f32 %v8294_v4, %v8206_v57  ;;  %v10821_v8 = vpop.f32.mrb[77].mxu0 }
0x1b69   : > { %v8297_v9 = vpop.f32.mrb[78].mxu0 }
0x1b6a   : > { %v10822_v10 = vpop.f32.mrb[79].mxu0 }
0x1b84   : > { %v8382_v52 = vpop.f32.mrb[76].mxu1 }
0x1b85   : > { %v8388_v13 = vadd.f32 %v8382_v52, %v8295_v7  ;;  %v10841_v14 = vpop.f32.mrb[77].mxu1 }
0x1b86   : > { %v8385_v59 = vpop.f32.mrb[78].mxu1 }
0x1b87   : > { %v8396_v16 = vadd.f32 %v9606_v36, %v8388_v13  ;;  %v10842_v17 = vpop.f32.mrb[79].mxu1 }
0x1b89   : > { %v8397_v18 = vmax.f32 %v8396_v16, 0.0 }
0x1b8b   : > { %v8398_v60 = vpack.c.bf16 %v8397_v18, %v8397_v18 }
0x1b8d   : > { %8540 = vmatmul.mubr.bf16.vlgmr.msra.gmra.mrb[80].mxu0 %v8398_v60 }
0x1c60   : > { %v8541_v23 = vpop.f32.mrb[80].mxu0 }
0x1c61   : > { %v8542_v24 = vadd.f32 %v8541_v23, %v8420_v20  ;;  %v8543_v25 = vpop.f32.mrb[81].mxu0 }
0x1c62   : > { %v8544_v29 = vadd.f32 %v8543_v25, %v8424_v22  ;;  %v8545_v35 = vpop.f32.mrb[82].mxu0 }
0x1c63   : > { %v8548_v30 = vadd.f32 %v8542_v24, %v14921_v11  ;;  %v8546_v31 = vpop.f32.mrb[83].mxu0 }
0x1c64   : > { %v8549_v32 = vadd.f32 %v8544_v29, %v14923_v12 }
0x1c65   : > { %v8550_v33 = vmax.f32 %v8548_v30, 0.0 }
0x1c66   : > { %v8551_v28 = vmax.f32 %v8549_v32, 0.0 }
0x1c68   : > { %v8554_v34 = vcombine.low %v8550_v33, %v8551_v28 }
0x1c6a   : > { %9623 = vst.sshfl [vmem:[%s2305_s3] sm:$0x33 pattern:$0x76325410] %v8554_v34 }
0x1c6b   : > { %12826 = shalt.err (!%p12823_p2)
}
0x1c6c   : > { %s12827_s2 = scalar_lea.hbm %s14999_s5, 64  ;;  %s12831_s8 = scalar_lea.hbm %s13378_s19, 128 }
0x1c6d   : > { %p12828_p3 = scmp.ne.s32.totalorder %s14999_s5, %s12827_s2  ;;  %p12832_p8 = scmp.lt.u32.totalorder %s14999_s5, %s13378_s19 }
0x1c6e   : > { %p12833_p11 = scmp.lt.u32.totalorder %s12831_s8, %s12827_s2  ;;  %p12835_p10 = scmp.lt.u32.totalorder %s12827_s2, %s14999_s5 }
0x1c6f   : > { %p12829_p4 = pnand %p12828_p3, %p15246_p12 }
0x1c70   : > { %p12834_p9 = por %p12833_p11, %p12832_p8 }
0x1c71   : > { %p12830_p7 = pneg %p12829_p4 }
0x1c72   : > { %p12836_p13 = por %p12835_p10, %p12834_p9 }
0x1c74   : > { %p12837_p0 = pnand %p12836_p13, %p12830_p7 }
0x1c76   : > { %12840 = shalt.err (!%p12837_p0)
}
0x1c77   : > { %11043 = dma.vmem_to_hbm [thread:$0]  (%p15246_p12), %s15001_s4, 64, %s14999_s5, %s8565_s6  }
0x1c78 PF: > { %s15247_s7 = sld [smem:[#allocation144_spill]]  ;;  %p11135_p1 = scmp.ge.s32.totalorder %s12963_s26, 2 }
0x1c79   : > { %s8591_s3 = sand.u32 1, %s12951_s0  }
0x1c7a   : > { %s8592_s23 = scalar_lea.sflag [#allocation4], %s8591_s3 }
0x1c7e   : > { %p15248_p5 = scmp.ne.s32.totalorder %s15247_s7, 0 }
0x1c80   : > { %p11046_p6 = pnand %p11135_p1, %p15248_p5 }
0x1c82   : > { %12946 = dma.done.wait (!%p11046_p6), %s8592_s23, 64  }
0x1c83   : > { %12948 = vsyncadd (!%p11046_p6), %s8592_s23, 4294967232  ;;  %s15249_s26 = sld [smem:[#allocation142_spill]]  ;;  %s15250_s28 = sld [smem:[#allocation141_spill]] }
0x1c84   : > { %s15251_s23 = sld [smem:[#allocation143_spill]]  ;;  %s15252_s0 = smov %s12955_s22 }
0x1c89   : > { %p151_p2 = scmp.ge.s32.totalorder %s15249_s26, 4   ;;  %s15253_s22 = smov %s15250_s28 }
0x1c8b   :  { %153 = sbr.rel (!%p151_p2) target bundleno = 143 (0x8f), region = 523 }
0x1c92   :  { %8597 = vsyncpa [#allocation3], 1 }
0x1c93   :  { %8599 = vsyncpa [#allocation3 + $0x1], 1 }
0x1c94   :  { %8600 = vsyncpa [#allocation6], 1 }
0x1c95   :  { %8601 = vsyncpa [#allocation9], 1 }
0x1c96   :  { %8602 = vsyncpa [#allocation12], 1 }
0x1c97   :  { %8603 = vsyncpa [#allocation15], 1 }
0x1c98   :  { %8604 = vsyncpa [#allocation18], 1 }
0x1c99   :  { %8605 = vsyncpa [#allocation21], 1 }
0x1c9a   :  { %8606 = vsyncpa [#allocation24], 1 }
0x1c9b   :  { %8607 = vsyncpa [#allocation27], 1 }
0x1c9c   :  { %8608 = vsyncpa [#allocation30], 1 }
0x1c9d   :  { %8609 = vsyncpa [#allocation33], 1 }
0x1c9e   :  { %8610 = vsyncpa [#allocation36], 1 }
0x1c9f   :  { %8611 = vsyncpa [#allocation39], 1 }
0x1ca0   :  { %8612 = vsyncpa [#allocation42], 1 }
0x1ca1   :  { %8613 = vsyncpa [#allocation45], 1 }
0x1ca2   :  { %8614 = vsyncpa [#allocation48], 1 }
0x1ca3   :  { %8615 = vsyncpa [#allocation51], 1 }
0x1ca4   :  { %8616 = vsyncpa [#allocation54], 1 }
0x1ca5   :  { %8617 = vsyncpa [#allocation57], 1 }
0x1ca6   :  { %8618 = vsyncpa [#allocation60], 1 }
0x1ca7   :  { %8619 = vsyncpa [#allocation63], 1 }
0x1ca8   :  { %8620 = vsyncpa [#allocation66], 1 }
0x1ca9   :  { %8621 = vsyncpa [#allocation4], 1 }
0x1caa   :  { %8623 = vsyncpa [#allocation4 + $0x1], 1 }

</bundles_post_ra>
